<compile_context>
chip_gen: v5e
topology: v5e:2x2
jax: 0.10.0
libtpu: 0.0.40
codegen_flags: <defaults>
</compile_context>

<pallas_src>
import math

import jax
import jax.numpy as jnp
from jax.experimental import pallas as pl
from jax.experimental.pallas import tpu as pltpu

# Direction hard-codes a (512, motion_dim) weight, so style_dim must be 512
# for the `wa + directions` additions in Generator.forward to type-check.
STYLE_DIM = 512
MOTION_DIM = 20
N_MLP_HIDDEN = 4                      # mlp      = 4 x (512->512) + 1 x (512->20)
N_POSE = 3                            # mlp_pose = 3 x (512->512)
N_EXP = 3                             # mlp_exp  = 3 x (512->512)
SCALE = 1.0 / math.sqrt(STYLE_DIM)    # EqualLinear scale (lr_mul = 1, in_dim = 512)

# Fused layer chain (all layers are 512 -> 512 after folding Direction into
# the last mlp layer):
#   [0..3]   mlp hidden layers              (input: wa_t)
#   [4]      fused (mlp[-1] ; Direction)    -> directions_D
#   [5..7]   mlp_pose                       -> directions_poseD
#   [8..10]  mlp_exp (restarts from d)      -> directions_expD
IDX_DIR = N_MLP_HIDDEN                # 4
IDX_POSE_END = IDX_DIR + N_POSE       # 7
IDX_EXP_START = IDX_POSE_END + 1      # 8
NUM_LAYERS = IDX_EXP_START + N_EXP    # 11


def latent_kernel(wa_ref, wa_t_ref,    # (B,512) f32
                  w_ref,               # (11,512,512) bf16, (in,out) layout, SCALE folded in
                  b_ref,               # (11,1,512)  f32
                  lat_pose_ref, lat_exp_ref):   # outputs (B,512) f32
    """Single invocation: everything resident in VMEM, 11 layers unrolled."""
    wa = wa_ref[...]
    h = wa_t_ref[...].astype(jnp.bfloat16)

    d = None
    y = None
    # Layers 0..7: mlp hidden, fused (mlp[-1]; Direction), then mlp_pose.
    for i in range(IDX_POSE_END + 1):
        y = jax.lax.dot_general(
            h, w_ref[i],                                   # (B,512) @ (512_in,512_out)
            dimension_numbers=(((1,), (0,)), ((), ())),
            preferred_element_type=jnp.float32) + b_ref[i]
        if i == IDX_DIR:
            d = y                                          # directions_D
        h = y.astype(jnp.bfloat16)
    lat_pose_ref[...] = wa + y                             # latent_poseD

    # Layers 8..10: mlp_exp restarts from directions_D.
    h = d.astype(jnp.bfloat16)
    for i in range(IDX_EXP_START, NUM_LAYERS):
        y = jax.lax.dot_general(
            h, w_ref[i],
            dimension_numbers=(((1,), (0,)), ((), ())),
            preferred_element_type=jnp.float32) + b_ref[i]
        h = y.astype(jnp.bfloat16)
    lat_exp_ref[...] = wa + y                              # latent_expD


def generator_latents(wa, wa_t, w_stack, b_stack):
    """wa, wa_t: [B,512] f32; w_stack: [11,512,512] bf16 (in,out layout, SCALE
    pre-folded); b_stack: [11,1,512] f32.
    Returns (latent_poseD, latent_expD), each [B,512] f32.

    The whole bf16 weight stack (~5.8 MB) plus biases/activations fits
    comfortably under the 32 MiB VMEM limit on all of v5e/v6e/v7x, so the
    kernel is a single invocation sitting on the HBM DMA floor.  Larger B
    amortizes the weight stream: weight DMA is independent of batch.
    """
    B = wa.shape[0]
    vmem_spec = pl.BlockSpec(memory_space=pltpu.MemorySpace.VMEM)
    out_shape = (jax.ShapeDtypeStruct((B, STYLE_DIM), jnp.float32),
                 jax.ShapeDtypeStruct((B, STYLE_DIM), jnp.float32))
    return pl.pallas_call(
        latent_kernel,
        out_shape=out_shape,
        in_specs=[vmem_spec, vmem_spec, vmem_spec, vmem_spec],
        out_specs=(vmem_spec, vmem_spec),
        compiler_params=pltpu.CompilerParams(
            vmem_limit_bytes=32 * 1024 * 1024),            # safe on v5e/v6e/v7x
    )(wa, wa_t, w_stack, b_stack)


def make_params(key):
    """Synthetic parameters matching Generator.__init__ shapes (biases made
    nonzero here purely to exercise the bias path; torch init is zeros)."""
    ks = jax.random.split(key, 9)
    p = {}
    # mlp: EqualLinear(512,512) x4  +  EqualLinear(512,20)
    p["mlp_w"] = jax.random.normal(ks[0], (N_MLP_HIDDEN, STYLE_DIM, STYLE_DIM), jnp.float32)
    p["mlp_b"] = 0.1 * jax.random.normal(ks[1], (N_MLP_HIDDEN, STYLE_DIM), jnp.float32)
    p["mlp_wl"] = jax.random.normal(ks[2], (MOTION_DIM, STYLE_DIM), jnp.float32)
    p["mlp_bl"] = 0.1 * jax.random.normal(ks[3], (1, MOTION_DIM), jnp.float32)
    # Direction: weight (512, motion_dim)
    p["dir_w"] = jax.random.normal(ks[4], (512, MOTION_DIM), jnp.float32)
    # mlp_pose / mlp_exp: EqualLinear(512,512) x3 each
    p["pose_w"] = jax.random.normal(ks[5], (N_POSE, STYLE_DIM, STYLE_DIM), jnp.float32)
    p["pose_b"] = 0.1 * jax.random.normal(ks[6], (N_POSE, STYLE_DIM), jnp.float32)
    p["exp_w"] = jax.random.normal(ks[7], (N_EXP, STYLE_DIM, STYLE_DIM), jnp.float32)
    p["exp_b"] = 0.1 * jax.random.normal(ks[8], (N_EXP, STYLE_DIM), jnp.float32)
    return p


def prepare_weights(p):
    """Fold Direction into the last mlp layer, stack all 11 layers, transpose
    to (in, out) layout, fold EqualLinear's SCALE in f32, then cast the weight
    stack to bf16 (f32 biases)."""
    q, _ = jnp.linalg.qr(p["dir_w"] + 1e-8)            # (512, MOTION_DIM)
    # h @ (wl*SCALE).T @ Q.T == h @ (SCALE * (Q @ wl)).T ; bias: bl @ Q.T
    w_dir = q @ p["mlp_wl"]                            # (512, 512), (out, in)
    b_dir = p["mlp_bl"] @ q.T                          # (1, 512)
    w_stack = jnp.concatenate(
        [p["mlp_w"], w_dir[None], p["pose_w"], p["exp_w"]], axis=0)   # (11,512,512) (out,in)
    b_stack = jnp.concatenate(
        [p["mlp_b"], b_dir, p["pose_b"], p["exp_b"]], axis=0)         # (11,512)
    assert w_stack.shape == (NUM_LAYERS, STYLE_DIM, STYLE_DIM)
    # (11, in, out) layout so the kernel is a plain x @ W; fold SCALE in f32.
    w_stack_t = jnp.transpose(w_stack, (0, 2, 1)) * jnp.float32(SCALE)
    return (w_stack_t.astype(jnp.bfloat16),
            b_stack.reshape(NUM_LAYERS, 1, STYLE_DIM).astype(jnp.float32))


def reference_latents_stacked(wa, wa_t, w_stack, b_stack):
    """Pure-JAX f32 replay of exactly the math the kernel performs, using the
    same fused / SCALE-folded / bf16-quantized weight stack."""
    w = w_stack.astype(jnp.float32)                    # (11, in, out)
    b = b_stack.reshape(NUM_LAYERS, STYLE_DIM).astype(jnp.float32)
    h = wa_t
    d = None
    for i in range(IDX_POSE_END + 1):                  # layers 0..7
        h = h @ w[i] + b[i][None, :]
        if i == IDX_DIR:
            d = h
    lat_pose = wa + h
    h = d
    for i in range(IDX_EXP_START, NUM_LAYERS):         # layers 8..10
        h = h @ w[i] + b[i][None, :]
    lat_exp = wa + h
    return lat_pose, lat_exp


def reference_latents_f32(wa, wa_t, p):
    """Pure-JAX f32 reference of the original (unfused) module semantics."""
    h = wa_t
    for i in range(N_MLP_HIDDEN):
        h = h @ (p["mlp_w"][i] * SCALE).T + p["mlp_b"][i][None, :]
    alpha = h @ (p["mlp_wl"] * SCALE).T + p["mlp_bl"]
    q, _ = jnp.linalg.qr(p["dir_w"] + 1e-8)
    d = alpha @ q.T                 # == sum(diag_embed(alpha) @ Q.T, dim=1)
    dp = d
    for i in range(N_POSE):
        dp = dp @ (p["pose_w"][i] * SCALE).T + p["pose_b"][i][None, :]
    de = d
    for i in range(N_EXP):
        de = de @ (p["exp_w"][i] * SCALE).T + p["exp_b"][i][None, :]
    return wa + dp, wa + de


if __name__ == "__main__":
    key = jax.random.PRNGKey(0)
    k_wa, k_wat, k_par = jax.random.split(key, 3)

    B = 2
    # wa, wa_t stand in for the (undefined) Encoder outputs.
    wa = jax.random.normal(k_wa, (B, STYLE_DIM), jnp.float32)
    wa_t = jax.random.normal(k_wat, (B, STYLE_DIM), jnp.float32)
    params = make_params(k_par)
    w_stack, b_stack = prepare_weights(params)

    lat_pose, lat_exp = generator_latents(wa, wa_t, w_stack, b_stack)
    jax.block_until_ready((lat_pose, lat_exp))

    # Kernel vs. f32 replay of the same fused / bf16 weights (tight check:
    # only difference is the kernel's bf16 activation casts).
    sp, se = reference_latents_stacked(wa, wa_t, w_stack, b_stack)
    assert jnp.allclose(lat_pose, sp, rtol=2e-2, atol=2e-2)
    assert jnp.allclose(lat_exp, se, rtol=2e-2, atol=2e-2)

    # Kernel vs. original unfused f32 module semantics (looser: bf16 weights).
    fp, fe = reference_latents_f32(wa, wa_t, params)
    assert jnp.allclose(lat_pose, fp, rtol=5e-2, atol=5e-2)
    assert jnp.allclose(lat_exp, fe, rtol=5e-2, atol=5e-2)

    print("KERNEL_OK")
</pallas_src>

<mosaic_0001>
module attributes {stable_mosaic.version = 11 : i64} {
  func.func @latent_kernel(%arg0: memref<2x512xf32, #tpu.memory_space<vmem>>, %arg1: memref<2x512xf32, #tpu.memory_space<vmem>>, %arg2: memref<11x512x512xbf16, #tpu.memory_space<vmem>>, %arg3: memref<11x1x512xf32, #tpu.memory_space<vmem>>, %arg4: memref<2x512xf32, #tpu.memory_space<vmem>>, %arg5: memref<2x512xf32, #tpu.memory_space<vmem>>) attributes {dimension_semantics = [], scalar_prefetch = 0 : i64, scratch_operands = 0 : i64, tpu.core_type = #tpu.core_type<tc>} {
    %c0 = arith.constant 0 : index
    %c0_0 = arith.constant 0 : index
    %0 = vector.load %arg0[%c0, %c0_0] : memref<2x512xf32, #tpu.memory_space<vmem>>, vector<2x512xf32>
    %c0_1 = arith.constant 0 : index
    %c0_2 = arith.constant 0 : index
    %1 = vector.load %arg1[%c0_1, %c0_2] : memref<2x512xf32, #tpu.memory_space<vmem>>, vector<2x512xf32>
    %2 = arith.truncf %1 : vector<2x512xf32> to vector<2x512xbf16>
    %c0_3 = arith.constant 0 : index
    %c0_4 = arith.constant 0 : index
    %c0_5 = arith.constant 0 : index
    %3 = vector.load %arg2[%c0_3, %c0_4, %c0_5] : memref<11x512x512xbf16, #tpu.memory_space<vmem>>, vector<1x512x512xbf16>
    %4 = vector.shape_cast %3 : vector<1x512x512xbf16> to vector<512x512xbf16>
    %cst = arith.constant dense<0.000000e+00> : vector<2x512xf32>
    %5 = tpu.matmul %2, %4, %cst {dimension_numbers = #tpu.dot_dimension_numbers<[1], [0], [0], [1], [0, 0, 1, 1], [], []>} : vector<2x512xbf16>, vector<512x512xbf16>, vector<2x512xf32> -> vector<2x512xf32>
    %c0_6 = arith.constant 0 : index
    %c0_7 = arith.constant 0 : index
    %c0_8 = arith.constant 0 : index
    %6 = vector.load %arg3[%c0_6, %c0_7, %c0_8] : memref<11x1x512xf32, #tpu.memory_space<vmem>>, vector<1x1x512xf32>
    %7 = vector.shape_cast %6 : vector<1x1x512xf32> to vector<1x512xf32>
    %8 = vector.broadcast %7 : vector<1x512xf32> to vector<2x512xf32>
    %9 = arith.addf %5, %8 : vector<2x512xf32>
    %10 = arith.truncf %9 : vector<2x512xf32> to vector<2x512xbf16>
    %c1 = arith.constant 1 : index
    %c0_9 = arith.constant 0 : index
    %c0_10 = arith.constant 0 : index
    %11 = vector.load %arg2[%c1, %c0_9, %c0_10] : memref<11x512x512xbf16, #tpu.memory_space<vmem>>, vector<1x512x512xbf16>
    %12 = vector.shape_cast %11 : vector<1x512x512xbf16> to vector<512x512xbf16>
    %cst_11 = arith.constant dense<0.000000e+00> : vector<2x512xf32>
    %13 = tpu.matmul %10, %12, %cst_11 {dimension_numbers = #tpu.dot_dimension_numbers<[1], [0], [0], [1], [0, 0, 1, 1], [], []>} : vector<2x512xbf16>, vector<512x512xbf16>, vector<2x512xf32> -> vector<2x512xf32>
    %c1_12 = arith.constant 1 : index
    %c0_13 = arith.constant 0 : index
    %c0_14 = arith.constant 0 : index
    %14 = vector.load %arg3[%c1_12, %c0_13, %c0_14] : memref<11x1x512xf32, #tpu.memory_space<vmem>>, vector<1x1x512xf32>
    %15 = vector.shape_cast %14 : vector<1x1x512xf32> to vector<1x512xf32>
    %16 = vector.broadcast %15 : vector<1x512xf32> to vector<2x512xf32>
    %17 = arith.addf %13, %16 : vector<2x512xf32>
    %18 = arith.truncf %17 : vector<2x512xf32> to vector<2x512xbf16>
    %c2 = arith.constant 2 : index
    %c0_15 = arith.constant 0 : index
    %c0_16 = arith.constant 0 : index
    %19 = vector.load %arg2[%c2, %c0_15, %c0_16] : memref<11x512x512xbf16, #tpu.memory_space<vmem>>, vector<1x512x512xbf16>
    %20 = vector.shape_cast %19 : vector<1x512x512xbf16> to vector<512x512xbf16>
    %cst_17 = arith.constant dense<0.000000e+00> : vector<2x512xf32>
    %21 = tpu.matmul %18, %20, %cst_17 {dimension_numbers = #tpu.dot_dimension_numbers<[1], [0], [0], [1], [0, 0, 1, 1], [], []>} : vector<2x512xbf16>, vector<512x512xbf16>, vector<2x512xf32> -> vector<2x512xf32>
    %c2_18 = arith.constant 2 : index
    %c0_19 = arith.constant 0 : index
    %c0_20 = arith.constant 0 : index
    %22 = vector.load %arg3[%c2_18, %c0_19, %c0_20] : memref<11x1x512xf32, #tpu.memory_space<vmem>>, vector<1x1x512xf32>
    %23 = vector.shape_cast %22 : vector<1x1x512xf32> to vector<1x512xf32>
    %24 = vector.broadcast %23 : vector<1x512xf32> to vector<2x512xf32>
    %25 = arith.addf %21, %24 : vector<2x512xf32>
    %26 = arith.truncf %25 : vector<2x512xf32> to vector<2x512xbf16>
    %c3 = arith.constant 3 : index
    %c0_21 = arith.constant 0 : index
    %c0_22 = arith.constant 0 : index
    %27 = vector.load %arg2[%c3, %c0_21, %c0_22] : memref<11x512x512xbf16, #tpu.memory_space<vmem>>, vector<1x512x512xbf16>
    %28 = vector.shape_cast %27 : vector<1x512x512xbf16> to vector<512x512xbf16>
    %cst_23 = arith.constant dense<0.000000e+00> : vector<2x512xf32>
    %29 = tpu.matmul %26, %28, %cst_23 {dimension_numbers = #tpu.dot_dimension_numbers<[1], [0], [0], [1], [0, 0, 1, 1], [], []>} : vector<2x512xbf16>, vector<512x512xbf16>, vector<2x512xf32> -> vector<2x512xf32>
    %c3_24 = arith.constant 3 : index
    %c0_25 = arith.constant 0 : index
    %c0_26 = arith.constant 0 : index
    %30 = vector.load %arg3[%c3_24, %c0_25, %c0_26] : memref<11x1x512xf32, #tpu.memory_space<vmem>>, vector<1x1x512xf32>
    %31 = vector.shape_cast %30 : vector<1x1x512xf32> to vector<1x512xf32>
    %32 = vector.broadcast %31 : vector<1x512xf32> to vector<2x512xf32>
    %33 = arith.addf %29, %32 : vector<2x512xf32>
    %34 = arith.truncf %33 : vector<2x512xf32> to vector<2x512xbf16>
    %c4 = arith.constant 4 : index
    %c0_27 = arith.constant 0 : index
    %c0_28 = arith.constant 0 : index
    %35 = vector.load %arg2[%c4, %c0_27, %c0_28] : memref<11x512x512xbf16, #tpu.memory_space<vmem>>, vector<1x512x512xbf16>
    %36 = vector.shape_cast %35 : vector<1x512x512xbf16> to vector<512x512xbf16>
    %cst_29 = arith.constant dense<0.000000e+00> : vector<2x512xf32>
    %37 = tpu.matmul %34, %36, %cst_29 {dimension_numbers = #tpu.dot_dimension_numbers<[1], [0], [0], [1], [0, 0, 1, 1], [], []>} : vector<2x512xbf16>, vector<512x512xbf16>, vector<2x512xf32> -> vector<2x512xf32>
    %c4_30 = arith.constant 4 : index
    %c0_31 = arith.constant 0 : index
    %c0_32 = arith.constant 0 : index
    %38 = vector.load %arg3[%c4_30, %c0_31, %c0_32] : memref<11x1x512xf32, #tpu.memory_space<vmem>>, vector<1x1x512xf32>
    %39 = vector.shape_cast %38 : vector<1x1x512xf32> to vector<1x512xf32>
    %40 = vector.broadcast %39 : vector<1x512xf32> to vector<2x512xf32>
    %41 = arith.addf %37, %40 : vector<2x512xf32>
    %42 = arith.truncf %41 : vector<2x512xf32> to vector<2x512xbf16>
    %c5 = arith.constant 5 : index
    %c0_33 = arith.constant 0 : index
    %c0_34 = arith.constant 0 : index
    %43 = vector.load %arg2[%c5, %c0_33, %c0_34] : memref<11x512x512xbf16, #tpu.memory_space<vmem>>, vector<1x512x512xbf16>
    %44 = vector.shape_cast %43 : vector<1x512x512xbf16> to vector<512x512xbf16>
    %cst_35 = arith.constant dense<0.000000e+00> : vector<2x512xf32>
    %45 = tpu.matmul %42, %44, %cst_35 {dimension_numbers = #tpu.dot_dimension_numbers<[1], [0], [0], [1], [0, 0, 1, 1], [], []>} : vector<2x512xbf16>, vector<512x512xbf16>, vector<2x512xf32> -> vector<2x512xf32>
    %c5_36 = arith.constant 5 : index
    %c0_37 = arith.constant 0 : index
    %c0_38 = arith.constant 0 : index
    %46 = vector.load %arg3[%c5_36, %c0_37, %c0_38] : memref<11x1x512xf32, #tpu.memory_space<vmem>>, vector<1x1x512xf32>
    %47 = vector.shape_cast %46 : vector<1x1x512xf32> to vector<1x512xf32>
    %48 = vector.broadcast %47 : vector<1x512xf32> to vector<2x512xf32>
    %49 = arith.addf %45, %48 : vector<2x512xf32>
    %50 = arith.truncf %49 : vector<2x512xf32> to vector<2x512xbf16>
    %c6 = arith.constant 6 : index
    %c0_39 = arith.constant 0 : index
    %c0_40 = arith.constant 0 : index
    %51 = vector.load %arg2[%c6, %c0_39, %c0_40] : memref<11x512x512xbf16, #tpu.memory_space<vmem>>, vector<1x512x512xbf16>
    %52 = vector.shape_cast %51 : vector<1x512x512xbf16> to vector<512x512xbf16>
    %cst_41 = arith.constant dense<0.000000e+00> : vector<2x512xf32>
    %53 = tpu.matmul %50, %52, %cst_41 {dimension_numbers = #tpu.dot_dimension_numbers<[1], [0], [0], [1], [0, 0, 1, 1], [], []>} : vector<2x512xbf16>, vector<512x512xbf16>, vector<2x512xf32> -> vector<2x512xf32>
    %c6_42 = arith.constant 6 : index
    %c0_43 = arith.constant 0 : index
    %c0_44 = arith.constant 0 : index
    %54 = vector.load %arg3[%c6_42, %c0_43, %c0_44] : memref<11x1x512xf32, #tpu.memory_space<vmem>>, vector<1x1x512xf32>
    %55 = vector.shape_cast %54 : vector<1x1x512xf32> to vector<1x512xf32>
    %56 = vector.broadcast %55 : vector<1x512xf32> to vector<2x512xf32>
    %57 = arith.addf %53, %56 : vector<2x512xf32>
    %58 = arith.truncf %57 : vector<2x512xf32> to vector<2x512xbf16>
    %c7 = arith.constant 7 : index
    %c0_45 = arith.constant 0 : index
    %c0_46 = arith.constant 0 : index
    %59 = vector.load %arg2[%c7, %c0_45, %c0_46] : memref<11x512x512xbf16, #tpu.memory_space<vmem>>, vector<1x512x512xbf16>
    %60 = vector.shape_cast %59 : vector<1x512x512xbf16> to vector<512x512xbf16>
    %cst_47 = arith.constant dense<0.000000e+00> : vector<2x512xf32>
    %61 = tpu.matmul %58, %60, %cst_47 {dimension_numbers = #tpu.dot_dimension_numbers<[1], [0], [0], [1], [0, 0, 1, 1], [], []>} : vector<2x512xbf16>, vector<512x512xbf16>, vector<2x512xf32> -> vector<2x512xf32>
    %c7_48 = arith.constant 7 : index
    %c0_49 = arith.constant 0 : index
    %c0_50 = arith.constant 0 : index
    %62 = vector.load %arg3[%c7_48, %c0_49, %c0_50] : memref<11x1x512xf32, #tpu.memory_space<vmem>>, vector<1x1x512xf32>
    %63 = vector.shape_cast %62 : vector<1x1x512xf32> to vector<1x512xf32>
    %64 = vector.broadcast %63 : vector<1x512xf32> to vector<2x512xf32>
    %65 = arith.addf %61, %64 : vector<2x512xf32>
    %66 = arith.addf %0, %65 : vector<2x512xf32>
    %c0_51 = arith.constant 0 : index
    %c0_52 = arith.constant 0 : index
    %67 = vector.load %arg4[%c0_51, %c0_52] : memref<2x512xf32, #tpu.memory_space<vmem>>, vector<2x512xf32>
    tpu.vector_store %arg4[%c0_51, %c0_52], %66 {strides = array<i32>} : memref<2x512xf32, #tpu.memory_space<vmem>>, vector<2x512xf32>,
    %68 = arith.truncf %41 : vector<2x512xf32> to vector<2x512xbf16>
    %c8 = arith.constant 8 : index
    %c0_53 = arith.constant 0 : index
    %c0_54 = arith.constant 0 : index
    %69 = vector.load %arg2[%c8, %c0_53, %c0_54] : memref<11x512x512xbf16, #tpu.memory_space<vmem>>, vector<1x512x512xbf16>
    %70 = vector.shape_cast %69 : vector<1x512x512xbf16> to vector<512x512xbf16>
    %cst_55 = arith.constant dense<0.000000e+00> : vector<2x512xf32>
    %71 = tpu.matmul %68, %70, %cst_55 {dimension_numbers = #tpu.dot_dimension_numbers<[1], [0], [0], [1], [0, 0, 1, 1], [], []>} : vector<2x512xbf16>, vector<512x512xbf16>, vector<2x512xf32> -> vector<2x512xf32>
    %c8_56 = arith.constant 8 : index
    %c0_57 = arith.constant 0 : index
    %c0_58 = arith.constant 0 : index
    %72 = vector.load %arg3[%c8_56, %c0_57, %c0_58] : memref<11x1x512xf32, #tpu.memory_space<vmem>>, vector<1x1x512xf32>
    %73 = vector.shape_cast %72 : vector<1x1x512xf32> to vector<1x512xf32>
    %74 = vector.broadcast %73 : vector<1x512xf32> to vector<2x512xf32>
    %75 = arith.addf %71, %74 : vector<2x512xf32>
    %76 = arith.truncf %75 : vector<2x512xf32> to vector<2x512xbf16>
    %c9 = arith.constant 9 : index
    %c0_59 = arith.constant 0 : index
    %c0_60 = arith.constant 0 : index
    %77 = vector.load %arg2[%c9, %c0_59, %c0_60] : memref<11x512x512xbf16, #tpu.memory_space<vmem>>, vector<1x512x512xbf16>
    %78 = vector.shape_cast %77 : vector<1x512x512xbf16> to vector<512x512xbf16>
    %cst_61 = arith.constant dense<0.000000e+00> : vector<2x512xf32>
    %79 = tpu.matmul %76, %78, %cst_61 {dimension_numbers = #tpu.dot_dimension_numbers<[1], [0], [0], [1], [0, 0, 1, 1], [], []>} : vector<2x512xbf16>, vector<512x512xbf16>, vector<2x512xf32> -> vector<2x512xf32>
    %c9_62 = arith.constant 9 : index
    %c0_63 = arith.constant 0 : index
    %c0_64 = arith.constant 0 : index
    %80 = vector.load %arg3[%c9_62, %c0_63, %c0_64] : memref<11x1x512xf32, #tpu.memory_space<vmem>>, vector<1x1x512xf32>
    %81 = vector.shape_cast %80 : vector<1x1x512xf32> to vector<1x512xf32>
    %82 = vector.broadcast %81 : vector<1x512xf32> to vector<2x512xf32>
    %83 = arith.addf %79, %82 : vector<2x512xf32>
    %84 = arith.truncf %83 : vector<2x512xf32> to vector<2x512xbf16>
    %c10 = arith.constant 10 : index
    %c0_65 = arith.constant 0 : index
    %c0_66 = arith.constant 0 : index
    %85 = vector.load %arg2[%c10, %c0_65, %c0_66] : memref<11x512x512xbf16, #tpu.memory_space<vmem>>, vector<1x512x512xbf16>
    %86 = vector.shape_cast %85 : vector<1x512x512xbf16> to vector<512x512xbf16>
    %cst_67 = arith.constant dense<0.000000e+00> : vector<2x512xf32>
    %87 = tpu.matmul %84, %86, %cst_67 {dimension_numbers = #tpu.dot_dimension_numbers<[1], [0], [0], [1], [0, 0, 1, 1], [], []>} : vector<2x512xbf16>, vector<512x512xbf16>, vector<2x512xf32> -> vector<2x512xf32>
    %c10_68 = arith.constant 10 : index
    %c0_69 = arith.constant 0 : index
    %c0_70 = arith.constant 0 : index
    %88 = vector.load %arg3[%c10_68, %c0_69, %c0_70] : memref<11x1x512xf32, #tpu.memory_space<vmem>>, vector<1x1x512xf32>
    %89 = vector.shape_cast %88 : vector<1x1x512xf32> to vector<1x512xf32>
    %90 = vector.broadcast %89 : vector<1x512xf32> to vector<2x512xf32>
    %91 = arith.addf %87, %90 : vector<2x512xf32>
    %92 = arith.addf %0, %91 : vector<2x512xf32>
    %c0_71 = arith.constant 0 : index
    %c0_72 = arith.constant 0 : index
    %93 = vector.load %arg5[%c0_71, %c0_72] : memref<2x512xf32, #tpu.memory_space<vmem>>, vector<2x512xf32>
    tpu.vector_store %arg5[%c0_71, %c0_72], %92 {strides = array<i32>} : memref<2x512xf32, #tpu.memory_space<vmem>>, vector<2x512xf32>,
    return
  }
}

</mosaic_0001>

<bundles_post_ra>
// kernel: tpu_custom_call.1
= control target key start
LH: loop header
LB: loop body
LE: loop exit
PB: predicated region body
PF: predicated region fallthrough
CT: control target
= control target key end

     0   :  { %11 = vsyncpa [#allocation3], 0  ;;  %s18980_s0 = inlined_call_operand.hbm [shape: f32[2,512], index: 0, kind: input, shape index: {}]   ;;  %s18981_s1 = inlined_call_operand.hbm [shape: f32[2,512], index: 1, kind: input, shape index: {}]   ;;  %s18982_s2 = inlined_call_operand.hbm [shape: bf16[11,512,512], index: 2, kind: input, shape index: {}]   ;;  %s18983_s3 = inlined_call_operand.hbm [shape: f32[11,1,512], index: 3, kind: input, shape index: {}]   ;;  %s18984_s4 = inlined_call_operand.hbm [shape: f32[2,512], index: 4, kind: output, shape index: {0}]   ;;  %s18985_s5 = inlined_call_operand.hbm [shape: f32[2,512], index: 5, kind: output, shape index: {1}]  }
   0x1   :  { %12 = vsyncpa [#allocation6], 0 }
   0x2   :  { %13 = vsyncpa [#allocation9], 0 }
   0x3   :  { %14 = vsyncpa [#allocation4], 0  ;;  %s32_s20 = sshll.u32 %s18981_s1, 4  ;;  %s33_s20 = int_to_ptr.hbm [resolvable:$true] %s32_s20 }
   0x4   :  { %15 = vsyncpa [#allocation12], 0  ;;  %s18267_s21 = smov [#allocation5]   ;;  %s21_s25 = sshll.u32 %s18980_s0, 4  ;;  %s22_s25 = int_to_ptr.hbm [resolvable:$true] %s21_s25 }
   0x5   :  { %s34_s22 = sshll.u32 %s18267_s21, 4  ;;  %s18268_s26 = smov [#allocation2]   ;;  %s35_s22 = int_to_ptr.vmem [resolvable:$true] %s34_s22 }
   0x6   :  { %37 = dma.hbm_to_vmem [thread:$0]  %s33_s20, 128, %s35_s22, [#allocation6]  }
   0x7   :  { %s23_s27 = sshll.u32 %s18268_s26, 4  ;;  %s42_s30 = sshll.u32 %s18982_s2, 4  ;;  %s24_s27 = int_to_ptr.vmem [resolvable:$true] %s23_s27  ;;  %s43_s30 = int_to_ptr.hbm [resolvable:$true] %s42_s30 }
   0x8   :  { %26 = dma.hbm_to_vmem [thread:$0]  %s22_s25, 128, %s24_s27, [#allocation3]  }
   0x9   :  { %s18269_s1 = smov [#allocation7]   ;;  %s55_s9 = sshll.u32 %s18983_s3, 4  ;;  %s56_s9 = int_to_ptr.hbm [resolvable:$true] %s55_s9 }
   0xa   :  { %s44_s6 = sshll.u32 %s18269_s1, 4  ;;  %s18270_s10 = smov 256   ;;  %s45_s6 = int_to_ptr.vmem [resolvable:$true] %s44_s6 }
   0xb   :  { %s18271_s0 = smov 16   ;;  %s18272_s11 = smov [#allocation8]  }
   0xc   :  { %50 = dma.hbm_to_vmem [thread:$0]  %s43_s30, 180224, %s45_s6, [#allocation6], %s18270_s10, %s18270_s10, %s18271_s0  }
   0xd   :  { %s57_s12 = sshll.u32 %s18272_s11, 4  ;;  %s18273_s13 = smov 64   ;;  %s58_s12 = int_to_ptr.vmem [resolvable:$true] %s57_s12 }
   0xe   :  { %s18274_s14 = smov 4  }
   0xf   :  { %63 = dma.hbm_to_vmem [thread:$0]  %s56_s9, 704, %s58_s12, [#allocation9], %s18273_s13, %s18273_s13, %s18274_s14  }
  0x10   :  { %18257 = dma.done.wait [#allocation3], 128  }
  0x11   :  { %18258 = vsyncadd [#allocation3], 4294967168 }
  0x12   :  { %18259 = dma.done.wait [#allocation6], 180352  }
  0x13   :  { %18260 = vsyncadd [#allocation6], 4294786944 }
  0x14   :  { %18261 = dma.done.wait [#allocation9], 704  }
  0x15   :  { %18262 = vsyncadd [#allocation9], 4294966592  ;;  %v11176_v0 = vld [vmem:[#allocation7 + $0xe0] sm:$0xf]  ;;  %v16724_v1 = vld [vmem:[#allocation7 + $0xec] sm:$0xf0] }
  0x16   :  { %v11304_v2 = vld [vmem:[#allocation7 + $0x1e0] sm:$0xf]  ;;  %v11177_v3 = vor.u32 %v16724_v1, %v11176_v0  ;;  %v16756_v4 = vld [vmem:[#allocation7 + $0x1ec] sm:$0xf0]  ;;  %vm8033_vm0 = vcmask 1041408   ;;  %vm8035_vm1 = vcmask 1045508  }
  0x17   :  { %v11432_v5 = vld [vmem:[#allocation7 + $0x2e0] sm:$0xf]  ;;  %v16788_v6 = vld [vmem:[#allocation7 + $0x2ec] sm:$0xf0]  ;;  %v11305_v7 = vor.u32 %v16756_v4, %v11304_v2  ;;  %vm8037_vm2 = vcmask 1043456   ;;  %s18275_s2 = smov [#allocation10]  }
  0x18   :  { %v11433_v8 = vor.u32 %v16788_v6, %v11432_v5  ;;  %v11560_v9 = vld [vmem:[#allocation7 + $0x3e0] sm:$0xf]  ;;  %v16820_v10 = vld [vmem:[#allocation7 + $0x3ec] sm:$0xf0]  ;;  %874 = vmatpush.bf16.msra.mxu0 %v11177_v3  ;;  %s11032_s3 = sshll.u32 %s18275_s2, 4  ;;  %s11034_s17 = sshll.u32 %s18984_s4, 4  ;;  %s11033_s3 = int_to_ptr.vmem [resolvable:$true] %s11032_s3  ;;  %s11035_s17 = int_to_ptr.hbm [resolvable:$true] %s11034_s17 }
  0x19   :  { %v11160_v11 = vld [vmem:[#allocation7 + $0xc0] sm:$0xf]  ;;  %v11561_v12 = vor.u32 %v16820_v10, %v11560_v9  ;;  %v16720_v13 = vld [vmem:[#allocation7 + $0xcc] sm:$0xf0]  ;;  %887 = vmatpush.bf16.msra.mxu1 %v11305_v7  ;;  %s18276_s4 = smov [#allocation11]   ;;  %s11045_s21 = sshll.u32 %s18985_s5, 4  ;;  %s11046_s21 = int_to_ptr.hbm [resolvable:$true] %s11045_s21 }
  0x1a   :  { %v11288_v14 = vld [vmem:[#allocation7 + $0x1c0] sm:$0xf]  ;;  %v16752_v15 = vld [vmem:[#allocation7 + $0x1cc] sm:$0xf0]  ;;  %900 = vmatpush.bf16.msra.mxu2 %v11433_v8  ;;  %v11161_v16 = vor.u32 %v16720_v13, %v11160_v11  ;;  %s11043_s18 = sshll.u32 %s18276_s4, 4  ;;  %s11044_s18 = int_to_ptr.vmem [resolvable:$true] %s11043_s18 }
  0x1b   :  { %v11289_v17 = vor.u32 %v16752_v15, %v11288_v14  ;;  %v11416_v18 = vld [vmem:[#allocation7 + $0x2c0] sm:$0xf]  ;;  %v16784_v19 = vld [vmem:[#allocation7 + $0x2cc] sm:$0xf0]  ;;  %913 = vmatpush.bf16.msra.mxu3 %v11561_v12 }
  0x1c   :  { %v11544_v20 = vld [vmem:[#allocation7 + $0x3c0] sm:$0xf]  ;;  %v11417_v21 = vor.u32 %v16784_v19, %v11416_v18  ;;  %v16816_v22 = vld [vmem:[#allocation7 + $0x3cc] sm:$0xf0]  ;;  %875 = vmatpush.bf16.msra.mxu0 %v11161_v16 }
  0x1d   :  { %v11144_v23 = vld [vmem:[#allocation7 + $0xa0] sm:$0xf]  ;;  %v16716_v24 = vld [vmem:[#allocation7 + $0xac] sm:$0xf0]  ;;  %v11545_v25 = vor.u32 %v16816_v22, %v11544_v20  ;;  %888 = vmatpush.bf16.msra.mxu1 %v11289_v17 }
  0x1e   :  { %v11272_v26 = vld [vmem:[#allocation7 + $0x1a0] sm:$0xf]  ;;  %v16748_v27 = vld [vmem:[#allocation7 + $0x1ac] sm:$0xf0]  ;;  %v11145_v29 = vor.u32 %v16716_v24, %v11144_v23  ;;  %901 = vmatpush.bf16.msra.mxu2 %v11417_v21 }
  0x1f   :  { %v11400_v28 = vld [vmem:[#allocation7 + $0x2a0] sm:$0xf]  ;;  %v16780_v30 = vld [vmem:[#allocation7 + $0x2ac] sm:$0xf0]  ;;  %v11273_v33 = vor.u32 %v16748_v27, %v11272_v26  ;;  %914 = vmatpush.bf16.msra.mxu3 %v11545_v25 }
  0x20   :  { %v11528_v31 = vld [vmem:[#allocation7 + $0x3a0] sm:$0xf]  ;;  %v16812_v32 = vld [vmem:[#allocation7 + $0x3ac] sm:$0xf0]  ;;  %v11401_v34 = vor.u32 %v16780_v30, %v11400_v28  ;;  %876 = vmatpush.bf16.msra.mxu0 %v11145_v29  ;;  %v16722_v28 = vld [vmem:[#allocation7 + $0xe4] sm:$0xf] }
  0x21   :  { %v11128_v35 = vld [vmem:[#allocation7 + $0x80] sm:$0xf]  ;;  %v16712_v36 = vld [vmem:[#allocation7 + $0x8c] sm:$0xf0]  ;;  %v11529_v38 = vor.u32 %v16812_v32, %v11528_v31  ;;  %889 = vmatpush.bf16.msra.mxu1 %v11273_v33  ;;  %v11178_v29 = vld [vmem:[#allocation7 + $0xf0] sm:$0xf0] }
  0x22   :  { %v11256_v37 = vld [vmem:[#allocation7 + $0x180] sm:$0xf]  ;;  %v16744_v39 = vld [vmem:[#allocation7 + $0x18c] sm:$0xf0]  ;;  %v11129_v44 = vor.u32 %v16712_v36, %v11128_v35  ;;  %902 = vmatpush.bf16.msra.mxu2 %v11401_v34  ;;  %v16754_v30 = vld [vmem:[#allocation7 + $0x1e4] sm:$0xf] }
  0x23   :  { %v11384_v40 = vld [vmem:[#allocation7 + $0x280] sm:$0xf]  ;;  %v16776_v41 = vld [vmem:[#allocation7 + $0x28c] sm:$0xf0]  ;;  %v11257_v45 = vor.u32 %v16744_v39, %v11256_v37  ;;  %915 = vmatpush.bf16.msra.mxu3 %v11529_v38  ;;  %v11306_v31 = vld [vmem:[#allocation7 + $0x1f0] sm:$0xf0] }
  0x24   :  { %v11512_v42 = vld [vmem:[#allocation7 + $0x380] sm:$0xf]  ;;  %v16808_v43 = vld [vmem:[#allocation7 + $0x38c] sm:$0xf0]  ;;  %v11385_v46 = vor.u32 %v16776_v41, %v11384_v40  ;;  %877 = vmatpush.bf16.msra.mxu0 %v11129_v44  ;;  %v81_v32 = vld [vmem:[#allocation5] sm:$0xff]  ;;  %v11181_v41 = vor.u32 %v16722_v28, %v11178_v29 }
  0x25   :  { %v11112_v47 = vld [vmem:[#allocation7 + $0x60] sm:$0xf]  ;;  %v16708_v48 = vld [vmem:[#allocation7 + $0x6c] sm:$0xf0]  ;;  %v11513_v50 = vor.u32 %v16808_v43, %v11512_v42  ;;  %890 = vmatpush.bf16.msra.mxu1 %v11257_v45  ;;  %v16786_v34 = vld [vmem:[#allocation7 + $0x2e4] sm:$0xf]  ;;  %v11309_v43 = vor.u32 %v16754_v30, %v11306_v31 }
  0x26   :  { %v11240_v49 = vld [vmem:[#allocation7 + $0x160] sm:$0xf]  ;;  %v16740_v51 = vld [vmem:[#allocation7 + $0x16c] sm:$0xf0]  ;;  %v11113_v56 = vor.u32 %v16708_v48, %v11112_v47  ;;  %903 = vmatpush.bf16.msra.mxu2 %v11385_v46  ;;  %v11434_v35 = vld [vmem:[#allocation7 + $0x2f0] sm:$0xf0] }
  0x27   :  { %v11368_v52 = vld [vmem:[#allocation7 + $0x260] sm:$0xf]  ;;  %v16772_v53 = vld [vmem:[#allocation7 + $0x26c] sm:$0xf0]  ;;  %v11241_v57 = vor.u32 %v16740_v51, %v11240_v49  ;;  %916 = vmatpush.bf16.msra.mxu3 %v11513_v50  ;;  %83 = vst [vmem:[#allocation1] ss:$4 sm:$0xff] %v81_v32  ;;  %v11437_v44 = vor.u32 %v16786_v34, %v11434_v35 }
  0x28   :  { %v11496_v54 = vld [vmem:[#allocation7 + $0x360] sm:$0xf]  ;;  %v16804_v55 = vld [vmem:[#allocation7 + $0x36c] sm:$0xf0]  ;;  %v11369_v58 = vor.u32 %v16772_v53, %v11368_v52  ;;  %878 = vmatpush.bf16.msra.mxu0 %v11113_v56  ;;  %v16818_v38 = vld [vmem:[#allocation7 + $0x3e4] sm:$0xf] }
  0x29   :  { %v11096_v59 = vld [vmem:[#allocation7 + $0x40] sm:$0xf]  ;;  %v16704_v60 = vld [vmem:[#allocation7 + $0x4c] sm:$0xf0]  ;;  %v11497_v62 = vor.u32 %v16804_v55, %v11496_v54  ;;  %891 = vmatpush.bf16.msra.mxu1 %v11241_v57  ;;  %v11562_v39 = vld [vmem:[#allocation7 + $0x3f0] sm:$0xf0] }
  0x2a   :  { %v11224_v61 = vld [vmem:[#allocation7 + $0x140] sm:$0xf]  ;;  %v16736_v63 = vld [vmem:[#allocation7 + $0x14c] sm:$0xf0]  ;;  %v11097_v4 = vor.u32 %v16704_v60, %v11096_v59  ;;  %904 = vmatpush.bf16.msra.mxu2 %v11369_v58  ;;  %v16718_v42 = vld [vmem:[#allocation7 + $0xc4] sm:$0xf]  ;;  %v11565_v48 = vor.u32 %v16818_v38, %v11562_v39 }
  0x2b   :  { %v11352_v0 = vld [vmem:[#allocation7 + $0x240] sm:$0xf]  ;;  %v16768_v1 = vld [vmem:[#allocation7 + $0x24c] sm:$0xf0]  ;;  %v11225_v5 = vor.u32 %v16736_v63, %v11224_v61  ;;  %917 = vmatpush.bf16.msra.mxu3 %v11497_v62  ;;  %v11162_v45 = vld [vmem:[#allocation7 + $0xd0] sm:$0xf0] }
  0x2c   :  { %v11480_v2 = vld [vmem:[#allocation7 + $0x340] sm:$0xf]  ;;  %v16800_v3 = vld [vmem:[#allocation7 + $0x34c] sm:$0xf0]  ;;  %v11353_v6 = vor.u32 %v16768_v1, %v11352_v0  ;;  %879 = vmatpush.bf16.msra.mxu0 %v11097_v4  ;;  %v16750_v46 = vld [vmem:[#allocation7 + $0x1c4] sm:$0xf]  ;;  %v11165_v55 = vor.u32 %v16718_v42, %v11162_v45 }
  0x2d   :  { %v11080_v7 = vld [vmem:[#allocation7 + $0x20] sm:$0xf]  ;;  %v16700_v8 = vld [vmem:[#allocation7 + $0x2c] sm:$0xf0]  ;;  %v11481_v10 = vor.u32 %v16800_v3, %v11480_v2  ;;  %892 = vmatpush.bf16.msra.mxu1 %v11225_v5  ;;  %v11290_v47 = vld [vmem:[#allocation7 + $0x1d0] sm:$0xf0] }
  0x2e   :  { %v11208_v9 = vld [vmem:[#allocation7 + $0x120] sm:$0xf]  ;;  %v16732_v11 = vld [vmem:[#allocation7 + $0x12c] sm:$0xf0]  ;;  %v11081_v17 = vor.u32 %v16700_v8, %v11080_v7  ;;  %905 = vmatpush.bf16.msra.mxu2 %v11353_v6  ;;  %v16782_v49 = vld [vmem:[#allocation7 + $0x2c4] sm:$0xf]  ;;  %v11293_v60 = vor.u32 %v16750_v46, %v11290_v47 }
  0x2f   :  { %v11336_v12 = vld [vmem:[#allocation7 + $0x220] sm:$0xf]  ;;  %v16764_v13 = vld [vmem:[#allocation7 + $0x22c] sm:$0xf0]  ;;  %v11209_v21 = vor.u32 %v16732_v11, %v11208_v9  ;;  %918 = vmatpush.bf16.msra.mxu3 %v11481_v10  ;;  %v11418_v50 = vld [vmem:[#allocation7 + $0x2d0] sm:$0xf0] }
  0x30   :  { %v11464_v14 = vld [vmem:[#allocation7 + $0x320] sm:$0xf]  ;;  %v16796_v15 = vld [vmem:[#allocation7 + $0x32c] sm:$0xf0]  ;;  %v11337_v22 = vor.u32 %v16764_v13, %v11336_v12  ;;  %880 = vmatpush.bf16.msra.mxu0 %v11081_v17  ;;  %v16814_v51 = vld [vmem:[#allocation7 + $0x3c4] sm:$0xf]  ;;  %v11421_v61 = vor.u32 %v16782_v49, %v11418_v50 }
  0x31   :  { %v11064_v16 = vld [vmem:[#allocation7] sm:$0xf]  ;;  %v16696_v18 = vld [vmem:[#allocation7 + $0xc] sm:$0xf0]  ;;  %v11465_v26 = vor.u32 %v16796_v15, %v11464_v14  ;;  %893 = vmatpush.bf16.msra.mxu1 %v11209_v21  ;;  %v11546_v52 = vld [vmem:[#allocation7 + $0x3d0] sm:$0xf0] }
  0x32   :  { %v11192_v19 = vld [vmem:[#allocation7 + $0x100] sm:$0xf]  ;;  %v16728_v20 = vld [vmem:[#allocation7 + $0x10c] sm:$0xf0]  ;;  %v11065_v33 = vor.u32 %v16696_v18, %v11064_v16  ;;  %906 = vmatpush.bf16.msra.mxu2 %v11337_v22  ;;  %v16714_v53 = vld [vmem:[#allocation7 + $0xa4] sm:$0xf]  ;;  %v11549_v0 = vor.u32 %v16814_v51, %v11546_v52 }
  0x33   :  { %v11320_v23 = vld [vmem:[#allocation7 + $0x200] sm:$0xf]  ;;  %v16760_v24 = vld [vmem:[#allocation7 + $0x20c] sm:$0xf0]  ;;  %v11193_v36 = vor.u32 %v16728_v20, %v11192_v19  ;;  %919 = vmatpush.bf16.msra.mxu3 %v11465_v26  ;;  %v11146_v54 = vld [vmem:[#allocation7 + $0xb0] sm:$0xf0] }
  0x34   :  { %v11448_v25 = vld [vmem:[#allocation7 + $0x300] sm:$0xf]  ;;  %v16792_v27 = vld [vmem:[#allocation7 + $0x30c] sm:$0xf0]  ;;  %v11321_v37 = vor.u32 %v16760_v24, %v11320_v23  ;;  %881 = vmatpush.bf16.msra.mxu0 %v11065_v33  ;;  %v16746_v56 = vld [vmem:[#allocation7 + $0x1a4] sm:$0xf]  ;;  %v11149_v9 = vor.u32 %v16714_v53, %v11146_v54 }
  0x35   :  { %v11449_v40 = vor.u32 %v16792_v27, %v11448_v25  ;;  %894 = vmatpush.bf16.msra.mxu1 %v11193_v36  ;;  %v11274_v57 = vld [vmem:[#allocation7 + $0x1b0] sm:$0xf0]  ;;  %v16778_v58 = vld [vmem:[#allocation7 + $0x2a4] sm:$0xf] }
  0x36   :  { %907 = vmatpush.bf16.msra.mxu2 %v11321_v37  ;;  %v11402_v59 = vld [vmem:[#allocation7 + $0x2b0] sm:$0xf0]  ;;  %v86_v62 = vld.sshfl [vmem:[#allocation1 + $0x10] sm:$0xff pattern:$0x73625140]  ;;  %v11277_v10 = vor.u32 %v16746_v56, %v11274_v57 }
  0x37   :  { %920 = vmatpush.bf16.msra.mxu3 %v11449_v40  ;;  %v84_v63 = vld.sshfl [vmem:[#allocation1] sm:$0xff pattern:$0x73625140]  ;;  %v18319_v1 = vpack.c.bf16 %v86_v62, %v86_v62  ;;  %v87_v3 = vld.sshfl [vmem:[#allocation1 + $0x18] sm:$0xff pattern:$0x73625140]  ;;  %v11405_v11 = vor.u32 %v16778_v58, %v11402_v59 }
  0x38   :  { %926 = vmatpush.bf16.msrb.mxu0 %v11181_v41  ;;  %v18321_v2 = vpack.c.bf16 %v84_v63, %v84_v63  ;;  %v85_v4 = vld.sshfl [vmem:[#allocation1 + $0x8] sm:$0xff pattern:$0x73625140]  ;;  %v18323_v5 = vpack.c.bf16 %v87_v3, %v87_v3  ;;  %v16810_v6 = vld [vmem:[#allocation7 + $0x3a4] sm:$0xf] }
  0x39   :  { %939 = vmatpush.bf16.msrb.mxu1 %v11309_v43  ;;  %v11530_v7 = vld [vmem:[#allocation7 + $0x3b0] sm:$0xf0]  ;;  %v18325_v8 = vpack.c.bf16 %v85_v4, %v85_v4  ;;  %908 = vmatmul.bf16.vlgmr.msra.gmra.mxu2 %v18319_v1  ;;  %v16710_v12 = vld [vmem:[#allocation7 + $0x84] sm:$0xf] }
  0x3a   :  { %952 = vmatpush.bf16.msrb.mxu2 %v11437_v44  ;;  %v11130_v13 = vld [vmem:[#allocation7 + $0x90] sm:$0xf0]  ;;  %v16742_v14 = vld [vmem:[#allocation7 + $0x184] sm:$0xf]  ;;  %882 = vmatmul.bf16.vlgmr.msra.gmra.mxu0 %v18321_v2  ;;  %v11533_v15 = vor.u32 %v16810_v6, %v11530_v7 }
  0x3b   :  { %965 = vmatpush.bf16.msrb.mxu3 %v11565_v48  ;;  %v11258_v16 = vld [vmem:[#allocation7 + $0x190] sm:$0xf0]  ;;  %v16774_v17 = vld [vmem:[#allocation7 + $0x284] sm:$0xf]  ;;  %895 = vmatmul.bf16.vlgmr.msra.gmra.mxu1 %v18325_v8  ;;  %v11133_v21 = vor.u32 %v16710_v12, %v11130_v13  ;;  %v16757_v13 = vld [vmem:[#allocation7 + $0x1f4] sm:$0xf0] }
  0x3c   :  { %927 = vmatpush.bf16.msrb.mxu0 %v11165_v55  ;;  %v11386_v18 = vld [vmem:[#allocation7 + $0x290] sm:$0xf0]  ;;  %921 = vmatmul.bf16.vlgmr.msra.gmra.mxu3 %v18323_v5  ;;  %v16806_v19 = vld [vmem:[#allocation7 + $0x384] sm:$0xf]  ;;  %v11261_v22 = vor.u32 %v16742_v14, %v11258_v16  ;;  %v11440_v14 = vld [vmem:[#allocation7 + $0x2e8] sm:$0xf] }
  0x3d   :  { %940 = vmatpush.bf16.msrb.mxu1 %v11293_v60  ;;  %v11514_v20 = vld [vmem:[#allocation7 + $0x390] sm:$0xf0]  ;;  %v11389_v23 = vor.u32 %v16774_v17, %v11386_v18  ;;  %v16706_v24 = vld [vmem:[#allocation7 + $0x64] sm:$0xf]  ;;  %v11568_v18 = vld [vmem:[#allocation7 + $0x3e8] sm:$0xf] }
  0x3e   :  { %953 = vmatpush.bf16.msrb.mxu2 %v11421_v61  ;;  %v11114_v25 = vld [vmem:[#allocation7 + $0x70] sm:$0xf0]  ;;  %v16738_v26 = vld [vmem:[#allocation7 + $0x164] sm:$0xf]  ;;  %v11517_v27 = vor.u32 %v16806_v19, %v11514_v20  ;;  %v16821_v19 = vld [vmem:[#allocation7 + $0x3f4] sm:$0xf0] }
  0x3f   :  { %966 = vmatpush.bf16.msrb.mxu3 %v11549_v0  ;;  %v11242_v28 = vld [vmem:[#allocation7 + $0x170] sm:$0xf0]  ;;  %v16770_v29 = vld [vmem:[#allocation7 + $0x264] sm:$0xf]  ;;  %v11117_v33 = vor.u32 %v16706_v24, %v11114_v25  ;;  %v11168_v24 = vld [vmem:[#allocation7 + $0xc8] sm:$0xf] }
  0x40   :  { %928 = vmatpush.bf16.msrb.mxu0 %v11149_v9  ;;  %v11370_v30 = vld [vmem:[#allocation7 + $0x270] sm:$0xf0]  ;;  %v16802_v31 = vld [vmem:[#allocation7 + $0x364] sm:$0xf]  ;;  %v11245_v34 = vor.u32 %v16738_v26, %v11242_v28  ;;  %v11184_v9 = vld [vmem:[#allocation7 + $0xe8] sm:$0xf] }
  0x41   :  { %941 = vmatpush.bf16.msrb.mxu1 %v11277_v10  ;;  %v11498_v32 = vld [vmem:[#allocation7 + $0x370] sm:$0xf0]  ;;  %v11373_v35 = vor.u32 %v16770_v29, %v11370_v30  ;;  %v16702_v36 = vld [vmem:[#allocation7 + $0x44] sm:$0xf]  ;;  %v16725_v10 = vld [vmem:[#allocation7 + $0xf4] sm:$0xf0] }
  0x42   :  { %954 = vmatpush.bf16.msrb.mxu2 %v11405_v11  ;;  %v11098_v37 = vld [vmem:[#allocation7 + $0x50] sm:$0xf0]  ;;  %v16734_v38 = vld [vmem:[#allocation7 + $0x144] sm:$0xf]  ;;  %v11501_v39 = vor.u32 %v16802_v31, %v11498_v32  ;;  %v11312_v11 = vld [vmem:[#allocation7 + $0x1e8] sm:$0xf] }
  0x43   :  { %967 = vmatpush.bf16.msrb.mxu3 %v11533_v15  ;;  %v11226_v40 = vld [vmem:[#allocation7 + $0x150] sm:$0xf0]  ;;  %v16766_v41 = vld [vmem:[#allocation7 + $0x244] sm:$0xf]  ;;  %v11101_v45 = vor.u32 %v16702_v36, %v11098_v37  ;;  %v16789_v15 = vld [vmem:[#allocation7 + $0x2f4] sm:$0xf0] }
  0x44   :  { %929 = vmatpush.bf16.msrb.mxu0 %v11133_v21  ;;  %v11354_v42 = vld [vmem:[#allocation7 + $0x250] sm:$0xf0]  ;;  %v16798_v43 = vld [vmem:[#allocation7 + $0x344] sm:$0xf]  ;;  %v11229_v46 = vor.u32 %v16734_v38, %v11226_v40  ;;  %v11185_v21 = vor.u32 %v16725_v10, %v11184_v9  ;;  %v16721_v25 = vld [vmem:[#allocation7 + $0xd4] sm:$0xf0] }
  0x45   :  { %942 = vmatpush.bf16.msrb.mxu1 %v11261_v22  ;;  %v11482_v44 = vld [vmem:[#allocation7 + $0x350] sm:$0xf0]  ;;  %v11357_v47 = vor.u32 %v16766_v41, %v11354_v42  ;;  %v16698_v48 = vld [vmem:[#allocation7 + $0x24] sm:$0xf]  ;;  %v11313_v22 = vor.u32 %v16757_v13, %v11312_v11  ;;  %v11296_v26 = vld [vmem:[#allocation7 + $0x1c8] sm:$0xf] }
  0x46   :  { %955 = vmatpush.bf16.msrb.mxu2 %v11389_v23  ;;  %v11082_v49 = vld [vmem:[#allocation7 + $0x30] sm:$0xf0]  ;;  %v16730_v50 = vld [vmem:[#allocation7 + $0x124] sm:$0xf]  ;;  %v11485_v51 = vor.u32 %v16798_v43, %v11482_v44  ;;  %v11441_v23 = vor.u32 %v16789_v15, %v11440_v14  ;;  %v16753_v28 = vld [vmem:[#allocation7 + $0x1d4] sm:$0xf0] }
  0x47   :  { %968 = vmatpush.bf16.msrb.mxu3 %v11517_v27  ;;  %v11210_v52 = vld [vmem:[#allocation7 + $0x130] sm:$0xf0]  ;;  %v16762_v53 = vld [vmem:[#allocation7 + $0x224] sm:$0xf]  ;;  %v11085_v57 = vor.u32 %v16698_v48, %v11082_v49  ;;  %v11569_v27 = vor.u32 %v16821_v19, %v11568_v18  ;;  %v11424_v29 = vld [vmem:[#allocation7 + $0x2c8] sm:$0xf] }
  0x48   :  { %930 = vmatpush.bf16.msrb.mxu0 %v11117_v33  ;;  %v11338_v54 = vld [vmem:[#allocation7 + $0x230] sm:$0xf0]  ;;  %v16794_v55 = vld [vmem:[#allocation7 + $0x324] sm:$0xf]  ;;  %v11213_v60 = vor.u32 %v16730_v50, %v11210_v52  ;;  %v16785_v30 = vld [vmem:[#allocation7 + $0x2d4] sm:$0xf0]  ;;  %v11169_v33 = vor.u32 %v16721_v25, %v11168_v24 }
  0x49   :  { %943 = vmatpush.bf16.msrb.mxu1 %v11245_v34  ;;  %v11466_v56 = vld [vmem:[#allocation7 + $0x330] sm:$0xf0]  ;;  %v16694_v58 = vld [vmem:[#allocation7 + $0x4] sm:$0xf]  ;;  %v11341_v61 = vor.u32 %v16762_v53, %v11338_v54  ;;  %v11552_v31 = vld [vmem:[#allocation7 + $0x3c8] sm:$0xf]  ;;  %v11297_v34 = vor.u32 %v16753_v28, %v11296_v26 }
  0x4a   :  { %956 = vmatpush.bf16.msrb.mxu2 %v11373_v35  ;;  %v11066_v59 = vld [vmem:[#allocation7 + $0x10] sm:$0xf0]  ;;  %v16726_v62 = vld [vmem:[#allocation7 + $0x104] sm:$0xf]  ;;  %v11469_v3 = vor.u32 %v16794_v55, %v11466_v56  ;;  %v16817_v32 = vld [vmem:[#allocation7 + $0x3d4] sm:$0xf0]  ;;  %v11425_v35 = vor.u32 %v16785_v30, %v11424_v29 }
  0x4b   :  { %969 = vmatpush.bf16.msrb.mxu3 %v11501_v39  ;;  %v11194_v63 = vld [vmem:[#allocation7 + $0x110] sm:$0xf0]  ;;  %v16758_v0 = vld [vmem:[#allocation7 + $0x204] sm:$0xf]  ;;  %v11069_v12 = vor.u32 %v16694_v58, %v11066_v59  ;;  %v11152_v36 = vld [vmem:[#allocation7 + $0xa8] sm:$0xf]  ;;  %v11553_v39 = vor.u32 %v16817_v32, %v11552_v31 }
  0x4c   :  { %931 = vmatpush.bf16.msrb.mxu0 %v11101_v45  ;;  %v11322_v4 = vld [vmem:[#allocation7 + $0x210] sm:$0xf0]  ;;  %v16790_v6 = vld [vmem:[#allocation7 + $0x304] sm:$0xf]  ;;  %v11197_v16 = vor.u32 %v16726_v62, %v11194_v63  ;;  %v16717_v37 = vld [vmem:[#allocation7 + $0xb4] sm:$0xf0] }
  0x4d   :  { %944 = vmatpush.bf16.msrb.mxu1 %v11229_v46  ;;  %v11450_v7 = vld [vmem:[#allocation7 + $0x310] sm:$0xf0]  ;;  %v11325_v17 = vor.u32 %v16758_v0, %v11322_v4  ;;  %v11280_v38 = vld [vmem:[#allocation7 + $0x1a8] sm:$0xf]  ;;  %v16749_v40 = vld [vmem:[#allocation7 + $0x1b4] sm:$0xf0]  ;;  %v11153_v45 = vor.u32 %v16717_v37, %v11152_v36 }
  0x4e   :  { %957 = vmatpush.bf16.msrb.mxu2 %v11357_v47  ;;  %v11453_v20 = vor.u32 %v16790_v6, %v11450_v7  ;;  %v11408_v41 = vld [vmem:[#allocation7 + $0x2a8] sm:$0xf]  ;;  %v16781_v42 = vld [vmem:[#allocation7 + $0x2b4] sm:$0xf0]  ;;  %v11281_v46 = vor.u32 %v16749_v40, %v11280_v38 }
  0x4f   :  { %970 = vmatpush.bf16.msrb.mxu3 %v11485_v51  ;;  %v11536_v43 = vld [vmem:[#allocation7 + $0x3a8] sm:$0xf]  ;;  %v16813_v44 = vld [vmem:[#allocation7 + $0x3b4] sm:$0xf0]  ;;  %v11409_v47 = vor.u32 %v16781_v42, %v11408_v41 }
  0x50   :  { %932 = vmatpush.bf16.msrb.mxu0 %v11085_v57  ;;  %v11136_v48 = vld [vmem:[#allocation7 + $0x88] sm:$0xf]  ;;  %v16713_v49 = vld [vmem:[#allocation7 + $0x94] sm:$0xf0]  ;;  %v11537_v51 = vor.u32 %v16813_v44, %v11536_v43 }
  0x51   :  { %945 = vmatpush.bf16.msrb.mxu1 %v11213_v60  ;;  %v11264_v50 = vld [vmem:[#allocation7 + $0x188] sm:$0xf]  ;;  %v16745_v52 = vld [vmem:[#allocation7 + $0x194] sm:$0xf0]  ;;  %v11137_v57 = vor.u32 %v16713_v49, %v11136_v48  ;;  %v11314_v49 = vld [vmem:[#allocation7 + $0x1f8] sm:$0xf0] }
  0x52   :  { %958 = vmatpush.bf16.msrb.mxu2 %v11341_v61  ;;  %v11392_v53 = vld [vmem:[#allocation7 + $0x288] sm:$0xf]  ;;  %v16777_v54 = vld [vmem:[#allocation7 + $0x294] sm:$0xf0]  ;;  %v11265_v58 = vor.u32 %v16745_v52, %v11264_v50  ;;  %v16787_v50 = vld [vmem:[#allocation7 + $0x2ec] sm:$0xf] }
  0x53   :  { %971 = vmatpush.bf16.msrb.mxu3 %v11469_v3  ;;  %v11520_v55 = vld [vmem:[#allocation7 + $0x388] sm:$0xf]  ;;  %v16809_v56 = vld [vmem:[#allocation7 + $0x394] sm:$0xf0]  ;;  %v11393_v59 = vor.u32 %v16777_v54, %v11392_v53  ;;  %v16819_v54 = vld [vmem:[#allocation7 + $0x3ec] sm:$0xf] }
  0x54   :  { %933 = vmatpush.bf16.msrb.mxu0 %v11069_v12  ;;  %v11120_v60 = vld [vmem:[#allocation7 + $0x68] sm:$0xf]  ;;  %v16709_v61 = vld [vmem:[#allocation7 + $0x74] sm:$0xf0]  ;;  %v11521_v63 = vor.u32 %v16809_v56, %v11520_v55  ;;  %v11570_v55 = vld [vmem:[#allocation7 + $0x3f8] sm:$0xf0] }
  0x55   :  { %946 = vmatpush.bf16.msrb.mxu1 %v11197_v16  ;;  %v11248_v62 = vld [vmem:[#allocation7 + $0x168] sm:$0xf]  ;;  %v16741_v0 = vld [vmem:[#allocation7 + $0x174] sm:$0xf0]  ;;  %v11121_v9 = vor.u32 %v16709_v61, %v11120_v60  ;;  %v16719_v60 = vld [vmem:[#allocation7 + $0xcc] sm:$0xf] }
  0x56   :  { %959 = vmatpush.bf16.msrb.mxu2 %v11325_v17  ;;  %v11376_v3 = vld [vmem:[#allocation7 + $0x268] sm:$0xf]  ;;  %v16773_v4 = vld [vmem:[#allocation7 + $0x274] sm:$0xf0]  ;;  %v11249_v10 = vor.u32 %v16741_v0, %v11248_v62  ;;  %v11170_v61 = vld [vmem:[#allocation7 + $0xd8] sm:$0xf0] }
  0x57   :  { %972 = vmatpush.bf16.msrb.mxu3 %v11453_v20  ;;  %934 = vmatmul.bf16.vlgmr.msrb.gmra.mxu0 %v18321_v2  ;;  %v11504_v6 = vld [vmem:[#allocation7 + $0x368] sm:$0xf]  ;;  %v16805_v7 = vld [vmem:[#allocation7 + $0x374] sm:$0xf0]  ;;  %v11377_v11 = vor.u32 %v16773_v4, %v11376_v3  ;;  %v16751_v62 = vld [vmem:[#allocation7 + $0x1cc] sm:$0xf] }
  0x58   :  { %978 = vmatpush.bf16.msra.mxu0 %v11185_v21  ;;  %947 = vmatmul.bf16.vlgmr.msrb.gmra.mxu1 %v18325_v8  ;;  %v11104_v12 = vld [vmem:[#allocation7 + $0x48] sm:$0xf]  ;;  %v16705_v13 = vld [vmem:[#allocation7 + $0x54] sm:$0xf0]  ;;  %v11505_v15 = vor.u32 %v16805_v7, %v11504_v6  ;;  %v11298_v0 = vld [vmem:[#allocation7 + $0x1d8] sm:$0xf0] }
  0x59   :  { %991 = vmatpush.bf16.msra.mxu1 %v11313_v22  ;;  %960 = vmatmul.bf16.vlgmr.msrb.gmra.mxu2 %v18319_v1  ;;  %v11232_v14 = vld [vmem:[#allocation7 + $0x148] sm:$0xf]  ;;  %v16737_v16 = vld [vmem:[#allocation7 + $0x154] sm:$0xf0]  ;;  %v11105_v21 = vor.u32 %v16705_v13, %v11104_v12  ;;  %v16783_v3 = vld [vmem:[#allocation7 + $0x2cc] sm:$0xf] }
  0x5a   :  { %1004 = vmatpush.bf16.msra.mxu2 %v11441_v23  ;;  %973 = vmatmul.bf16.vlgmr.msrb.gmra.mxu3 %v18323_v5  ;;  %v11360_v17 = vld [vmem:[#allocation7 + $0x248] sm:$0xf]  ;;  %v16769_v18 = vld [vmem:[#allocation7 + $0x254] sm:$0xf0]  ;;  %v11233_v22 = vor.u32 %v16737_v16, %v11232_v14  ;;  %v11426_v4 = vld [vmem:[#allocation7 + $0x2d8] sm:$0xf0] }
  0x5b   :  { %1017 = vmatpush.bf16.msra.mxu3 %v11569_v27  ;;  %v11488_v19 = vld [vmem:[#allocation7 + $0x348] sm:$0xf]  ;;  %v16801_v20 = vld [vmem:[#allocation7 + $0x354] sm:$0xf0]  ;;  %v11361_v23 = vor.u32 %v16769_v18, %v11360_v17  ;;  %v16815_v6 = vld [vmem:[#allocation7 + $0x3cc] sm:$0xf] }
  0x5c   :  { %979 = vmatpush.bf16.msra.mxu0 %v11169_v33  ;;  %v11088_v24 = vld [vmem:[#allocation7 + $0x28] sm:$0xf]  ;;  %v16701_v25 = vld [vmem:[#allocation7 + $0x34] sm:$0xf0]  ;;  %v11489_v27 = vor.u32 %v16801_v20, %v11488_v19  ;;  %v11554_v7 = vld [vmem:[#allocation7 + $0x3d8] sm:$0xf0] }
  0x5d   :  { %992 = vmatpush.bf16.msra.mxu1 %v11297_v34  ;;  %v11216_v26 = vld [vmem:[#allocation7 + $0x128] sm:$0xf]  ;;  %v16733_v28 = vld [vmem:[#allocation7 + $0x134] sm:$0xf0]  ;;  %v11089_v33 = vor.u32 %v16701_v25, %v11088_v24  ;;  %v16715_v12 = vld [vmem:[#allocation7 + $0xac] sm:$0xf] }
  0x5e   :  { %1005 = vmatpush.bf16.msra.mxu2 %v11425_v35  ;;  %v11344_v29 = vld [vmem:[#allocation7 + $0x228] sm:$0xf]  ;;  %v16765_v30 = vld [vmem:[#allocation7 + $0x234] sm:$0xf0]  ;;  %v11217_v36 = vor.u32 %v16733_v28, %v11216_v26  ;;  %v11154_v13 = vld [vmem:[#allocation7 + $0xb8] sm:$0xf0] }
  0x5f   :  { %1018 = vmatpush.bf16.msra.mxu3 %v11553_v39  ;;  %v11472_v31 = vld [vmem:[#allocation7 + $0x328] sm:$0xf]  ;;  %v16797_v32 = vld [vmem:[#allocation7 + $0x334] sm:$0xf0]  ;;  %v11345_v37 = vor.u32 %v16765_v30, %v11344_v29  ;;  %v16747_v14 = vld [vmem:[#allocation7 + $0x1ac] sm:$0xf] }
  0x60   :  { %980 = vmatpush.bf16.msra.mxu0 %v11153_v45  ;;  %v11072_v34 = vld [vmem:[#allocation7 + $0x8] sm:$0xf]  ;;  %v16697_v35 = vld [vmem:[#allocation7 + $0x14] sm:$0xf0]  ;;  %v11473_v41 = vor.u32 %v16797_v32, %v11472_v31  ;;  %v16723_v45 = vld [vmem:[#allocation7 + $0xec] sm:$0xf] }
  0x61   :  { %993 = vmatpush.bf16.msra.mxu1 %v11281_v46  ;;  %v11200_v38 = vld [vmem:[#allocation7 + $0x108] sm:$0xf]  ;;  %v16729_v39 = vld [vmem:[#allocation7 + $0x114] sm:$0xf0]  ;;  %v11186_v46 = vld [vmem:[#allocation7 + $0xf8] sm:$0xf0]  ;;  %v11073_v48 = vor.u32 %v16697_v35, %v11072_v34 }
  0x62   :  { %1006 = vmatpush.bf16.msra.mxu2 %v11409_v47  ;;  %v11328_v40 = vld [vmem:[#allocation7 + $0x208] sm:$0xf]  ;;  %v16761_v42 = vld [vmem:[#allocation7 + $0x214] sm:$0xf0]  ;;  %v16755_v47 = vld [vmem:[#allocation7 + $0x1ec] sm:$0xf]  ;;  %v11201_v52 = vor.u32 %v16729_v39, %v11200_v38 }
  0x63   :  { %1019 = vmatpush.bf16.msra.mxu3 %v11537_v51  ;;  %v11456_v43 = vld [vmem:[#allocation7 + $0x308] sm:$0xf]  ;;  %v16793_v44 = vld [vmem:[#allocation7 + $0x314] sm:$0xf0]  ;;  %v11442_v51 = vld [vmem:[#allocation7 + $0x2f8] sm:$0xf0]  ;;  %v11329_v53 = vor.u32 %v16761_v42, %v11328_v40 }
  0x64   :  { %981 = vmatpush.bf16.msra.mxu0 %v11137_v57  ;;  %v11457_v56 = vor.u32 %v16793_v44, %v11456_v43  ;;  %v11189_v57 = vor.u32 %v16723_v45, %v11186_v46  ;;  %v11282_v16 = vld [vmem:[#allocation7 + $0x1b8] sm:$0xf0]  ;;  %v16779_v17 = vld [vmem:[#allocation7 + $0x2ac] sm:$0xf] }
  0x65   :  { %994 = vmatpush.bf16.msra.mxu1 %v11265_v58  ;;  %v11317_v58 = vor.u32 %v16755_v47, %v11314_v49  ;;  %v11410_v18 = vld [vmem:[#allocation7 + $0x2b8] sm:$0xf0]  ;;  %v16811_v19 = vld [vmem:[#allocation7 + $0x3ac] sm:$0xf] }
  0x66   :  { %1007 = vmatpush.bf16.msra.mxu2 %v11393_v59  ;;  %v11445_v59 = vor.u32 %v16787_v50, %v11442_v51  ;;  %v11538_v20 = vld [vmem:[#allocation7 + $0x3b8] sm:$0xf0]  ;;  %v16711_v24 = vld [vmem:[#allocation7 + $0x8c] sm:$0xf] }
  0x67   :  { %1020 = vmatpush.bf16.msra.mxu3 %v11521_v63  ;;  %v11573_v63 = vor.u32 %v16819_v54, %v11570_v55  ;;  %v11138_v25 = vld [vmem:[#allocation7 + $0x98] sm:$0xf0]  ;;  %v16743_v26 = vld [vmem:[#allocation7 + $0x18c] sm:$0xf] }
  0x68   :  { %982 = vmatpush.bf16.msra.mxu0 %v11121_v9  ;;  %v11173_v9 = vor.u32 %v16719_v60, %v11170_v61  ;;  %v11266_v28 = vld [vmem:[#allocation7 + $0x198] sm:$0xf0]  ;;  %v16775_v29 = vld [vmem:[#allocation7 + $0x28c] sm:$0xf] }
  0x69   :  { %995 = vmatpush.bf16.msra.mxu1 %v11249_v10  ;;  %v11301_v10 = vor.u32 %v16751_v62, %v11298_v0  ;;  %v11394_v30 = vld [vmem:[#allocation7 + $0x298] sm:$0xf0]  ;;  %v16807_v31 = vld [vmem:[#allocation7 + $0x38c] sm:$0xf]  ;;  %v11269_v34 = vor.u32 %v16743_v26, %v11266_v28 }
  0x6a   :  { %1008 = vmatpush.bf16.msra.mxu2 %v11377_v11  ;;  %v11429_v11 = vor.u32 %v16783_v3, %v11426_v4  ;;  %v11522_v32 = vld [vmem:[#allocation7 + $0x398] sm:$0xf0]  ;;  %v11397_v35 = vor.u32 %v16775_v29, %v11394_v30  ;;  %v16739_v38 = vld [vmem:[#allocation7 + $0x16c] sm:$0xf]  ;;  %v11672_v30 = vld [vmem:[#allocation7 + $0x4c0] sm:$0xf] }
  0x6b   :  { %1021 = vmatpush.bf16.msra.mxu3 %v11505_v15  ;;  %v11557_v15 = vor.u32 %v16815_v6, %v11554_v7  ;;  %v11525_v39 = vor.u32 %v16807_v31, %v11522_v32  ;;  %v11250_v40 = vld [vmem:[#allocation7 + $0x178] sm:$0xf0]  ;;  %v16803_v43 = vld [vmem:[#allocation7 + $0x36c] sm:$0xf]  ;;  %v16848_v31 = vld [vmem:[#allocation7 + $0x4cc] sm:$0xf0] }
  0x6c   :  { %983 = vmatpush.bf16.msra.mxu0 %v11105_v21  ;;  %v11157_v21 = vor.u32 %v16715_v12, %v11154_v13  ;;  %v11378_v42 = vld [vmem:[#allocation7 + $0x278] sm:$0xf0]  ;;  %v11253_v46 = vor.u32 %v16739_v38, %v11250_v40  ;;  %v16735_v50 = vld [vmem:[#allocation7 + $0x14c] sm:$0xf]  ;;  %v16876_v40 = vld [vmem:[#allocation7 + $0x5ac] sm:$0xf0] }
  0x6d   :  { %996 = vmatpush.bf16.msra.mxu1 %v11233_v22  ;;  %v11285_v22 = vor.u32 %v16747_v14, %v11282_v16  ;;  %v11506_v44 = vld [vmem:[#allocation7 + $0x378] sm:$0xf0]  ;;  %v16799_v55 = vld [vmem:[#allocation7 + $0x34c] sm:$0xf] }
  0x6e   :  { %1009 = vmatpush.bf16.msra.mxu2 %v11361_v23  ;;  %v11413_v23 = vor.u32 %v16779_v17, %v11410_v18  ;;  %v11106_v49 = vld [vmem:[#allocation7 + $0x58] sm:$0xf0]  ;;  %v11509_v51 = vor.u32 %v16803_v43, %v11506_v44  ;;  %v16699_v60 = vld [vmem:[#allocation7 + $0x2c] sm:$0xf]  ;;  %v16840_v43 = vld [vmem:[#allocation7 + $0x48c] sm:$0xf0] }
  0x6f   :  { %1022 = vmatpush.bf16.msra.mxu3 %v11489_v27  ;;  %v11541_v27 = vor.u32 %v16811_v19, %v11538_v20  ;;  %v11362_v54 = vld [vmem:[#allocation7 + $0x258] sm:$0xf0]  ;;  %v16731_v62 = vld [vmem:[#allocation7 + $0x12c] sm:$0xf] }
  0x70   :  { %984 = vmatpush.bf16.msra.mxu0 %v11089_v33  ;;  %v11141_v33 = vor.u32 %v16711_v24, %v11138_v25  ;;  %v11090_v61 = vld [vmem:[#allocation7 + $0x38] sm:$0xf0]  ;;  %v16763_v3 = vld [vmem:[#allocation7 + $0x22c] sm:$0xf]  ;;  %v11816_v24 = vld [vmem:[#allocation7 + $0x5e0] sm:$0xf] }
  0x71   :  { %997 = vmatpush.bf16.msra.mxu1 %v11217_v36  ;;  %v16707_v36 = vld [vmem:[#allocation7 + $0x6c] sm:$0xf]  ;;  %v11218_v0 = vld [vmem:[#allocation7 + $0x138] sm:$0xf0]  ;;  %v16884_v25 = vld [vmem:[#allocation7 + $0x5ec] sm:$0xf0] }
  0x72   :  { %1010 = vmatpush.bf16.msra.mxu2 %v11345_v37  ;;  %v11122_v37 = vld [vmem:[#allocation7 + $0x78] sm:$0xf0]  ;;  %v16795_v6 = vld [vmem:[#allocation7 + $0x32c] sm:$0xf]  ;;  %v11817_v32 = vor.u32 %v16884_v25, %v11816_v24  ;;  %v16908_v24 = vld [vmem:[#allocation7 + $0x6ac] sm:$0xf0] }
  0x73   :  { %1023 = vmatpush.bf16.msra.mxu3 %v11473_v41  ;;  %v16771_v41 = vld [vmem:[#allocation7 + $0x26c] sm:$0xf]  ;;  %v11125_v45 = vor.u32 %v16707_v36, %v11122_v37  ;;  %v11346_v4 = vld [vmem:[#allocation7 + $0x238] sm:$0xf0]  ;;  %v11656_v36 = vld [vmem:[#allocation7 + $0x4a0] sm:$0xf] }
  0x74   :  { %985 = vmatpush.bf16.msra.mxu0 %v11073_v48  ;;  %v11381_v47 = vor.u32 %v16771_v41, %v11378_v42  ;;  %v16703_v48 = vld [vmem:[#allocation7 + $0x4c] sm:$0xf]  ;;  %v11474_v7 = vld [vmem:[#allocation7 + $0x338] sm:$0xf0]  ;;  %v11349_v12 = vor.u32 %v16763_v3, %v11346_v4  ;;  %v16844_v37 = vld [vmem:[#allocation7 + $0x4ac] sm:$0xf0] }
  0x75   :  { %998 = vmatpush.bf16.msra.mxu1 %v11201_v52  ;;  %v11234_v52 = vld [vmem:[#allocation7 + $0x158] sm:$0xf0]  ;;  %v16727_v14 = vld [vmem:[#allocation7 + $0x10c] sm:$0xf]  ;;  %v11477_v16 = vor.u32 %v16795_v6, %v11474_v7  ;;  %v11657_v41 = vor.u32 %v16844_v37, %v11656_v36  ;;  %v11640_v42 = vld [vmem:[#allocation7 + $0x480] sm:$0xf] }
  0x76   :  { %1011 = vmatpush.bf16.msra.mxu2 %v11329_v53  ;;  %v16767_v53 = vld [vmem:[#allocation7 + $0x24c] sm:$0xf]  ;;  %v11074_v13 = vld [vmem:[#allocation7 + $0x18] sm:$0xf0]  ;;  %v16824_v3 = vld [vmem:[#allocation7 + $0x40c] sm:$0xf0] }
  0x77   :  { %1024 = vmatpush.bf16.msra.mxu3 %v11457_v56  ;;  %986 = vmatmul.bf16.vlgmr.msra.gmra.mxu0 %v18321_v2  ;;  %v11490_v56 = vld [vmem:[#allocation7 + $0x358] sm:$0xf0]  ;;  %v16759_v17 = vld [vmem:[#allocation7 + $0x20c] sm:$0xf]  ;;  %v16850_v6 = vld [vmem:[#allocation7 + $0x4e4] sm:$0xf] }
  0x78   :  { %1030 = vmatpush.bf16.msrb.mxu0 %v11189_v57  ;;  %999 = vmatmul.bf16.vlgmr.msra.gmra.mxu1 %v18325_v8  ;;  %v11109_v57 = vor.u32 %v16703_v48, %v11106_v49  ;;  %v11330_v18 = vld [vmem:[#allocation7 + $0x218] sm:$0xf0]  ;;  %v16791_v19 = vld [vmem:[#allocation7 + $0x30c] sm:$0xf]  ;;  %v16836_v48 = vld [vmem:[#allocation7 + $0x46c] sm:$0xf0] }
  0x79   :  { %1043 = vmatpush.bf16.msrb.mxu1 %v11317_v58  ;;  %1012 = vmatmul.bf16.vlgmr.msra.gmra.mxu2 %v18319_v1  ;;  %v11237_v58 = vor.u32 %v16735_v50, %v11234_v52  ;;  %v11458_v20 = vld [vmem:[#allocation7 + $0x318] sm:$0xf0]  ;;  %v11752_v49 = vld [vmem:[#allocation7 + $0x560] sm:$0xf]  ;;  %v11690_v7 = vld [vmem:[#allocation7 + $0x4f0] sm:$0xf0] }
  0x7a   :  { %1056 = vmatpush.bf16.msrb.mxu2 %v11445_v59  ;;  %1025 = vmatmul.bf16.vlgmr.msra.gmra.mxu3 %v18323_v5  ;;  %v11365_v59 = vor.u32 %v16767_v53, %v11362_v54  ;;  %v11461_v28 = vor.u32 %v16791_v19, %v11458_v20  ;;  %v11736_v53 = vld [vmem:[#allocation7 + $0x540] sm:$0xf]  ;;  %v16864_v54 = vld [vmem:[#allocation7 + $0x54c] sm:$0xf0]  ;;  %v16846_v19 = vld [vmem:[#allocation7 + $0x4c4] sm:$0xf] }
  0x7b   :  { %1069 = vmatpush.bf16.msrb.mxu3 %v11573_v63  ;;  %v11493_v63 = vor.u32 %v16799_v55, %v11490_v56  ;;  %v11592_v56 = vld [vmem:[#allocation7 + $0x420] sm:$0xf]  ;;  %v16878_v25 = vld [vmem:[#allocation7 + $0x5c4] sm:$0xf] }
  0x7c   :  { %1031 = vmatpush.bf16.msrb.mxu0 %v11173_v9  ;;  %v11093_v9 = vor.u32 %v16699_v60, %v11090_v61  ;;  %v16860_v60 = vld [vmem:[#allocation7 + $0x52c] sm:$0xf0]  ;;  %v11944_v61 = vld [vmem:[#allocation7 + $0x6e0] sm:$0xf] }
  0x7d   :  { %1044 = vmatpush.bf16.msrb.mxu1 %v11301_v10  ;;  %v16695_v10 = vld [vmem:[#allocation7 + $0xc] sm:$0xf] }
  0x7e   :  { %1057 = vmatpush.bf16.msrb.mxu2 %v11429_v11  ;;  %v11221_v11 = vor.u32 %v16731_v62, %v11218_v0  ;;  %v16916_v62 = vld [vmem:[#allocation7 + $0x6ec] sm:$0xf0]  ;;  %v11576_v0 = vld [vmem:[#allocation7 + $0x400] sm:$0xf] }
  0x7f   :  { %1070 = vmatpush.bf16.msrb.mxu3 %v11557_v15  ;;  %v11202_v15 = vld [vmem:[#allocation7 + $0x118] sm:$0xf0]  ;;  %v11945_v4 = vor.u32 %v16916_v62, %v11944_v61  ;;  %v11738_v61 = vld [vmem:[#allocation7 + $0x550] sm:$0xf0]  ;;  %v11848_v62 = vld [vmem:[#allocation7 + $0x620] sm:$0xf] }
  0x80   :  { %1032 = vmatpush.bf16.msrb.mxu0 %v11157_v21  ;;  %v11688_v21 = vld [vmem:[#allocation7 + $0x4e0] sm:$0xf]  ;;  %v11205_v26 = vor.u32 %v16727_v14, %v11202_v15  ;;  %v16882_v14 = vld [vmem:[#allocation7 + $0x5e4] sm:$0xf]  ;;  %v11818_v15 = vld [vmem:[#allocation7 + $0x5f0] sm:$0xf0] }
  0x81   :  { %1045 = vmatpush.bf16.msrb.mxu1 %v11285_v22  ;;  %v16852_v22 = vld [vmem:[#allocation7 + $0x4ec] sm:$0xf0] }
  0x82   :  { %1058 = vmatpush.bf16.msrb.mxu2 %v11413_v23  ;;  %v11077_v23 = vor.u32 %v16695_v10, %v11074_v13  ;;  %v11689_v29 = vor.u32 %v16852_v22, %v11688_v21  ;;  %v11704_v10 = vld [vmem:[#allocation7 + $0x500] sm:$0xf]  ;;  %v16912_v13 = vld [vmem:[#allocation7 + $0x6cc] sm:$0xf0]  ;;  %v11674_v21 = vld [vmem:[#allocation7 + $0x4d0] sm:$0xf0]  ;;  %v11821_v22 = vor.u32 %v16882_v14, %v11818_v15 }
  0x83   :  { %1071 = vmatpush.bf16.msrb.mxu3 %v11541_v27  ;;  %v11333_v27 = vor.u32 %v16759_v17, %v11330_v18  ;;  %v11577_v17 = vor.u32 %v16824_v3, %v11576_v0  ;;  %v11693_v18 = vor.u32 %v16850_v6, %v11690_v7  ;;  %v16826_v7 = vld [vmem:[#allocation7 + $0x424] sm:$0xf]  ;;  %v11722_v15 = vld [vmem:[#allocation7 + $0x530] sm:$0xf0] }
  0x84   :  { %1033 = vmatpush.bf16.msrb.mxu0 %v11141_v33  ;;  %v11800_v33 = vld [vmem:[#allocation7 + $0x5c0] sm:$0xf]  ;;  %v16858_v14 = vld [vmem:[#allocation7 + $0x524] sm:$0xf] }
  0x85   :  { %1046 = vmatpush.bf16.msrb.mxu1 %v11269_v34  ;;  %v16880_v34 = vld [vmem:[#allocation7 + $0x5cc] sm:$0xf0] }
  0x86   :  { %1059 = vmatpush.bf16.msrb.mxu2 %v11397_v35  ;;  %v11673_v35 = vor.u32 %v16848_v31, %v11672_v30  ;;  %v11801_v38 = vor.u32 %v16880_v34, %v11800_v33  ;;  %v11658_v30 = vld [vmem:[#allocation7 + $0x4b0] sm:$0xf0]  ;;  %v16904_v33 = vld [vmem:[#allocation7 + $0x68c] sm:$0xf0]  ;;  %v16874_v34 = vld [vmem:[#allocation7 + $0x5a4] sm:$0xf] }
  0x87   :  { %1072 = vmatpush.bf16.msrb.mxu3 %v11525_v39  ;;  %v11784_v39 = vld [vmem:[#allocation7 + $0x5a0] sm:$0xf] }
  0x88   :  { %1034 = vmatpush.bf16.msrb.mxu0 %v11125_v45  ;;  %v11785_v44 = vor.u32 %v16876_v40, %v11784_v39  ;;  %v11768_v45 = vld [vmem:[#allocation7 + $0x580] sm:$0xf]  ;;  %v11642_v39 = vld [vmem:[#allocation7 + $0x490] sm:$0xf0] }
  0x89   :  { %1047 = vmatpush.bf16.msrb.mxu1 %v11253_v46  ;;  %v11641_v46 = vor.u32 %v16840_v43, %v11640_v42  ;;  %v18343_v40 = vld [vmem:[#allocation8] sm:$0xf]  ;;  %v16900_v43 = vld [vmem:[#allocation7 + $0x66c] sm:$0xf0] }
  0x8a   :  { %1060 = vmatpush.bf16.msrb.mxu2 %v11381_v47  ;;  %v11624_v47 = vld [vmem:[#allocation7 + $0x460] sm:$0xf] }
  0x8b   :  { %1073 = vmatpush.bf16.msrb.mxu3 %v11509_v51  ;;  %v11625_v50 = vor.u32 %v16836_v48, %v11624_v47  ;;  %v11608_v51 = vld [vmem:[#allocation7 + $0x440] sm:$0xf]  ;;  %v226_v47 = vperm.slane %v18343_v40, 0  ;;  %v16834_v48 = vld [vmem:[#allocation7 + $0x464] sm:$0xf] }
  0x8c   :  { %1035 = vmatpush.bf16.msrb.mxu0 %v11109_v57  ;;  %v16828_v57 = vld [vmem:[#allocation7 + $0x42c] sm:$0xf0]  ;;  %v11880_v42 = vld [vmem:[#allocation7 + $0x660] sm:$0xf] }
  0x8d   :  { %1048 = vmatpush.bf16.msrb.mxu1 %v11237_v58  ;;  %v11737_v58 = vor.u32 %v16864_v54, %v11736_v53 }
  0x8e   :  { %1061 = vmatpush.bf16.msrb.mxu2 %v11365_v59  ;;  %v11720_v59 = vld [vmem:[#allocation7 + $0x520] sm:$0xf] }
  0x8f   :  { %1074 = vmatpush.bf16.msrb.mxu3 %v11493_v63  ;;  %v11593_v63 = vor.u32 %v16828_v57, %v11592_v56  ;;  %v16830_v57 = vld [vmem:[#allocation7 + $0x444] sm:$0xf] }
  0x90   :  { %1036 = vmatpush.bf16.msrb.mxu0 %v11093_v9  ;;  %v11721_v9 = vor.u32 %v16860_v60, %v11720_v59  ;;  %v16862_v60 = vld [vmem:[#allocation7 + $0x544] sm:$0xf] }
  0x91   :  { %1049 = vmatpush.bf16.msrb.mxu1 %v11221_v11  ;;  %v16856_v11 = vld [vmem:[#allocation7 + $0x50c] sm:$0xf0] }
  0x92   :  { %1062 = vmatpush.bf16.msrb.mxu2 %v11349_v12  ;;  %v11928_v12 = vld [vmem:[#allocation7 + $0x6c0] sm:$0xf]  ;;  %v11705_v20 = vor.u32 %v16856_v11, %v11704_v10  ;;  %v11594_v10 = vld [vmem:[#allocation7 + $0x430] sm:$0xf0]  ;;  %v11741_v11 = vor.u32 %v16862_v60, %v11738_v61 }
  0x93   :  { %1075 = vmatpush.bf16.msrb.mxu3 %v11477_v16  ;;  %v11929_v16 = vor.u32 %v16912_v13, %v11928_v12  ;;  %v11832_v12 = vld [vmem:[#allocation7 + $0x600] sm:$0xf]  ;;  %v16888_v13 = vld [vmem:[#allocation7 + $0x60c] sm:$0xf0] }
  0x94   :  { %1037 = vmatpush.bf16.msrb.mxu0 %v11077_v23  ;;  %v11912_v23 = vld [vmem:[#allocation7 + $0x6a0] sm:$0xf] }
  0x95   :  { %1050 = vmatpush.bf16.msrb.mxu1 %v11205_v26  ;;  %v11802_v26 = vld [vmem:[#allocation7 + $0x5d0] sm:$0xf0] }
  0x96   :  { %1063 = vmatpush.bf16.msrb.mxu2 %v11333_v27  ;;  %v11913_v27 = vor.u32 %v16908_v24, %v11912_v23  ;;  %v11805_v31 = vor.u32 %v16878_v25, %v11802_v26  ;;  %v11597_v24 = vor.u32 %v16826_v7, %v11594_v10  ;;  %v11696_v25 = vld [vmem:[#allocation7 + $0x4e8] sm:$0xf]  ;;  %v16853_v26 = vld [vmem:[#allocation7 + $0x4f4] sm:$0xf0]  ;;  %v11882_v7 = vld [vmem:[#allocation7 + $0x670] sm:$0xf0] }
  0x97   :  { %1076 = vmatpush.bf16.msrb.mxu3 %v11461_v28  ;;  %1038 = vmatmul.bf16.vlgmr.msrb.gmra.mxu0 %v18321_v2  ;;  %v16872_v2 = vld [vmem:[#allocation7 + $0x58c] sm:$0xf0]  ;;  %v11677_v28 = vor.u32 %v16846_v19, %v11674_v21  ;;  %v11578_v19 = vld [vmem:[#allocation7 + $0x410] sm:$0xf0] }
  0x98   :  { %1866 = vmatpush.bf16.msra.mxu0 %v11689_v29  ;;  %1051 = vmatmul.bf16.vlgmr.msrb.gmra.mxu1 %v18325_v8  ;;  %v11769_v8 = vor.u32 %v16872_v2, %v11768_v45  ;;  %v16842_v29 = vld [vmem:[#allocation7 + $0x4a4] sm:$0xf]  ;;  %v11770_v45 = vld [vmem:[#allocation7 + $0x590] sm:$0xf0]  ;;  %v11881_v2 = vor.u32 %v16900_v43, %v11880_v42  ;;  %v16948_v21 = vld [vmem:[#allocation7 + $0x7ec] sm:$0xf0] }
  0x99   :  { %1879 = vmatpush.bf16.msra.mxu1 %v11817_v32  ;;  %1064 = vmatmul.bf16.vlgmr.msrb.gmra.mxu2 %v18319_v1  ;;  %v16868_v1 = vld [vmem:[#allocation7 + $0x56c] sm:$0xf0]  ;;  %v11896_v32 = vld [vmem:[#allocation7 + $0x680] sm:$0xf]  ;;  %v11661_v37 = vor.u32 %v16842_v29, %v11658_v30  ;;  %v11946_v29 = vld [vmem:[#allocation7 + $0x6f0] sm:$0xf0] }
  0x9a   :  { %1077 = vmatmul.bf16.vlgmr.msrb.gmra.mxu3 %v18323_v5  ;;  %v16832_v5 = vld [vmem:[#allocation7 + $0x44c] sm:$0xf0]  ;;  %v11753_v52 = vor.u32 %v16868_v1, %v11752_v49  ;;  %1892 = vmatpush.bf16.msra.mxu2 %v11945_v4  ;;  %v11897_v36 = vor.u32 %v16904_v33, %v11896_v32  ;;  %v16866_v1 = vld [vmem:[#allocation7 + $0x564] sm:$0xf]  ;;  %v11706_v33 = vld [vmem:[#allocation7 + $0x510] sm:$0xf0] }
  0x9b   :  { %v11609_v55 = vor.u32 %v16832_v5, %v11608_v51  ;;  %v11864_v51 = vld [vmem:[#allocation7 + $0x640] sm:$0xf]  ;;  %v16896_v5 = vld [vmem:[#allocation7 + $0x64c] sm:$0xf0]  ;;  %v16854_v32 = vld [vmem:[#allocation7 + $0x504] sm:$0xf] }
  0x9c   :  { %1867 = vmatpush.bf16.msra.mxu0 %v11673_v35  ;;  %v11786_v35 = vld [vmem:[#allocation7 + $0x5b0] sm:$0xf0] }
  0x9d   :  { %1880 = vmatpush.bf16.msra.mxu1 %v11801_v38  ;;  %v16838_v38 = vld [vmem:[#allocation7 + $0x484] sm:$0xf] }
  0x9e   :  { %1893 = vmatpush.bf16.msra.mxu2 %v11929_v16  ;;  %v11833_v16 = vor.u32 %v16888_v13, %v11832_v12  ;;  %v11632_v12 = vld [vmem:[#allocation7 + $0x468] sm:$0xf]  ;;  %v16837_v13 = vld [vmem:[#allocation7 + $0x474] sm:$0xf0] }
  0xa0   :  { %1868 = vmatpush.bf16.msra.mxu0 %v11657_v41  ;;  %v11789_v41 = vor.u32 %v16874_v34, %v11786_v35  ;;  %v12056_v35 = vld [vmem:[#allocation7 + $0x7c0] sm:$0xf] }
  0xa1   :  { %1881 = vmatpush.bf16.msra.mxu1 %v11785_v44  ;;  %v16870_v44 = vld [vmem:[#allocation7 + $0x584] sm:$0xf] }
  0xa2   :  { %1894 = vmatpush.bf16.msra.mxu2 %v11913_v27  ;;  %v11773_v49 = vor.u32 %v16870_v44, %v11770_v45  ;;  %v11697_v45 = vor.u32 %v16853_v26, %v11696_v25  ;;  %v11616_v25 = vld [vmem:[#allocation7 + $0x448] sm:$0xf]  ;;  %v16833_v26 = vld [vmem:[#allocation7 + $0x454] sm:$0xf0] }
  0xa4   :  { %1869 = vmatpush.bf16.msra.mxu0 %v11641_v46  ;;  %v11645_v46 = vor.u32 %v16838_v38, %v11642_v39  ;;  %v16910_v38 = vld [vmem:[#allocation7 + $0x6c4] sm:$0xf]  ;;  %v11930_v39 = vld [vmem:[#allocation7 + $0x6d0] sm:$0xf0] }
  0xa5   :  { %1882 = vmatpush.bf16.msra.mxu1 %v11769_v8  ;;  %v11626_v8 = vld [vmem:[#allocation7 + $0x470] sm:$0xf0]  ;;  %v11933_v42 = vor.u32 %v16910_v38, %v11930_v39  ;;  %v16885_v38 = vld [vmem:[#allocation7 + $0x5f4] sm:$0xf0] }
  0xa6   :  { %1895 = vmatpush.bf16.msra.mxu2 %v11897_v36  ;;  %v11629_v54 = vor.u32 %v16834_v48, %v11626_v8  ;;  %v12040_v8 = vld [vmem:[#allocation7 + $0x7a0] sm:$0xf] }
  0xa8   :  { %1870 = vmatpush.bf16.msra.mxu0 %v11625_v50  ;;  %v11754_v50 = vld [vmem:[#allocation7 + $0x570] sm:$0xf0] }
  0xa9   :  { %1883 = vmatpush.bf16.msra.mxu1 %v11753_v52  ;;  %v11865_v52 = vor.u32 %v16896_v5, %v11864_v51  ;;  %v11757_v59 = vor.u32 %v16866_v1, %v11754_v50  ;;  %v16906_v1 = vld [vmem:[#allocation7 + $0x6a4] sm:$0xf]  ;;  %v11914_v51 = vld [vmem:[#allocation7 + $0x6b0] sm:$0xf0] }
  0xaa   :  { %1896 = vmatpush.bf16.msra.mxu2 %v11881_v2  ;;  %v11709_v2 = vor.u32 %v16854_v32, %v11706_v33  ;;  %v11850_v32 = vld [vmem:[#allocation7 + $0x630] sm:$0xf0] }
  0xac   :  { %1871 = vmatpush.bf16.msra.mxu0 %v11609_v55 }
  0xad   :  { %1884 = vmatpush.bf16.msra.mxu1 %v11737_v58  ;;  %v11610_v58 = vld [vmem:[#allocation7 + $0x450] sm:$0xf0] }
  0xae   :  { %1897 = vmatpush.bf16.msra.mxu2 %v11865_v52  ;;  %v11613_v6 = vor.u32 %v16830_v57, %v11610_v58  ;;  %v11664_v52 = vld [vmem:[#allocation7 + $0x4a8] sm:$0xf]  ;;  %v16902_v57 = vld [vmem:[#allocation7 + $0x684] sm:$0xf] }
  0xb0   :  { %1872 = vmatpush.bf16.msra.mxu0 %v11593_v63  ;;  %v16892_v63 = vld [vmem:[#allocation7 + $0x62c] sm:$0xf0] }
  0xb1   :  { %1885 = vmatpush.bf16.msra.mxu1 %v11721_v9  ;;  %v11849_v3 = vor.u32 %v16892_v63, %v11848_v62  ;;  %v11648_v62 = vld [vmem:[#allocation7 + $0x488] sm:$0xf]  ;;  %v16841_v63 = vld [vmem:[#allocation7 + $0x494] sm:$0xf0] }
  0xb3   :  { %1898 = vmatpush.bf16.msra.mxu2 %v11849_v3  ;;  %v16932_v3 = vld [vmem:[#allocation7 + $0x76c] sm:$0xf0] }
  0xb4   :  { %1873 = vmatpush.bf16.msra.mxu0 %v11577_v17 }
  0xb5   :  { %1886 = vmatpush.bf16.msra.mxu1 %v11705_v20  ;;  %v12072_v20 = vld [vmem:[#allocation7 + $0x7e0] sm:$0xf] }
  0xb7   :  { %v883_v53 = vpop.f32.mrf.mxu0  ;;  %1899 = vmatpush.bf16.msra.mxu2 %v11833_v16  ;;  %v16928_v16 = vld [vmem:[#allocation7 + $0x74c] sm:$0xf0] }
  0xb8   :  { %1918 = vmatpush.bf16.msrb.mxu0 %v11693_v18  ;;  %v884_v55 = vadd.f32 %v883_v53, %v226_v47  ;;  %v896_v56 = vpop.f32.mrf.mxu1  ;;  %v16822_v18 = vld [vmem:[#allocation7 + $0x404] sm:$0xf]  ;;  %v16849_v47 = vld [vmem:[#allocation7 + $0x4d4] sm:$0xf0] }
  0xb9   :  { %1931 = vmatpush.bf16.msrb.mxu1 %v11821_v22  ;;  %v16914_v22 = vld [vmem:[#allocation7 + $0x6e4] sm:$0xf]  ;;  %v11581_v43 = vor.u32 %v16822_v18, %v11578_v19  ;;  %v16845_v53 = vld [vmem:[#allocation7 + $0x4b4] sm:$0xf0] }
  0xba   :  { %v897_v0 = vadd.f32 %v896_v56, %v884_v55  ;;  %v11949_v34 = vor.u32 %v16914_v22, %v11946_v29  ;;  %v12024_v55 = vld [vmem:[#allocation7 + $0x780] sm:$0xf]  ;;  %v16936_v56 = vld [vmem:[#allocation7 + $0x78c] sm:$0xf0]  ;;  %v11665_v61 = vor.u32 %v16845_v53, %v11664_v52  ;;  %v11633_v22 = vor.u32 %v16837_v13, %v11632_v12  ;;  %v16890_v29 = vld [vmem:[#allocation7 + $0x624] sm:$0xf] }
  0xbb   :  { %v12025_v58 = vor.u32 %v16936_v56, %v12024_v55  ;;  %v11853_v39 = vor.u32 %v16890_v29, %v11850_v32  ;;  %v16946_v53 = vld [vmem:[#allocation7 + $0x7e4] sm:$0xf]  ;;  %v11584_v55 = vld [vmem:[#allocation7 + $0x408] sm:$0xf]  ;;  %v16825_v56 = vld [vmem:[#allocation7 + $0x414] sm:$0xf0] }
  0xbc   :  { %1919 = vmatpush.bf16.msrb.mxu0 %v11677_v28  ;;  %v909_v4 = vpop.f32.mrf.mxu2  ;;  %v12073_v28 = vor.u32 %v16948_v21, %v12072_v20  ;;  %1944 = vmatpush.bf16.msrb.mxu2 %v11949_v34  ;;  %v11866_v21 = vld [vmem:[#allocation7 + $0x650] sm:$0xf0]  ;;  %v16938_v13 = vld [vmem:[#allocation7 + $0x7a4] sm:$0xf]  ;;  %v11650_v29 = vld [vmem:[#allocation7 + $0x498] sm:$0xf0] }
  0xbd   :  { %1932 = vmatpush.bf16.msrb.mxu1 %v11805_v31  ;;  %v910_v9 = vadd.f32 %v909_v4, %v897_v0  ;;  %v11725_v31 = vor.u32 %v16858_v14, %v11722_v15  ;;  %v12008_v0 = vld [vmem:[#allocation7 + $0x760] sm:$0xf]  ;;  %v12010_v32 = vld [vmem:[#allocation7 + $0x770] sm:$0xf0] }
  0xbe   :  { %1905 = vmatpush.bf16.msra.mxu3 %v12073_v28  ;;  %v12009_v4 = vor.u32 %v16932_v3, %v12008_v0  ;;  %v11992_v15 = vld [vmem:[#allocation7 + $0x740] sm:$0xf]  ;;  %v16924_v28 = vld [vmem:[#allocation7 + $0x72c] sm:$0xf0]  ;;  %v11585_v0 = vor.u32 %v16825_v56, %v11584_v55  ;;  %v11792_v3 = vld [vmem:[#allocation7 + $0x5a8] sm:$0xf] }
  0xbf   :  { %v922_v17 = vpop.f32.mrf.mxu3  ;;  %v885_v27 = vpop.f32.mrf.mxu0  ;;  %v11993_v20 = vor.u32 %v16928_v16, %v11992_v15  ;;  %v11776_v15 = vld [vmem:[#allocation7 + $0x588] sm:$0xf]  ;;  %v16873_v16 = vld [vmem:[#allocation7 + $0x594] sm:$0xf0] }
  0xc0   :  { %1920 = vmatpush.bf16.msrb.mxu0 %v11661_v37  ;;  %v923_v23 = vadd.f32 %v922_v17, %v910_v9  ;;  %v898_v30 = vpop.f32.mrf.mxu1  ;;  %v16944_v37 = vld [vmem:[#allocation7 + $0x7cc] sm:$0xf0]  ;;  %1945 = vmatpush.bf16.msrb.mxu2 %v11933_v42  ;;  %v227_v9 = vperm.slane %v18343_v40, 1  ;;  %v16894_v17 = vld [vmem:[#allocation7 + $0x644] sm:$0xf] }
  0xc1   :  { %1933 = vmatpush.bf16.msrb.mxu1 %v11789_v41  ;;  %v12057_v41 = vor.u32 %v16944_v37, %v12056_v35  ;;  %v11976_v27 = vld [vmem:[#allocation7 + $0x720] sm:$0xf]  ;;  %v11617_v35 = vor.u32 %v16833_v26, %v11616_v25  ;;  %v11824_v37 = vld [vmem:[#allocation7 + $0x5e8] sm:$0xf]  ;;  %v16829_v42 = vld [vmem:[#allocation7 + $0x434] sm:$0xf0] }
  0xc2   :  { %v18346_v36 = vpack.c.bf16 %v923_v23, %v923_v23  ;;  %v11869_v23 = vor.u32 %v16894_v17, %v11866_v21  ;;  %v16843_v21 = vld [vmem:[#allocation7 + $0x4ac] sm:$0xf]  ;;  %v16869_v25 = vld [vmem:[#allocation7 + $0x574] sm:$0xf0]  ;;  %v11712_v55 = vld [vmem:[#allocation7 + $0x508] sm:$0xf] }
  0xc3   :  { %1906 = vmatpush.bf16.msra.mxu3 %v12057_v41  ;;  %v11600_v41 = vld [vmem:[#allocation7 + $0x428] sm:$0xf]  ;;  %v16857_v56 = vld [vmem:[#allocation7 + $0x514] sm:$0xf0] }
  0xc4   :  { %1921 = vmatpush.bf16.msrb.mxu0 %v11645_v46  ;;  %v911_v44 = vpop.f32.mrf.mxu2  ;;  %v11680_v46 = vld [vmem:[#allocation7 + $0x4c8] sm:$0xf] }
  0xc5   :  { %1934 = vmatpush.bf16.msrb.mxu1 %v11773_v49  ;;  %1874 = vmatmul.bf16.vlgmr.msra.gmra.mxu0 %v18346_v36  ;;  %v16940_v49 = vld [vmem:[#allocation7 + $0x7ac] sm:$0xf0]  ;;  %v11681_v5 = vor.u32 %v16849_v47, %v11680_v46  ;;  %v16886_v46 = vld [vmem:[#allocation7 + $0x604] sm:$0xf]  ;;  %v11825_v47 = vor.u32 %v16885_v38, %v11824_v37  ;;  %v228_v38 = vperm.slane %v18343_v40, 2 }
  0xc6   :  { %v12041_v50 = vor.u32 %v16940_v49, %v12040_v8 }
  0xc7   :  { %v924_v48 = vpop.f32.mrf.mxu3 }
  0xc8   :  { %1922 = vmatpush.bf16.msrb.mxu0 %v11629_v54  ;;  %v11917_v54 = vor.u32 %v16906_v1, %v11914_v51  ;;  %1907 = vmatpush.bf16.msra.mxu3 %v12041_v50  ;;  %v11808_v48 = vld [vmem:[#allocation7 + $0x5c8] sm:$0xf]  ;;  %v11834_v1 = vld [vmem:[#allocation7 + $0x610] sm:$0xf0]  ;;  %v11601_v51 = vor.u32 %v16829_v42, %v11600_v41  ;;  %v11634_v41 = vld [vmem:[#allocation7 + $0x478] sm:$0xf0] }
  0xc9   :  { %1935 = vmatpush.bf16.msrb.mxu1 %v11757_v59  ;;  %v11898_v59 = vld [vmem:[#allocation7 + $0x690] sm:$0xf0]  ;;  %v11837_v52 = vor.u32 %v16886_v46, %v11834_v1  ;;  %v16861_v46 = vld [vmem:[#allocation7 + $0x534] sm:$0xf0]  ;;  %v16831_v1 = vld [vmem:[#allocation7 + $0x44c] sm:$0xf] }
  0xca   :  { %1946 = vmatpush.bf16.msrb.mxu2 %v11917_v54  ;;  %v11901_v60 = vor.u32 %v16902_v57, %v11898_v59  ;;  %v12074_v54 = vld [vmem:[#allocation7 + $0x7f0] sm:$0xf0]  ;;  %v11698_v59 = vld [vmem:[#allocation7 + $0x4f8] sm:$0xf0] }
  0xcb   :  { %v12077_v57 = vor.u32 %v16946_v53, %v12074_v54  ;;  %v16922_v53 = vld [vmem:[#allocation7 + $0x724] sm:$0xf]  ;;  %v11978_v54 = vld [vmem:[#allocation7 + $0x730] sm:$0xf0] }
  0xcc   :  { %1923 = vmatpush.bf16.msrb.mxu0 %v11613_v6  ;;  %1908 = vmatpush.bf16.msra.mxu3 %v12025_v58  ;;  %v16898_v6 = vld [vmem:[#allocation7 + $0x664] sm:$0xf]  ;;  %v16851_v58 = vld [vmem:[#allocation7 + $0x4ec] sm:$0xf] }
  0xcd   :  { %1936 = vmatpush.bf16.msrb.mxu1 %v11741_v11  ;;  %v11885_v10 = vor.u32 %v16898_v6, %v11882_v7  ;;  %v11649_v11 = vor.u32 %v16841_v63, %v11648_v62  ;;  %v12058_v63 = vld [vmem:[#allocation7 + $0x7d0] sm:$0xf0] }
  0xce   :  { %1947 = vmatpush.bf16.msrb.mxu2 %v11901_v60  ;;  %v16942_v60 = vld [vmem:[#allocation7 + $0x7c4] sm:$0xf] }
  0xcf   :  { %v12061_v7 = vor.u32 %v16942_v60, %v12058_v63  ;;  %v11952_v60 = vld [vmem:[#allocation7 + $0x6e8] sm:$0xf] }
  0xd0   :  { %1924 = vmatpush.bf16.msrb.mxu0 %v11597_v24  ;;  %1909 = vmatpush.bf16.msra.mxu3 %v12009_v4  ;;  %v16877_v4 = vld [vmem:[#allocation7 + $0x5b4] sm:$0xf0] }
  0xd1   :  { %1937 = vmatpush.bf16.msrb.mxu1 %v11725_v31  ;;  %v11977_v31 = vor.u32 %v16924_v28, %v11976_v27  ;;  %v11793_v12 = vor.u32 %v16877_v4, %v11792_v3  ;;  %v16839_v28 = vld [vmem:[#allocation7 + $0x48c] sm:$0xf]  ;;  %v16917_v3 = vld [vmem:[#allocation7 + $0x6f4] sm:$0xf0] }
  0xd2   :  { %1948 = vmatpush.bf16.msrb.mxu2 %v11885_v10  ;;  %v16847_v10 = vld [vmem:[#allocation7 + $0x4cc] sm:$0xf]  ;;  %v11653_v37 = vor.u32 %v16839_v28, %v11650_v29 }
  0xd3   :  { %v16827_v4 = vld [vmem:[#allocation7 + $0x42c] sm:$0xf] }
  0xd4   :  { %1925 = vmatpush.bf16.msrb.mxu0 %v11581_v43  ;;  %v935_v14 = vpop.f32.mrf.mxu0  ;;  %1910 = vmatpush.bf16.msra.mxu3 %v11993_v20  ;;  %v12026_v20 = vld [vmem:[#allocation7 + $0x790] sm:$0xf0]  ;;  %v16875_v29 = vld [vmem:[#allocation7 + $0x5ac] sm:$0xf] }
  0xd5   :  { %1938 = vmatpush.bf16.msrb.mxu1 %v11709_v2  ;;  %v936_v18 = vadd.f32 %v935_v14, %v227_v9  ;;  %v948_v19 = vpop.f32.mrf.mxu1  ;;  %v16920_v2 = vld [vmem:[#allocation7 + $0x70c] sm:$0xf0]  ;;  %v11701_v9 = vor.u32 %v16851_v58, %v11698_v59  ;;  %v12042_v14 = vld [vmem:[#allocation7 + $0x7b0] sm:$0xf0] }
  0xd6   :  { %1949 = vmatpush.bf16.msrb.mxu2 %v11869_v23  ;;  %v12045_v17 = vor.u32 %v16938_v13, %v12042_v14  ;;  %v11777_v23 = vor.u32 %v16873_v16, %v11776_v15  ;;  %v11953_v14 = vor.u32 %v16917_v3, %v11952_v60  ;;  %v16889_v3 = vld [vmem:[#allocation7 + $0x614] sm:$0xf0] }
  0xd7   :  { %1926 = vmatmul.bf16.vlgmr.msrb.gmra.mxu0 %v18346_v36  ;;  %v949_v24 = vadd.f32 %v948_v19, %v936_v18  ;;  %v16934_v19 = vld [vmem:[#allocation7 + $0x784] sm:$0xf] }
  0xd8   :  { %1970 = vmatpush.bf16.msra.mxu0 %v11697_v45  ;;  %1911 = vmatpush.bf16.msra.mxu3 %v11977_v31  ;;  %v11960_v45 = vld [vmem:[#allocation7 + $0x700] sm:$0xf]  ;;  %v12029_v26 = vor.u32 %v16934_v19, %v12026_v20  ;;  %v16930_v31 = vld [vmem:[#allocation7 + $0x764] sm:$0xf]  ;;  %v11810_v19 = vld [vmem:[#allocation7 + $0x5d8] sm:$0xf0] }
  0xd9   :  { %v11961_v49 = vor.u32 %v16920_v2, %v11960_v45  ;;  %v11728_v2 = vld [vmem:[#allocation7 + $0x528] sm:$0xf] }
  0xda   :  { %1950 = vmatpush.bf16.msrb.mxu2 %v11853_v39  ;;  %v16835_v39 = vld [vmem:[#allocation7 + $0x46c] sm:$0xf] }
  0xdc   :  { %1971 = vmatpush.bf16.msra.mxu0 %v11681_v5  ;;  %v961_v30 = vpop.f32.mrf.mxu2  ;;  %v937_v44 = vpop.f32.mrf.mxu0  ;;  %v16881_v5 = vld [vmem:[#allocation7 + $0x5d4] sm:$0xf0]  ;;  %1912 = vmatpush.bf16.msra.mxu3 %v11961_v49  ;;  %v11637_v49 = vor.u32 %v16835_v39, %v11634_v41  ;;  %v11904_v39 = vld [vmem:[#allocation7 + $0x688] sm:$0xf] }
  0xdd   :  { %v962_v33 = vadd.f32 %v961_v30, %v949_v24  ;;  %v974_v34 = vpop.f32.mrf.mxu3  ;;  %v950_v8 = vpop.f32.mrf.mxu1  ;;  %v11760_v24 = vld [vmem:[#allocation7 + $0x568] sm:$0xf]  ;;  %v11994_v44 = vld [vmem:[#allocation7 + $0x750] sm:$0xf0]  ;;  %v16905_v41 = vld [vmem:[#allocation7 + $0x694] sm:$0xf0] }
  0xde   :  { %1951 = vmatpush.bf16.msrb.mxu2 %v11837_v52  ;;  %v11761_v30 = vor.u32 %v16869_v25, %v11760_v24  ;;  %v11729_v52 = vor.u32 %v16861_v46, %v11728_v2  ;;  %v11888_v2 = vld [vmem:[#allocation7 + $0x668] sm:$0xf]  ;;  %v16901_v46 = vld [vmem:[#allocation7 + $0x674] sm:$0xf0] }
  0xdf   :  { %v975_v43 = vadd.f32 %v974_v34, %v962_v33  ;;  %v11744_v33 = vld [vmem:[#allocation7 + $0x548] sm:$0xf]  ;;  %v16865_v34 = vld [vmem:[#allocation7 + $0x554] sm:$0xf0] }
  0xe0   :  { %1972 = vmatpush.bf16.msra.mxu0 %v11665_v61  ;;  %v11809_v61 = vor.u32 %v16881_v5, %v11808_v48  ;;  %1957 = vmatpush.bf16.msrb.mxu3 %v12077_v57  ;;  %v11745_v42 = vor.u32 %v16865_v34, %v11744_v33  ;;  %v11981_v57 = vor.u32 %v16922_v53, %v11978_v54  ;;  %v16909_v33 = vld [vmem:[#allocation7 + $0x6b4] sm:$0xf0] }
  0xe1   :  { %v18351_v50 = vpack.c.bf16 %v975_v43, %v975_v43  ;;  %v16926_v43 = vld [vmem:[#allocation7 + $0x744] sm:$0xf] }
  0xe3   :  { %1887 = vmatmul.bf16.vlgmr.msra.gmra.mxu1 %v18351_v50 }
  0xe4   :  { %1973 = vmatpush.bf16.msra.mxu0 %v11649_v11  ;;  %1983 = vmatpush.bf16.msra.mxu1 %v11825_v47  ;;  %v963_v62 = vpop.f32.mrf.mxu2  ;;  %v11682_v11 = vld [vmem:[#allocation7 + $0x4d8] sm:$0xf0]  ;;  %v11997_v47 = vor.u32 %v16926_v43, %v11994_v44  ;;  %v11905_v43 = vor.u32 %v16905_v41, %v11904_v39  ;;  %v16867_v44 = vld [vmem:[#allocation7 + $0x56c] sm:$0xf]  ;;  %v12032_v39 = vld [vmem:[#allocation7 + $0x788] sm:$0xf] }
  0xe5   :  { %v976_v6 = vpop.f32.mrf.mxu3  ;;  %1958 = vmatpush.bf16.msrb.mxu3 %v12061_v7  ;;  %v11685_v18 = vor.u32 %v16847_v10, %v11682_v11  ;;  %v11826_v62 = vld [vmem:[#allocation7 + $0x5f8] sm:$0xf0]  ;;  %v11713_v7 = vor.u32 %v16857_v56, %v11712_v55  ;;  %v11962_v10 = vld [vmem:[#allocation7 + $0x710] sm:$0xf0]  ;;  %v16859_v56 = vld [vmem:[#allocation7 + $0x52c] sm:$0xf] }
  0xe6   :  { %v11602_v6 = vld [vmem:[#allocation7 + $0x438] sm:$0xf0]  ;;  %v16937_v41 = vld [vmem:[#allocation7 + $0x794] sm:$0xf0] }
  0xe7   :  { %v11605_v15 = vor.u32 %v16827_v4, %v11602_v6  ;;  %v16915_v6 = vld [vmem:[#allocation7 + $0x6ec] sm:$0xf] }
  0xe8   :  { %1974 = vmatpush.bf16.msra.mxu0 %v11633_v22  ;;  %1984 = vmatpush.bf16.msra.mxu1 %v11809_v61  ;;  %v11666_v22 = vld [vmem:[#allocation7 + $0x4b8] sm:$0xf0]  ;;  %v16883_v61 = vld [vmem:[#allocation7 + $0x5ec] sm:$0xf] }
  0xe9   :  { %1959 = vmatpush.bf16.msrb.mxu3 %v12045_v17  ;;  %v11669_v27 = vor.u32 %v16843_v21, %v11666_v22  ;;  %v11936_v17 = vld [vmem:[#allocation7 + $0x6c8] sm:$0xf]  ;;  %v16913_v21 = vld [vmem:[#allocation7 + $0x6d4] sm:$0xf0]  ;;  %v16823_v22 = vld [vmem:[#allocation7 + $0x40c] sm:$0xf] }
  0xec   :  { %1975 = vmatpush.bf16.msra.mxu0 %v11617_v35  ;;  %1985 = vmatpush.bf16.msra.mxu1 %v11793_v12  ;;  %v12013_v35 = vor.u32 %v16930_v31, %v12010_v32  ;;  %v11829_v12 = vor.u32 %v16883_v61, %v11826_v62  ;;  %v11920_v32 = vld [vmem:[#allocation7 + $0x6a8] sm:$0xf]  ;;  %v16855_v62 = vld [vmem:[#allocation7 + $0x50c] sm:$0xf] }
  0xed   :  { %1960 = vmatpush.bf16.msrb.mxu3 %v12029_v26  ;;  %v11937_v26 = vor.u32 %v16913_v21, %v11936_v17  ;;  %v16911_v21 = vld [vmem:[#allocation7 + $0x6cc] sm:$0xf] }
  0xf0   :  { %1976 = vmatpush.bf16.msra.mxu0 %v11601_v51  ;;  %1986 = vmatpush.bf16.msra.mxu1 %v11777_v23  ;;  %v11618_v51 = vld [vmem:[#allocation7 + $0x458] sm:$0xf0] }
  0xf1   :  { %1961 = vmatpush.bf16.msrb.mxu3 %v12013_v35  ;;  %v11621_v59 = vor.u32 %v16831_v1, %v11618_v51  ;;  %v11586_v23 = vld [vmem:[#allocation7 + $0x418] sm:$0xf0]  ;;  %v11921_v35 = vor.u32 %v16909_v33, %v11920_v32  ;;  %v11872_v51 = vld [vmem:[#allocation7 + $0x648] sm:$0xf]  ;;  %v16941_v33 = vld [vmem:[#allocation7 + $0x7b4] sm:$0xf0] }
  0xf2   :  { %v11746_v1 = vld [vmem:[#allocation7 + $0x558] sm:$0xf0]  ;;  %v12048_v32 = vld [vmem:[#allocation7 + $0x7a8] sm:$0xf] }
  0xf3   :  { %1939 = vmatmul.bf16.vlgmr.msrb.gmra.mxu1 %v18351_v50 }
  0xf4   :  { %1977 = vmatpush.bf16.msra.mxu0 %v11585_v0  ;;  %1987 = vmatpush.bf16.msra.mxu1 %v11761_v30  ;;  %v987_v45 = vpop.f32.mrf.mxu0  ;;  %v11794_v30 = vld [vmem:[#allocation7 + $0x5b8] sm:$0xf0] }
  0xf5   :  { %v988_v48 = vadd.f32 %v987_v45, %v228_v38  ;;  %v1000_v8 = vpop.f32.mrf.mxu1  ;;  %1962 = vmatpush.bf16.msrb.mxu3 %v11997_v47  ;;  %v11797_v34 = vor.u32 %v16875_v29, %v11794_v30  ;;  %v11778_v38 = vld [vmem:[#allocation7 + $0x598] sm:$0xf0]  ;;  %v16907_v29 = vld [vmem:[#allocation7 + $0x6ac] sm:$0xf] }
  0xf6   :  { %v11762_v45 = vld [vmem:[#allocation7 + $0x578] sm:$0xf0] }
  0xf7   :  { %1978 = vmatmul.bf16.vlgmr.msra.gmra.mxu0 %v18346_v36  ;;  %v1001_v5 = vadd.f32 %v1000_v8, %v988_v48  ;;  %v11765_v47 = vor.u32 %v16867_v44, %v11762_v45  ;;  %v229_v48 = vperm.slane %v18343_v40, 3  ;;  %v11889_v8 = vor.u32 %v16901_v46, %v11888_v2  ;;  %v11922_v30 = vld [vmem:[#allocation7 + $0x6b8] sm:$0xf0]  ;;  %v12016_v45 = vld [vmem:[#allocation7 + $0x768] sm:$0xf] }
  0xf8   :  { %2022 = vmatpush.bf16.msrb.mxu0 %v11701_v9  ;;  %1988 = vmatpush.bf16.msra.mxu1 %v11745_v42  ;;  %v16918_v9 = vld [vmem:[#allocation7 + $0x704] sm:$0xf]  ;;  %v11890_v44 = vld [vmem:[#allocation7 + $0x678] sm:$0xf0]  ;;  %v16933_v2 = vld [vmem:[#allocation7 + $0x774] sm:$0xf0] }
  0xf9   :  { %1963 = vmatpush.bf16.msrb.mxu3 %v11981_v57  ;;  %v11965_v24 = vor.u32 %v16918_v9, %v11962_v10  ;;  %v11730_v57 = vld [vmem:[#allocation7 + $0x538] sm:$0xf0] }
  0xfa   :  { %v11733_v40 = vor.u32 %v16859_v56, %v11730_v57  ;;  %v16887_v57 = vld [vmem:[#allocation7 + $0x60c] sm:$0xf] }
  0xfc   :  { %2023 = vmatpush.bf16.msrb.mxu0 %v11685_v18  ;;  %v1013_v58 = vpop.f32.mrf.mxu2  ;;  %1989 = vmatpush.bf16.msra.mxu1 %v11729_v52  ;;  %v989_v13 = vpop.f32.mrf.mxu0  ;;  %v16879_v18 = vld [vmem:[#allocation7 + $0x5cc] sm:$0xf] }
  0xfd   :  { %v1014_v63 = vadd.f32 %v1013_v58, %v1001_v5  ;;  %v1026_v0 = vpop.f32.mrf.mxu3  ;;  %v1002_v16 = vpop.f32.mrf.mxu1  ;;  %v11813_v25 = vor.u32 %v16879_v18, %v11810_v19  ;;  %1964 = vmatpush.bf16.msrb.mxu3 %v11965_v24  ;;  %v16897_v5 = vld [vmem:[#allocation7 + $0x654] sm:$0xf0]  ;;  %v11856_v58 = vld [vmem:[#allocation7 + $0x628] sm:$0xf] }
  0xfe   :  { %v11873_v55 = vor.u32 %v16897_v5, %v11872_v51  ;;  %v12080_v13 = vld [vmem:[#allocation7 + $0x7e8] sm:$0xf] }
  0xff   :  { %v1027_v11 = vadd.f32 %v1026_v0, %v1014_v63  ;;  %v11714_v63 = vld [vmem:[#allocation7 + $0x518] sm:$0xf0]  ;;  %v11840_v0 = vld [vmem:[#allocation7 + $0x608] sm:$0xf] }
 0x100   :  { %2024 = vmatpush.bf16.msrb.mxu0 %v11669_v27  ;;  %1990 = vmatpush.bf16.msra.mxu1 %v11713_v7  ;;  %v11589_v27 = vor.u32 %v16823_v22, %v11586_v23  ;;  %v11954_v7 = vld [vmem:[#allocation7 + $0x6f8] sm:$0xf0]  ;;  %v11841_v16 = vor.u32 %v16889_v3, %v11840_v0  ;;  %v12064_v24 = vld [vmem:[#allocation7 + $0x7c8] sm:$0xf]  ;;  %v16943_v3 = vld [vmem:[#allocation7 + $0x7cc] sm:$0xf] }
 0x101   :  { %v18357_v20 = vpack.c.bf16 %v1027_v11, %v1027_v11  ;;  %v11957_v18 = vor.u32 %v16915_v6, %v11954_v7  ;;  %v11938_v22 = vld [vmem:[#allocation7 + $0x6d8] sm:$0xf0]  ;;  %v16939_v7 = vld [vmem:[#allocation7 + $0x7ac] sm:$0xf] }
 0x103   :  { %1900 = vmatmul.bf16.vlgmr.msra.gmra.mxu2 %v18357_v20  ;;  %1991 = vmatmul.bf16.vlgmr.msra.gmra.mxu1 %v18351_v50 }
 0x104   :  { %2025 = vmatpush.bf16.msrb.mxu0 %v11653_v37  ;;  %2035 = vmatpush.bf16.msrb.mxu1 %v11829_v12  ;;  %v1015_v28 = vpop.f32.mrf.mxu2  ;;  %v16871_v37 = vld [vmem:[#allocation7 + $0x58c] sm:$0xf]  ;;  %v11717_v12 = vor.u32 %v16855_v62, %v11714_v63 }
 0x105   :  { %1996 = vmatpush.bf16.msra.mxu2 %v11953_v14  ;;  %v1028_v31 = vpop.f32.mrf.mxu3  ;;  %v11781_v42 = vor.u32 %v16871_v37, %v11778_v38  ;;  %v16949_v14 = vld [vmem:[#allocation7 + $0x7f4] sm:$0xf0]  ;;  %v16903_v37 = vld [vmem:[#allocation7 + $0x68c] sm:$0xf]  ;;  %v11906_v38 = vld [vmem:[#allocation7 + $0x698] sm:$0xf0] }
 0x106   :  { %v12081_v19 = vor.u32 %v16949_v14, %v12080_v13 }
 0x108   :  { %2026 = vmatpush.bf16.msrb.mxu0 %v11637_v49  ;;  %2036 = vmatpush.bf16.msrb.mxu1 %v11813_v25  ;;  %v16863_v49 = vld [vmem:[#allocation7 + $0x54c] sm:$0xf]  ;;  %v16945_v25 = vld [vmem:[#allocation7 + $0x7d4] sm:$0xf0] }
 0x109   :  { %1997 = vmatpush.bf16.msra.mxu2 %v11937_v26  ;;  %v11941_v26 = vor.u32 %v16911_v21, %v11938_v22  ;;  %v12065_v28 = vor.u32 %v16945_v25, %v12064_v24  ;;  %v12200_v21 = vld [vmem:[#allocation7 + $0x8e0] sm:$0xf] }
 0x10c   :  { %2027 = vmatpush.bf16.msrb.mxu0 %v11621_v59  ;;  %2037 = vmatpush.bf16.msrb.mxu1 %v11797_v34  ;;  %v16893_v59 = vld [vmem:[#allocation7 + $0x634] sm:$0xf0]  ;;  %v11925_v34 = vor.u32 %v16907_v29, %v11922_v30  ;;  %v16976_v29 = vld [vmem:[#allocation7 + $0x8cc] sm:$0xf0] }
 0x10d   :  { %1998 = vmatpush.bf16.msra.mxu2 %v11921_v35  ;;  %v11857_v61 = vor.u32 %v16893_v59, %v11856_v58  ;;  %v12049_v35 = vor.u32 %v16941_v33, %v12048_v32  ;;  %v11842_v58 = vld [vmem:[#allocation7 + $0x618] sm:$0xf0]  ;;  %v11968_v59 = vld [vmem:[#allocation7 + $0x708] sm:$0xf]  ;;  %v12168_v32 = vld [vmem:[#allocation7 + $0x8a0] sm:$0xf] }
 0x10e   :  { %v11845_v62 = vor.u32 %v16887_v57, %v11842_v58  ;;  %v16972_v33 = vld [vmem:[#allocation7 + $0x8ac] sm:$0xf0] }
 0x10f   :  { %v17004_v57 = vld [vmem:[#allocation7 + $0x9ac] sm:$0xf0] }
 0x110   :  { %2028 = vmatpush.bf16.msrb.mxu0 %v11605_v15  ;;  %2038 = vmatpush.bf16.msrb.mxu1 %v11781_v42  ;;  %v11909_v42 = vor.u32 %v16903_v37, %v11906_v38  ;;  %v12169_v37 = vor.u32 %v16972_v33, %v12168_v32  ;;  %v12152_v38 = vld [vmem:[#allocation7 + $0x880] sm:$0xf] }
 0x111   :  { %1999 = vmatpush.bf16.msra.mxu2 %v11905_v43  ;;  %v16899_v43 = vld [vmem:[#allocation7 + $0x66c] sm:$0xf]  ;;  %v12424_v32 = vld [vmem:[#allocation7 + $0xaa0] sm:$0xf] }
 0x112   :  { %v11893_v46 = vor.u32 %v16899_v43, %v11890_v44  ;;  %v12136_v43 = vld [vmem:[#allocation7 + $0x860] sm:$0xf]  ;;  %v16964_v44 = vld [vmem:[#allocation7 + $0x86c] sm:$0xf0] }
 0x113   :  { %1952 = vmatmul.bf16.vlgmr.msrb.gmra.mxu2 %v18357_v20 }
 0x114   :  { %2029 = vmatpush.bf16.msrb.mxu0 %v11589_v27  ;;  %v1039_v52 = vpop.f32.mrf.mxu0  ;;  %2039 = vmatpush.bf16.msrb.mxu1 %v11765_v47  ;;  %v12017_v47 = vor.u32 %v16933_v2, %v12016_v45  ;;  %v12328_v45 = vld [vmem:[#allocation7 + $0x9e0] sm:$0xf]  ;;  %v17012_v2 = vld [vmem:[#allocation7 + $0x9ec] sm:$0xf0] }
 0x115   :  { %v1040_v53 = vadd.f32 %v1039_v52, %v229_v48  ;;  %v1052_v54 = vpop.f32.mrf.mxu1  ;;  %2000 = vmatpush.bf16.msra.mxu2 %v11889_v8  ;;  %v16895_v48 = vld [vmem:[#allocation7 + $0x64c] sm:$0xf]  ;;  %v11874_v8 = vld [vmem:[#allocation7 + $0x658] sm:$0xf0] }
 0x116   :  { %v11877_v51 = vor.u32 %v16895_v48, %v11874_v8  ;;  %v16891_v52 = vld [vmem:[#allocation7 + $0x62c] sm:$0xf]  ;;  %v12312_v48 = vld [vmem:[#allocation7 + $0x9c0] sm:$0xf]  ;;  %v17008_v8 = vld [vmem:[#allocation7 + $0x9cc] sm:$0xf0] }
 0x117   :  { %2030 = vmatmul.bf16.vlgmr.msrb.gmra.mxu0 %v18346_v36  ;;  %v11749_v36 = vor.u32 %v16863_v49, %v11746_v1  ;;  %v1053_v60 = vadd.f32 %v1052_v54, %v1040_v53  ;;  %v12000_v49 = vld [vmem:[#allocation7 + $0x748] sm:$0xf]  ;;  %v16929_v1 = vld [vmem:[#allocation7 + $0x754] sm:$0xf0] }
 0x118   :  { %v12001_v5 = vor.u32 %v16929_v1, %v12000_v49  ;;  %v11984_v53 = vld [vmem:[#allocation7 + $0x728] sm:$0xf]  ;;  %v16925_v54 = vld [vmem:[#allocation7 + $0x734] sm:$0xf0]  ;;  %v12120_v49 = vld [vmem:[#allocation7 + $0x840] sm:$0xf] }
 0x119   :  { %2040 = vmatpush.bf16.msrb.mxu1 %v11749_v36  ;;  %2001 = vmatpush.bf16.msra.mxu2 %v11873_v55  ;;  %v11858_v36 = vld [vmem:[#allocation7 + $0x638] sm:$0xf0]  ;;  %v11985_v56 = vor.u32 %v16925_v54, %v11984_v53  ;;  %v16960_v1 = vld [vmem:[#allocation7 + $0x84c] sm:$0xf0]  ;;  %v12104_v53 = vld [vmem:[#allocation7 + $0x820] sm:$0xf] }
 0x11a   :  { %v11861_v55 = vor.u32 %v16891_v52, %v11858_v36  ;;  %v16956_v54 = vld [vmem:[#allocation7 + $0x82c] sm:$0xf0] }
 0x11c   :  { %v1065_v4 = vpop.f32.mrf.mxu2  ;;  %v1041_v11 = vpop.f32.mrf.mxu0 }
 0x11d   :  { %v1066_v9 = vadd.f32 %v1065_v4, %v1053_v60  ;;  %v1078_v10 = vpop.f32.mrf.mxu3  ;;  %2041 = vmatpush.bf16.msrb.mxu1 %v11733_v40  ;;  %v1054_v15 = vpop.f32.mrf.mxu1  ;;  %2002 = vmatpush.bf16.msra.mxu2 %v11857_v61  ;;  %v16921_v60 = vld [vmem:[#allocation7 + $0x714] sm:$0xf0]  ;;  %v16947_v40 = vld [vmem:[#allocation7 + $0x7ec] sm:$0xf]  ;;  %v12082_v61 = vld [vmem:[#allocation7 + $0x7f8] sm:$0xf0] }
 0x11e   :  { %v11969_v63 = vor.u32 %v16921_v60, %v11968_v59  ;;  %v12085_v0 = vor.u32 %v16947_v40, %v12082_v61  ;;  %v12066_v4 = vld [vmem:[#allocation7 + $0x7d8] sm:$0xf0]  ;;  %v16935_v11 = vld [vmem:[#allocation7 + $0x78c] sm:$0xf]  ;;  %v12088_v59 = vld [vmem:[#allocation7 + $0x800] sm:$0xf] }
 0x11f   :  { %v1079_v17 = vadd.f32 %v1078_v10, %v1066_v9  ;;  %v12069_v6 = vor.u32 %v16943_v3, %v12066_v4  ;;  %v12050_v9 = vld [vmem:[#allocation7 + $0x7b8] sm:$0xf0]  ;;  %v16931_v15 = vld [vmem:[#allocation7 + $0x76c] sm:$0xf]  ;;  %v16952_v60 = vld [vmem:[#allocation7 + $0x80c] sm:$0xf0] }
 0x120   :  { %v12053_v10 = vor.u32 %v16939_v7, %v12050_v9  ;;  %v12089_v61 = vor.u32 %v16952_v60, %v12088_v59  ;;  %v12264_v7 = vld [vmem:[#allocation7 + $0x960] sm:$0xf]  ;;  %v16996_v9 = vld [vmem:[#allocation7 + $0x96c] sm:$0xf0] }
 0x121   :  { %v18364_v23 = vpack.c.bf16 %v1079_v17, %v1079_v17  ;;  %2042 = vmatpush.bf16.msrb.mxu1 %v11717_v12  ;;  %2003 = vmatpush.bf16.msra.mxu2 %v11841_v16  ;;  %v12034_v12 = vld [vmem:[#allocation7 + $0x798] sm:$0xf0]  ;;  %v12376_v60 = vld [vmem:[#allocation7 + $0xa40] sm:$0xf] }
 0x122   :  { %v12037_v13 = vor.u32 %v16935_v11, %v12034_v12  ;;  %v12018_v16 = vld [vmem:[#allocation7 + $0x778] sm:$0xf0]  ;;  %v12265_v11 = vor.u32 %v16996_v9, %v12264_v7  ;;  %v17044_v12 = vld [vmem:[#allocation7 + $0xaec] sm:$0xf0]  ;;  %v12360_v9 = vld [vmem:[#allocation7 + $0xa20] sm:$0xf] }
 0x123   :  { %1913 = vmatmul.bf16.vlgmr.msra.gmra.mxu3 %v18364_v23  ;;  %v12021_v17 = vor.u32 %v16931_v15, %v12018_v16  ;;  %v12186_v15 = vld [vmem:[#allocation7 + $0x8d0] sm:$0xf0] }
 0x124   :  { %2009 = vmatpush.bf16.msra.mxu3 %v12081_v19  ;;  %v1067_v27 = vpop.f32.mrf.mxu2  ;;  %2043 = vmatmul.bf16.vlgmr.msrb.gmra.mxu1 %v18351_v50  ;;  %v12033_v50 = vor.u32 %v16937_v41, %v12032_v39  ;;  %v12002_v19 = vld [vmem:[#allocation7 + $0x758] sm:$0xf0]  ;;  %v16968_v39 = vld [vmem:[#allocation7 + $0x88c] sm:$0xf0] }
 0x125   :  { %2048 = vmatpush.bf16.msrb.mxu2 %v11957_v18  ;;  %v1080_v31 = vpop.f32.mrf.mxu3  ;;  %v16927_v18 = vld [vmem:[#allocation7 + $0x74c] sm:$0xf]  ;;  %v11986_v27 = vld [vmem:[#allocation7 + $0x738] sm:$0xf0] }
 0x126   :  { %2004 = vmatmul.bf16.vlgmr.msra.gmra.mxu2 %v18357_v20  ;;  %v12005_v24 = vor.u32 %v16927_v18, %v12002_v19  ;;  %v12248_v18 = vld [vmem:[#allocation7 + $0x940] sm:$0xf]  ;;  %v16992_v19 = vld [vmem:[#allocation7 + $0x94c] sm:$0xf0] }
 0x128   :  { %2010 = vmatpush.bf16.msra.mxu3 %v12065_v28  ;;  %v12184_v28 = vld [vmem:[#allocation7 + $0x8c0] sm:$0xf] }
 0x129   :  { %2049 = vmatpush.bf16.msrb.mxu2 %v11941_v26  ;;  %v16923_v26 = vld [vmem:[#allocation7 + $0x72c] sm:$0xf]  ;;  %v12185_v30 = vor.u32 %v16976_v29, %v12184_v28 }
 0x12a   :  { %v11989_v31 = vor.u32 %v16923_v26, %v11986_v27 }
 0x12c   :  { %2011 = vmatpush.bf16.msra.mxu3 %v12049_v35  ;;  %v11970_v35 = vld [vmem:[#allocation7 + $0x718] sm:$0xf0] }
 0x12d   :  { %2050 = vmatpush.bf16.msrb.mxu2 %v11925_v34  ;;  %v16919_v34 = vld [vmem:[#allocation7 + $0x70c] sm:$0xf] }
 0x12e   :  { %v11973_v41 = vor.u32 %v16919_v34, %v11970_v35  ;;  %v17036_v34 = vld [vmem:[#allocation7 + $0xaac] sm:$0xf0]  ;;  %v16966_v35 = vld [vmem:[#allocation7 + $0x884] sm:$0xf] }
 0x130   :  { %2012 = vmatpush.bf16.msra.mxu3 %v12033_v50 }
 0x131   :  { %2051 = vmatpush.bf16.msrb.mxu2 %v11909_v42  ;;  %v12153_v42 = vor.u32 %v16968_v39, %v12152_v38  ;;  %v12425_v38 = vor.u32 %v17036_v34, %v12424_v32  ;;  %v12458_v34 = vld [vmem:[#allocation7 + $0xaf0] sm:$0xf0] }
 0x133   :  { %1965 = vmatmul.bf16.vlgmr.msrb.gmra.mxu3 %v18364_v23 }
 0x134   :  { %2013 = vmatpush.bf16.msra.mxu3 %v12017_v47  ;;  %v12329_v47 = vor.u32 %v17012_v2, %v12328_v45  ;;  %v16962_v45 = vld [vmem:[#allocation7 + $0x864] sm:$0xf]  ;;  %v12138_v2 = vld [vmem:[#allocation7 + $0x870] sm:$0xf0] }
 0x135   :  { %2052 = vmatpush.bf16.msrb.mxu2 %v11893_v46  ;;  %v12137_v46 = vor.u32 %v16964_v44, %v12136_v43  ;;  %v12408_v43 = vld [vmem:[#allocation7 + $0xa80] sm:$0xf]  ;;  %v17032_v44 = vld [vmem:[#allocation7 + $0xa8c] sm:$0xf0] }
 0x136   :  { %2871 = vmatpush.bf16.msra.mxu1 %v12329_v47  ;;  %v12409_v47 = vor.u32 %v17032_v44, %v12408_v43  ;;  %v12250_v43 = vld [vmem:[#allocation7 + $0x950] sm:$0xf0]  ;;  %v17038_v44 = vld [vmem:[#allocation7 + $0xac4] sm:$0xf] }
 0x138   :  { %2014 = vmatpush.bf16.msra.mxu3 %v12001_v5  ;;  %v12121_v5 = vor.u32 %v16960_v1, %v12120_v49  ;;  %v12141_v1 = vor.u32 %v16962_v45, %v12138_v2  ;;  %v12442_v2 = vld [vmem:[#allocation7 + $0xad0] sm:$0xf0] }
 0x139   :  { %2053 = vmatpush.bf16.msrb.mxu2 %v11877_v51  ;;  %v12313_v51 = vor.u32 %v17008_v8, %v12312_v48  ;;  %v17010_v48 = vld [vmem:[#allocation7 + $0x9e4] sm:$0xf]  ;;  %v12330_v8 = vld [vmem:[#allocation7 + $0x9f0] sm:$0xf0] }
 0x13b   :  { %2872 = vmatpush.bf16.msra.mxu1 %v12313_v51  ;;  %v12333_v51 = vor.u32 %v17010_v48, %v12330_v8  ;;  %v12552_v48 = vld [vmem:[#allocation7 + $0xba0] sm:$0xf]  ;;  %v17068_v8 = vld [vmem:[#allocation7 + $0xbac] sm:$0xf0] }
 0x13c   :  { %2015 = vmatpush.bf16.msra.mxu3 %v11985_v56  ;;  %v12105_v56 = vor.u32 %v16956_v54, %v12104_v53  ;;  %v16958_v54 = vld [vmem:[#allocation7 + $0x844] sm:$0xf] }
 0x13d   :  { %2054 = vmatpush.bf16.msrb.mxu2 %v11861_v55  ;;  %v12296_v55 = vld [vmem:[#allocation7 + $0x9a0] sm:$0xf] }
 0x13e   :  { %v12297_v58 = vor.u32 %v17004_v57, %v12296_v55  ;;  %v12122_v55 = vld [vmem:[#allocation7 + $0x850] sm:$0xf0] }
 0x13f   :  { %v12125_v57 = vor.u32 %v16958_v54, %v12122_v55  ;;  %v18389_v55 = vld [vmem:[#allocation8 + $0x4] sm:$0xf] }
 0x140   :  { %2016 = vmatpush.bf16.msra.mxu3 %v11969_v63  ;;  %2873 = vmatpush.bf16.msra.mxu1 %v12297_v58  ;;  %v16978_v63 = vld [vmem:[#allocation7 + $0x8e4] sm:$0xf]  ;;  %v12314_v58 = vld [vmem:[#allocation7 + $0x9d0] sm:$0xf0] }
 0x141   :  { %2055 = vmatpush.bf16.msrb.mxu2 %v11845_v62  ;;  %v17000_v62 = vld [vmem:[#allocation7 + $0x98c] sm:$0xf0] }
 0x142   :  { %v18372_v14 = vpop.f32.mrf.mxu0 }
 0x143   :  { %2017 = vmatmul.bf16.vlgmr.msra.gmra.mxu3 %v18364_v23 }
 0x144   :  { %2061 = vmatpush.bf16.msrb.mxu3 %v12085_v0  ;;  %2056 = vmatmul.bf16.vlgmr.msrb.gmra.mxu2 %v18357_v20  ;;  %v16980_v20 = vld [vmem:[#allocation7 + $0x8ec] sm:$0xf0]  ;;  %v12202_v0 = vld [vmem:[#allocation7 + $0x8f0] sm:$0xf0] }
 0x145   :  { %v12201_v22 = vor.u32 %v16980_v20, %v12200_v21  ;;  %v12440_v21 = vld [vmem:[#allocation7 + $0xac0] sm:$0xf]  ;;  %v12249_v20 = vor.u32 %v16992_v19, %v12248_v18  ;;  %v12282_v18 = vld [vmem:[#allocation7 + $0x990] sm:$0xf0] }
 0x147   :  { %2858 = vmatpush.bf16.msra.mxu0 %v12201_v22  ;;  %v17040_v22 = vld [vmem:[#allocation7 + $0xacc] sm:$0xf0] }
 0x148   :  { %2062 = vmatpush.bf16.msrb.mxu3 %v12069_v6  ;;  %v12205_v6 = vor.u32 %v16978_v63, %v12202_v0  ;;  %v12441_v27 = vor.u32 %v17040_v22, %v12440_v21  ;;  %v12106_v63 = vld [vmem:[#allocation7 + $0x830] sm:$0xf0]  ;;  %v17002_v0 = vld [vmem:[#allocation7 + $0x9a4] sm:$0xf]  ;;  %v17016_v22 = vld [vmem:[#allocation7 + $0xa0c] sm:$0xf0] }
 0x14a   :  { %v1877_v25 = vpop.f32.mrf.mxu0 }
 0x14b   :  { %2859 = vmatpush.bf16.msra.mxu0 %v12185_v30  ;;  %v12170_v25 = vld [vmem:[#allocation7 + $0x8b0] sm:$0xf0]  ;;  %v12232_v30 = vld [vmem:[#allocation7 + $0x920] sm:$0xf] }
 0x14c   :  { %2063 = vmatpush.bf16.msrb.mxu3 %v12053_v10  ;;  %v12456_v10 = vld [vmem:[#allocation7 + $0xae0] sm:$0xf] }
 0x14d   :  { %v12457_v16 = vor.u32 %v17044_v12, %v12456_v10  ;;  %v17020_v10 = vld [vmem:[#allocation7 + $0xa2c] sm:$0xf0] }
 0x14e   :  { %v12361_v12 = vor.u32 %v17020_v10, %v12360_v9  ;;  %v17026_v10 = vld [vmem:[#allocation7 + $0xa64] sm:$0xf] }
 0x14f   :  { %2860 = vmatpush.bf16.msra.mxu0 %v12169_v37  ;;  %2884 = vmatpush.bf16.msra.mxu2 %v12457_v16  ;;  %v12154_v37 = vld [vmem:[#allocation7 + $0x890] sm:$0xf0]  ;;  %v16998_v16 = vld [vmem:[#allocation7 + $0x984] sm:$0xf] }
 0x150   :  { %2064 = vmatpush.bf16.msrb.mxu3 %v12037_v13  ;;  %v16974_v13 = vld [vmem:[#allocation7 + $0x8c4] sm:$0xf]  ;;  %v12157_v39 = vor.u32 %v16966_v35, %v12154_v37  ;;  %v12285_v21 = vor.u32 %v16998_v16, %v12282_v18  ;;  %v12568_v37 = vld [vmem:[#allocation7 + $0xbc0] sm:$0xf] }
 0x151   :  { %v12504_v16 = vld [vmem:[#allocation7 + $0xb40] sm:$0xf] }
 0x153   :  { %2861 = vmatpush.bf16.msra.mxu0 %v12153_v42  ;;  %2885 = vmatpush.bf16.msra.mxu2 %v12441_v27  ;;  %v16984_v42 = vld [vmem:[#allocation7 + $0x90c] sm:$0xf0] }
 0x154   :  { %2065 = vmatpush.bf16.msrb.mxu3 %v12021_v17  ;;  %v18374_v50 = vpop.f32.mrf.mxu0  ;;  %v12189_v17 = vor.u32 %v16974_v13, %v12186_v15  ;;  %v16950_v13 = vld [vmem:[#allocation7 + $0x804] sm:$0xf]  ;;  %v12090_v15 = vld [vmem:[#allocation7 + $0x810] sm:$0xf0] }
 0x157   :  { %2862 = vmatpush.bf16.msra.mxu0 %v12137_v46  ;;  %2886 = vmatpush.bf16.msra.mxu2 %v12425_v38  ;;  %v17072_v38 = vld [vmem:[#allocation7 + $0xbcc] sm:$0xf0] }
 0x158   :  { %2066 = vmatpush.bf16.msrb.mxu3 %v12005_v24  ;;  %v16970_v24 = vld [vmem:[#allocation7 + $0x8a4] sm:$0xf] }
 0x159   :  { %v12173_v28 = vor.u32 %v16970_v24, %v12170_v25  ;;  %v12584_v24 = vld [vmem:[#allocation7 + $0xbe0] sm:$0xf] }
 0x15b   :  { %2863 = vmatpush.bf16.msra.mxu0 %v12121_v5  ;;  %2887 = vmatpush.bf16.msra.mxu2 %v12409_v47  ;;  %v12392_v5 = vld [vmem:[#allocation7 + $0xa60] sm:$0xf]  ;;  %v12445_v47 = vor.u32 %v17038_v44, %v12442_v2  ;;  %v17014_v44 = vld [vmem:[#allocation7 + $0xa04] sm:$0xf] }
 0x15c   :  { %2067 = vmatpush.bf16.msrb.mxu3 %v11989_v31  ;;  %v1929_v52 = vpop.f32.mrf.mxu0  ;;  %v16988_v31 = vld [vmem:[#allocation7 + $0x92c] sm:$0xf0]  ;;  %v17074_v2 = vld [vmem:[#allocation7 + $0xbe4] sm:$0xf] }
 0x15d   :  { %v12233_v33 = vor.u32 %v16988_v31, %v12232_v30  ;;  %v17028_v52 = vld [vmem:[#allocation7 + $0xa6c] sm:$0xf0]  ;;  %v12266_v30 = vld [vmem:[#allocation7 + $0x970] sm:$0xf0] }
 0x15e   :  { %v12393_v53 = vor.u32 %v17028_v52, %v12392_v5  ;;  %v17034_v5 = vld [vmem:[#allocation7 + $0xaa4] sm:$0xf] }
 0x15f   :  { %2864 = vmatpush.bf16.msra.mxu0 %v12105_v56  ;;  %v17006_v56 = vld [vmem:[#allocation7 + $0x9c4] sm:$0xf] }
 0x160   :  { %2068 = vmatpush.bf16.msrb.mxu3 %v11973_v41  ;;  %v18377_v36 = vpop.f32.mrf.mxu1  ;;  %v12216_v41 = vld [vmem:[#allocation7 + $0x900] sm:$0xf]  ;;  %v12317_v59 = vor.u32 %v17006_v56, %v12314_v58  ;;  %2888 = vmatpush.bf16.msra.mxu2 %v12393_v53  ;;  %v12426_v53 = vld [vmem:[#allocation7 + $0xab0] sm:$0xf0] }
 0x161   :  { %v12217_v46 = vor.u32 %v16984_v42, %v12216_v41  ;;  %v12569_v41 = vor.u32 %v17072_v38, %v12568_v37  ;;  %v16990_v42 = vld [vmem:[#allocation7 + $0x944] sm:$0xf]  ;;  %v12429_v54 = vor.u32 %v17034_v5, %v12426_v53  ;;  %v12536_v56 = vld [vmem:[#allocation7 + $0xb80] sm:$0xf]  ;;  %v16973_v53 = vld [vmem:[#allocation7 + $0x8b4] sm:$0xf0] }
 0x162   :  { %v12253_v45 = vor.u32 %v16990_v42, %v12250_v43 }
 0x163   :  { %2069 = vmatmul.bf16.vlgmr.msrb.gmra.mxu3 %v18364_v23  ;;  %v12280_v23 = vld [vmem:[#allocation7 + $0x980] sm:$0xf]  ;;  %2865 = vmatpush.bf16.msra.mxu0 %v12089_v61 }
 0x164   :  { %v12281_v4 = vor.u32 %v17000_v62, %v12280_v23  ;;  %v17024_v23 = vld [vmem:[#allocation7 + $0xa4c] sm:$0xf0]  ;;  %v16954_v62 = vld [vmem:[#allocation7 + $0x824] sm:$0xf] }
 0x166   :  { %2874 = vmatpush.bf16.msra.mxu1 %v12281_v4  ;;  %v12109_v4 = vor.u32 %v16954_v62, %v12106_v63  ;;  %v12410_v63 = vld [vmem:[#allocation7 + $0xa90] sm:$0xf0] }
 0x167   :  { %2910 = vmatpush.bf16.msrb.mxu0 %v12205_v6  ;;  %v12298_v6 = vld [vmem:[#allocation7 + $0x9b0] sm:$0xf0] }
 0x168   :  { %v1890_v40 = vpop.f32.mrf.mxu1  ;;  %v12301_v7 = vor.u32 %v17002_v0, %v12298_v6  ;;  %v12520_v6 = vld [vmem:[#allocation7 + $0xb60] sm:$0xf] }
 0x169   :  { %v12377_v40 = vor.u32 %v17024_v23, %v12376_v60  ;;  %v16982_v60 = vld [vmem:[#allocation7 + $0x904] sm:$0xf]  ;;  %v12218_v23 = vld [vmem:[#allocation7 + $0x910] sm:$0xf0] }
 0x16a   :  { %2875 = vmatpush.bf16.msra.mxu1 %v12265_v11  ;;  %v12221_v62 = vor.u32 %v16982_v60, %v12218_v23 }
 0x16b   :  { %2911 = vmatpush.bf16.msrb.mxu0 %v12189_v17  ;;  %2889 = vmatpush.bf16.msra.mxu2 %v12377_v40  ;;  %v12093_v17 = vor.u32 %v16950_v13, %v12090_v15  ;;  %v17030_v40 = vld [vmem:[#allocation7 + $0xa84] sm:$0xf] }
 0x16c   :  { %v12413_v0 = vor.u32 %v17030_v40, %v12410_v63  ;;  %v12160_v40 = vld [vmem:[#allocation7 + $0x888] sm:$0xf]  ;;  %v16969_v63 = vld [vmem:[#allocation7 + $0x894] sm:$0xf0] }
 0x16e   :  { %2876 = vmatpush.bf16.msra.mxu1 %v12249_v20  ;;  %v12344_v20 = vld [vmem:[#allocation7 + $0xa00] sm:$0xf] }
 0x16f   :  { %2912 = vmatpush.bf16.msrb.mxu0 %v12173_v28  ;;  %2890 = vmatpush.bf16.msra.mxu2 %v12361_v12  ;;  %v12345_v27 = vor.u32 %v17016_v22, %v12344_v20  ;;  %v17076_v28 = vld [vmem:[#allocation7 + $0xbec] sm:$0xf0]  ;;  %v12394_v12 = vld [vmem:[#allocation7 + $0xa70] sm:$0xf0]  ;;  %v17022_v20 = vld [vmem:[#allocation7 + $0xa44] sm:$0xf] }
 0x170   :  { %v18381_v26 = vpop.f32.mrf.mxu1  ;;  %v12585_v31 = vor.u32 %v17076_v28, %v12584_v24  ;;  %v12397_v13 = vor.u32 %v17026_v10, %v12394_v12  ;;  %v12378_v22 = vld [vmem:[#allocation7 + $0xa50] sm:$0xf0]  ;;  %v12488_v28 = vld [vmem:[#allocation7 + $0xb20] sm:$0xf]  ;;  %v12144_v10 = vld [vmem:[#allocation7 + $0x868] sm:$0xf] }
 0x171   :  { %v16965_v12 = vld [vmem:[#allocation7 + $0x874] sm:$0xf0] }
 0x172   :  { %2877 = vmatpush.bf16.msra.mxu1 %v12233_v33  ;;  %v17042_v33 = vld [vmem:[#allocation7 + $0xae4] sm:$0xf]  ;;  %2897 = vmatpush.bf16.msra.mxu3 %v12585_v31 }
 0x173   :  { %2913 = vmatpush.bf16.msrb.mxu0 %v12157_v39  ;;  %v12461_v35 = vor.u32 %v17042_v33, %v12458_v34  ;;  %2891 = vmatpush.bf16.msra.mxu2 %v12345_v27  ;;  %v17018_v31 = vld [vmem:[#allocation7 + $0xa24] sm:$0xf]  ;;  %v12208_v33 = vld [vmem:[#allocation7 + $0x8e8] sm:$0xf]  ;;  %v16981_v34 = vld [vmem:[#allocation7 + $0x8f4] sm:$0xf0] }
 0x174   :  { %v18379_v3 = vpop.f32.mrf.mxu0 }
 0x176   :  { %2878 = vmatpush.bf16.msra.mxu1 %v12217_v46  ;;  %2898 = vmatpush.bf16.msra.mxu3 %v12569_v41  ;;  %v17048_v41 = vld [vmem:[#allocation7 + $0xb0c] sm:$0xf0] }
 0x177   :  { %2914 = vmatpush.bf16.msrb.mxu0 %v12141_v1  ;;  %2936 = vmatpush.bf16.msrb.mxu2 %v12461_v35  ;;  %v16986_v1 = vld [vmem:[#allocation7 + $0x924] sm:$0xf] }
 0x178   :  { %v1942_v49 = vpop.f32.mrf.mxu1 }
 0x179   :  { %v12553_v49 = vor.u32 %v17068_v8, %v12552_v48  ;;  %v16977_v48 = vld [vmem:[#allocation7 + $0x8d4] sm:$0xf0] }
 0x17a   :  { %2923 = vmatpush.bf16.msrb.mxu1 %v12333_v51  ;;  %v12234_v51 = vld [vmem:[#allocation7 + $0x930] sm:$0xf0] }
 0x17b   :  { %2915 = vmatpush.bf16.msrb.mxu0 %v12125_v57  ;;  %2937 = vmatpush.bf16.msrb.mxu2 %v12445_v47  ;;  %v12237_v52 = vor.u32 %v16986_v1, %v12234_v51  ;;  %v17064_v57 = vld [vmem:[#allocation7 + $0xb8c] sm:$0xf0]  ;;  %v1219_v51 = vperm.slane %v18389_v55, 1 }
 0x17c   :  { %v1981_v29 = vpop.f32.mrf.mxu0  ;;  %2899 = vmatpush.bf16.msra.mxu3 %v12553_v49  ;;  %v12586_v49 = vld [vmem:[#allocation7 + $0xbf0] sm:$0xf0] }
 0x17d   :  { %v16994_v29 = vld [vmem:[#allocation7 + $0x964] sm:$0xf]  ;;  %v12589_v1 = vor.u32 %v17074_v2, %v12586_v49  ;;  %v17001_v49 = vld [vmem:[#allocation7 + $0x994] sm:$0xf0] }
 0x17e   :  { %2924 = vmatpush.bf16.msrb.mxu1 %v12317_v59  ;;  %v12269_v32 = vor.u32 %v16994_v29, %v12266_v30  ;;  %v12537_v59 = vor.u32 %v17064_v57, %v12536_v56  ;;  %v17052_v29 = vld [vmem:[#allocation7 + $0xb2c] sm:$0xf0]  ;;  %v12570_v56 = vld [vmem:[#allocation7 + $0xbd0] sm:$0xf0] }
 0x17f   :  { %2916 = vmatpush.bf16.msrb.mxu0 %v12109_v4  ;;  %2938 = vmatpush.bf16.msrb.mxu2 %v12429_v54  ;;  %v1218_v4 = vperm.slane %v18389_v55, 0  ;;  %v12489_v30 = vor.u32 %v17052_v29, %v12488_v28  ;;  %v17070_v54 = vld [vmem:[#allocation7 + $0xbc4] sm:$0xf]  ;;  %v16961_v28 = vld [vmem:[#allocation7 + $0x854] sm:$0xf0] }
 0x180   :  { %v18383_v61 = vpop.f32.mrf.mxu1  ;;  %2900 = vmatpush.bf16.msra.mxu3 %v12537_v59  ;;  %v12573_v59 = vor.u32 %v17070_v54, %v12570_v56 }
 0x181   :  { %v1876_v15 = vadd.f32 %v18372_v14, %v1218_v4  ;;  %v12362_v14 = vld [vmem:[#allocation7 + $0xa30] sm:$0xf0] }
 0x182   :  { %2925 = vmatpush.bf16.msrb.mxu1 %v12301_v7  ;;  %v17060_v7 = vld [vmem:[#allocation7 + $0xb6c] sm:$0xf0]  ;;  %v12365_v35 = vor.u32 %v17018_v31, %v12362_v14  ;;  %v12554_v4 = vld [vmem:[#allocation7 + $0xbb0] sm:$0xf0]  ;;  %v17058_v31 = vld [vmem:[#allocation7 + $0xb64] sm:$0xf] }
 0x183   :  { %2917 = vmatpush.bf16.msrb.mxu0 %v12093_v17  ;;  %2939 = vmatpush.bf16.msrb.mxu2 %v12413_v0  ;;  %v12521_v9 = vor.u32 %v17060_v7, %v12520_v6  ;;  %v17056_v17 = vld [vmem:[#allocation7 + $0xb4c] sm:$0xf0]  ;;  %v1889_v27 = vadd.f32 %v18377_v36, %v1876_v15  ;;  %v12209_v36 = vor.u32 %v16981_v34, %v12208_v33  ;;  %v17066_v0 = vld [vmem:[#allocation7 + $0xba4] sm:$0xf]  ;;  %v12522_v14 = vld [vmem:[#allocation7 + $0xb70] sm:$0xf0] }
 0x184   :  { %v12557_v6 = vor.u32 %v17066_v0, %v12554_v4  ;;  %v12474_v0 = vld [vmem:[#allocation7 + $0xb10] sm:$0xf0] }
 0x185   :  { %2901 = vmatpush.bf16.msra.mxu3 %v12521_v9  ;;  %v12161_v9 = vor.u32 %v16969_v63, %v12160_v40  ;;  %v17046_v63 = vld [vmem:[#allocation7 + $0xb04] sm:$0xf] }
 0x186   :  { %v18385_v11 = vpop.f32.mrf.mxu2  ;;  %2926 = vmatpush.bf16.msrb.mxu1 %v12285_v21  ;;  %v12505_v21 = vor.u32 %v17056_v17, %v12504_v16  ;;  %v17013_v16 = vld [vmem:[#allocation7 + $0x9f4] sm:$0xf0]  ;;  %v17062_v17 = vld [vmem:[#allocation7 + $0xb84] sm:$0xf] }
 0x187   :  { %2940 = vmatpush.bf16.msrb.mxu2 %v12397_v13  ;;  %v12336_v13 = vld [vmem:[#allocation7 + $0x9e8] sm:$0xf] }
 0x188   :  { %v1994_v25 = vpop.f32.mrf.mxu1 }
 0x189   :  { %v12381_v25 = vor.u32 %v17022_v20, %v12378_v22  ;;  %2902 = vmatpush.bf16.msra.mxu3 %v12505_v21  ;;  %v12145_v22 = vor.u32 %v16965_v12, %v12144_v10 }
 0x18a   :  { %2927 = vmatpush.bf16.msrb.mxu1 %v12269_v32  ;;  %v1902_v32 = vadd.f32 %v18385_v11, %v1889_v27  ;;  %v12192_v11 = vld [vmem:[#allocation7 + $0x8c8] sm:$0xf] }
 0x18b   :  { %2941 = vmatpush.bf16.msrb.mxu2 %v12381_v25  ;;  %v12193_v5 = vor.u32 %v16977_v48, %v12192_v11  ;;  %v12337_v25 = vor.u32 %v17013_v16, %v12336_v13  ;;  %v12128_v27 = vld [vmem:[#allocation7 + $0x848] sm:$0xf]  ;;  %v16953_v11 = vld [vmem:[#allocation7 + $0x814] sm:$0xf0] }
 0x18c   :  { %v12129_v33 = vor.u32 %v16961_v28, %v12128_v27  ;;  %v12288_v48 = vld [vmem:[#allocation7 + $0x988] sm:$0xf] }
 0x18d   :  { %2903 = vmatpush.bf16.msra.mxu3 %v12489_v30  ;;  %v17009_v30 = vld [vmem:[#allocation7 + $0x9d4] sm:$0xf0]  ;;  %v12256_v16 = vld [vmem:[#allocation7 + $0x948] sm:$0xf] }
 0x18e   :  { %v1903_v39 = vpop.f32.mrf.mxu2  ;;  %2928 = vmatpush.bf16.msrb.mxu1 %v12253_v45  ;;  %v12346_v45 = vld [vmem:[#allocation7 + $0xa10] sm:$0xf0] }
 0x18f   :  { %v12472_v39 = vld [vmem:[#allocation7 + $0xb00] sm:$0xf]  ;;  %2942 = vmatpush.bf16.msrb.mxu2 %v12365_v35  ;;  %v12349_v8 = vor.u32 %v17014_v44, %v12346_v45  ;;  %v12112_v35 = vld [vmem:[#allocation7 + $0x828] sm:$0xf] }
 0x190   :  { %v12473_v43 = vor.u32 %v17048_v41, %v12472_v39  ;;  %v17005_v39 = vld [vmem:[#allocation7 + $0x9b4] sm:$0xf0]  ;;  %v17054_v41 = vld [vmem:[#allocation7 + $0xb44] sm:$0xf] }
 0x192   :  { %2929 = vmatpush.bf16.msrb.mxu1 %v12237_v52  ;;  %2904 = vmatpush.bf16.msra.mxu3 %v12473_v43  ;;  %v12176_v52 = vld [vmem:[#allocation7 + $0x8a8] sm:$0xf] }
 0x193   :  { %2943 = vmatpush.bf16.msrb.mxu2 %v12349_v8  ;;  %v12177_v23 = vor.u32 %v16973_v53, %v12176_v52  ;;  %v12210_v52 = vld [vmem:[#allocation7 + $0x8f8] sm:$0xf0] }
 0x194   :  { %v18387_v19 = vpop.f32.mrf.mxu0 }
 0x196   :  { %v18391_v58 = vpop.f32.mrf.mxu2  ;;  %2930 = vmatpush.bf16.msrb.mxu1 %v12221_v62  ;;  %2949 = vmatpush.bf16.msrb.mxu3 %v12589_v1  ;;  %v1928_v62 = vadd.f32 %v18374_v50, %v1219_v51  ;;  %v17050_v1 = vld [vmem:[#allocation7 + $0xb24] sm:$0xf]  ;;  %v12490_v51 = vld [vmem:[#allocation7 + $0xb30] sm:$0xf0] }
 0x197   :  { %v12493_v53 = vor.u32 %v17050_v1, %v12490_v51  ;;  %v17029_v1 = vld [vmem:[#allocation7 + $0xa74] sm:$0xf0]  ;;  %v16959_v51 = vld [vmem:[#allocation7 + $0x84c] sm:$0xf] }
 0x198   :  { %v1941_v7 = vadd.f32 %v18381_v26, %v1928_v62  ;;  %v12320_v26 = vld [vmem:[#allocation7 + $0x9c8] sm:$0xf] }
 0x199   :  { %v12321_v34 = vor.u32 %v17009_v30, %v12320_v26  ;;  %v12464_v62 = vld [vmem:[#allocation7 + $0xae8] sm:$0xf]  ;;  %v16989_v30 = vld [vmem:[#allocation7 + $0x934] sm:$0xf0] }
 0x19a   :  { %2950 = vmatpush.bf16.msrb.mxu3 %v12573_v59  ;;  %v1954_v15 = vadd.f32 %v18391_v58, %v1941_v7  ;;  %v12525_v58 = vor.u32 %v17058_v31, %v12522_v14  ;;  %v12272_v59 = vld [vmem:[#allocation7 + $0x968] sm:$0xf]  ;;  %v16975_v7 = vld [vmem:[#allocation7 + $0x8cc] sm:$0xf] }
 0x19b   :  { %v12240_v26 = vld [vmem:[#allocation7 + $0x928] sm:$0xf] }
 0x19c   :  { %v2033_v46 = vpop.f32.mrf.mxu0  ;;  %v12432_v31 = vld [vmem:[#allocation7 + $0xaa8] sm:$0xf] }
 0x19e   :  { %v1955_v18 = vpop.f32.mrf.mxu2  ;;  %2951 = vmatpush.bf16.msrb.mxu3 %v12557_v6  ;;  %v17045_v6 = vld [vmem:[#allocation7 + $0xaf4] sm:$0xf0] }
 0x19f   :  { %v12538_v18 = vld [vmem:[#allocation7 + $0xb90] sm:$0xf0] }
 0x1a0   :  { %v12541_v50 = vor.u32 %v17062_v17, %v12538_v18  ;;  %v16993_v17 = vld [vmem:[#allocation7 + $0x954] sm:$0xf0]  ;;  %v12448_v18 = vld [vmem:[#allocation7 + $0xac8] sm:$0xf] }
 0x1a1   :  { %v18395_v24 = vpop.f32.mrf.mxu1 }
 0x1a2   :  { %2952 = vmatpush.bf16.msrb.mxu3 %v12541_v50  ;;  %v16971_v50 = vld [vmem:[#allocation7 + $0x8ac] sm:$0xf] }
 0x1a6   :  { %v1914_v37 = vpop.f32.mrf.mxu3  ;;  %2953 = vmatpush.bf16.msrb.mxu3 %v12525_v58  ;;  %v17037_v58 = vld [vmem:[#allocation7 + $0xab4] sm:$0xf0] }
 0x1a7   :  { %v1915_v38 = vadd.f32 %v1914_v37, %v1902_v32  ;;  %v1220_v32 = vperm.slane %v18389_v55, 2  ;;  %v16957_v37 = vld [vmem:[#allocation7 + $0x834] sm:$0xf0] }
 0x1a8   :  { %v12113_v45 = vor.u32 %v16957_v37, %v12112_v35  ;;  %v12433_v35 = vor.u32 %v17037_v58, %v12432_v31  ;;  %v12466_v31 = vld [vmem:[#allocation7 + $0xaf8] sm:$0xf0] }
 0x1a9   :  { %v18399_v42 = vpop.f32.mrf.mxu2  ;;  %v18401_v46 = vpack.c.bf16 %v1915_v38, %v1915_v38  ;;  %v2046_v47 = vpop.f32.mrf.mxu1  ;;  %v12304_v38 = vld [vmem:[#allocation7 + $0x9a8] sm:$0xf]  ;;  %v1980_v8 = vadd.f32 %v18379_v3, %v1220_v32  ;;  %v16967_v32 = vld [vmem:[#allocation7 + $0x88c] sm:$0xf] }
 0x1aa   :  { %v12305_v2 = vor.u32 %v17005_v39, %v12304_v38  ;;  %v12096_v47 = vld [vmem:[#allocation7 + $0x808] sm:$0xf]  ;;  %v16985_v39 = vld [vmem:[#allocation7 + $0x914] sm:$0xf0] }
 0x1ab   :  { %2866 = vmatmul.bf16.vlgmr.msra.gmra.mxu0 %v18401_v46  ;;  %v1993_v54 = vadd.f32 %v18383_v61, %v1980_v8  ;;  %v12097_v56 = vor.u32 %v16953_v11, %v12096_v47  ;;  %v12477_v61 = vor.u32 %v17046_v63, %v12474_v0  ;;  %v12224_v38 = vld [vmem:[#allocation7 + $0x908] sm:$0xf]  ;;  %v17003_v63 = vld [vmem:[#allocation7 + $0x9ac] sm:$0xf]  ;;  %v12306_v0 = vld [vmem:[#allocation7 + $0x9b8] sm:$0xf0] }
 0x1ac   :  { %2962 = vmatpush.bf16.msra.mxu0 %v12209_v36  ;;  %v12506_v36 = vld [vmem:[#allocation7 + $0xb50] sm:$0xf0]  ;;  %v12225_v47 = vor.u32 %v16985_v39, %v12224_v38  ;;  %v12400_v8 = vld [vmem:[#allocation7 + $0xa68] sm:$0xf]  ;;  %v12258_v38 = vld [vmem:[#allocation7 + $0x958] sm:$0xf0] }
 0x1ad   :  { %v12509_v44 = vor.u32 %v17054_v41, %v12506_v36  ;;  %v12416_v41 = vld [vmem:[#allocation7 + $0xa88] sm:$0xf]  ;;  %v17033_v36 = vld [vmem:[#allocation7 + $0xa94] sm:$0xf0]  ;;  %v17039_v39 = vld [vmem:[#allocation7 + $0xacc] sm:$0xf] }
 0x1ae   :  { %v1916_v57 = vpop.f32.mrf.mxu3  ;;  %v12417_v11 = vor.u32 %v17033_v36, %v12416_v41  ;;  %v12450_v41 = vld [vmem:[#allocation7 + $0xad8] sm:$0xf0] }
 0x1af   :  { %2954 = vmatpush.bf16.msrb.mxu3 %v12509_v44  ;;  %v12289_v57 = vor.u32 %v17001_v49, %v12288_v48  ;;  %v12146_v44 = vld [vmem:[#allocation7 + $0x878] sm:$0xf0] }
 0x1b0   :  { %2963 = vmatpush.bf16.msra.mxu0 %v12193_v5  ;;  %v16979_v5 = vld [vmem:[#allocation7 + $0x8ec] sm:$0xf] }
 0x1b1   :  { %v2007_v60 = vpop.f32.mrf.mxu2  ;;  %v12213_v3 = vor.u32 %v16979_v5, %v12210_v52  ;;  %v12130_v5 = vld [vmem:[#allocation7 + $0x858] sm:$0xf0]  ;;  %v17007_v52 = vld [vmem:[#allocation7 + $0x9cc] sm:$0xf] }
 0x1b2   :  { %v16997_v60 = vld [vmem:[#allocation7 + $0x974] sm:$0xf0] }
 0x1b3   :  { %2955 = vmatpush.bf16.msrb.mxu3 %v12493_v53  ;;  %v12273_v12 = vor.u32 %v16997_v60, %v12272_v59  ;;  %v12322_v53 = vld [vmem:[#allocation7 + $0x9d8] sm:$0xf0]  ;;  %v12384_v59 = vld [vmem:[#allocation7 + $0xa48] sm:$0xf] }
 0x1b4   :  { %2964 = vmatpush.bf16.msra.mxu0 %v12177_v23  ;;  %v2006_v23 = vadd.f32 %v18399_v42, %v1993_v54  ;;  %v12465_v42 = vor.u32 %v17045_v6, %v12464_v62  ;;  %v1221_v54 = vperm.slane %v18389_v55, 3  ;;  %v12325_v60 = vor.u32 %v17007_v52, %v12322_v53  ;;  %v12114_v62 = vld [vmem:[#allocation7 + $0x838] sm:$0xf0]  ;;  %v12368_v6 = vld [vmem:[#allocation7 + $0xa28] sm:$0xf] }
 0x1b5   :  { %v17065_v52 = vld [vmem:[#allocation7 + $0xb94] sm:$0xf0]  ;;  %v16983_v53 = vld [vmem:[#allocation7 + $0x90c] sm:$0xf] }
 0x1b6   :  { %v1966_v21 = vpop.f32.mrf.mxu3 }
 0x1b7   :  { %v1967_v20 = vadd.f32 %v1966_v21, %v1954_v15  ;;  %2956 = vmatpush.bf16.msrb.mxu3 %v12477_v61  ;;  %v17041_v21 = vld [vmem:[#allocation7 + $0xad4] sm:$0xf0] }
 0x1b8   :  { %2965 = vmatpush.bf16.msra.mxu0 %v12161_v9  ;;  %v12194_v9 = vld [vmem:[#allocation7 + $0x8d8] sm:$0xf0]  ;;  %v12449_v27 = vor.u32 %v17041_v21, %v12448_v18  ;;  %v17021_v61 = vld [vmem:[#allocation7 + $0xa34] sm:$0xf0]  ;;  %v12352_v21 = vld [vmem:[#allocation7 + $0xa08] sm:$0xf] }
 0x1b9   :  { %v18408_v29 = vpack.c.bf16 %v1967_v20, %v1967_v20  ;;  %v12197_v15 = vor.u32 %v16975_v7, %v12194_v9  ;;  %v12178_v20 = vld [vmem:[#allocation7 + $0x8b8] sm:$0xf0]  ;;  %v2032_v7 = vadd.f32 %v18387_v19, %v1221_v54  ;;  %v12309_v9 = vor.u32 %v17003_v63, %v12306_v0  ;;  %v12592_v19 = vld [vmem:[#allocation7 + $0xbe8] sm:$0xf]  ;;  %v17027_v63 = vld [vmem:[#allocation7 + $0xa6c] sm:$0xf] }
 0x1ba   :  { %v12181_v28 = vor.u32 %v16971_v50, %v12178_v20  ;;  %v17017_v50 = vld [vmem:[#allocation7 + $0xa14] sm:$0xf0]  ;;  %v12226_v54 = vld [vmem:[#allocation7 + $0x918] sm:$0xf0] }
 0x1bb   :  { %2879 = vmatmul.bf16.vlgmr.msra.gmra.mxu1 %v18408_v29  ;;  %2918 = vmatmul.bf16.vlgmr.msrb.gmra.mxu0 %v18401_v46  ;;  %v12402_v0 = vld [vmem:[#allocation7 + $0xa78] sm:$0xf0] }
 0x1bc   :  { %2966 = vmatpush.bf16.msra.mxu0 %v12145_v22  ;;  %2975 = vmatpush.bf16.msra.mxu1 %v12337_v25  ;;  %v12257_v22 = vor.u32 %v16993_v17, %v12256_v16  ;;  %v2045_v16 = vadd.f32 %v18395_v24, %v2032_v7  ;;  %v12369_v17 = vor.u32 %v17021_v61, %v12368_v6  ;;  %v12512_v6 = vld [vmem:[#allocation7 + $0xb48] sm:$0xf]  ;;  %v17057_v7 = vld [vmem:[#allocation7 + $0xb54] sm:$0xf0]  ;;  %v12386_v61 = vld [vmem:[#allocation7 + $0xa58] sm:$0xf0] }
 0x1bd   :  { %v12353_v24 = vor.u32 %v17017_v50, %v12352_v21  ;;  %v12480_v50 = vld [vmem:[#allocation7 + $0xb08] sm:$0xf] }
 0x1be   :  { %v1968_v43 = vpop.f32.mrf.mxu3 }
 0x1bf   :  { %v16963_v43 = vld [vmem:[#allocation7 + $0x86c] sm:$0xf] }
 0x1c0   :  { %2967 = vmatpush.bf16.msra.mxu0 %v12129_v33  ;;  %2976 = vmatpush.bf16.msra.mxu1 %v12321_v34  ;;  %v12162_v33 = vld [vmem:[#allocation7 + $0x898] sm:$0xf0]  ;;  %v12241_v34 = vor.u32 %v16989_v30, %v12240_v26  ;;  %v12149_v48 = vor.u32 %v16963_v43, %v12146_v44  ;;  %v17043_v30 = vld [vmem:[#allocation7 + $0xaec] sm:$0xf]  ;;  %v12453_v44 = vor.u32 %v17039_v39, %v12450_v41  ;;  %v12712_v39 = vld [vmem:[#allocation7 + $0xce0] sm:$0xf] }
 0x1c1   :  { %v12165_v37 = vor.u32 %v16967_v32, %v12162_v33  ;;  %v12274_v26 = vld [vmem:[#allocation7 + $0x978] sm:$0xf0]  ;;  %v17108_v41 = vld [vmem:[#allocation7 + $0xcec] sm:$0xf0] }
 0x1c4   :  { %2968 = vmatpush.bf16.msra.mxu0 %v12113_v45  ;;  %2977 = vmatpush.bf16.msra.mxu1 %v12305_v2  ;;  %v17011_v45 = vld [vmem:[#allocation7 + $0x9ec] sm:$0xf]  ;;  %v12338_v2 = vld [vmem:[#allocation7 + $0x9f8] sm:$0xf0] }
 0x1c5   :  { %v12341_v49 = vor.u32 %v17011_v45, %v12338_v2  ;;  %v12560_v45 = vld [vmem:[#allocation7 + $0xba8] sm:$0xf]  ;;  %v17069_v2 = vld [vmem:[#allocation7 + $0xbb4] sm:$0xf0] }
 0x1c6   :  { %v2018_v4 = vpop.f32.mrf.mxu3 }
 0x1c7   :  { %v18416_v40 = vpop.f32.mrf.mxu2  ;;  %v2019_v10 = vadd.f32 %v2018_v4, %v2006_v23  ;;  %v17025_v23 = vld [vmem:[#allocation7 + $0xa54] sm:$0xf0] }
 0x1c8   :  { %2969 = vmatpush.bf16.msra.mxu0 %v12097_v56  ;;  %2978 = vmatpush.bf16.msra.mxu1 %v12289_v57  ;;  %v12401_v56 = vor.u32 %v17029_v1, %v12400_v8  ;;  %v12133_v57 = vor.u32 %v16959_v51, %v12130_v5  ;;  %v12385_v4 = vor.u32 %v17025_v23, %v12384_v59  ;;  %v17035_v8 = vld [vmem:[#allocation7 + $0xaac] sm:$0xf]  ;;  %v12544_v5 = vld [vmem:[#allocation7 + $0xb88] sm:$0xf] }
 0x1c9   :  { %v18418_v13 = vpack.c.bf16 %v2019_v10, %v2019_v10  ;;  %v16951_v10 = vld [vmem:[#allocation7 + $0x80c] sm:$0xf]  ;;  %v2058_v20 = vadd.f32 %v18416_v40, %v2045_v16  ;;  %v12576_v40 = vld [vmem:[#allocation7 + $0xbc8] sm:$0xf]  ;;  %v12561_v1 = vor.u32 %v17069_v2, %v12560_v45  ;;  %v12545_v59 = vor.u32 %v17065_v52, %v12544_v5  ;;  %v12514_v45 = vld [vmem:[#allocation7 + $0xb58] sm:$0xf0] }
 0x1ca   :  { %v17019_v16 = vld [vmem:[#allocation7 + $0xa2c] sm:$0xf]  ;;  %v12482_v5 = vld [vmem:[#allocation7 + $0xb18] sm:$0xf0] }
 0x1cb   :  { %2892 = vmatmul.bf16.vlgmr.msra.gmra.mxu2 %v18418_v13  ;;  %2931 = vmatmul.bf16.vlgmr.msrb.gmra.mxu1 %v18408_v29 }
 0x1cc   :  { %3014 = vmatpush.bf16.msrb.mxu0 %v12213_v3  ;;  %2979 = vmatpush.bf16.msra.mxu1 %v12273_v12  ;;  %v16955_v3 = vld [vmem:[#allocation7 + $0x82c] sm:$0xf]  ;;  %v12098_v12 = vld [vmem:[#allocation7 + $0x818] sm:$0xf0] }
 0x1cd   :  { %2970 = vmatmul.bf16.vlgmr.msra.gmra.mxu0 %v18401_v46  ;;  %2988 = vmatpush.bf16.msra.mxu2 %v12465_v42  ;;  %v12117_v55 = vor.u32 %v16955_v3, %v12114_v62  ;;  %v16999_v42 = vld [vmem:[#allocation7 + $0x98c] sm:$0xf]  ;;  %v12101_v18 = vor.u32 %v16951_v10, %v12098_v12  ;;  %v12528_v3 = vld [vmem:[#allocation7 + $0xb68] sm:$0xf]  ;;  %v17061_v62 = vld [vmem:[#allocation7 + $0xb74] sm:$0xf0]  ;;  %v12513_v10 = vor.u32 %v17057_v7, %v12512_v6 }
 0x1ce   :  { %v2020_v14 = vpop.f32.mrf.mxu3  ;;  %v12824_v6 = vld [vmem:[#allocation7 + $0xdc0] sm:$0xf] }
 0x1cf   :  { %v2059_v25 = vpop.f32.mrf.mxu2 }
 0x1d0   :  { %3015 = vmatpush.bf16.msrb.mxu0 %v12197_v15  ;;  %2980 = vmatpush.bf16.msra.mxu1 %v12257_v22  ;;  %v12290_v15 = vld [vmem:[#allocation7 + $0x998] sm:$0xf0]  ;;  %v17077_v25 = vld [vmem:[#allocation7 + $0xbf4] sm:$0xf0] }
 0x1d1   :  { %2989 = vmatpush.bf16.msra.mxu2 %v12449_v27  ;;  %v12293_v22 = vor.u32 %v16999_v42, %v12290_v15  ;;  %v16995_v27 = vld [vmem:[#allocation7 + $0x96c] sm:$0xf]  ;;  %v12593_v58 = vor.u32 %v17077_v25, %v12592_v19  ;;  %v12496_v42 = vld [vmem:[#allocation7 + $0xb28] sm:$0xf]  ;;  %v17053_v15 = vld [vmem:[#allocation7 + $0xb34] sm:$0xf0] }
 0x1d2   :  { %v12277_v33 = vor.u32 %v16995_v27, %v12274_v26  ;;  %v12354_v19 = vld [vmem:[#allocation7 + $0xa18] sm:$0xf0]  ;;  %v17075_v25 = vld [vmem:[#allocation7 + $0xbec] sm:$0xf] }
 0x1d3   :  { %v12594_v27 = vld [vmem:[#allocation7 + $0xbf8] sm:$0xf0] }
 0x1d4   :  { %3016 = vmatpush.bf16.msrb.mxu0 %v12181_v28  ;;  %2981 = vmatpush.bf16.msra.mxu1 %v12241_v34  ;;  %v12469_v34 = vor.u32 %v17043_v30, %v12466_v31  ;;  %v12597_v26 = vor.u32 %v17075_v25, %v12594_v27  ;;  %v17071_v30 = vld [vmem:[#allocation7 + $0xbcc] sm:$0xf]  ;;  %v12578_v31 = vld [vmem:[#allocation7 + $0xbd8] sm:$0xf0]  ;;  %v12714_v25 = vld [vmem:[#allocation7 + $0xcf0] sm:$0xf0] }
 0x1d5   :  { %2990 = vmatpush.bf16.msra.mxu2 %v12433_v35  ;;  %v17073_v35 = vld [vmem:[#allocation7 + $0xbd4] sm:$0xf0] }
 0x1d6   :  { %v12577_v36 = vor.u32 %v17073_v35, %v12576_v40  ;;  %v12546_v40 = vld [vmem:[#allocation7 + $0xb98] sm:$0xf0] }
 0x1d8   :  { %3017 = vmatpush.bf16.msrb.mxu0 %v12165_v37  ;;  %2982 = vmatpush.bf16.msra.mxu1 %v12225_v47  ;;  %v16991_v37 = vld [vmem:[#allocation7 + $0x94c] sm:$0xf] }
 0x1d9   :  { %2991 = vmatpush.bf16.msra.mxu2 %v12417_v11  ;;  %v12261_v43 = vor.u32 %v16991_v37, %v12258_v38  ;;  %v16987_v47 = vld [vmem:[#allocation7 + $0x92c] sm:$0xf]  ;;  %v12530_v38 = vld [vmem:[#allocation7 + $0xb78] sm:$0xf0] }
 0x1da   :  { %v17059_v37 = vld [vmem:[#allocation7 + $0xb6c] sm:$0xf] }
 0x1db   :  { %2944 = vmatmul.bf16.vlgmr.msrb.gmra.mxu2 %v18418_v13  ;;  %2983 = vmatmul.bf16.vlgmr.msra.gmra.mxu1 %v18408_v29 }
 0x1dc   :  { %3018 = vmatpush.bf16.msrb.mxu0 %v12149_v48  ;;  %3027 = vmatpush.bf16.msrb.mxu1 %v12341_v49  ;;  %v12242_v48 = vld [vmem:[#allocation7 + $0x938] sm:$0xf0] }
 0x1dd   :  { %2992 = vmatpush.bf16.msra.mxu2 %v12401_v56  ;;  %v12434_v49 = vld [vmem:[#allocation7 + $0xab8] sm:$0xf0]  ;;  %v17031_v56 = vld [vmem:[#allocation7 + $0xa8c] sm:$0xf] }
 0x1de   :  { %v12437_v51 = vor.u32 %v17035_v8, %v12434_v49  ;;  %v12680_v49 = vld [vmem:[#allocation7 + $0xca0] sm:$0xf] }
 0x1e0   :  { %3019 = vmatpush.bf16.msrb.mxu0 %v12133_v57  ;;  %3028 = vmatpush.bf16.msrb.mxu1 %v12325_v60  ;;  %v12418_v57 = vld [vmem:[#allocation7 + $0xa98] sm:$0xf0]  ;;  %v12229_v60 = vor.u32 %v16983_v53, %v12226_v54  ;;  %v12664_v54 = vld [vmem:[#allocation7 + $0xc80] sm:$0xf] }
 0x1e1   :  { %2993 = vmatpush.bf16.msra.mxu2 %v12385_v4  ;;  %v12421_v23 = vor.u32 %v17031_v56, %v12418_v57  ;;  %v12529_v4 = vor.u32 %v17061_v62, %v12528_v3  ;;  %v17096_v56 = vld [vmem:[#allocation7 + $0xc8c] sm:$0xf0]  ;;  %v12648_v57 = vld [vmem:[#allocation7 + $0xc60] sm:$0xf] }
 0x1e2   :  { %v17140_v3 = vld [vmem:[#allocation7 + $0xdec] sm:$0xf0] }
 0x1e4   :  { %3020 = vmatpush.bf16.msrb.mxu0 %v12117_v55  ;;  %3029 = vmatpush.bf16.msrb.mxu1 %v12309_v9  ;;  %v12405_v55 = vor.u32 %v17027_v63, %v12402_v0  ;;  %v17023_v9 = vld [vmem:[#allocation7 + $0xa4c] sm:$0xf] }
 0x1e5   :  { %2994 = vmatpush.bf16.msra.mxu2 %v12369_v17  ;;  %v12389_v12 = vor.u32 %v17023_v9, %v12386_v61  ;;  %v12370_v17 = vld [vmem:[#allocation7 + $0xa38] sm:$0xf0]  ;;  %v17136_v9 = vld [vmem:[#allocation7 + $0xdcc] sm:$0xf0] }
 0x1e6   :  { %v2070_v28 = vpop.f32.mrf.mxu3  ;;  %v12373_v21 = vor.u32 %v17019_v16, %v12370_v17  ;;  %v12825_v61 = vor.u32 %v17136_v9, %v12824_v6  ;;  %v17132_v16 = vld [vmem:[#allocation7 + $0xdac] sm:$0xf0]  ;;  %v12904_v6 = vld [vmem:[#allocation7 + $0xe60] sm:$0xf] }
 0x1e7   :  { %v2071_v14 = vadd.f32 %v2070_v28, %v2058_v20  ;;  %v17049_v20 = vld [vmem:[#allocation7 + $0xb14] sm:$0xf0] }
 0x1e8   :  { %3021 = vmatpush.bf16.msrb.mxu0 %v12101_v18  ;;  %3030 = vmatpush.bf16.msrb.mxu1 %v12293_v22  ;;  %v12497_v18 = vor.u32 %v17053_v15, %v12496_v42  ;;  %v17015_v22 = vld [vmem:[#allocation7 + $0xa0c] sm:$0xf]  ;;  %v12481_v28 = vor.u32 %v17049_v20, %v12480_v50  ;;  %v12808_v42 = vld [vmem:[#allocation7 + $0xda0] sm:$0xf] }
 0x1e9   :  { %v18429_v32 = vpack.c.bf16 %v2071_v14, %v2071_v14  ;;  %2995 = vmatpush.bf16.msra.mxu2 %v12353_v24  ;;  %v12581_v14 = vor.u32 %v17071_v30, %v12578_v31  ;;  %v17067_v24 = vld [vmem:[#allocation7 + $0xbac] sm:$0xf]  ;;  %v12809_v17 = vor.u32 %v17132_v16, %v12808_v42  ;;  %v12792_v50 = vld [vmem:[#allocation7 + $0xd80] sm:$0xf]  ;;  %v17172_v31 = vld [vmem:[#allocation7 + $0xeec] sm:$0xf0] }
 0x1ea   :  { %v12968_v30 = vld [vmem:[#allocation7 + $0xee0] sm:$0xf] }
 0x1eb   :  { %2905 = vmatmul.bf16.vlgmr.msra.gmra.mxu3 %v18429_v32  ;;  %3022 = vmatmul.bf16.vlgmr.msrb.gmra.mxu0 %v18401_v46  ;;  %v12245_v46 = vor.u32 %v16987_v47, %v12242_v48  ;;  %v17051_v47 = vld [vmem:[#allocation7 + $0xb2c] sm:$0xf]  ;;  %v17104_v48 = vld [vmem:[#allocation7 + $0xccc] sm:$0xf0]  ;;  %v12888_v16 = vld [vmem:[#allocation7 + $0xe40] sm:$0xf] }
 0x1ec   :  { %3001 = vmatpush.bf16.msra.mxu3 %v12593_v58  ;;  %3031 = vmatpush.bf16.msrb.mxu1 %v12277_v33  ;;  %v12562_v58 = vld [vmem:[#allocation7 + $0xbb8] sm:$0xf0] }
 0x1ed   :  { %3040 = vmatpush.bf16.msrb.mxu2 %v12469_v34  ;;  %v12565_v33 = vor.u32 %v17067_v24, %v12562_v58  ;;  %v17063_v34 = vld [vmem:[#allocation7 + $0xb8c] sm:$0xf]  ;;  %v12969_v24 = vor.u32 %v17172_v31, %v12968_v30  ;;  %v17102_v58 = vld [vmem:[#allocation7 + $0xcc4] sm:$0xf] }
 0x1ee   :  { %v2072_v11 = vpop.f32.mrf.mxu3  ;;  %2996 = vmatmul.bf16.vlgmr.msra.gmra.mxu2 %v18418_v13  ;;  %v12549_v35 = vor.u32 %v17063_v34, %v12546_v40  ;;  %v17078_v31 = vld [vmem:[#allocation7 + $0xc04] sm:$0xf] }
 0x1ef   :  { %v12696_v11 = vld [vmem:[#allocation7 + $0xcc0] sm:$0xf] }
 0x1f0   :  { %3002 = vmatpush.bf16.msra.mxu3 %v12577_v36  ;;  %3032 = vmatpush.bf16.msrb.mxu1 %v12261_v43  ;;  %v12713_v36 = vor.u32 %v17108_v41, %v12712_v39  ;;  %v12533_v43 = vor.u32 %v17059_v37, %v12530_v38  ;;  %v12697_v8 = vor.u32 %v17104_v48, %v12696_v11  ;;  %v12760_v37 = vld [vmem:[#allocation7 + $0xd40] sm:$0xf]  ;;  %v17120_v38 = vld [vmem:[#allocation7 + $0xd4c] sm:$0xf0] }
 0x1f1   :  { %3041 = vmatpush.bf16.msrb.mxu2 %v12453_v44  ;;  %v17055_v44 = vld [vmem:[#allocation7 + $0xb4c] sm:$0xf]  ;;  %v12952_v39 = vld [vmem:[#allocation7 + $0xec0] sm:$0xf]  ;;  %v12761_v41 = vor.u32 %v17120_v38, %v12760_v37  ;;  %v17164_v48 = vld [vmem:[#allocation7 + $0xeac] sm:$0xf0] }
 0x1f2   :  { %3850 = vmatpush.bf16.msra.mxu0 %v12713_v36  ;;  %v12517_v2 = vor.u32 %v17055_v44, %v12514_v45  ;;  %v17168_v36 = vld [vmem:[#allocation7 + $0xecc] sm:$0xf0]  ;;  %v12682_v44 = vld [vmem:[#allocation7 + $0xcb0] sm:$0xf0]  ;;  %v12936_v11 = vld [vmem:[#allocation7 + $0xea0] sm:$0xf] }
 0x1f3   :  { %v12953_v45 = vor.u32 %v17168_v36, %v12952_v39  ;;  %v12856_v39 = vld [vmem:[#allocation7 + $0xe00] sm:$0xf] }
 0x1f4   :  { %3003 = vmatpush.bf16.msra.mxu3 %v12561_v1  ;;  %3033 = vmatpush.bf16.msrb.mxu1 %v12245_v46  ;;  %v17100_v1 = vld [vmem:[#allocation7 + $0xcac] sm:$0xf0]  ;;  %v13096_v36 = vld [vmem:[#allocation7 + $0xfe0] sm:$0xf] }
 0x1f5   :  { %3042 = vmatpush.bf16.msrb.mxu2 %v12437_v51  ;;  %v17047_v51 = vld [vmem:[#allocation7 + $0xb0c] sm:$0xf]  ;;  %v12681_v52 = vor.u32 %v17100_v1, %v12680_v49  ;;  %v12937_v49 = vor.u32 %v17164_v48, %v12936_v11  ;;  %v17094_v1 = vld [vmem:[#allocation7 + $0xc84] sm:$0xf] }
 0x1f6   :  { %3851 = vmatpush.bf16.msra.mxu0 %v12697_v8  ;;  %v12485_v53 = vor.u32 %v17047_v51, %v12482_v5  ;;  %v17170_v48 = vld [vmem:[#allocation7 + $0xee4] sm:$0xf] }
 0x1f8   :  { %3004 = vmatpush.bf16.msra.mxu3 %v12545_v59  ;;  %3034 = vmatpush.bf16.msrb.mxu1 %v12229_v60  ;;  %v12665_v59 = vor.u32 %v17096_v56, %v12664_v54  ;;  %v17092_v60 = vld [vmem:[#allocation7 + $0xc6c] sm:$0xf0]  ;;  %v12920_v56 = vld [vmem:[#allocation7 + $0xe80] sm:$0xf] }
 0x1f9   :  { %3043 = vmatpush.bf16.msrb.mxu2 %v12421_v23  ;;  %v12840_v23 = vld [vmem:[#allocation7 + $0xde0] sm:$0xf]  ;;  %v12649_v63 = vor.u32 %v17092_v60, %v12648_v57  ;;  %v17112_v54 = vld [vmem:[#allocation7 + $0xd0c] sm:$0xf0]  ;;  %v17090_v60 = vld [vmem:[#allocation7 + $0xc64] sm:$0xf] }
 0x1fa   :  { %3852 = vmatpush.bf16.msra.mxu0 %v12681_v52  ;;  %v12841_v62 = vor.u32 %v17140_v3, %v12840_v23  ;;  %v12650_v23 = vld [vmem:[#allocation7 + $0xc70] sm:$0xf0] }
 0x1fb   :  { %2957 = vmatmul.bf16.vlgmr.msrb.gmra.mxu3 %v18429_v32  ;;  %3035 = vmatmul.bf16.vlgmr.msrb.gmra.mxu1 %v18408_v29  ;;  %v12357_v29 = vor.u32 %v17015_v22, %v12354_v19  ;;  %v17128_v22 = vld [vmem:[#allocation7 + $0xd8c] sm:$0xf0]  ;;  %v17106_v19 = vld [vmem:[#allocation7 + $0xce4] sm:$0xf] }
 0x1fc   :  { %3005 = vmatpush.bf16.msra.mxu3 %v12529_v4  ;;  %3863 = vmatpush.bf16.msra.mxu1 %v12841_v62  ;;  %v12632_v4 = vld [vmem:[#allocation7 + $0xc40] sm:$0xf]  ;;  %v12793_v27 = vor.u32 %v17128_v22, %v12792_v50  ;;  %v12653_v62 = vor.u32 %v17090_v60, %v12650_v23  ;;  %v12618_v22 = vld [vmem:[#allocation7 + $0xc30] sm:$0xf0] }
 0x1fd   :  { %3044 = vmatpush.bf16.msrb.mxu2 %v12405_v55  ;;  %v17088_v55 = vld [vmem:[#allocation7 + $0xc4c] sm:$0xf0]  ;;  %v13064_v23 = vld [vmem:[#allocation7 + $0xfa0] sm:$0xf] }
 0x1fe   :  { %3853 = vmatpush.bf16.msra.mxu0 %v12665_v59  ;;  %v12633_v7 = vor.u32 %v17088_v55, %v12632_v4  ;;  %v17160_v59 = vld [vmem:[#allocation7 + $0xe8c] sm:$0xf0]  ;;  %v12842_v4 = vld [vmem:[#allocation7 + $0xdf0] sm:$0xf0] }
 0x1ff   :  { %v12921_v3 = vor.u32 %v17160_v59, %v12920_v56 }
 0x200   :  { %3006 = vmatpush.bf16.msra.mxu3 %v12513_v10  ;;  %v12616_v10 = vld [vmem:[#allocation7 + $0xc20] sm:$0xf]  ;;  %3864 = vmatpush.bf16.msra.mxu1 %v12825_v61  ;;  %v17086_v61 = vld [vmem:[#allocation7 + $0xc44] sm:$0xf] }
 0x201   :  { %3045 = vmatpush.bf16.msrb.mxu2 %v12389_v12  ;;  %v17084_v12 = vld [vmem:[#allocation7 + $0xc2c] sm:$0xf0] }
 0x202   :  { %3854 = vmatpush.bf16.msra.mxu0 %v12649_v63  ;;  %v12617_v15 = vor.u32 %v17084_v12, %v12616_v10  ;;  %v17138_v63 = vld [vmem:[#allocation7 + $0xde4] sm:$0xf]  ;;  %v12634_v10 = vld [vmem:[#allocation7 + $0xc50] sm:$0xf0] }
 0x203   :  { %v12845_v55 = vor.u32 %v17138_v63, %v12842_v4  ;;  %v17134_v12 = vld [vmem:[#allocation7 + $0xdc4] sm:$0xf]  ;;  %v12637_v42 = vor.u32 %v17086_v61, %v12634_v10  ;;  %v12746_v4 = vld [vmem:[#allocation7 + $0xd30] sm:$0xf0]  ;;  %v13048_v61 = vld [vmem:[#allocation7 + $0xf80] sm:$0xf] }
 0x204   :  { %3007 = vmatpush.bf16.msra.mxu3 %v12497_v18  ;;  %3865 = vmatpush.bf16.msra.mxu1 %v12809_v17  ;;  %v17152_v17 = vld [vmem:[#allocation7 + $0xe4c] sm:$0xf0]  ;;  %v17114_v63 = vld [vmem:[#allocation7 + $0xd24] sm:$0xf] }
 0x205   :  { %3046 = vmatpush.bf16.msrb.mxu2 %v12373_v21  ;;  %v17080_v21 = vld [vmem:[#allocation7 + $0xc0c] sm:$0xf0] }
 0x206   :  { %3855 = vmatpush.bf16.msra.mxu0 %v12633_v7  ;;  %v17156_v7 = vld [vmem:[#allocation7 + $0xe6c] sm:$0xf0] }
 0x207   :  { %v12905_v9 = vor.u32 %v17156_v7, %v12904_v6  ;;  %v12749_v6 = vor.u32 %v17114_v63, %v12746_v4  ;;  %v12938_v7 = vld [vmem:[#allocation7 + $0xeb0] sm:$0xf0]  ;;  %v17192_v10 = vld [vmem:[#allocation7 + $0xf8c] sm:$0xf0] }
 0x208   :  { %3008 = vmatpush.bf16.msra.mxu3 %v12481_v28  ;;  %v12717_v28 = vor.u32 %v17106_v19, %v12714_v25  ;;  %3866 = vmatpush.bf16.msra.mxu1 %v12793_v27  ;;  %v17130_v19 = vld [vmem:[#allocation7 + $0xda4] sm:$0xf]  ;;  %v12810_v27 = vld [vmem:[#allocation7 + $0xdb0] sm:$0xf0] }
 0x209   :  { %3047 = vmatpush.bf16.msrb.mxu2 %v12357_v29  ;;  %v12776_v29 = vld [vmem:[#allocation7 + $0xd60] sm:$0xf] }
 0x20a   :  { %3856 = vmatpush.bf16.msra.mxu0 %v12617_v15  ;;  %v12826_v15 = vld [vmem:[#allocation7 + $0xdd0] sm:$0xf0] }
 0x20b   :  { %3009 = vmatmul.bf16.vlgmr.msra.gmra.mxu3 %v18429_v32 }
 0x20c   :  { %3053 = vmatpush.bf16.msrb.mxu3 %v12597_v26  ;;  %3048 = vmatmul.bf16.vlgmr.msrb.gmra.mxu2 %v18418_v13  ;;  %v12498_v13 = vld [vmem:[#allocation7 + $0xb38] sm:$0xf0]  ;;  %v17124_v26 = vld [vmem:[#allocation7 + $0xd6c] sm:$0xf0] }
 0x20d   :  { %v12501_v46 = vor.u32 %v17051_v47, %v12498_v13  ;;  %3876 = vmatpush.bf16.msra.mxu2 %v12969_v24  ;;  %v12744_v47 = vld [vmem:[#allocation7 + $0xd20] sm:$0xf]  ;;  %v17116_v13 = vld [vmem:[#allocation7 + $0xd2c] sm:$0xf0]  ;;  %v17126_v24 = vld [vmem:[#allocation7 + $0xd84] sm:$0xf] }
 0x20e   :  { %v12745_v8 = vor.u32 %v17116_v13, %v12744_v47  ;;  %v12778_v47 = vld [vmem:[#allocation7 + $0xd70] sm:$0xf0] }
 0x210   :  { %3054 = vmatpush.bf16.msrb.mxu3 %v12581_v14  ;;  %v12777_v14 = vor.u32 %v17124_v26, %v12776_v29  ;;  %v12872_v29 = vld [vmem:[#allocation7 + $0xe20] sm:$0xf]  ;;  %v17148_v26 = vld [vmem:[#allocation7 + $0xe2c] sm:$0xf0] }
 0x211   :  { %3877 = vmatpush.bf16.msra.mxu2 %v12953_v45  ;;  %v12873_v30 = vor.u32 %v17148_v26, %v12872_v29  ;;  %v17204_v45 = vld [vmem:[#allocation7 + $0xfec] sm:$0xf0]  ;;  %v17154_v29 = vld [vmem:[#allocation7 + $0xe64] sm:$0xf]  ;;  %v12906_v26 = vld [vmem:[#allocation7 + $0xe70] sm:$0xf0] }
 0x212   :  { %3867 = vmatpush.bf16.msra.mxu1 %v12777_v14  ;;  %v12602_v14 = vld [vmem:[#allocation7 + $0xc10] sm:$0xf0]  ;;  %v13097_v13 = vor.u32 %v17204_v45, %v13096_v36  ;;  %v17180_v45 = vld [vmem:[#allocation7 + $0xf2c] sm:$0xf0] }
 0x214   :  { %3055 = vmatpush.bf16.msrb.mxu3 %v12565_v33  ;;  %v12698_v33 = vld [vmem:[#allocation7 + $0xcd0] sm:$0xf0] }
 0x215   :  { %v12701_v34 = vor.u32 %v17102_v58, %v12698_v33  ;;  %3878 = vmatpush.bf16.msra.mxu2 %v12937_v49  ;;  %v12605_v33 = vor.u32 %v17078_v31, %v12602_v14  ;;  %v12909_v31 = vor.u32 %v17154_v29, %v12906_v26  ;;  %v13016_v14 = vld [vmem:[#allocation7 + $0xf40] sm:$0xf]  ;;  %v12656_v26 = vld [vmem:[#allocation7 + $0xc68] sm:$0xf] }
 0x216   :  { %3868 = vmatpush.bf16.msra.mxu1 %v12761_v41  ;;  %v17144_v41 = vld [vmem:[#allocation7 + $0xe0c] sm:$0xf0] }
 0x218   :  { %3056 = vmatpush.bf16.msrb.mxu3 %v12549_v35 }
 0x219   :  { %3879 = vmatpush.bf16.msra.mxu2 %v12921_v3  ;;  %v17196_v3 = vld [vmem:[#allocation7 + $0xfac] sm:$0xf0] }
 0x21a   :  { %3869 = vmatpush.bf16.msra.mxu1 %v12745_v8  ;;  %v12970_v8 = vld [vmem:[#allocation7 + $0xef0] sm:$0xf0] }
 0x21b   :  { %v12973_v49 = vor.u32 %v17170_v48, %v12970_v8  ;;  %v12720_v48 = vld [vmem:[#allocation7 + $0xce8] sm:$0xf]  ;;  %v17109_v8 = vld [vmem:[#allocation7 + $0xcf4] sm:$0xf0] }
 0x21c   :  { %3057 = vmatpush.bf16.msrb.mxu3 %v12533_v43  ;;  %v17098_v43 = vld [vmem:[#allocation7 + $0xca4] sm:$0xf] }
 0x21d   :  { %3880 = vmatpush.bf16.msra.mxu2 %v12905_v9 }
 0x220   :  { %3058 = vmatpush.bf16.msrb.mxu3 %v12517_v2  ;;  %v12685_v2 = vor.u32 %v17098_v43, %v12682_v44  ;;  %v12857_v44 = vor.u32 %v17144_v41, %v12856_v39 }
 0x224   :  { %3059 = vmatpush.bf16.msrb.mxu3 %v12501_v46  ;;  %v12666_v46 = vld [vmem:[#allocation7 + $0xc90] sm:$0xf0] }
 0x225   :  { %v12669_v51 = vor.u32 %v17094_v1, %v12666_v46  ;;  %v13080_v1 = vld [vmem:[#allocation7 + $0xfc0] sm:$0xf]  ;;  %v17200_v46 = vld [vmem:[#allocation7 + $0xfcc] sm:$0xf0] }
 0x228   :  { %3060 = vmatpush.bf16.msrb.mxu3 %v12485_v53  ;;  %v18439_v0 = vpop.f32.mrf.mxu0  ;;  %v12728_v53 = vld [vmem:[#allocation7 + $0xd00] sm:$0xf] }
 0x229   :  { %v12729_v57 = vor.u32 %v17112_v54, %v12728_v53  ;;  %v17166_v53 = vld [vmem:[#allocation7 + $0xec4] sm:$0xf] }
 0x22b   :  { %3061 = vmatmul.bf16.vlgmr.msrb.gmra.mxu3 %v18429_v32  ;;  %v12600_v32 = vld [vmem:[#allocation7 + $0xc00] sm:$0xf]  ;;  %3870 = vmatpush.bf16.msra.mxu1 %v12729_v57  ;;  %v12954_v57 = vld [vmem:[#allocation7 + $0xed0] sm:$0xf0] }
 0x22c   :  { %v12601_v20 = vor.u32 %v17080_v21, %v12600_v32  ;;  %v12889_v21 = vor.u32 %v17152_v17, %v12888_v16  ;;  %3889 = vmatpush.bf16.msra.mxu3 %v13097_v13  ;;  %v12957_v59 = vor.u32 %v17166_v53, %v12954_v57  ;;  %v17158_v16 = vld [vmem:[#allocation7 + $0xe84] sm:$0xf]  ;;  %v12874_v13 = vld [vmem:[#allocation7 + $0xe30] sm:$0xf0] }
 0x22d   :  { %v17142_v53 = vld [vmem:[#allocation7 + $0xe04] sm:$0xf] }
 0x22e   :  { %3857 = vmatpush.bf16.msra.mxu0 %v12601_v20  ;;  %v17082_v20 = vld [vmem:[#allocation7 + $0xc24] sm:$0xf]  ;;  %3881 = vmatpush.bf16.msra.mxu2 %v12889_v21  ;;  %v12922_v21 = vld [vmem:[#allocation7 + $0xe90] sm:$0xf0] }
 0x22f   :  { %3915 = vmatpush.bf16.msrb.mxu1 %v12845_v55  ;;  %v12621_v25 = vor.u32 %v17082_v20, %v12618_v22  ;;  %v17162_v55 = vld [vmem:[#allocation7 + $0xea4] sm:$0xf]  ;;  %v18455_v20 = vld [vmem:[#allocation8 + $0x8] sm:$0xf]  ;;  %v12925_v22 = vor.u32 %v17158_v16, %v12922_v21  ;;  %v17097_v21 = vld [vmem:[#allocation7 + $0xc94] sm:$0xf0] }
 0x230   :  { %v2869_v18 = vpop.f32.mrf.mxu0  ;;  %v12941_v9 = vor.u32 %v17162_v55, %v12938_v7  ;;  %v2211_v4 = vperm.slane %v18455_v20, 1  ;;  %v17101_v7 = vld [vmem:[#allocation7 + $0xcb4] sm:$0xf0] }
 0x231   :  { %v12829_v18 = vor.u32 %v17134_v12, %v12826_v15  ;;  %v13049_v12 = vor.u32 %v17192_v10, %v13048_v61  ;;  %v12730_v15 = vld [vmem:[#allocation7 + $0xd10] sm:$0xf0] }
 0x232   :  { %3902 = vmatpush.bf16.msrb.mxu0 %v12717_v28  ;;  %v12813_v28 = vor.u32 %v17130_v19, %v12810_v27  ;;  %3882 = vmatpush.bf16.msra.mxu2 %v12873_v30  ;;  %v17188_v27 = vld [vmem:[#allocation7 + $0xf6c] sm:$0xf0]  ;;  %v2210_v30 = vperm.slane %v18455_v20, 0  ;;  %v13082_v61 = vld [vmem:[#allocation7 + $0xfd0] sm:$0xf0] }
 0x233   :  { %3916 = vmatpush.bf16.msrb.mxu1 %v12829_v18 }
 0x234   :  { %v2868_v39 = vadd.f32 %v18439_v0, %v2210_v30  ;;  %v12984_v0 = vld [vmem:[#allocation7 + $0xf00] sm:$0xf]  ;;  %v17093_v30 = vld [vmem:[#allocation7 + $0xc74] sm:$0xf0] }
 0x236   :  { %3903 = vmatpush.bf16.msrb.mxu0 %v12701_v34  ;;  %v12794_v34 = vld [vmem:[#allocation7 + $0xd90] sm:$0xf0]  ;;  %3883 = vmatpush.bf16.msra.mxu2 %v12857_v44  ;;  %v13000_v44 = vld [vmem:[#allocation7 + $0xf20] sm:$0xf] }
 0x237   :  { %3917 = vmatpush.bf16.msrb.mxu1 %v12813_v28  ;;  %v12797_v37 = vor.u32 %v17126_v24, %v12794_v34  ;;  %v17184_v24 = vld [vmem:[#allocation7 + $0xf4c] sm:$0xf0] }
 0x238   :  { %v18441_v40 = vpop.f32.mrf.mxu1  ;;  %v18443_v35 = vpop.f32.mrf.mxu0  ;;  %v13017_v34 = vor.u32 %v17184_v24, %v13016_v14  ;;  %v17141_v24 = vld [vmem:[#allocation7 + $0xdf4] sm:$0xf0] }
 0x239   :  { %v2920_v16 = vadd.f32 %v18443_v35, %v2211_v4  ;;  %v17190_v35 = vld [vmem:[#allocation7 + $0xf84] sm:$0xf] }
 0x23a   :  { %3904 = vmatpush.bf16.msrb.mxu0 %v12685_v2  ;;  %v17122_v2 = vld [vmem:[#allocation7 + $0xd64] sm:$0xf]  ;;  %3928 = vmatpush.bf16.msrb.mxu2 %v12973_v49 }
 0x23b   :  { %3918 = vmatpush.bf16.msrb.mxu1 %v12797_v37  ;;  %v12781_v11 = vor.u32 %v17122_v2, %v12778_v47  ;;  %v17150_v37 = vld [vmem:[#allocation7 + $0xe44] sm:$0xf]  ;;  %v13001_v2 = vor.u32 %v17180_v45, %v13000_v44  ;;  %v17089_v44 = vld [vmem:[#allocation7 + $0xc54] sm:$0xf0] }
 0x23c   :  { %v17146_v47 = vld [vmem:[#allocation7 + $0xe24] sm:$0xf] }
 0x23d   :  { %v12877_v49 = vor.u32 %v17146_v47, %v12874_v13  ;;  %v17137_v47 = vld [vmem:[#allocation7 + $0xdd4] sm:$0xf0]  ;;  %v17186_v13 = vld [vmem:[#allocation7 + $0xf64] sm:$0xf] }
 0x23e   :  { %3905 = vmatpush.bf16.msrb.mxu0 %v12669_v51  ;;  %v13081_v51 = vor.u32 %v17200_v46, %v13080_v1  ;;  %3929 = vmatpush.bf16.msrb.mxu2 %v12957_v59  ;;  %v12704_v59 = vld [vmem:[#allocation7 + $0xcc8] sm:$0xf]  ;;  %v17178_v4 = vld [vmem:[#allocation7 + $0xf24] sm:$0xf] }
 0x23f   :  { %3919 = vmatpush.bf16.msrb.mxu1 %v12781_v11 }
 0x240   :  { %v2882_v5 = vpop.f32.mrf.mxu1  ;;  %v2921_v52 = vpop.f32.mrf.mxu0  ;;  %3890 = vmatpush.bf16.msra.mxu3 %v13081_v51  ;;  %v17176_v51 = vld [vmem:[#allocation7 + $0xf0c] sm:$0xf0] }
 0x241   :  { %v17118_v5 = vld [vmem:[#allocation7 + $0xd44] sm:$0xf]  ;;  %v12762_v52 = vld [vmem:[#allocation7 + $0xd50] sm:$0xf0] }
 0x242   :  { %3906 = vmatpush.bf16.msrb.mxu0 %v12653_v62  ;;  %v12765_v56 = vor.u32 %v17118_v5, %v12762_v52  ;;  %v13065_v62 = vor.u32 %v17196_v3, %v13064_v23  ;;  %3930 = vmatpush.bf16.msrb.mxu2 %v12941_v9  ;;  %v12721_v52 = vor.u32 %v17109_v8, %v12720_v48  ;;  %v17105_v23 = vld [vmem:[#allocation7 + $0xcd4] sm:$0xf0]  ;;  %v13098_v3 = vld [vmem:[#allocation7 + $0xff0] sm:$0xf0]  ;;  %v17198_v9 = vld [vmem:[#allocation7 + $0xfc4] sm:$0xf] }
 0x243   :  { %v12705_v55 = vor.u32 %v17105_v23, %v12704_v59  ;;  %v2212_v48 = vperm.slane %v18455_v20, 2  ;;  %v12608_v59 = vld [vmem:[#allocation7 + $0xc08] sm:$0xf]  ;;  %v17081_v23 = vld [vmem:[#allocation7 + $0xc14] sm:$0xf0] }
 0x244   :  { %3920 = vmatpush.bf16.msrb.mxu1 %v12765_v56  ;;  %3891 = vmatpush.bf16.msra.mxu3 %v13065_v62  ;;  %v17202_v56 = vld [vmem:[#allocation7 + $0xfe4] sm:$0xf] }
 0x245   :  { %v13101_v63 = vor.u32 %v17202_v56, %v13098_v3 }
 0x246   :  { %3907 = vmatpush.bf16.msrb.mxu0 %v12637_v42  ;;  %v17110_v42 = vld [vmem:[#allocation7 + $0xd04] sm:$0xf]  ;;  %3931 = vmatpush.bf16.msrb.mxu2 %v12925_v22 }
 0x247   :  { %v12733_v18 = vor.u32 %v17110_v42, %v12730_v15  ;;  %v12672_v15 = vld [vmem:[#allocation7 + $0xc88] sm:$0xf]  ;;  %v17194_v22 = vld [vmem:[#allocation7 + $0xfa4] sm:$0xf] }
 0x248   :  { %v18445_v32 = vpop.f32.mrf.mxu1  ;;  %3921 = vmatpush.bf16.msrb.mxu1 %v12749_v6  ;;  %3892 = vmatpush.bf16.msra.mxu3 %v13049_v12  ;;  %v12688_v6 = vld [vmem:[#allocation7 + $0xca8] sm:$0xf]  ;;  %v13085_v12 = vor.u32 %v17198_v9, %v13082_v61  ;;  %v12673_v29 = vor.u32 %v17097_v21, %v12672_v15  ;;  %v17125_v15 = vld [vmem:[#allocation7 + $0xd74] sm:$0xf0] }
 0x249   :  { %v12689_v42 = vor.u32 %v17101_v7, %v12688_v6  ;;  %v17107_v6 = vld [vmem:[#allocation7 + $0xcec] sm:$0xf]  ;;  %v12722_v7 = vld [vmem:[#allocation7 + $0xcf8] sm:$0xf0] }
 0x24a   :  { %v18447_v50 = vpop.f32.mrf.mxu0  ;;  %3908 = vmatpush.bf16.msrb.mxu0 %v12621_v25  ;;  %v13032_v25 = vld [vmem:[#allocation7 + $0xf60] sm:$0xf]  ;;  %3932 = vmatpush.bf16.msrb.mxu2 %v12909_v31  ;;  %v12848_v31 = vld [vmem:[#allocation7 + $0xde8] sm:$0xf]  ;;  %v12725_v21 = vor.u32 %v17107_v6, %v12722_v7  ;;  %v12642_v6 = vld [vmem:[#allocation7 + $0xc58] sm:$0xf0] }
 0x24b   :  { %v13033_v28 = vor.u32 %v17188_v27, %v13032_v25  ;;  %v2972_v3 = vadd.f32 %v18447_v50, %v2212_v48  ;;  %v17174_v50 = vld [vmem:[#allocation7 + $0xf04] sm:$0xf]  ;;  %v12674_v48 = vld [vmem:[#allocation7 + $0xc98] sm:$0xf0]  ;;  %v17135_v7 = vld [vmem:[#allocation7 + $0xdcc] sm:$0xf] }
 0x24c   :  { %3922 = vmatpush.bf16.msrb.mxu1 %v12733_v18 }
 0x24d   :  { %3893 = vmatpush.bf16.msra.mxu3 %v13033_v28  ;;  %v2933_v28 = vadd.f32 %v18445_v32, %v2920_v16  ;;  %v12832_v32 = vld [vmem:[#allocation7 + $0xdc8] sm:$0xf] }
 0x24e   :  { %v18449_v58 = vpop.f32.mrf.mxu2  ;;  %3909 = vmatpush.bf16.msrb.mxu0 %v12605_v33 }
 0x250   :  { %v2934_v38 = vpop.f32.mrf.mxu1 }
 0x251   :  { %v12890_v38 = vld [vmem:[#allocation7 + $0xe50] sm:$0xf0]  ;;  %3894 = vmatpush.bf16.msra.mxu3 %v13017_v34 }
 0x252   :  { %v2973_v43 = vpop.f32.mrf.mxu0  ;;  %v12893_v36 = vor.u32 %v17150_v37, %v12890_v38  ;;  %v13050_v34 = vld [vmem:[#allocation7 + $0xf90] sm:$0xf0] }
 0x253   :  { %v2881_v43 = vadd.f32 %v18441_v40, %v2868_v39  ;;  %v12985_v40 = vor.u32 %v17176_v51, %v12984_v0  ;;  %v13053_v38 = vor.u32 %v17190_v35, %v13050_v34  ;;  %v12816_v0 = vld [vmem:[#allocation7 + $0xda8] sm:$0xf]  ;;  %v17133_v51 = vld [vmem:[#allocation7 + $0xdb4] sm:$0xf0] }
 0x254   :  { %3933 = vmatpush.bf16.msrb.mxu2 %v12893_v36  ;;  %v12849_v36 = vor.u32 %v17141_v24, %v12848_v31  ;;  %v12817_v56 = vor.u32 %v17133_v51, %v12816_v0  ;;  %v12768_v35 = vld [vmem:[#allocation7 + $0xd48] sm:$0xf]  ;;  %v17121_v34 = vld [vmem:[#allocation7 + $0xd54] sm:$0xf0] }
 0x255   :  { %v2894_v11 = vadd.f32 %v18449_v58, %v2881_v43  ;;  %3895 = vmatpush.bf16.msra.mxu3 %v13001_v2  ;;  %v12640_v43 = vld [vmem:[#allocation7 + $0xc48] sm:$0xf]  ;;  %v17113_v51 = vld [vmem:[#allocation7 + $0xd14] sm:$0xf0] }
 0x256   :  { %v2895_v54 = vpop.f32.mrf.mxu2  ;;  %v12641_v8 = vor.u32 %v17089_v44, %v12640_v43  ;;  %v12736_v0 = vld [vmem:[#allocation7 + $0xd08] sm:$0xf] }
 0x257   :  { %v12858_v54 = vld [vmem:[#allocation7 + $0xe10] sm:$0xf0] }
 0x258   :  { %v18451_v60 = vpop.f32.mrf.mxu1  ;;  %3934 = vmatpush.bf16.msrb.mxu2 %v12877_v49  ;;  %v12861_v58 = vor.u32 %v17142_v53, %v12858_v54  ;;  %v12833_v49 = vor.u32 %v17137_v47, %v12832_v32  ;;  %v12752_v32 = vld [vmem:[#allocation7 + $0xd28] sm:$0xf] }
 0x259   :  { %3896 = vmatpush.bf16.msra.mxu3 %v12985_v40  ;;  %v2985_v61 = vadd.f32 %v18451_v60, %v2972_v3  ;;  %v12944_v47 = vld [vmem:[#allocation7 + $0xea8] sm:$0xf] }
 0x25a   :  { %v12912_v3 = vld [vmem:[#allocation7 + $0xe68] sm:$0xf] }
 0x25c   :  { %3935 = vmatpush.bf16.msrb.mxu2 %v12861_v58  ;;  %v12800_v58 = vld [vmem:[#allocation7 + $0xd88] sm:$0xf] }
 0x25d   :  { %3941 = vmatpush.bf16.msrb.mxu3 %v13101_v63  ;;  %v17129_v63 = vld [vmem:[#allocation7 + $0xd94] sm:$0xf0] }
 0x25e   :  { %v18453_v17 = vpop.f32.mrf.mxu2 }
 0x25f   :  { %v2946_v14 = vadd.f32 %v18453_v17, %v2933_v28  ;;  %v13034_v17 = vld [vmem:[#allocation7 + $0xf70] sm:$0xf0]  ;;  %v17103_v28 = vld [vmem:[#allocation7 + $0xccc] sm:$0xf] }
 0x260   :  { %v2986_v19 = vpop.f32.mrf.mxu1 }
 0x261   :  { %3942 = vmatpush.bf16.msrb.mxu3 %v13085_v12  ;;  %v13066_v19 = vld [vmem:[#allocation7 + $0xfb0] sm:$0xf0]  ;;  %v12801_v12 = vor.u32 %v17129_v63, %v12800_v58 }
 0x262   :  { %v13069_v27 = vor.u32 %v17194_v22, %v13066_v19  ;;  %v12976_v22 = vld [vmem:[#allocation7 + $0xee8] sm:$0xf]  ;;  %v12986_v19 = vld [vmem:[#allocation7 + $0xf10] sm:$0xf0] }
 0x265   :  { %3943 = vmatpush.bf16.msrb.mxu3 %v13069_v27  ;;  %v17173_v27 = vld [vmem:[#allocation7 + $0xef4] sm:$0xf0] }
 0x266   :  { %v2947_v41 = vpop.f32.mrf.mxu2 }
 0x267   :  { %v12657_v41 = vor.u32 %v17093_v30, %v12656_v26  ;;  %v12989_v26 = vor.u32 %v17174_v50, %v12986_v19  ;;  %v17131_v50 = vld [vmem:[#allocation7 + $0xdac] sm:$0xf]  ;;  %v12818_v19 = vld [vmem:[#allocation7 + $0xdb8] sm:$0xf0] }
 0x268   :  { %v18458_v33 = vpop.f32.mrf.mxu0 }
 0x269   :  { %3944 = vmatpush.bf16.msrb.mxu3 %v13053_v38  ;;  %v17169_v38 = vld [vmem:[#allocation7 + $0xed4] sm:$0xf0] }
 0x26e   :  { %v2906_v1 = vpop.f32.mrf.mxu3 }
 0x26f   :  { %v2907_v46 = vadd.f32 %v2906_v1, %v2894_v11  ;;  %v13037_v11 = vor.u32 %v17186_v13, %v13034_v17  ;;  %v12624_v1 = vld [vmem:[#allocation7 + $0xc28] sm:$0xf]  ;;  %v17165_v17 = vld [vmem:[#allocation7 + $0xeb4] sm:$0xf0] }
 0x270   :  { %v3025_v5 = vpop.f32.mrf.mxu0 }
 0x271   :  { %v18463_v57 = vpack.c.bf16 %v2907_v46, %v2907_v46  ;;  %v18465_v62 = vpop.f32.mrf.mxu2  ;;  %v17085_v46 = vld [vmem:[#allocation7 + $0xc34] sm:$0xf0]  ;;  %3945 = vmatpush.bf16.msrb.mxu3 %v13037_v11  ;;  %v17182_v5 = vld [vmem:[#allocation7 + $0xf44] sm:$0xf]  ;;  %v17095_v11 = vld [vmem:[#allocation7 + $0xc8c] sm:$0xf] }
 0x272   :  { %v12625_v54 = vor.u32 %v17085_v46, %v12624_v1  ;;  %v2998_v16 = vadd.f32 %v18465_v62, %v2985_v61  ;;  %v12977_v62 = vor.u32 %v17173_v27, %v12976_v22  ;;  %v12945_v1 = vor.u32 %v17165_v17, %v12944_v47  ;;  %v12626_v22 = vld [vmem:[#allocation7 + $0xc38] sm:$0xf0]  ;;  %v12880_v27 = vld [vmem:[#allocation7 + $0xe28] sm:$0xf]  ;;  %v17171_v47 = vld [vmem:[#allocation7 + $0xeec] sm:$0xf] }
 0x273   :  { %3858 = vmatmul.bf16.vlgmr.msra.gmra.mxu0 %v18463_v57  ;;  %v12677_v46 = vor.u32 %v17095_v11, %v12674_v48  ;;  %v2213_v61 = vperm.slane %v18455_v20, 3 }
 0x274   :  { %3954 = vmatpush.bf16.msra.mxu0 %v12721_v52  ;;  %v13018_v52 = vld [vmem:[#allocation7 + $0xf50] sm:$0xf0] }
 0x275   :  { %v13021_v53 = vor.u32 %v17182_v5, %v13018_v52  ;;  %v12928_v5 = vld [vmem:[#allocation7 + $0xe88] sm:$0xf]  ;;  %v17161_v52 = vld [vmem:[#allocation7 + $0xe94] sm:$0xf0] }
 0x276   :  { %v2908_v10 = vpop.f32.mrf.mxu3 }
 0x277   :  { %3946 = vmatpush.bf16.msrb.mxu3 %v13021_v53  ;;  %v12609_v10 = vor.u32 %v17081_v23, %v12608_v59  ;;  %v12658_v53 = vld [vmem:[#allocation7 + $0xc78] sm:$0xf0]  ;;  %v12737_v59 = vor.u32 %v17113_v51, %v12736_v0  ;;  %v12929_v23 = vor.u32 %v17161_v52, %v12928_v5  ;;  %v17167_v51 = vld [vmem:[#allocation7 + $0xecc] sm:$0xf] }
 0x278   :  { %3955 = vmatpush.bf16.msra.mxu0 %v12705_v55  ;;  %v18470_v18 = vpop.f32.mrf.mxu1  ;;  %v13002_v55 = vld [vmem:[#allocation7 + $0xf30] sm:$0xf0]  ;;  %v12770_v0 = vld [vmem:[#allocation7 + $0xd58] sm:$0xf0] }
 0x279   :  { %v2999_v25 = vpop.f32.mrf.mxu2  ;;  %v13005_v9 = vor.u32 %v17178_v4, %v13002_v55  ;;  %v17157_v4 = vld [vmem:[#allocation7 + $0xe74] sm:$0xf0]  ;;  %v17087_v55 = vld [vmem:[#allocation7 + $0xc4c] sm:$0xf]  ;;  %v12962_v5 = vld [vmem:[#allocation7 + $0xed8] sm:$0xf0] }
 0x27b   :  { %3947 = vmatpush.bf16.msrb.mxu3 %v13005_v9  ;;  %v12834_v9 = vld [vmem:[#allocation7 + $0xdd8] sm:$0xf0] }
 0x27c   :  { %3956 = vmatpush.bf16.msra.mxu0 %v12689_v42  ;;  %v12784_v42 = vld [vmem:[#allocation7 + $0xd68] sm:$0xf] }
 0x27d   :  { %v12785_v31 = vor.u32 %v17125_v15, %v12784_v42  ;;  %v12896_v42 = vld [vmem:[#allocation7 + $0xe48] sm:$0xf]  ;;  %v12837_v15 = vor.u32 %v17135_v7, %v12834_v9  ;;  %v17193_v7 = vld [vmem:[#allocation7 + $0xf94] sm:$0xf0]  ;;  %v17111_v9 = vld [vmem:[#allocation7 + $0xd0c] sm:$0xf] }
 0x27e   :  { %v2958_v37 = vpop.f32.mrf.mxu3 }
 0x27f   :  { %v2959_v39 = vadd.f32 %v2958_v37, %v2946_v14  ;;  %v12960_v37 = vld [vmem:[#allocation7 + $0xec8] sm:$0xf]  ;;  %3948 = vmatpush.bf16.msrb.mxu3 %v12989_v26  ;;  %v17149_v26 = vld [vmem:[#allocation7 + $0xe34] sm:$0xf0] }
 0x280   :  { %3957 = vmatpush.bf16.msra.mxu0 %v12673_v29  ;;  %v3038_v2 = vpop.f32.mrf.mxu1  ;;  %v12706_v29 = vld [vmem:[#allocation7 + $0xcd8] sm:$0xf0]  ;;  %v12961_v43 = vor.u32 %v17169_v38, %v12960_v37  ;;  %v12864_v38 = vld [vmem:[#allocation7 + $0xe08] sm:$0xf] }
 0x281   :  { %v18474_v45 = vpack.c.bf16 %v2959_v39, %v2959_v39  ;;  %v12709_v24 = vor.u32 %v17103_v28, %v12706_v29  ;;  %v17099_v39 = vld [vmem:[#allocation7 + $0xcac] sm:$0xf]  ;;  %v17117_v2 = vld [vmem:[#allocation7 + $0xd34] sm:$0xf0]  ;;  %v3024_v28 = vadd.f32 %v18458_v33, %v2213_v61  ;;  %v12821_v29 = vor.u32 %v17131_v50, %v12818_v19  ;;  %v13104_v33 = vld [vmem:[#allocation7 + $0xfe8] sm:$0xf] }
 0x282   :  { %v12738_v61 = vld [vmem:[#allocation7 + $0xd18] sm:$0xf0]  ;;  %v17155_v50 = vld [vmem:[#allocation7 + $0xe6c] sm:$0xf] }
 0x283   :  { %3871 = vmatmul.bf16.vlgmr.msra.gmra.mxu1 %v18474_v45  ;;  %3910 = vmatmul.bf16.vlgmr.msrb.gmra.mxu0 %v18463_v57  ;;  %v12914_v19 = vld [vmem:[#allocation7 + $0xe78] sm:$0xf0] }
 0x284   :  { %3958 = vmatpush.bf16.msra.mxu0 %v12657_v41  ;;  %3967 = vmatpush.bf16.msra.mxu1 %v12849_v36  ;;  %v12690_v41 = vld [vmem:[#allocation7 + $0xcb8] sm:$0xf0]  ;;  %v12769_v36 = vor.u32 %v17121_v34, %v12768_v35  ;;  %v3037_v35 = vadd.f32 %v18470_v18, %v3024_v28  ;;  %v12881_v34 = vor.u32 %v17149_v26, %v12880_v27  ;;  %v13024_v27 = vld [vmem:[#allocation7 + $0xf48] sm:$0xf]  ;;  %v17185_v28 = vld [vmem:[#allocation7 + $0xf54] sm:$0xf0] }
 0x285   :  { %v12693_v44 = vor.u32 %v17099_v39, %v12690_v41  ;;  %v17145_v39 = vld [vmem:[#allocation7 + $0xe14] sm:$0xf0]  ;;  %v12898_v26 = vld [vmem:[#allocation7 + $0xe58] sm:$0xf0] }
 0x286   :  { %v2960_v40 = vpop.f32.mrf.mxu3  ;;  %v12865_v18 = vor.u32 %v17145_v39, %v12864_v38  ;;  %v12992_v39 = vld [vmem:[#allocation7 + $0xf08] sm:$0xf] }
 0x287   :  { %v17091_v40 = vld [vmem:[#allocation7 + $0xc6c] sm:$0xf] }
 0x288   :  { %3959 = vmatpush.bf16.msra.mxu0 %v12641_v8  ;;  %3968 = vmatpush.bf16.msra.mxu1 %v12833_v49  ;;  %v12753_v49 = vor.u32 %v17117_v2, %v12752_v32  ;;  %v12661_v58 = vor.u32 %v17091_v40, %v12658_v53  ;;  %v12786_v2 = vld [vmem:[#allocation7 + $0xd78] sm:$0xf0]  ;;  %v12965_v53 = vor.u32 %v17167_v51, %v12962_v5  ;;  %v13224_v51 = vld [vmem:[#allocation7 + $0x10e0] sm:$0xf]  ;;  %v17236_v5 = vld [vmem:[#allocation7 + $0x10ec] sm:$0xf0] }
 0x28c   :  { %3960 = vmatpush.bf16.msra.mxu0 %v12625_v54  ;;  %3969 = vmatpush.bf16.msra.mxu1 %v12817_v56  ;;  %v17139_v54 = vld [vmem:[#allocation7 + $0xdec] sm:$0xf]  ;;  %v12850_v56 = vld [vmem:[#allocation7 + $0xdf8] sm:$0xf0] }
 0x28d   :  { %v12853_v63 = vor.u32 %v17139_v54, %v12850_v56  ;;  %v13072_v54 = vld [vmem:[#allocation7 + $0xfa8] sm:$0xf]  ;;  %v17197_v56 = vld [vmem:[#allocation7 + $0xfb4] sm:$0xf0] }
 0x28e   :  { %v3010_v25 = vpop.f32.mrf.mxu3 }
 0x28f   :  { %v3011_v30 = vadd.f32 %v3010_v25, %v2998_v16  ;;  %v18482_v60 = vpop.f32.mrf.mxu2  ;;  %v17153_v16 = vld [vmem:[#allocation7 + $0xe54] sm:$0xf0] }
 0x290   :  { %3961 = vmatpush.bf16.msra.mxu0 %v12609_v10  ;;  %3970 = vmatpush.bf16.msra.mxu1 %v12801_v12  ;;  %v12913_v10 = vor.u32 %v17157_v4, %v12912_v3  ;;  %v12645_v12 = vor.u32 %v17087_v55, %v12642_v6  ;;  %v12897_v25 = vor.u32 %v17153_v16, %v12896_v42  ;;  %v17163_v3 = vld [vmem:[#allocation7 + $0xeac] sm:$0xf]  ;;  %v13056_v6 = vld [vmem:[#allocation7 + $0xf88] sm:$0xf] }
 0x291   :  { %v18484_v14 = vpack.c.bf16 %v3011_v30, %v3011_v30  ;;  %v17079_v30 = vld [vmem:[#allocation7 + $0xc0c] sm:$0xf]  ;;  %v3050_v41 = vadd.f32 %v18482_v60, %v3037_v35  ;;  %v13088_v60 = vld [vmem:[#allocation7 + $0xfc8] sm:$0xf]  ;;  %v13073_v4 = vor.u32 %v17197_v56, %v13072_v54  ;;  %v13057_v42 = vor.u32 %v17193_v7, %v13056_v6  ;;  %v13026_v54 = vld [vmem:[#allocation7 + $0xf58] sm:$0xf0] }
 0x292   :  { %v17147_v35 = vld [vmem:[#allocation7 + $0xe2c] sm:$0xf]  ;;  %v12994_v6 = vld [vmem:[#allocation7 + $0xf18] sm:$0xf0] }
 0x293   :  { %3884 = vmatmul.bf16.vlgmr.msra.gmra.mxu2 %v18484_v14  ;;  %3923 = vmatmul.bf16.vlgmr.msrb.gmra.mxu1 %v18474_v45 }
 0x294   :  { %4006 = vmatpush.bf16.msrb.mxu0 %v12725_v21  ;;  %3971 = vmatpush.bf16.msra.mxu1 %v12785_v31  ;;  %v17083_v21 = vld [vmem:[#allocation7 + $0xc2c] sm:$0xf]  ;;  %v12610_v31 = vld [vmem:[#allocation7 + $0xc18] sm:$0xf0] }
 0x295   :  { %3962 = vmatmul.bf16.vlgmr.msra.gmra.mxu0 %v18463_v57  ;;  %3980 = vmatpush.bf16.msra.mxu2 %v12977_v62  ;;  %v12629_v20 = vor.u32 %v17083_v21, %v12626_v22  ;;  %v17127_v62 = vld [vmem:[#allocation7 + $0xd8c] sm:$0xf]  ;;  %v12613_v37 = vor.u32 %v17079_v30, %v12610_v31  ;;  %v13040_v21 = vld [vmem:[#allocation7 + $0xf68] sm:$0xf]  ;;  %v17189_v22 = vld [vmem:[#allocation7 + $0xf74] sm:$0xf0]  ;;  %v13025_v30 = vor.u32 %v17185_v28, %v13024_v27 }
 0x296   :  { %v3012_v13 = vpop.f32.mrf.mxu3  ;;  %v13336_v27 = vld [vmem:[#allocation7 + $0x11c0] sm:$0xf] }
 0x297   :  { %v3051_v8 = vpop.f32.mrf.mxu2  ;;  %v12978_v13 = vld [vmem:[#allocation7 + $0xef8] sm:$0xf0] }
 0x298   :  { %4007 = vmatpush.bf16.msrb.mxu0 %v12709_v24  ;;  %3972 = vmatpush.bf16.msra.mxu1 %v12769_v36  ;;  %v12802_v24 = vld [vmem:[#allocation7 + $0xd98] sm:$0xf0] }
 0x299   :  { %3981 = vmatpush.bf16.msra.mxu2 %v12961_v43  ;;  %v12805_v36 = vor.u32 %v17127_v62, %v12802_v24  ;;  %v17205_v43 = vld [vmem:[#allocation7 + $0xff4] sm:$0xf0]  ;;  %v13008_v62 = vld [vmem:[#allocation7 + $0xf28] sm:$0xf] }
 0x29a   :  { %v13105_v11 = vor.u32 %v17205_v43, %v13104_v33  ;;  %v17181_v24 = vld [vmem:[#allocation7 + $0xf34] sm:$0xf0]  ;;  %v12866_v33 = vld [vmem:[#allocation7 + $0xe18] sm:$0xf0]  ;;  %v17203_v43 = vld [vmem:[#allocation7 + $0xfec] sm:$0xf] }
 0x29c   :  { %4008 = vmatpush.bf16.msrb.mxu0 %v12693_v44  ;;  %3973 = vmatpush.bf16.msra.mxu1 %v12753_v49  ;;  %v17123_v44 = vld [vmem:[#allocation7 + $0xd6c] sm:$0xf]  ;;  %v12981_v49 = vor.u32 %v17171_v47, %v12978_v13  ;;  %v13090_v13 = vld [vmem:[#allocation7 + $0xfd8] sm:$0xf0] }
 0x29d   :  { %3982 = vmatpush.bf16.msra.mxu2 %v12945_v1  ;;  %v12789_v8 = vor.u32 %v17123_v44, %v12786_v2  ;;  %v17201_v1 = vld [vmem:[#allocation7 + $0xfd4] sm:$0xf0]  ;;  %v13106_v44 = vld [vmem:[#allocation7 + $0xff8] sm:$0xf0]  ;;  %v17199_v47 = vld [vmem:[#allocation7 + $0xfcc] sm:$0xf] }
 0x29e   :  { %v13089_v52 = vor.u32 %v17201_v1, %v13088_v60  ;;  %v13109_v2 = vor.u32 %v17203_v43, %v13106_v44  ;;  %v13058_v60 = vld [vmem:[#allocation7 + $0xf98] sm:$0xf0]  ;;  %v13226_v43 = vld [vmem:[#allocation7 + $0x10f0] sm:$0xf0] }
 0x2a0   :  { %4009 = vmatpush.bf16.msrb.mxu0 %v12677_v46  ;;  %3974 = vmatpush.bf16.msra.mxu1 %v12737_v59  ;;  %v17119_v46 = vld [vmem:[#allocation7 + $0xd4c] sm:$0xf] }
 0x2a1   :  { %3983 = vmatpush.bf16.msra.mxu2 %v12929_v23  ;;  %v12773_v40 = vor.u32 %v17119_v46, %v12770_v0  ;;  %v17115_v59 = vld [vmem:[#allocation7 + $0xd2c] sm:$0xf]  ;;  %v13042_v0 = vld [vmem:[#allocation7 + $0xf78] sm:$0xf0] }
 0x2a2   :  { %v17187_v46 = vld [vmem:[#allocation7 + $0xf6c] sm:$0xf] }
 0x2a3   :  { %3936 = vmatmul.bf16.vlgmr.msrb.gmra.mxu2 %v18484_v14  ;;  %3975 = vmatmul.bf16.vlgmr.msra.gmra.mxu1 %v18474_v45 }
 0x2a4   :  { %4010 = vmatpush.bf16.msrb.mxu0 %v12661_v58  ;;  %4019 = vmatpush.bf16.msrb.mxu1 %v12853_v63  ;;  %v12754_v58 = vld [vmem:[#allocation7 + $0xd38] sm:$0xf0] }
 0x2a5   :  { %3984 = vmatpush.bf16.msra.mxu2 %v12913_v10  ;;  %v12946_v63 = vld [vmem:[#allocation7 + $0xeb8] sm:$0xf0]  ;;  %v17159_v10 = vld [vmem:[#allocation7 + $0xe8c] sm:$0xf] }
 0x2a6   :  { %v12949_v55 = vor.u32 %v17163_v3, %v12946_v63  ;;  %v13192_v63 = vld [vmem:[#allocation7 + $0x10a0] sm:$0xf] }
 0x2a8   :  { %4011 = vmatpush.bf16.msrb.mxu0 %v12645_v12  ;;  %4020 = vmatpush.bf16.msrb.mxu1 %v12837_v15  ;;  %v12930_v12 = vld [vmem:[#allocation7 + $0xe98] sm:$0xf0]  ;;  %v12741_v15 = vor.u32 %v17111_v9, %v12738_v61  ;;  %v13176_v61 = vld [vmem:[#allocation7 + $0x1080] sm:$0xf] }
 0x2a9   :  { %3985 = vmatpush.bf16.msra.mxu2 %v12897_v25  ;;  %v12933_v16 = vor.u32 %v17159_v10, %v12930_v12  ;;  %v13041_v25 = vor.u32 %v17189_v22, %v13040_v21  ;;  %v17224_v10 = vld [vmem:[#allocation7 + $0x108c] sm:$0xf0]  ;;  %v13160_v12 = vld [vmem:[#allocation7 + $0x1060] sm:$0xf] }
 0x2aa   :  { %v17268_v21 = vld [vmem:[#allocation7 + $0x11ec] sm:$0xf0] }
 0x2ac   :  { %4012 = vmatpush.bf16.msrb.mxu0 %v12629_v20  ;;  %4021 = vmatpush.bf16.msrb.mxu1 %v12821_v29  ;;  %v12917_v20 = vor.u32 %v17155_v50, %v12914_v19  ;;  %v17151_v29 = vld [vmem:[#allocation7 + $0xe4c] sm:$0xf] }
 0x2ad   :  { %3986 = vmatpush.bf16.msra.mxu2 %v12881_v34  ;;  %v12901_v31 = vor.u32 %v17151_v29, %v12898_v26  ;;  %v12882_v34 = vld [vmem:[#allocation7 + $0xe38] sm:$0xf0]  ;;  %v17264_v29 = vld [vmem:[#allocation7 + $0x11cc] sm:$0xf0] }
 0x2ae   :  { %v3062_v32 = vpop.f32.mrf.mxu3  ;;  %v12885_v38 = vor.u32 %v17147_v35, %v12882_v34  ;;  %v13337_v26 = vor.u32 %v17264_v29, %v13336_v27  ;;  %v17260_v35 = vld [vmem:[#allocation7 + $0x11ac] sm:$0xf0]  ;;  %v13416_v27 = vld [vmem:[#allocation7 + $0x1260] sm:$0xf] }
 0x2af   :  { %v3063_v17 = vadd.f32 %v3062_v32, %v3050_v41  ;;  %v17177_v41 = vld [vmem:[#allocation7 + $0xf14] sm:$0xf0] }
 0x2b0   :  { %4013 = vmatpush.bf16.msrb.mxu0 %v12613_v37  ;;  %4022 = vmatpush.bf16.msrb.mxu1 %v12805_v36  ;;  %v13009_v37 = vor.u32 %v17181_v24, %v13008_v62  ;;  %v17143_v36 = vld [vmem:[#allocation7 + $0xe0c] sm:$0xf]  ;;  %v12993_v32 = vor.u32 %v17177_v41, %v12992_v39  ;;  %v13320_v62 = vld [vmem:[#allocation7 + $0x11a0] sm:$0xf] }
 0x2b1   :  { %v18495_v48 = vpack.c.bf16 %v3063_v17, %v3063_v17  ;;  %3987 = vmatpush.bf16.msra.mxu2 %v12865_v18  ;;  %v13093_v17 = vor.u32 %v17199_v47, %v13090_v13  ;;  %v17195_v18 = vld [vmem:[#allocation7 + $0xfac] sm:$0xf]  ;;  %v13321_v34 = vor.u32 %v17260_v35, %v13320_v62  ;;  %v13304_v39 = vld [vmem:[#allocation7 + $0x1180] sm:$0xf]  ;;  %v17300_v13 = vld [vmem:[#allocation7 + $0x12ec] sm:$0xf0] }
 0x2b2   :  { %v13480_v47 = vld [vmem:[#allocation7 + $0x12e0] sm:$0xf] }
 0x2b3   :  { %3897 = vmatmul.bf16.vlgmr.msra.gmra.mxu3 %v18495_v48  ;;  %4014 = vmatmul.bf16.vlgmr.msrb.gmra.mxu0 %v18463_v57  ;;  %v12757_v57 = vor.u32 %v17115_v59, %v12754_v58  ;;  %v17179_v59 = vld [vmem:[#allocation7 + $0xf2c] sm:$0xf]  ;;  %v17232_v58 = vld [vmem:[#allocation7 + $0x10cc] sm:$0xf0]  ;;  %v13400_v35 = vld [vmem:[#allocation7 + $0x1240] sm:$0xf] }
 0x2b4   :  { %3993 = vmatpush.bf16.msra.mxu3 %v13105_v11  ;;  %4023 = vmatpush.bf16.msrb.mxu1 %v12789_v8  ;;  %v13074_v11 = vld [vmem:[#allocation7 + $0xfb8] sm:$0xf0] }
 0x2b5   :  { %4032 = vmatpush.bf16.msrb.mxu2 %v12981_v49  ;;  %v13077_v8 = vor.u32 %v17195_v18, %v13074_v11  ;;  %v17191_v49 = vld [vmem:[#allocation7 + $0xf8c] sm:$0xf]  ;;  %v13481_v18 = vor.u32 %v17300_v13, %v13480_v47  ;;  %v17230_v11 = vld [vmem:[#allocation7 + $0x10c4] sm:$0xf] }
 0x2b6   :  { %v3064_v23 = vpop.f32.mrf.mxu3  ;;  %3988 = vmatmul.bf16.vlgmr.msra.gmra.mxu2 %v18484_v14  ;;  %v13061_v1 = vor.u32 %v17191_v49, %v13058_v60  ;;  %v17206_v13 = vld [vmem:[#allocation7 + $0x1004] sm:$0xf] }
 0x2b7   :  { %v13208_v23 = vld [vmem:[#allocation7 + $0x10c0] sm:$0xf] }
 0x2b8   :  { %3994 = vmatpush.bf16.msra.mxu3 %v13089_v52  ;;  %4024 = vmatpush.bf16.msrb.mxu1 %v12773_v40  ;;  %v13225_v52 = vor.u32 %v17236_v5, %v13224_v51  ;;  %v13045_v40 = vor.u32 %v17187_v46, %v13042_v0  ;;  %v13209_v3 = vor.u32 %v17232_v58, %v13208_v23  ;;  %v13272_v46 = vld [vmem:[#allocation7 + $0x1140] sm:$0xf]  ;;  %v17248_v0 = vld [vmem:[#allocation7 + $0x114c] sm:$0xf0] }
 0x2b9   :  { %4033 = vmatpush.bf16.msrb.mxu2 %v12965_v53  ;;  %v17183_v53 = vld [vmem:[#allocation7 + $0xf4c] sm:$0xf]  ;;  %v13464_v51 = vld [vmem:[#allocation7 + $0x12c0] sm:$0xf]  ;;  %v13273_v5 = vor.u32 %v17248_v0, %v13272_v46  ;;  %v17292_v58 = vld [vmem:[#allocation7 + $0x12ac] sm:$0xf0] }
 0x2ba   :  { %4842 = vmatpush.bf16.msra.mxu0 %v13225_v52  ;;  %v13029_v56 = vor.u32 %v17183_v53, %v13026_v54  ;;  %v17296_v52 = vld [vmem:[#allocation7 + $0x12cc] sm:$0xf0]  ;;  %v13194_v53 = vld [vmem:[#allocation7 + $0x10b0] sm:$0xf0]  ;;  %v13448_v23 = vld [vmem:[#allocation7 + $0x12a0] sm:$0xf] }
 0x2bb   :  { %v13465_v54 = vor.u32 %v17296_v52, %v13464_v51  ;;  %v13368_v51 = vld [vmem:[#allocation7 + $0x1200] sm:$0xf] }
 0x2bc   :  { %3995 = vmatpush.bf16.msra.mxu3 %v13073_v4  ;;  %4025 = vmatpush.bf16.msrb.mxu1 %v12757_v57  ;;  %v17228_v4 = vld [vmem:[#allocation7 + $0x10ac] sm:$0xf0]  ;;  %v13608_v52 = vld [vmem:[#allocation7 + $0x13e0] sm:$0xf] }
 0x2bd   :  { %4034 = vmatpush.bf16.msrb.mxu2 %v12949_v55  ;;  %v17175_v55 = vld [vmem:[#allocation7 + $0xf0c] sm:$0xf]  ;;  %v13193_v7 = vor.u32 %v17228_v4, %v13192_v63  ;;  %v13449_v63 = vor.u32 %v17292_v58, %v13448_v23  ;;  %v17222_v4 = vld [vmem:[#allocation7 + $0x1084] sm:$0xf] }
 0x2be   :  { %4843 = vmatpush.bf16.msra.mxu0 %v13209_v3  ;;  %v12997_v9 = vor.u32 %v17175_v55, %v12994_v6  ;;  %v17298_v58 = vld [vmem:[#allocation7 + $0x12e4] sm:$0xf] }
 0x2c0   :  { %3996 = vmatpush.bf16.msra.mxu3 %v13057_v42  ;;  %4026 = vmatpush.bf16.msrb.mxu1 %v12741_v15  ;;  %v13177_v42 = vor.u32 %v17224_v10, %v13176_v61  ;;  %v17220_v15 = vld [vmem:[#allocation7 + $0x106c] sm:$0xf0]  ;;  %v13432_v10 = vld [vmem:[#allocation7 + $0x1280] sm:$0xf] }
 0x2c1   :  { %4035 = vmatpush.bf16.msrb.mxu2 %v12933_v16  ;;  %v13352_v16 = vld [vmem:[#allocation7 + $0x11e0] sm:$0xf]  ;;  %v13161_v50 = vor.u32 %v17220_v15, %v13160_v12  ;;  %v17240_v61 = vld [vmem:[#allocation7 + $0x110c] sm:$0xf0]  ;;  %v17218_v15 = vld [vmem:[#allocation7 + $0x1064] sm:$0xf] }
 0x2c2   :  { %4844 = vmatpush.bf16.msra.mxu0 %v13193_v7  ;;  %v13353_v22 = vor.u32 %v17268_v21, %v13352_v16  ;;  %v13162_v16 = vld [vmem:[#allocation7 + $0x1070] sm:$0xf0] }
 0x2c3   :  { %3949 = vmatmul.bf16.vlgmr.msrb.gmra.mxu3 %v18495_v48  ;;  %4027 = vmatmul.bf16.vlgmr.msrb.gmra.mxu1 %v18474_v45  ;;  %v12869_v45 = vor.u32 %v17143_v36, %v12866_v33  ;;  %v17256_v36 = vld [vmem:[#allocation7 + $0x118c] sm:$0xf0]  ;;  %v17234_v33 = vld [vmem:[#allocation7 + $0x10e4] sm:$0xf] }
 0x2c4   :  { %3997 = vmatpush.bf16.msra.mxu3 %v13041_v25  ;;  %4855 = vmatpush.bf16.msra.mxu1 %v13353_v22  ;;  %v13144_v25 = vld [vmem:[#allocation7 + $0x1040] sm:$0xf]  ;;  %v13305_v44 = vor.u32 %v17256_v36, %v13304_v39  ;;  %v13165_v22 = vor.u32 %v17218_v15, %v13162_v16  ;;  %v13130_v36 = vld [vmem:[#allocation7 + $0x1030] sm:$0xf0] }
 0x2c5   :  { %4036 = vmatpush.bf16.msrb.mxu2 %v12917_v20  ;;  %v17216_v20 = vld [vmem:[#allocation7 + $0x104c] sm:$0xf0]  ;;  %v13576_v16 = vld [vmem:[#allocation7 + $0x13a0] sm:$0xf] }
 0x2c6   :  { %4845 = vmatpush.bf16.msra.mxu0 %v13177_v42  ;;  %v13145_v28 = vor.u32 %v17216_v20, %v13144_v25  ;;  %v17288_v42 = vld [vmem:[#allocation7 + $0x128c] sm:$0xf0]  ;;  %v13354_v25 = vld [vmem:[#allocation7 + $0x11f0] sm:$0xf0] }
 0x2c7   :  { %v13433_v21 = vor.u32 %v17288_v42, %v13432_v10 }
 0x2c8   :  { %3998 = vmatpush.bf16.msra.mxu3 %v13025_v30  ;;  %v13128_v30 = vld [vmem:[#allocation7 + $0x1020] sm:$0xf]  ;;  %4856 = vmatpush.bf16.msra.mxu1 %v13337_v26  ;;  %v17214_v26 = vld [vmem:[#allocation7 + $0x1044] sm:$0xf] }
 0x2c9   :  { %4037 = vmatpush.bf16.msrb.mxu2 %v12901_v31  ;;  %v17212_v31 = vld [vmem:[#allocation7 + $0x102c] sm:$0xf0] }
 0x2ca   :  { %4846 = vmatpush.bf16.msra.mxu0 %v13161_v50  ;;  %v13129_v24 = vor.u32 %v17212_v31, %v13128_v30  ;;  %v17266_v50 = vld [vmem:[#allocation7 + $0x11e4] sm:$0xf]  ;;  %v13146_v30 = vld [vmem:[#allocation7 + $0x1050] sm:$0xf0] }
 0x2cb   :  { %v13357_v20 = vor.u32 %v17266_v50, %v13354_v25  ;;  %v17262_v31 = vld [vmem:[#allocation7 + $0x11c4] sm:$0xf]  ;;  %v13149_v62 = vor.u32 %v17214_v26, %v13146_v30  ;;  %v13258_v25 = vld [vmem:[#allocation7 + $0x1130] sm:$0xf0]  ;;  %v13560_v26 = vld [vmem:[#allocation7 + $0x1380] sm:$0xf] }
 0x2cc   :  { %3999 = vmatpush.bf16.msra.mxu3 %v13009_v37  ;;  %4857 = vmatpush.bf16.msra.mxu1 %v13321_v34  ;;  %v17280_v34 = vld [vmem:[#allocation7 + $0x124c] sm:$0xf0]  ;;  %v17242_v50 = vld [vmem:[#allocation7 + $0x1124] sm:$0xf] }
 0x2cd   :  { %4038 = vmatpush.bf16.msrb.mxu2 %v12885_v38  ;;  %v17208_v38 = vld [vmem:[#allocation7 + $0x100c] sm:$0xf0] }
 0x2ce   :  { %4847 = vmatpush.bf16.msra.mxu0 %v13145_v28  ;;  %v17284_v28 = vld [vmem:[#allocation7 + $0x126c] sm:$0xf0] }
 0x2cf   :  { %v13417_v29 = vor.u32 %v17284_v28, %v13416_v27  ;;  %v13261_v27 = vor.u32 %v17242_v50, %v13258_v25  ;;  %v13450_v28 = vld [vmem:[#allocation7 + $0x12b0] sm:$0xf0]  ;;  %v17320_v30 = vld [vmem:[#allocation7 + $0x138c] sm:$0xf0] }
 0x2d0   :  { %4000 = vmatpush.bf16.msra.mxu3 %v12993_v32  ;;  %v13229_v32 = vor.u32 %v17234_v33, %v13226_v43  ;;  %4858 = vmatpush.bf16.msra.mxu1 %v13305_v44  ;;  %v17258_v33 = vld [vmem:[#allocation7 + $0x11a4] sm:$0xf]  ;;  %v13322_v44 = vld [vmem:[#allocation7 + $0x11b0] sm:$0xf0] }
 0x2d1   :  { %4039 = vmatpush.bf16.msrb.mxu2 %v12869_v45  ;;  %v13288_v45 = vld [vmem:[#allocation7 + $0x1160] sm:$0xf] }
 0x2d2   :  { %4848 = vmatpush.bf16.msra.mxu0 %v13129_v24  ;;  %v13338_v24 = vld [vmem:[#allocation7 + $0x11d0] sm:$0xf0] }
 0x2d3   :  { %4001 = vmatmul.bf16.vlgmr.msra.gmra.mxu3 %v18495_v48 }
 0x2d4   :  { %4045 = vmatpush.bf16.msrb.mxu3 %v13109_v2  ;;  %4040 = vmatmul.bf16.vlgmr.msrb.gmra.mxu2 %v18484_v14  ;;  %v13010_v14 = vld [vmem:[#allocation7 + $0xf38] sm:$0xf0]  ;;  %v17252_v2 = vld [vmem:[#allocation7 + $0x116c] sm:$0xf0] }
 0x2d5   :  { %v13013_v57 = vor.u32 %v17179_v59, %v13010_v14  ;;  %4868 = vmatpush.bf16.msra.mxu2 %v13481_v18  ;;  %v13256_v59 = vld [vmem:[#allocation7 + $0x1120] sm:$0xf]  ;;  %v17244_v14 = vld [vmem:[#allocation7 + $0x112c] sm:$0xf0]  ;;  %v17254_v18 = vld [vmem:[#allocation7 + $0x1184] sm:$0xf] }
 0x2d6   :  { %v13257_v3 = vor.u32 %v17244_v14, %v13256_v59  ;;  %v13290_v59 = vld [vmem:[#allocation7 + $0x1170] sm:$0xf0] }
 0x2d8   :  { %4046 = vmatpush.bf16.msrb.mxu3 %v13093_v17  ;;  %v13289_v17 = vor.u32 %v17252_v2, %v13288_v45  ;;  %v13384_v45 = vld [vmem:[#allocation7 + $0x1220] sm:$0xf]  ;;  %v17276_v2 = vld [vmem:[#allocation7 + $0x122c] sm:$0xf0] }
 0x2d9   :  { %4869 = vmatpush.bf16.msra.mxu2 %v13465_v54  ;;  %v13385_v47 = vor.u32 %v17276_v2, %v13384_v45  ;;  %v17332_v54 = vld [vmem:[#allocation7 + $0x13ec] sm:$0xf0]  ;;  %v17282_v45 = vld [vmem:[#allocation7 + $0x1264] sm:$0xf]  ;;  %v13418_v2 = vld [vmem:[#allocation7 + $0x1270] sm:$0xf0] }
 0x2da   :  { %4859 = vmatpush.bf16.msra.mxu1 %v13289_v17  ;;  %v13114_v17 = vld [vmem:[#allocation7 + $0x1010] sm:$0xf0]  ;;  %v13609_v14 = vor.u32 %v17332_v54, %v13608_v52  ;;  %v17308_v54 = vld [vmem:[#allocation7 + $0x132c] sm:$0xf0] }
 0x2dc   :  { %4047 = vmatpush.bf16.msrb.mxu3 %v13077_v8  ;;  %v13210_v8 = vld [vmem:[#allocation7 + $0x10d0] sm:$0xf0] }
 0x2dd   :  { %v13213_v49 = vor.u32 %v17230_v11, %v13210_v8  ;;  %4870 = vmatpush.bf16.msra.mxu2 %v13449_v63  ;;  %v13117_v8 = vor.u32 %v17206_v13, %v13114_v17  ;;  %v13421_v13 = vor.u32 %v17282_v45, %v13418_v2  ;;  %v13528_v17 = vld [vmem:[#allocation7 + $0x1340] sm:$0xf]  ;;  %v13168_v2 = vld [vmem:[#allocation7 + $0x1068] sm:$0xf] }
 0x2de   :  { %4860 = vmatpush.bf16.msra.mxu1 %v13273_v5  ;;  %v17272_v5 = vld [vmem:[#allocation7 + $0x120c] sm:$0xf0] }
 0x2e0   :  { %4048 = vmatpush.bf16.msrb.mxu3 %v13061_v1 }
 0x2e1   :  { %4871 = vmatpush.bf16.msra.mxu2 %v13433_v21  ;;  %v17324_v21 = vld [vmem:[#allocation7 + $0x13ac] sm:$0xf0] }
 0x2e2   :  { %4861 = vmatpush.bf16.msra.mxu1 %v13257_v3  ;;  %v13482_v3 = vld [vmem:[#allocation7 + $0x12f0] sm:$0xf0] }
 0x2e3   :  { %v13485_v63 = vor.u32 %v17298_v58, %v13482_v3  ;;  %v13232_v58 = vld [vmem:[#allocation7 + $0x10e8] sm:$0xf]  ;;  %v17237_v3 = vld [vmem:[#allocation7 + $0x10f4] sm:$0xf0] }
 0x2e4   :  { %4049 = vmatpush.bf16.msrb.mxu3 %v13045_v40  ;;  %v17226_v40 = vld [vmem:[#allocation7 + $0x10a4] sm:$0xf] }
 0x2e5   :  { %4872 = vmatpush.bf16.msra.mxu2 %v13417_v29 }
 0x2e8   :  { %4050 = vmatpush.bf16.msrb.mxu3 %v13029_v56  ;;  %v13197_v56 = vor.u32 %v17226_v40, %v13194_v53  ;;  %v13369_v53 = vor.u32 %v17272_v5, %v13368_v51 }
 0x2ec   :  { %4051 = vmatpush.bf16.msrb.mxu3 %v13013_v57  ;;  %v13178_v57 = vld [vmem:[#allocation7 + $0x1090] sm:$0xf0] }
 0x2ed   :  { %v13181_v55 = vor.u32 %v17222_v4, %v13178_v57  ;;  %v13592_v4 = vld [vmem:[#allocation7 + $0x13c0] sm:$0xf]  ;;  %v17328_v57 = vld [vmem:[#allocation7 + $0x13cc] sm:$0xf0] }
 0x2f0   :  { %4052 = vmatpush.bf16.msrb.mxu3 %v12997_v9  ;;  %v18505_v19 = vpop.f32.mrf.mxu0  ;;  %v13240_v9 = vld [vmem:[#allocation7 + $0x1100] sm:$0xf] }
 0x2f1   :  { %v13241_v12 = vor.u32 %v17240_v61, %v13240_v9  ;;  %v17294_v9 = vld [vmem:[#allocation7 + $0x12c4] sm:$0xf] }
 0x2f3   :  { %4053 = vmatmul.bf16.vlgmr.msrb.gmra.mxu3 %v18495_v48  ;;  %v13112_v48 = vld [vmem:[#allocation7 + $0x1000] sm:$0xf]  ;;  %4862 = vmatpush.bf16.msra.mxu1 %v13241_v12  ;;  %v13466_v12 = vld [vmem:[#allocation7 + $0x12d0] sm:$0xf0] }
 0x2f4   :  { %v13113_v41 = vor.u32 %v17208_v38, %v13112_v48  ;;  %v13401_v38 = vor.u32 %v17280_v34, %v13400_v35  ;;  %4881 = vmatpush.bf16.msra.mxu3 %v13609_v14  ;;  %v13469_v42 = vor.u32 %v17294_v9, %v13466_v12  ;;  %v17286_v35 = vld [vmem:[#allocation7 + $0x1284] sm:$0xf]  ;;  %v13386_v14 = vld [vmem:[#allocation7 + $0x1230] sm:$0xf0] }
 0x2f5   :  { %v17270_v9 = vld [vmem:[#allocation7 + $0x1204] sm:$0xf] }
 0x2f6   :  { %4849 = vmatpush.bf16.msra.mxu0 %v13113_v41  ;;  %v17210_v41 = vld [vmem:[#allocation7 + $0x1024] sm:$0xf]  ;;  %4873 = vmatpush.bf16.msra.mxu2 %v13401_v38  ;;  %v13434_v38 = vld [vmem:[#allocation7 + $0x1290] sm:$0xf0] }
 0x2f7   :  { %4907 = vmatpush.bf16.msrb.mxu1 %v13357_v20  ;;  %v13133_v43 = vor.u32 %v17210_v41, %v13130_v36  ;;  %v17290_v20 = vld [vmem:[#allocation7 + $0x12a4] sm:$0xf]  ;;  %v18521_v41 = vld [vmem:[#allocation8 + $0xc] sm:$0xf]  ;;  %v13437_v36 = vor.u32 %v17286_v35, %v13434_v38  ;;  %v17225_v38 = vld [vmem:[#allocation7 + $0x1094] sm:$0xf0] }
 0x2f8   :  { %v3861_v37 = vpop.f32.mrf.mxu0  ;;  %v13453_v29 = vor.u32 %v17290_v20, %v13450_v28  ;;  %v3203_v25 = vperm.slane %v18521_v41, 1  ;;  %v17229_v28 = vld [vmem:[#allocation7 + $0x10b4] sm:$0xf0] }
 0x2f9   :  { %v13341_v37 = vor.u32 %v17262_v31, %v13338_v24  ;;  %v13561_v31 = vor.u32 %v17320_v30, %v13560_v26  ;;  %v13242_v24 = vld [vmem:[#allocation7 + $0x1110] sm:$0xf0] }
 0x2fa   :  { %4894 = vmatpush.bf16.msrb.mxu0 %v13229_v32  ;;  %v13325_v32 = vor.u32 %v17258_v33, %v13322_v44  ;;  %4874 = vmatpush.bf16.msra.mxu2 %v13385_v47  ;;  %v17316_v44 = vld [vmem:[#allocation7 + $0x136c] sm:$0xf0]  ;;  %v3202_v47 = vperm.slane %v18521_v41, 0  ;;  %v13594_v26 = vld [vmem:[#allocation7 + $0x13d0] sm:$0xf0] }
 0x2fb   :  { %4908 = vmatpush.bf16.msrb.mxu1 %v13341_v37 }
 0x2fc   :  { %v3860_v51 = vadd.f32 %v18505_v19, %v3202_v47  ;;  %v13496_v19 = vld [vmem:[#allocation7 + $0x1300] sm:$0xf]  ;;  %v17221_v47 = vld [vmem:[#allocation7 + $0x1074] sm:$0xf0] }
 0x2fe   :  { %4895 = vmatpush.bf16.msrb.mxu0 %v13213_v49  ;;  %v13306_v49 = vld [vmem:[#allocation7 + $0x1190] sm:$0xf0]  ;;  %4875 = vmatpush.bf16.msra.mxu2 %v13369_v53  ;;  %v13512_v53 = vld [vmem:[#allocation7 + $0x1320] sm:$0xf] }
 0x2ff   :  { %4909 = vmatpush.bf16.msrb.mxu1 %v13325_v32  ;;  %v13309_v46 = vor.u32 %v17254_v18, %v13306_v49  ;;  %v17312_v18 = vld [vmem:[#allocation7 + $0x134c] sm:$0xf0] }
 0x300   :  { %v18507_v60 = vpop.f32.mrf.mxu1  ;;  %v18509_v1 = vpop.f32.mrf.mxu0  ;;  %v13529_v49 = vor.u32 %v17312_v18, %v13528_v17  ;;  %v17269_v18 = vld [vmem:[#allocation7 + $0x11f4] sm:$0xf0] }
 0x301   :  { %v3912_v35 = vadd.f32 %v18509_v1, %v3203_v25  ;;  %v17318_v1 = vld [vmem:[#allocation7 + $0x1384] sm:$0xf] }
 0x302   :  { %4896 = vmatpush.bf16.msrb.mxu0 %v13197_v56  ;;  %v17250_v56 = vld [vmem:[#allocation7 + $0x1164] sm:$0xf]  ;;  %4920 = vmatpush.bf16.msrb.mxu2 %v13485_v63 }
 0x303   :  { %4910 = vmatpush.bf16.msrb.mxu1 %v13309_v46  ;;  %v13293_v23 = vor.u32 %v17250_v56, %v13290_v59  ;;  %v17278_v46 = vld [vmem:[#allocation7 + $0x1244] sm:$0xf]  ;;  %v13513_v56 = vor.u32 %v17308_v54, %v13512_v53  ;;  %v17217_v53 = vld [vmem:[#allocation7 + $0x1054] sm:$0xf0] }
 0x304   :  { %v17274_v59 = vld [vmem:[#allocation7 + $0x1224] sm:$0xf] }
 0x305   :  { %v13389_v63 = vor.u32 %v17274_v59, %v13386_v14  ;;  %v17265_v59 = vld [vmem:[#allocation7 + $0x11d4] sm:$0xf0]  ;;  %v17314_v14 = vld [vmem:[#allocation7 + $0x1364] sm:$0xf] }
 0x306   :  { %4897 = vmatpush.bf16.msrb.mxu0 %v13181_v55  ;;  %v13593_v55 = vor.u32 %v17328_v57, %v13592_v4  ;;  %4921 = vmatpush.bf16.msrb.mxu2 %v13469_v42  ;;  %v13216_v42 = vld [vmem:[#allocation7 + $0x10c8] sm:$0xf]  ;;  %v17306_v25 = vld [vmem:[#allocation7 + $0x1324] sm:$0xf] }
 0x307   :  { %4911 = vmatpush.bf16.msrb.mxu1 %v13293_v23 }
 0x308   :  { %v3874_v6 = vpop.f32.mrf.mxu1  ;;  %v3913_v7 = vpop.f32.mrf.mxu0  ;;  %4882 = vmatpush.bf16.msra.mxu3 %v13593_v55  ;;  %v17304_v55 = vld [vmem:[#allocation7 + $0x130c] sm:$0xf0] }
 0x309   :  { %v17246_v6 = vld [vmem:[#allocation7 + $0x1144] sm:$0xf]  ;;  %v13274_v7 = vld [vmem:[#allocation7 + $0x1150] sm:$0xf0] }
 0x30a   :  { %4898 = vmatpush.bf16.msrb.mxu0 %v13165_v22  ;;  %v13277_v10 = vor.u32 %v17246_v6, %v13274_v7  ;;  %v13577_v22 = vor.u32 %v17324_v21, %v13576_v16  ;;  %4922 = vmatpush.bf16.msrb.mxu2 %v13453_v29  ;;  %v13233_v7 = vor.u32 %v17237_v3, %v13232_v58  ;;  %v17233_v16 = vld [vmem:[#allocation7 + $0x10d4] sm:$0xf0]  ;;  %v13610_v21 = vld [vmem:[#allocation7 + $0x13f0] sm:$0xf0]  ;;  %v17326_v29 = vld [vmem:[#allocation7 + $0x13c4] sm:$0xf] }
 0x30b   :  { %v13217_v20 = vor.u32 %v17233_v16, %v13216_v42  ;;  %v3204_v58 = vperm.slane %v18521_v41, 2  ;;  %v13120_v42 = vld [vmem:[#allocation7 + $0x1008] sm:$0xf]  ;;  %v17209_v16 = vld [vmem:[#allocation7 + $0x1014] sm:$0xf0] }
 0x30c   :  { %4912 = vmatpush.bf16.msrb.mxu1 %v13277_v10  ;;  %4883 = vmatpush.bf16.msra.mxu3 %v13577_v22  ;;  %v17330_v10 = vld [vmem:[#allocation7 + $0x13e4] sm:$0xf] }
 0x30d   :  { %v13613_v50 = vor.u32 %v17330_v10, %v13610_v21 }
 0x30e   :  { %4899 = vmatpush.bf16.msrb.mxu0 %v13149_v62  ;;  %v17238_v62 = vld [vmem:[#allocation7 + $0x1104] sm:$0xf]  ;;  %4923 = vmatpush.bf16.msrb.mxu2 %v13437_v36 }
 0x30f   :  { %v13245_v37 = vor.u32 %v17238_v62, %v13242_v24  ;;  %v13184_v24 = vld [vmem:[#allocation7 + $0x1088] sm:$0xf]  ;;  %v17322_v36 = vld [vmem:[#allocation7 + $0x13a4] sm:$0xf] }
 0x310   :  { %v18511_v48 = vpop.f32.mrf.mxu1  ;;  %4913 = vmatpush.bf16.msrb.mxu1 %v13261_v27  ;;  %4884 = vmatpush.bf16.msra.mxu3 %v13561_v31  ;;  %v13200_v27 = vld [vmem:[#allocation7 + $0x10a8] sm:$0xf]  ;;  %v13597_v31 = vor.u32 %v17326_v29, %v13594_v26  ;;  %v13185_v45 = vor.u32 %v17225_v38, %v13184_v24  ;;  %v17253_v24 = vld [vmem:[#allocation7 + $0x1174] sm:$0xf0] }
 0x311   :  { %v13201_v62 = vor.u32 %v17229_v28, %v13200_v27  ;;  %v17235_v27 = vld [vmem:[#allocation7 + $0x10ec] sm:$0xf]  ;;  %v13234_v28 = vld [vmem:[#allocation7 + $0x10f8] sm:$0xf0] }
 0x312   :  { %v18513_v39 = vpop.f32.mrf.mxu0  ;;  %4900 = vmatpush.bf16.msrb.mxu0 %v13133_v43  ;;  %v13544_v43 = vld [vmem:[#allocation7 + $0x1360] sm:$0xf]  ;;  %4924 = vmatpush.bf16.msrb.mxu2 %v13421_v13  ;;  %v13360_v13 = vld [vmem:[#allocation7 + $0x11e8] sm:$0xf]  ;;  %v13237_v38 = vor.u32 %v17235_v27, %v13234_v28  ;;  %v13154_v27 = vld [vmem:[#allocation7 + $0x1058] sm:$0xf0] }
 0x313   :  { %v13545_v32 = vor.u32 %v17316_v44, %v13544_v43  ;;  %v3964_v21 = vadd.f32 %v18513_v39, %v3204_v58  ;;  %v17302_v39 = vld [vmem:[#allocation7 + $0x1304] sm:$0xf]  ;;  %v13186_v58 = vld [vmem:[#allocation7 + $0x1098] sm:$0xf0]  ;;  %v17263_v28 = vld [vmem:[#allocation7 + $0x11cc] sm:$0xf] }
 0x314   :  { %4914 = vmatpush.bf16.msrb.mxu1 %v13245_v37 }
 0x315   :  { %4885 = vmatpush.bf16.msra.mxu3 %v13545_v32  ;;  %v3925_v32 = vadd.f32 %v18511_v48, %v3912_v35  ;;  %v13344_v48 = vld [vmem:[#allocation7 + $0x11c8] sm:$0xf] }
 0x316   :  { %v18515_v11 = vpop.f32.mrf.mxu2  ;;  %4901 = vmatpush.bf16.msrb.mxu0 %v13117_v8 }
 0x318   :  { %v3926_v0 = vpop.f32.mrf.mxu1 }
 0x319   :  { %v13402_v0 = vld [vmem:[#allocation7 + $0x1250] sm:$0xf0]  ;;  %4886 = vmatpush.bf16.msra.mxu3 %v13529_v49 }
 0x31a   :  { %v3965_v40 = vpop.f32.mrf.mxu0  ;;  %v13405_v52 = vor.u32 %v17278_v46, %v13402_v0  ;;  %v13562_v49 = vld [vmem:[#allocation7 + $0x1390] sm:$0xf0] }
 0x31b   :  { %v3873_v40 = vadd.f32 %v18507_v60, %v3860_v51  ;;  %v13497_v60 = vor.u32 %v17304_v55, %v13496_v19  ;;  %v13565_v0 = vor.u32 %v17318_v1, %v13562_v49  ;;  %v13328_v19 = vld [vmem:[#allocation7 + $0x11a8] sm:$0xf]  ;;  %v17261_v55 = vld [vmem:[#allocation7 + $0x11b4] sm:$0xf0] }
 0x31c   :  { %4925 = vmatpush.bf16.msrb.mxu2 %v13405_v52  ;;  %v13361_v52 = vor.u32 %v17269_v18, %v13360_v13  ;;  %v13329_v10 = vor.u32 %v17261_v55, %v13328_v19  ;;  %v13280_v1 = vld [vmem:[#allocation7 + $0x1148] sm:$0xf]  ;;  %v17249_v49 = vld [vmem:[#allocation7 + $0x1154] sm:$0xf0] }
 0x31d   :  { %v3886_v23 = vadd.f32 %v18515_v11, %v3873_v40  ;;  %4887 = vmatpush.bf16.msra.mxu3 %v13513_v56  ;;  %v13152_v40 = vld [vmem:[#allocation7 + $0x1048] sm:$0xf]  ;;  %v17241_v55 = vld [vmem:[#allocation7 + $0x1114] sm:$0xf0] }
 0x31e   :  { %v3887_v61 = vpop.f32.mrf.mxu2  ;;  %v13153_v3 = vor.u32 %v17217_v53, %v13152_v40  ;;  %v13248_v19 = vld [vmem:[#allocation7 + $0x1108] sm:$0xf] }
 0x31f   :  { %v13370_v61 = vld [vmem:[#allocation7 + $0x1210] sm:$0xf0] }
 0x320   :  { %v18517_v15 = vpop.f32.mrf.mxu1  ;;  %4926 = vmatpush.bf16.msrb.mxu2 %v13389_v63  ;;  %v13373_v11 = vor.u32 %v17270_v9, %v13370_v61  ;;  %v13345_v63 = vor.u32 %v17265_v59, %v13344_v48  ;;  %v13264_v48 = vld [vmem:[#allocation7 + $0x1128] sm:$0xf] }
 0x321   :  { %4888 = vmatpush.bf16.msra.mxu3 %v13497_v60  ;;  %v3977_v26 = vadd.f32 %v18517_v15, %v3964_v21  ;;  %v13456_v59 = vld [vmem:[#allocation7 + $0x12a8] sm:$0xf] }
 0x322   :  { %v13424_v21 = vld [vmem:[#allocation7 + $0x1268] sm:$0xf] }
 0x324   :  { %4927 = vmatpush.bf16.msrb.mxu2 %v13373_v11  ;;  %v13312_v11 = vld [vmem:[#allocation7 + $0x1188] sm:$0xf] }
 0x325   :  { %4933 = vmatpush.bf16.msrb.mxu3 %v13613_v50  ;;  %v17257_v50 = vld [vmem:[#allocation7 + $0x1194] sm:$0xf0] }
 0x326   :  { %v18519_v34 = vpop.f32.mrf.mxu2 }
 0x327   :  { %v3938_v17 = vadd.f32 %v18519_v34, %v3925_v32  ;;  %v13546_v34 = vld [vmem:[#allocation7 + $0x1370] sm:$0xf0]  ;;  %v17231_v32 = vld [vmem:[#allocation7 + $0x10cc] sm:$0xf] }
 0x328   :  { %v3978_v33 = vpop.f32.mrf.mxu1 }
 0x329   :  { %4934 = vmatpush.bf16.msrb.mxu3 %v13597_v31  ;;  %v13578_v33 = vld [vmem:[#allocation7 + $0x13b0] sm:$0xf0]  ;;  %v13313_v31 = vor.u32 %v17257_v50, %v13312_v11 }
 0x32a   :  { %v13581_v44 = vor.u32 %v17322_v36, %v13578_v33  ;;  %v13488_v36 = vld [vmem:[#allocation7 + $0x12e8] sm:$0xf]  ;;  %v13498_v33 = vld [vmem:[#allocation7 + $0x1310] sm:$0xf0] }
 0x32d   :  { %4935 = vmatpush.bf16.msrb.mxu3 %v13581_v44  ;;  %v17301_v44 = vld [vmem:[#allocation7 + $0x12f4] sm:$0xf0] }
 0x32e   :  { %v3939_v5 = vpop.f32.mrf.mxu2 }
 0x32f   :  { %v13169_v5 = vor.u32 %v17221_v47, %v13168_v2  ;;  %v13501_v2 = vor.u32 %v17302_v39, %v13498_v33  ;;  %v17259_v39 = vld [vmem:[#allocation7 + $0x11ac] sm:$0xf]  ;;  %v13330_v33 = vld [vmem:[#allocation7 + $0x11b8] sm:$0xf0] }
 0x330   :  { %v18524_v8 = vpop.f32.mrf.mxu0 }
 0x331   :  { %4936 = vmatpush.bf16.msrb.mxu3 %v13565_v0  ;;  %v17297_v0 = vld [vmem:[#allocation7 + $0x12d4] sm:$0xf0] }
 0x336   :  { %v3898_v4 = vpop.f32.mrf.mxu3 }
 0x337   :  { %v3899_v57 = vadd.f32 %v3898_v4, %v3886_v23  ;;  %v13549_v23 = vor.u32 %v17314_v14, %v13546_v34  ;;  %v13136_v4 = vld [vmem:[#allocation7 + $0x1028] sm:$0xf]  ;;  %v17293_v34 = vld [vmem:[#allocation7 + $0x12b4] sm:$0xf0] }
 0x338   :  { %v4017_v6 = vpop.f32.mrf.mxu0 }
 0x339   :  { %v18529_v12 = vpack.c.bf16 %v3899_v57, %v3899_v57  ;;  %v18531_v22 = vpop.f32.mrf.mxu2  ;;  %v17213_v57 = vld [vmem:[#allocation7 + $0x1034] sm:$0xf0]  ;;  %4937 = vmatpush.bf16.msrb.mxu3 %v13549_v23  ;;  %v17310_v6 = vld [vmem:[#allocation7 + $0x1344] sm:$0xf]  ;;  %v17223_v23 = vld [vmem:[#allocation7 + $0x108c] sm:$0xf] }
 0x33a   :  { %v13137_v61 = vor.u32 %v17213_v57, %v13136_v4  ;;  %v3990_v35 = vadd.f32 %v18531_v22, %v3977_v26  ;;  %v13489_v22 = vor.u32 %v17301_v44, %v13488_v36  ;;  %v13457_v4 = vor.u32 %v17293_v34, %v13456_v59  ;;  %v13138_v36 = vld [vmem:[#allocation7 + $0x1038] sm:$0xf0]  ;;  %v13392_v44 = vld [vmem:[#allocation7 + $0x1228] sm:$0xf]  ;;  %v17299_v59 = vld [vmem:[#allocation7 + $0x12ec] sm:$0xf] }
 0x33b   :  { %4850 = vmatmul.bf16.vlgmr.msra.gmra.mxu0 %v18529_v12  ;;  %v13189_v57 = vor.u32 %v17223_v23, %v13186_v58  ;;  %v3205_v26 = vperm.slane %v18521_v41, 3 }
 0x33c   :  { %4946 = vmatpush.bf16.msra.mxu0 %v13233_v7  ;;  %v13530_v7 = vld [vmem:[#allocation7 + $0x1350] sm:$0xf0] }
 0x33d   :  { %v13533_v9 = vor.u32 %v17310_v6, %v13530_v7  ;;  %v13440_v6 = vld [vmem:[#allocation7 + $0x1288] sm:$0xf]  ;;  %v17289_v7 = vld [vmem:[#allocation7 + $0x1294] sm:$0xf0] }
 0x33e   :  { %v3900_v30 = vpop.f32.mrf.mxu3 }
 0x33f   :  { %4938 = vmatpush.bf16.msrb.mxu3 %v13533_v9  ;;  %v13121_v30 = vor.u32 %v17209_v16, %v13120_v42  ;;  %v13170_v9 = vld [vmem:[#allocation7 + $0x1078] sm:$0xf0]  ;;  %v13249_v42 = vor.u32 %v17241_v55, %v13248_v19  ;;  %v13441_v16 = vor.u32 %v17289_v7, %v13440_v6  ;;  %v17295_v55 = vld [vmem:[#allocation7 + $0x12cc] sm:$0xf] }
 0x340   :  { %4947 = vmatpush.bf16.msra.mxu0 %v13217_v20  ;;  %v18536_v37 = vpop.f32.mrf.mxu1  ;;  %v13514_v20 = vld [vmem:[#allocation7 + $0x1330] sm:$0xf0]  ;;  %v13282_v19 = vld [vmem:[#allocation7 + $0x1158] sm:$0xf0] }
 0x341   :  { %v3991_v43 = vpop.f32.mrf.mxu2  ;;  %v13517_v29 = vor.u32 %v17306_v25, %v13514_v20  ;;  %v17285_v25 = vld [vmem:[#allocation7 + $0x1274] sm:$0xf0]  ;;  %v17215_v20 = vld [vmem:[#allocation7 + $0x104c] sm:$0xf]  ;;  %v13474_v6 = vld [vmem:[#allocation7 + $0x12d8] sm:$0xf0] }
 0x343   :  { %4939 = vmatpush.bf16.msrb.mxu3 %v13517_v29  ;;  %v13346_v29 = vld [vmem:[#allocation7 + $0x11d8] sm:$0xf0] }
 0x344   :  { %4948 = vmatpush.bf16.msra.mxu0 %v13201_v62  ;;  %v13296_v62 = vld [vmem:[#allocation7 + $0x1168] sm:$0xf] }
 0x345   :  { %v13297_v13 = vor.u32 %v17253_v24, %v13296_v62  ;;  %v13408_v62 = vld [vmem:[#allocation7 + $0x1248] sm:$0xf]  ;;  %v13349_v24 = vor.u32 %v17263_v28, %v13346_v29  ;;  %v17321_v28 = vld [vmem:[#allocation7 + $0x1394] sm:$0xf0]  ;;  %v17239_v29 = vld [vmem:[#allocation7 + $0x110c] sm:$0xf] }
 0x346   :  { %v3950_v46 = vpop.f32.mrf.mxu3 }
 0x347   :  { %v3951_v51 = vadd.f32 %v3950_v46, %v3938_v17  ;;  %v13472_v46 = vld [vmem:[#allocation7 + $0x12c8] sm:$0xf]  ;;  %4940 = vmatpush.bf16.msrb.mxu3 %v13501_v2  ;;  %v17277_v2 = vld [vmem:[#allocation7 + $0x1234] sm:$0xf0] }
 0x348   :  { %4949 = vmatpush.bf16.msra.mxu0 %v13185_v45  ;;  %v4030_v56 = vpop.f32.mrf.mxu1  ;;  %v13218_v45 = vld [vmem:[#allocation7 + $0x10d8] sm:$0xf0]  ;;  %v13473_v40 = vor.u32 %v17297_v0, %v13472_v46  ;;  %v13376_v0 = vld [vmem:[#allocation7 + $0x1208] sm:$0xf] }
 0x349   :  { %v18540_v54 = vpack.c.bf16 %v3951_v51, %v3951_v51  ;;  %v13221_v18 = vor.u32 %v17231_v32, %v13218_v45  ;;  %v17227_v51 = vld [vmem:[#allocation7 + $0x10ac] sm:$0xf]  ;;  %v17245_v56 = vld [vmem:[#allocation7 + $0x1134] sm:$0xf0]  ;;  %v4016_v32 = vadd.f32 %v18524_v8, %v3205_v26  ;;  %v13333_v45 = vor.u32 %v17259_v39, %v13330_v33  ;;  %v13616_v8 = vld [vmem:[#allocation7 + $0x13e8] sm:$0xf] }
 0x34a   :  { %v13250_v26 = vld [vmem:[#allocation7 + $0x1118] sm:$0xf0]  ;;  %v17283_v39 = vld [vmem:[#allocation7 + $0x126c] sm:$0xf] }
 0x34b   :  { %4863 = vmatmul.bf16.vlgmr.msra.gmra.mxu1 %v18540_v54  ;;  %4902 = vmatmul.bf16.vlgmr.msrb.gmra.mxu0 %v18529_v12  ;;  %v13426_v33 = vld [vmem:[#allocation7 + $0x1278] sm:$0xf0] }
 0x34c   :  { %4950 = vmatpush.bf16.msra.mxu0 %v13169_v5  ;;  %4959 = vmatpush.bf16.msra.mxu1 %v13361_v52  ;;  %v13202_v5 = vld [vmem:[#allocation7 + $0x10b8] sm:$0xf0]  ;;  %v13281_v52 = vor.u32 %v17249_v49, %v13280_v1  ;;  %v4029_v1 = vadd.f32 %v18536_v37, %v4016_v32  ;;  %v13393_v49 = vor.u32 %v17277_v2, %v13392_v44  ;;  %v13536_v44 = vld [vmem:[#allocation7 + $0x1348] sm:$0xf]  ;;  %v17313_v32 = vld [vmem:[#allocation7 + $0x1354] sm:$0xf0] }
 0x34d   :  { %v13205_v53 = vor.u32 %v17227_v51, %v13202_v5  ;;  %v17273_v51 = vld [vmem:[#allocation7 + $0x1214] sm:$0xf0]  ;;  %v13410_v2 = vld [vmem:[#allocation7 + $0x1258] sm:$0xf0] }
 0x34e   :  { %v3952_v60 = vpop.f32.mrf.mxu3  ;;  %v13377_v37 = vor.u32 %v17273_v51, %v13376_v0  ;;  %v13504_v51 = vld [vmem:[#allocation7 + $0x1308] sm:$0xf] }
 0x34f   :  { %v17219_v60 = vld [vmem:[#allocation7 + $0x106c] sm:$0xf] }
 0x350   :  { %4951 = vmatpush.bf16.msra.mxu0 %v13153_v3  ;;  %4960 = vmatpush.bf16.msra.mxu1 %v13345_v63  ;;  %v13265_v63 = vor.u32 %v17245_v56, %v13264_v48  ;;  %v13173_v11 = vor.u32 %v17219_v60, %v13170_v9  ;;  %v13298_v56 = vld [vmem:[#allocation7 + $0x1178] sm:$0xf0]  ;;  %v13477_v9 = vor.u32 %v17295_v55, %v13474_v6  ;;  %v13736_v55 = vld [vmem:[#allocation7 + $0x14e0] sm:$0xf]  ;;  %v17364_v6 = vld [vmem:[#allocation7 + $0x14ec] sm:$0xf0] }
 0x354   :  { %4952 = vmatpush.bf16.msra.mxu0 %v13137_v61  ;;  %4961 = vmatpush.bf16.msra.mxu1 %v13329_v10  ;;  %v17267_v61 = vld [vmem:[#allocation7 + $0x11ec] sm:$0xf]  ;;  %v13362_v10 = vld [vmem:[#allocation7 + $0x11f8] sm:$0xf0] }
 0x355   :  { %v13365_v50 = vor.u32 %v17267_v61, %v13362_v10  ;;  %v13584_v61 = vld [vmem:[#allocation7 + $0x13a8] sm:$0xf]  ;;  %v17325_v10 = vld [vmem:[#allocation7 + $0x13b4] sm:$0xf0] }
 0x356   :  { %v4002_v43 = vpop.f32.mrf.mxu3 }
 0x357   :  { %v4003_v47 = vadd.f32 %v4002_v43, %v3990_v35  ;;  %v18548_v15 = vpop.f32.mrf.mxu2  ;;  %v17281_v35 = vld [vmem:[#allocation7 + $0x1254] sm:$0xf0] }
 0x358   :  { %4953 = vmatpush.bf16.msra.mxu0 %v13121_v30  ;;  %4962 = vmatpush.bf16.msra.mxu1 %v13313_v31  ;;  %v13425_v30 = vor.u32 %v17285_v25, %v13424_v21  ;;  %v13157_v31 = vor.u32 %v17215_v20, %v13154_v27  ;;  %v13409_v43 = vor.u32 %v17281_v35, %v13408_v62  ;;  %v17291_v21 = vld [vmem:[#allocation7 + $0x12ac] sm:$0xf]  ;;  %v13568_v27 = vld [vmem:[#allocation7 + $0x1388] sm:$0xf] }
 0x359   :  { %v18550_v17 = vpack.c.bf16 %v4003_v47, %v4003_v47  ;;  %v17207_v47 = vld [vmem:[#allocation7 + $0x100c] sm:$0xf]  ;;  %v4042_v5 = vadd.f32 %v18548_v15, %v4029_v1  ;;  %v13600_v15 = vld [vmem:[#allocation7 + $0x13c8] sm:$0xf]  ;;  %v13585_v25 = vor.u32 %v17325_v10, %v13584_v61  ;;  %v13569_v62 = vor.u32 %v17321_v28, %v13568_v27  ;;  %v13538_v61 = vld [vmem:[#allocation7 + $0x1358] sm:$0xf0] }
 0x35a   :  { %v17275_v1 = vld [vmem:[#allocation7 + $0x122c] sm:$0xf]  ;;  %v13506_v27 = vld [vmem:[#allocation7 + $0x1318] sm:$0xf0] }
 0x35b   :  { %4876 = vmatmul.bf16.vlgmr.msra.gmra.mxu2 %v18550_v17  ;;  %4915 = vmatmul.bf16.vlgmr.msrb.gmra.mxu1 %v18540_v54 }
 0x35c   :  { %4998 = vmatpush.bf16.msrb.mxu0 %v13237_v38  ;;  %4963 = vmatpush.bf16.msra.mxu1 %v13297_v13  ;;  %v17211_v38 = vld [vmem:[#allocation7 + $0x102c] sm:$0xf]  ;;  %v13122_v13 = vld [vmem:[#allocation7 + $0x1018] sm:$0xf0] }
 0x35d   :  { %4954 = vmatmul.bf16.vlgmr.msra.gmra.mxu0 %v18529_v12  ;;  %4972 = vmatpush.bf16.msra.mxu2 %v13489_v22  ;;  %v13141_v41 = vor.u32 %v17211_v38, %v13138_v36  ;;  %v17255_v22 = vld [vmem:[#allocation7 + $0x118c] sm:$0xf]  ;;  %v13125_v46 = vor.u32 %v17207_v47, %v13122_v13  ;;  %v13552_v38 = vld [vmem:[#allocation7 + $0x1368] sm:$0xf]  ;;  %v17317_v36 = vld [vmem:[#allocation7 + $0x1374] sm:$0xf0]  ;;  %v13537_v47 = vor.u32 %v17313_v32, %v13536_v44 }
 0x35e   :  { %v4004_v14 = vpop.f32.mrf.mxu3  ;;  %v13848_v44 = vld [vmem:[#allocation7 + $0x15c0] sm:$0xf] }
 0x35f   :  { %v4043_v3 = vpop.f32.mrf.mxu2  ;;  %v13490_v14 = vld [vmem:[#allocation7 + $0x12f8] sm:$0xf0] }
 0x360   :  { %4999 = vmatpush.bf16.msrb.mxu0 %v13221_v18  ;;  %4964 = vmatpush.bf16.msra.mxu1 %v13281_v52  ;;  %v13314_v18 = vld [vmem:[#allocation7 + $0x1198] sm:$0xf0] }
 0x361   :  { %4973 = vmatpush.bf16.msra.mxu2 %v13473_v40  ;;  %v13317_v52 = vor.u32 %v17255_v22, %v13314_v18  ;;  %v17333_v40 = vld [vmem:[#allocation7 + $0x13f4] sm:$0xf0]  ;;  %v13520_v22 = vld [vmem:[#allocation7 + $0x1328] sm:$0xf] }
 0x362   :  { %v13617_v23 = vor.u32 %v17333_v40, %v13616_v8  ;;  %v17309_v18 = vld [vmem:[#allocation7 + $0x1334] sm:$0xf0]  ;;  %v13378_v8 = vld [vmem:[#allocation7 + $0x1218] sm:$0xf0]  ;;  %v17331_v40 = vld [vmem:[#allocation7 + $0x13ec] sm:$0xf] }
 0x364   :  { %5000 = vmatpush.bf16.msrb.mxu0 %v13205_v53  ;;  %4965 = vmatpush.bf16.msra.mxu1 %v13265_v63  ;;  %v17251_v53 = vld [vmem:[#allocation7 + $0x116c] sm:$0xf]  ;;  %v13493_v63 = vor.u32 %v17299_v59, %v13490_v14  ;;  %v13602_v14 = vld [vmem:[#allocation7 + $0x13d8] sm:$0xf0] }
 0x365   :  { %4974 = vmatpush.bf16.msra.mxu2 %v13457_v4  ;;  %v13301_v3 = vor.u32 %v17251_v53, %v13298_v56  ;;  %v17329_v4 = vld [vmem:[#allocation7 + $0x13d4] sm:$0xf0]  ;;  %v13618_v53 = vld [vmem:[#allocation7 + $0x13f8] sm:$0xf0]  ;;  %v17327_v59 = vld [vmem:[#allocation7 + $0x13cc] sm:$0xf] }
 0x366   :  { %v13601_v7 = vor.u32 %v17329_v4, %v13600_v15  ;;  %v13621_v56 = vor.u32 %v17331_v40, %v13618_v53  ;;  %v13570_v15 = vld [vmem:[#allocation7 + $0x1398] sm:$0xf0]  ;;  %v13738_v40 = vld [vmem:[#allocation7 + $0x14f0] sm:$0xf0] }
 0x368   :  { %5001 = vmatpush.bf16.msrb.mxu0 %v13189_v57  ;;  %4966 = vmatpush.bf16.msra.mxu1 %v13249_v42  ;;  %v17247_v57 = vld [vmem:[#allocation7 + $0x114c] sm:$0xf] }
 0x369   :  { %4975 = vmatpush.bf16.msra.mxu2 %v13441_v16  ;;  %v13285_v60 = vor.u32 %v17247_v57, %v13282_v19  ;;  %v17243_v42 = vld [vmem:[#allocation7 + $0x112c] sm:$0xf]  ;;  %v13554_v19 = vld [vmem:[#allocation7 + $0x1378] sm:$0xf0] }
 0x36a   :  { %v17315_v57 = vld [vmem:[#allocation7 + $0x136c] sm:$0xf] }
 0x36b   :  { %4928 = vmatmul.bf16.vlgmr.msrb.gmra.mxu2 %v18550_v17  ;;  %4967 = vmatmul.bf16.vlgmr.msra.gmra.mxu1 %v18540_v54 }
 0x36c   :  { %5002 = vmatpush.bf16.msrb.mxu0 %v13173_v11  ;;  %5011 = vmatpush.bf16.msrb.mxu1 %v13365_v50  ;;  %v13266_v11 = vld [vmem:[#allocation7 + $0x1138] sm:$0xf0] }
 0x36d   :  { %4976 = vmatpush.bf16.msra.mxu2 %v13425_v30  ;;  %v13458_v50 = vld [vmem:[#allocation7 + $0x12b8] sm:$0xf0]  ;;  %v17287_v30 = vld [vmem:[#allocation7 + $0x128c] sm:$0xf] }
 0x36e   :  { %v13461_v20 = vor.u32 %v17291_v21, %v13458_v50  ;;  %v13704_v50 = vld [vmem:[#allocation7 + $0x14a0] sm:$0xf] }
 0x370   :  { %5003 = vmatpush.bf16.msrb.mxu0 %v13157_v31  ;;  %5012 = vmatpush.bf16.msrb.mxu1 %v13349_v24  ;;  %v13442_v31 = vld [vmem:[#allocation7 + $0x1298] sm:$0xf0]  ;;  %v13253_v24 = vor.u32 %v17239_v29, %v13250_v26  ;;  %v13688_v26 = vld [vmem:[#allocation7 + $0x1480] sm:$0xf] }
 0x371   :  { %4977 = vmatpush.bf16.msra.mxu2 %v13409_v43  ;;  %v13445_v35 = vor.u32 %v17287_v30, %v13442_v31  ;;  %v13553_v43 = vor.u32 %v17317_v36, %v13552_v38  ;;  %v17352_v30 = vld [vmem:[#allocation7 + $0x148c] sm:$0xf0]  ;;  %v13672_v31 = vld [vmem:[#allocation7 + $0x1460] sm:$0xf] }
 0x372   :  { %v17396_v38 = vld [vmem:[#allocation7 + $0x15ec] sm:$0xf0] }
 0x374   :  { %5004 = vmatpush.bf16.msrb.mxu0 %v13141_v41  ;;  %5013 = vmatpush.bf16.msrb.mxu1 %v13333_v45  ;;  %v13429_v41 = vor.u32 %v17283_v39, %v13426_v33  ;;  %v17279_v45 = vld [vmem:[#allocation7 + $0x124c] sm:$0xf] }
 0x375   :  { %4978 = vmatpush.bf16.msra.mxu2 %v13393_v49  ;;  %v13413_v13 = vor.u32 %v17279_v45, %v13410_v2  ;;  %v13394_v49 = vld [vmem:[#allocation7 + $0x1238] sm:$0xf0]  ;;  %v17392_v45 = vld [vmem:[#allocation7 + $0x15cc] sm:$0xf0] }
 0x376   :  { %v4054_v48 = vpop.f32.mrf.mxu3  ;;  %v13397_v0 = vor.u32 %v17275_v1, %v13394_v49  ;;  %v13849_v2 = vor.u32 %v17392_v45, %v13848_v44  ;;  %v17388_v1 = vld [vmem:[#allocation7 + $0x15ac] sm:$0xf0]  ;;  %v13928_v44 = vld [vmem:[#allocation7 + $0x1660] sm:$0xf] }
 0x377   :  { %v4055_v34 = vadd.f32 %v4054_v48, %v4042_v5  ;;  %v17305_v5 = vld [vmem:[#allocation7 + $0x1314] sm:$0xf0] }
 0x378   :  { %5005 = vmatpush.bf16.msrb.mxu0 %v13125_v46  ;;  %5014 = vmatpush.bf16.msrb.mxu1 %v13317_v52  ;;  %v13521_v46 = vor.u32 %v17309_v18, %v13520_v22  ;;  %v17271_v52 = vld [vmem:[#allocation7 + $0x120c] sm:$0xf]  ;;  %v13505_v48 = vor.u32 %v17305_v5, %v13504_v51  ;;  %v13832_v22 = vld [vmem:[#allocation7 + $0x15a0] sm:$0xf] }
 0x379   :  { %v18561_v58 = vpack.c.bf16 %v4055_v34, %v4055_v34  ;;  %4979 = vmatpush.bf16.msra.mxu2 %v13377_v37  ;;  %v13605_v34 = vor.u32 %v17327_v59, %v13602_v14  ;;  %v17323_v37 = vld [vmem:[#allocation7 + $0x13ac] sm:$0xf]  ;;  %v13833_v49 = vor.u32 %v17388_v1, %v13832_v22  ;;  %v13816_v51 = vld [vmem:[#allocation7 + $0x1580] sm:$0xf]  ;;  %v17428_v14 = vld [vmem:[#allocation7 + $0x16ec] sm:$0xf0] }
 0x37a   :  { %v13992_v59 = vld [vmem:[#allocation7 + $0x16e0] sm:$0xf] }
 0x37b   :  { %4889 = vmatmul.bf16.vlgmr.msra.gmra.mxu3 %v18561_v58  ;;  %5006 = vmatmul.bf16.vlgmr.msrb.gmra.mxu0 %v18529_v12  ;;  %v13269_v12 = vor.u32 %v17243_v42, %v13266_v11  ;;  %v17307_v42 = vld [vmem:[#allocation7 + $0x132c] sm:$0xf]  ;;  %v17360_v11 = vld [vmem:[#allocation7 + $0x14cc] sm:$0xf0]  ;;  %v13912_v1 = vld [vmem:[#allocation7 + $0x1640] sm:$0xf] }
 0x37c   :  { %4985 = vmatpush.bf16.msra.mxu3 %v13617_v23  ;;  %5015 = vmatpush.bf16.msrb.mxu1 %v13301_v3  ;;  %v13586_v23 = vld [vmem:[#allocation7 + $0x13b8] sm:$0xf0] }
 0x37d   :  { %5024 = vmatpush.bf16.msrb.mxu2 %v13493_v63  ;;  %v13589_v3 = vor.u32 %v17323_v37, %v13586_v23  ;;  %v17319_v63 = vld [vmem:[#allocation7 + $0x138c] sm:$0xf]  ;;  %v13993_v37 = vor.u32 %v17428_v14, %v13992_v59  ;;  %v17358_v23 = vld [vmem:[#allocation7 + $0x14c4] sm:$0xf] }
 0x37e   :  { %v4056_v16 = vpop.f32.mrf.mxu3  ;;  %4980 = vmatmul.bf16.vlgmr.msra.gmra.mxu2 %v18550_v17  ;;  %v13573_v4 = vor.u32 %v17319_v63, %v13570_v15  ;;  %v17334_v14 = vld [vmem:[#allocation7 + $0x1404] sm:$0xf] }
 0x37f   :  { %v13720_v16 = vld [vmem:[#allocation7 + $0x14c0] sm:$0xf] }
 0x380   :  { %4986 = vmatpush.bf16.msra.mxu3 %v13601_v7  ;;  %5016 = vmatpush.bf16.msrb.mxu1 %v13285_v60  ;;  %v13737_v7 = vor.u32 %v17364_v6, %v13736_v55  ;;  %v13557_v60 = vor.u32 %v17315_v57, %v13554_v19  ;;  %v13721_v21 = vor.u32 %v17360_v11, %v13720_v16  ;;  %v13784_v57 = vld [vmem:[#allocation7 + $0x1540] sm:$0xf]  ;;  %v17376_v19 = vld [vmem:[#allocation7 + $0x154c] sm:$0xf0] }
 0x381   :  { %5025 = vmatpush.bf16.msrb.mxu2 %v13477_v9  ;;  %v17311_v9 = vld [vmem:[#allocation7 + $0x134c] sm:$0xf]  ;;  %v13976_v55 = vld [vmem:[#allocation7 + $0x16c0] sm:$0xf]  ;;  %v13785_v6 = vor.u32 %v17376_v19, %v13784_v57  ;;  %v17420_v11 = vld [vmem:[#allocation7 + $0x16ac] sm:$0xf0] }
 0x382   :  { %5834 = vmatpush.bf16.msra.mxu0 %v13737_v7  ;;  %v13541_v10 = vor.u32 %v17311_v9, %v13538_v61  ;;  %v17424_v7 = vld [vmem:[#allocation7 + $0x16cc] sm:$0xf0]  ;;  %v13706_v9 = vld [vmem:[#allocation7 + $0x14b0] sm:$0xf0]  ;;  %v13960_v16 = vld [vmem:[#allocation7 + $0x16a0] sm:$0xf] }
 0x383   :  { %v13977_v61 = vor.u32 %v17424_v7, %v13976_v55  ;;  %v13880_v55 = vld [vmem:[#allocation7 + $0x1600] sm:$0xf] }
 0x384   :  { %4987 = vmatpush.bf16.msra.mxu3 %v13585_v25  ;;  %5017 = vmatpush.bf16.msrb.mxu1 %v13269_v12  ;;  %v17356_v25 = vld [vmem:[#allocation7 + $0x14ac] sm:$0xf0]  ;;  %v14120_v7 = vld [vmem:[#allocation7 + $0x17e0] sm:$0xf] }
 0x385   :  { %5026 = vmatpush.bf16.msrb.mxu2 %v13461_v20  ;;  %v17303_v20 = vld [vmem:[#allocation7 + $0x130c] sm:$0xf]  ;;  %v13705_v28 = vor.u32 %v17356_v25, %v13704_v50  ;;  %v13961_v50 = vor.u32 %v17420_v11, %v13960_v16  ;;  %v17350_v25 = vld [vmem:[#allocation7 + $0x1484] sm:$0xf] }
 0x386   :  { %5835 = vmatpush.bf16.msra.mxu0 %v13721_v21  ;;  %v13509_v29 = vor.u32 %v17303_v20, %v13506_v27  ;;  %v17426_v11 = vld [vmem:[#allocation7 + $0x16e4] sm:$0xf] }
 0x388   :  { %4988 = vmatpush.bf16.msra.mxu3 %v13569_v62  ;;  %5018 = vmatpush.bf16.msrb.mxu1 %v13253_v24  ;;  %v13689_v62 = vor.u32 %v17352_v30, %v13688_v26  ;;  %v17348_v24 = vld [vmem:[#allocation7 + $0x146c] sm:$0xf0]  ;;  %v13944_v30 = vld [vmem:[#allocation7 + $0x1680] sm:$0xf] }
 0x389   :  { %5027 = vmatpush.bf16.msrb.mxu2 %v13445_v35  ;;  %v13864_v35 = vld [vmem:[#allocation7 + $0x15e0] sm:$0xf]  ;;  %v13673_v39 = vor.u32 %v17348_v24, %v13672_v31  ;;  %v17368_v26 = vld [vmem:[#allocation7 + $0x150c] sm:$0xf0]  ;;  %v17346_v24 = vld [vmem:[#allocation7 + $0x1464] sm:$0xf] }
 0x38a   :  { %5836 = vmatpush.bf16.msra.mxu0 %v13705_v28  ;;  %v13865_v36 = vor.u32 %v17396_v38, %v13864_v35  ;;  %v13674_v35 = vld [vmem:[#allocation7 + $0x1470] sm:$0xf0] }
 0x38b   :  { %4941 = vmatmul.bf16.vlgmr.msrb.gmra.mxu3 %v18561_v58  ;;  %5019 = vmatmul.bf16.vlgmr.msrb.gmra.mxu1 %v18540_v54  ;;  %v13381_v54 = vor.u32 %v17271_v52, %v13378_v8  ;;  %v17384_v52 = vld [vmem:[#allocation7 + $0x158c] sm:$0xf0]  ;;  %v17362_v8 = vld [vmem:[#allocation7 + $0x14e4] sm:$0xf] }
 0x38c   :  { %4989 = vmatpush.bf16.msra.mxu3 %v13553_v43  ;;  %5847 = vmatpush.bf16.msra.mxu1 %v13865_v36  ;;  %v13656_v43 = vld [vmem:[#allocation7 + $0x1440] sm:$0xf]  ;;  %v13817_v53 = vor.u32 %v17384_v52, %v13816_v51  ;;  %v13677_v36 = vor.u32 %v17346_v24, %v13674_v35  ;;  %v13642_v52 = vld [vmem:[#allocation7 + $0x1430] sm:$0xf0] }
 0x38d   :  { %5028 = vmatpush.bf16.msrb.mxu2 %v13429_v41  ;;  %v17344_v41 = vld [vmem:[#allocation7 + $0x144c] sm:$0xf0]  ;;  %v14088_v35 = vld [vmem:[#allocation7 + $0x17a0] sm:$0xf] }
 0x38e   :  { %5837 = vmatpush.bf16.msra.mxu0 %v13689_v62  ;;  %v13657_v32 = vor.u32 %v17344_v41, %v13656_v43  ;;  %v17416_v62 = vld [vmem:[#allocation7 + $0x168c] sm:$0xf0]  ;;  %v13866_v43 = vld [vmem:[#allocation7 + $0x15f0] sm:$0xf0] }
 0x38f   :  { %v13945_v38 = vor.u32 %v17416_v62, %v13944_v30 }
 0x390   :  { %4990 = vmatpush.bf16.msra.mxu3 %v13537_v47  ;;  %v13640_v47 = vld [vmem:[#allocation7 + $0x1420] sm:$0xf]  ;;  %5848 = vmatpush.bf16.msra.mxu1 %v13849_v2  ;;  %v17342_v2 = vld [vmem:[#allocation7 + $0x1444] sm:$0xf] }
 0x391   :  { %5029 = vmatpush.bf16.msrb.mxu2 %v13413_v13  ;;  %v17340_v13 = vld [vmem:[#allocation7 + $0x142c] sm:$0xf0] }
 0x392   :  { %5838 = vmatpush.bf16.msra.mxu0 %v13673_v39  ;;  %v13641_v18 = vor.u32 %v17340_v13, %v13640_v47  ;;  %v17394_v39 = vld [vmem:[#allocation7 + $0x15e4] sm:$0xf]  ;;  %v13658_v47 = vld [vmem:[#allocation7 + $0x1450] sm:$0xf0] }
 0x393   :  { %v13869_v41 = vor.u32 %v17394_v39, %v13866_v43  ;;  %v17390_v13 = vld [vmem:[#allocation7 + $0x15c4] sm:$0xf]  ;;  %v13661_v22 = vor.u32 %v17342_v2, %v13658_v47  ;;  %v13770_v43 = vld [vmem:[#allocation7 + $0x1530] sm:$0xf0]  ;;  %v14072_v2 = vld [vmem:[#allocation7 + $0x1780] sm:$0xf] }
 0x394   :  { %4991 = vmatpush.bf16.msra.mxu3 %v13521_v46  ;;  %5849 = vmatpush.bf16.msra.mxu1 %v13833_v49  ;;  %v17408_v49 = vld [vmem:[#allocation7 + $0x164c] sm:$0xf0]  ;;  %v17370_v39 = vld [vmem:[#allocation7 + $0x1524] sm:$0xf] }
 0x395   :  { %5030 = vmatpush.bf16.msrb.mxu2 %v13397_v0  ;;  %v17336_v0 = vld [vmem:[#allocation7 + $0x140c] sm:$0xf0] }
 0x396   :  { %5839 = vmatpush.bf16.msra.mxu0 %v13657_v32  ;;  %v17412_v32 = vld [vmem:[#allocation7 + $0x166c] sm:$0xf0] }
 0x397   :  { %v13929_v45 = vor.u32 %v17412_v32, %v13928_v44  ;;  %v13773_v44 = vor.u32 %v17370_v39, %v13770_v43  ;;  %v13962_v32 = vld [vmem:[#allocation7 + $0x16b0] sm:$0xf0]  ;;  %v17448_v47 = vld [vmem:[#allocation7 + $0x178c] sm:$0xf0] }
 0x398   :  { %4992 = vmatpush.bf16.msra.mxu3 %v13505_v48  ;;  %v13741_v48 = vor.u32 %v17362_v8, %v13738_v40  ;;  %5850 = vmatpush.bf16.msra.mxu1 %v13817_v53  ;;  %v17386_v8 = vld [vmem:[#allocation7 + $0x15a4] sm:$0xf]  ;;  %v13834_v53 = vld [vmem:[#allocation7 + $0x15b0] sm:$0xf0] }
 0x399   :  { %5031 = vmatpush.bf16.msrb.mxu2 %v13381_v54  ;;  %v13800_v54 = vld [vmem:[#allocation7 + $0x1560] sm:$0xf] }
 0x39a   :  { %5840 = vmatpush.bf16.msra.mxu0 %v13641_v18  ;;  %v13850_v18 = vld [vmem:[#allocation7 + $0x15d0] sm:$0xf0] }
 0x39b   :  { %4993 = vmatmul.bf16.vlgmr.msra.gmra.mxu3 %v18561_v58 }
 0x39c   :  { %5037 = vmatpush.bf16.msrb.mxu3 %v13621_v56  ;;  %5032 = vmatmul.bf16.vlgmr.msrb.gmra.mxu2 %v18550_v17  ;;  %v13522_v17 = vld [vmem:[#allocation7 + $0x1338] sm:$0xf0]  ;;  %v17380_v56 = vld [vmem:[#allocation7 + $0x156c] sm:$0xf0] }
 0x39d   :  { %v13525_v12 = vor.u32 %v17307_v42, %v13522_v17  ;;  %5860 = vmatpush.bf16.msra.mxu2 %v13993_v37  ;;  %v13768_v42 = vld [vmem:[#allocation7 + $0x1520] sm:$0xf]  ;;  %v17372_v17 = vld [vmem:[#allocation7 + $0x152c] sm:$0xf0]  ;;  %v17382_v37 = vld [vmem:[#allocation7 + $0x1584] sm:$0xf] }
 0x39e   :  { %v13769_v21 = vor.u32 %v17372_v17, %v13768_v42  ;;  %v13802_v42 = vld [vmem:[#allocation7 + $0x1570] sm:$0xf0] }
 0x3a0   :  { %5038 = vmatpush.bf16.msrb.mxu3 %v13605_v34  ;;  %v13801_v34 = vor.u32 %v17380_v56, %v13800_v54  ;;  %v13896_v54 = vld [vmem:[#allocation7 + $0x1620] sm:$0xf]  ;;  %v17404_v56 = vld [vmem:[#allocation7 + $0x162c] sm:$0xf0] }
 0x3a1   :  { %5861 = vmatpush.bf16.msra.mxu2 %v13977_v61  ;;  %v13897_v59 = vor.u32 %v17404_v56, %v13896_v54  ;;  %v17460_v61 = vld [vmem:[#allocation7 + $0x17ec] sm:$0xf0]  ;;  %v17410_v54 = vld [vmem:[#allocation7 + $0x1664] sm:$0xf]  ;;  %v13930_v56 = vld [vmem:[#allocation7 + $0x1670] sm:$0xf0] }
 0x3a2   :  { %5851 = vmatpush.bf16.msra.mxu1 %v13801_v34  ;;  %v13626_v34 = vld [vmem:[#allocation7 + $0x1410] sm:$0xf0]  ;;  %v14121_v17 = vor.u32 %v17460_v61, %v14120_v7  ;;  %v17436_v61 = vld [vmem:[#allocation7 + $0x172c] sm:$0xf0] }
 0x3a4   :  { %5039 = vmatpush.bf16.msrb.mxu3 %v13589_v3  ;;  %v13722_v3 = vld [vmem:[#allocation7 + $0x14d0] sm:$0xf0] }
 0x3a5   :  { %v13725_v63 = vor.u32 %v17358_v23, %v13722_v3  ;;  %5862 = vmatpush.bf16.msra.mxu2 %v13961_v50  ;;  %v13629_v3 = vor.u32 %v17334_v14, %v13626_v34  ;;  %v13933_v14 = vor.u32 %v17410_v54, %v13930_v56  ;;  %v14040_v34 = vld [vmem:[#allocation7 + $0x1740] sm:$0xf]  ;;  %v13680_v56 = vld [vmem:[#allocation7 + $0x1468] sm:$0xf] }
 0x3a6   :  { %5852 = vmatpush.bf16.msra.mxu1 %v13785_v6  ;;  %v17400_v6 = vld [vmem:[#allocation7 + $0x160c] sm:$0xf0] }
 0x3a8   :  { %5040 = vmatpush.bf16.msrb.mxu3 %v13573_v4 }
 0x3a9   :  { %5863 = vmatpush.bf16.msra.mxu2 %v13945_v38  ;;  %v17452_v38 = vld [vmem:[#allocation7 + $0x17ac] sm:$0xf0] }
 0x3aa   :  { %5853 = vmatpush.bf16.msra.mxu1 %v13769_v21  ;;  %v13994_v21 = vld [vmem:[#allocation7 + $0x16f0] sm:$0xf0] }
 0x3ab   :  { %v13997_v50 = vor.u32 %v17426_v11, %v13994_v21  ;;  %v13744_v11 = vld [vmem:[#allocation7 + $0x14e8] sm:$0xf]  ;;  %v17365_v21 = vld [vmem:[#allocation7 + $0x14f4] sm:$0xf0] }
 0x3ac   :  { %5041 = vmatpush.bf16.msrb.mxu3 %v13557_v60  ;;  %v17354_v60 = vld [vmem:[#allocation7 + $0x14a4] sm:$0xf] }
 0x3ad   :  { %5864 = vmatpush.bf16.msra.mxu2 %v13929_v45 }
 0x3b0   :  { %5042 = vmatpush.bf16.msrb.mxu3 %v13541_v10  ;;  %v13709_v10 = vor.u32 %v17354_v60, %v13706_v9  ;;  %v13881_v9 = vor.u32 %v17400_v6, %v13880_v55 }
 0x3b4   :  { %5043 = vmatpush.bf16.msrb.mxu3 %v13525_v12  ;;  %v13690_v12 = vld [vmem:[#allocation7 + $0x1490] sm:$0xf0] }
 0x3b5   :  { %v13693_v20 = vor.u32 %v17350_v25, %v13690_v12  ;;  %v14104_v25 = vld [vmem:[#allocation7 + $0x17c0] sm:$0xf]  ;;  %v17456_v12 = vld [vmem:[#allocation7 + $0x17cc] sm:$0xf0] }
 0x3b8   :  { %5044 = vmatpush.bf16.msrb.mxu3 %v13509_v29  ;;  %v18571_v33 = vpop.f32.mrf.mxu0  ;;  %v13752_v29 = vld [vmem:[#allocation7 + $0x1500] sm:$0xf] }
 0x3b9   :  { %v13753_v31 = vor.u32 %v17368_v26, %v13752_v29  ;;  %v17422_v29 = vld [vmem:[#allocation7 + $0x16c4] sm:$0xf] }
 0x3bb   :  { %5045 = vmatmul.bf16.vlgmr.msrb.gmra.mxu3 %v18561_v58  ;;  %v13624_v58 = vld [vmem:[#allocation7 + $0x1400] sm:$0xf]  ;;  %5854 = vmatpush.bf16.msra.mxu1 %v13753_v31  ;;  %v13978_v31 = vld [vmem:[#allocation7 + $0x16d0] sm:$0xf0] }
 0x3bc   :  { %v13625_v5 = vor.u32 %v17336_v0, %v13624_v58  ;;  %v13913_v0 = vor.u32 %v17408_v49, %v13912_v1  ;;  %5873 = vmatpush.bf16.msra.mxu3 %v14121_v17  ;;  %v13981_v62 = vor.u32 %v17422_v29, %v13978_v31  ;;  %v17414_v1 = vld [vmem:[#allocation7 + $0x1684] sm:$0xf]  ;;  %v13898_v17 = vld [vmem:[#allocation7 + $0x1630] sm:$0xf0] }
 0x3bd   :  { %v17398_v29 = vld [vmem:[#allocation7 + $0x1604] sm:$0xf] }
 0x3be   :  { %5841 = vmatpush.bf16.msra.mxu0 %v13625_v5  ;;  %v17338_v5 = vld [vmem:[#allocation7 + $0x1424] sm:$0xf]  ;;  %5865 = vmatpush.bf16.msra.mxu2 %v13913_v0  ;;  %v13946_v0 = vld [vmem:[#allocation7 + $0x1690] sm:$0xf0] }
 0x3bf   :  { %5899 = vmatpush.bf16.msrb.mxu1 %v13869_v41  ;;  %v13645_v40 = vor.u32 %v17338_v5, %v13642_v52  ;;  %v17418_v41 = vld [vmem:[#allocation7 + $0x16a4] sm:$0xf]  ;;  %v18587_v5 = vld [vmem:[#allocation8 + $0x10] sm:$0xf]  ;;  %v13949_v52 = vor.u32 %v17414_v1, %v13946_v0  ;;  %v17353_v0 = vld [vmem:[#allocation7 + $0x1494] sm:$0xf0] }
 0x3c0   :  { %v4853_v46 = vpop.f32.mrf.mxu0  ;;  %v13965_v45 = vor.u32 %v17418_v41, %v13962_v32  ;;  %v4195_v43 = vperm.slane %v18587_v5, 1  ;;  %v17357_v32 = vld [vmem:[#allocation7 + $0x14b4] sm:$0xf0] }
 0x3c1   :  { %v13853_v46 = vor.u32 %v17390_v13, %v13850_v18  ;;  %v14073_v13 = vor.u32 %v17448_v47, %v14072_v2  ;;  %v13754_v18 = vld [vmem:[#allocation7 + $0x1510] sm:$0xf0] }
 0x3c2   :  { %5886 = vmatpush.bf16.msrb.mxu0 %v13741_v48  ;;  %v13837_v48 = vor.u32 %v17386_v8, %v13834_v53  ;;  %5866 = vmatpush.bf16.msra.mxu2 %v13897_v59  ;;  %v17444_v53 = vld [vmem:[#allocation7 + $0x176c] sm:$0xf0]  ;;  %v4194_v59 = vperm.slane %v18587_v5, 0  ;;  %v14106_v2 = vld [vmem:[#allocation7 + $0x17d0] sm:$0xf0] }
 0x3c3   :  { %5900 = vmatpush.bf16.msrb.mxu1 %v13853_v46 }
 0x3c4   :  { %v4852_v55 = vadd.f32 %v18571_v33, %v4194_v59  ;;  %v14008_v33 = vld [vmem:[#allocation7 + $0x1700] sm:$0xf]  ;;  %v17349_v59 = vld [vmem:[#allocation7 + $0x1474] sm:$0xf0] }
 0x3c6   :  { %5887 = vmatpush.bf16.msrb.mxu0 %v13725_v63  ;;  %v13818_v63 = vld [vmem:[#allocation7 + $0x1590] sm:$0xf0]  ;;  %5867 = vmatpush.bf16.msra.mxu2 %v13881_v9  ;;  %v14024_v9 = vld [vmem:[#allocation7 + $0x1720] sm:$0xf] }
 0x3c7   :  { %5901 = vmatpush.bf16.msrb.mxu1 %v13837_v48  ;;  %v13821_v57 = vor.u32 %v17382_v37, %v13818_v63  ;;  %v17440_v37 = vld [vmem:[#allocation7 + $0x174c] sm:$0xf0] }
 0x3c8   :  { %v18573_v15 = vpop.f32.mrf.mxu1  ;;  %v18575_v4 = vpop.f32.mrf.mxu0  ;;  %v14041_v63 = vor.u32 %v17440_v37, %v14040_v34  ;;  %v17397_v37 = vld [vmem:[#allocation7 + $0x15f4] sm:$0xf0] }
 0x3c9   :  { %v4904_v1 = vadd.f32 %v18575_v4, %v4195_v43  ;;  %v17446_v4 = vld [vmem:[#allocation7 + $0x1784] sm:$0xf] }
 0x3ca   :  { %5888 = vmatpush.bf16.msrb.mxu0 %v13709_v10  ;;  %v17378_v10 = vld [vmem:[#allocation7 + $0x1564] sm:$0xf]  ;;  %5912 = vmatpush.bf16.msrb.mxu2 %v13997_v50 }
 0x3cb   :  { %5902 = vmatpush.bf16.msrb.mxu1 %v13821_v57  ;;  %v13805_v16 = vor.u32 %v17378_v10, %v13802_v42  ;;  %v17406_v57 = vld [vmem:[#allocation7 + $0x1644] sm:$0xf]  ;;  %v14025_v10 = vor.u32 %v17436_v61, %v14024_v9  ;;  %v17345_v9 = vld [vmem:[#allocation7 + $0x1454] sm:$0xf0] }
 0x3cc   :  { %v17402_v42 = vld [vmem:[#allocation7 + $0x1624] sm:$0xf] }
 0x3cd   :  { %v13901_v50 = vor.u32 %v17402_v42, %v13898_v17  ;;  %v17393_v42 = vld [vmem:[#allocation7 + $0x15d4] sm:$0xf0]  ;;  %v17442_v17 = vld [vmem:[#allocation7 + $0x1764] sm:$0xf] }
 0x3ce   :  { %5889 = vmatpush.bf16.msrb.mxu0 %v13693_v20  ;;  %v14105_v20 = vor.u32 %v17456_v12, %v14104_v25  ;;  %5913 = vmatpush.bf16.msrb.mxu2 %v13981_v62  ;;  %v13728_v62 = vld [vmem:[#allocation7 + $0x14c8] sm:$0xf]  ;;  %v17434_v43 = vld [vmem:[#allocation7 + $0x1724] sm:$0xf] }
 0x3cf   :  { %5903 = vmatpush.bf16.msrb.mxu1 %v13805_v16 }
 0x3d0   :  { %v4866_v27 = vpop.f32.mrf.mxu1  ;;  %v4905_v28 = vpop.f32.mrf.mxu0  ;;  %5874 = vmatpush.bf16.msra.mxu3 %v14105_v20  ;;  %v17432_v20 = vld [vmem:[#allocation7 + $0x170c] sm:$0xf0] }
 0x3d1   :  { %v17374_v27 = vld [vmem:[#allocation7 + $0x1544] sm:$0xf]  ;;  %v13786_v28 = vld [vmem:[#allocation7 + $0x1550] sm:$0xf0] }
 0x3d2   :  { %5890 = vmatpush.bf16.msrb.mxu0 %v13677_v36  ;;  %v13789_v30 = vor.u32 %v17374_v27, %v13786_v28  ;;  %v14089_v36 = vor.u32 %v17452_v38, %v14088_v35  ;;  %5914 = vmatpush.bf16.msrb.mxu2 %v13965_v45  ;;  %v13745_v28 = vor.u32 %v17365_v21, %v13744_v11  ;;  %v17361_v35 = vld [vmem:[#allocation7 + $0x14d4] sm:$0xf0]  ;;  %v14122_v38 = vld [vmem:[#allocation7 + $0x17f0] sm:$0xf0]  ;;  %v17454_v45 = vld [vmem:[#allocation7 + $0x17c4] sm:$0xf] }
 0x3d3   :  { %v13729_v41 = vor.u32 %v17361_v35, %v13728_v62  ;;  %v4196_v11 = vperm.slane %v18587_v5, 2  ;;  %v13632_v62 = vld [vmem:[#allocation7 + $0x1408] sm:$0xf]  ;;  %v17337_v35 = vld [vmem:[#allocation7 + $0x1414] sm:$0xf0] }
 0x3d4   :  { %5904 = vmatpush.bf16.msrb.mxu1 %v13789_v30  ;;  %5875 = vmatpush.bf16.msra.mxu3 %v14089_v36  ;;  %v17458_v30 = vld [vmem:[#allocation7 + $0x17e4] sm:$0xf] }
 0x3d5   :  { %v14125_v39 = vor.u32 %v17458_v30, %v14122_v38 }
 0x3d6   :  { %5891 = vmatpush.bf16.msrb.mxu0 %v13661_v22  ;;  %v17366_v22 = vld [vmem:[#allocation7 + $0x1504] sm:$0xf]  ;;  %5915 = vmatpush.bf16.msrb.mxu2 %v13949_v52 }
 0x3d7   :  { %v13757_v46 = vor.u32 %v17366_v22, %v13754_v18  ;;  %v13696_v18 = vld [vmem:[#allocation7 + $0x1488] sm:$0xf]  ;;  %v17450_v52 = vld [vmem:[#allocation7 + $0x17a4] sm:$0xf] }
 0x3d8   :  { %v18577_v58 = vpop.f32.mrf.mxu1  ;;  %5905 = vmatpush.bf16.msrb.mxu1 %v13773_v44  ;;  %5876 = vmatpush.bf16.msra.mxu3 %v14073_v13  ;;  %v13712_v44 = vld [vmem:[#allocation7 + $0x14a8] sm:$0xf]  ;;  %v14109_v13 = vor.u32 %v17454_v45, %v14106_v2  ;;  %v13697_v54 = vor.u32 %v17353_v0, %v13696_v18  ;;  %v17381_v18 = vld [vmem:[#allocation7 + $0x1574] sm:$0xf0] }
 0x3d9   :  { %v13713_v22 = vor.u32 %v17357_v32, %v13712_v44  ;;  %v17363_v44 = vld [vmem:[#allocation7 + $0x14ec] sm:$0xf]  ;;  %v13746_v32 = vld [vmem:[#allocation7 + $0x14f8] sm:$0xf0] }
 0x3da   :  { %v18579_v51 = vpop.f32.mrf.mxu0  ;;  %5892 = vmatpush.bf16.msrb.mxu0 %v13645_v40  ;;  %v14056_v40 = vld [vmem:[#allocation7 + $0x1760] sm:$0xf]  ;;  %5916 = vmatpush.bf16.msrb.mxu2 %v13933_v14  ;;  %v13872_v14 = vld [vmem:[#allocation7 + $0x15e8] sm:$0xf]  ;;  %v13749_v0 = vor.u32 %v17363_v44, %v13746_v32  ;;  %v13666_v44 = vld [vmem:[#allocation7 + $0x1458] sm:$0xf0] }
 0x3db   :  { %v14057_v48 = vor.u32 %v17444_v53, %v14056_v40  ;;  %v4956_v38 = vadd.f32 %v18579_v51, %v4196_v11  ;;  %v17430_v51 = vld [vmem:[#allocation7 + $0x1704] sm:$0xf]  ;;  %v13698_v11 = vld [vmem:[#allocation7 + $0x1498] sm:$0xf0]  ;;  %v17391_v32 = vld [vmem:[#allocation7 + $0x15cc] sm:$0xf] }
 0x3dc   :  { %5906 = vmatpush.bf16.msrb.mxu1 %v13757_v46 }
 0x3dd   :  { %5877 = vmatpush.bf16.msra.mxu3 %v14057_v48  ;;  %v4917_v48 = vadd.f32 %v18577_v58, %v4904_v1  ;;  %v13856_v58 = vld [vmem:[#allocation7 + $0x15c8] sm:$0xf] }
 0x3de   :  { %v18581_v23 = vpop.f32.mrf.mxu2  ;;  %5893 = vmatpush.bf16.msrb.mxu0 %v13629_v3 }
 0x3e0   :  { %v4918_v19 = vpop.f32.mrf.mxu1 }
 0x3e1   :  { %v13914_v19 = vld [vmem:[#allocation7 + $0x1650] sm:$0xf0]  ;;  %5878 = vmatpush.bf16.msra.mxu3 %v14041_v63 }
 0x3e2   :  { %v4957_v60 = vpop.f32.mrf.mxu0  ;;  %v13917_v7 = vor.u32 %v17406_v57, %v13914_v19  ;;  %v14074_v63 = vld [vmem:[#allocation7 + $0x1790] sm:$0xf0] }
 0x3e3   :  { %v4865_v60 = vadd.f32 %v18573_v15, %v4852_v55  ;;  %v14009_v15 = vor.u32 %v17432_v20, %v14008_v33  ;;  %v14077_v19 = vor.u32 %v17446_v4, %v14074_v63  ;;  %v13840_v33 = vld [vmem:[#allocation7 + $0x15a8] sm:$0xf]  ;;  %v17389_v20 = vld [vmem:[#allocation7 + $0x15b4] sm:$0xf0] }
 0x3e4   :  { %5917 = vmatpush.bf16.msrb.mxu2 %v13917_v7  ;;  %v13873_v7 = vor.u32 %v17397_v37, %v13872_v14  ;;  %v13841_v30 = vor.u32 %v17389_v20, %v13840_v33  ;;  %v13792_v4 = vld [vmem:[#allocation7 + $0x1548] sm:$0xf]  ;;  %v17377_v63 = vld [vmem:[#allocation7 + $0x1554] sm:$0xf0] }
 0x3e5   :  { %v4878_v16 = vadd.f32 %v18581_v23, %v4865_v60  ;;  %5879 = vmatpush.bf16.msra.mxu3 %v14025_v10  ;;  %v13664_v60 = vld [vmem:[#allocation7 + $0x1448] sm:$0xf]  ;;  %v17369_v20 = vld [vmem:[#allocation7 + $0x1514] sm:$0xf0] }
 0x3e6   :  { %v4879_v26 = vpop.f32.mrf.mxu2  ;;  %v13665_v21 = vor.u32 %v17345_v9, %v13664_v60  ;;  %v13760_v33 = vld [vmem:[#allocation7 + $0x1508] sm:$0xf] }
 0x3e7   :  { %v13882_v26 = vld [vmem:[#allocation7 + $0x1610] sm:$0xf0] }
 0x3e8   :  { %v18583_v24 = vpop.f32.mrf.mxu1  ;;  %5918 = vmatpush.bf16.msrb.mxu2 %v13901_v50  ;;  %v13885_v23 = vor.u32 %v17398_v29, %v13882_v26  ;;  %v13857_v50 = vor.u32 %v17393_v42, %v13856_v58  ;;  %v13776_v58 = vld [vmem:[#allocation7 + $0x1528] sm:$0xf] }
 0x3e9   :  { %5880 = vmatpush.bf16.msra.mxu3 %v14009_v15  ;;  %v4969_v2 = vadd.f32 %v18583_v24, %v4956_v38  ;;  %v13968_v42 = vld [vmem:[#allocation7 + $0x16a8] sm:$0xf] }
 0x3ea   :  { %v13936_v38 = vld [vmem:[#allocation7 + $0x1668] sm:$0xf] }
 0x3ec   :  { %5919 = vmatpush.bf16.msrb.mxu2 %v13885_v23  ;;  %v13824_v23 = vld [vmem:[#allocation7 + $0x1588] sm:$0xf] }
 0x3ed   :  { %5925 = vmatpush.bf16.msrb.mxu3 %v14125_v39  ;;  %v17385_v39 = vld [vmem:[#allocation7 + $0x1594] sm:$0xf0] }
 0x3ee   :  { %v18585_v49 = vpop.f32.mrf.mxu2 }
 0x3ef   :  { %v4930_v34 = vadd.f32 %v18585_v49, %v4917_v48  ;;  %v14058_v49 = vld [vmem:[#allocation7 + $0x1770] sm:$0xf0]  ;;  %v17359_v48 = vld [vmem:[#allocation7 + $0x14cc] sm:$0xf] }
 0x3f0   :  { %v4970_v8 = vpop.f32.mrf.mxu1 }
 0x3f1   :  { %5926 = vmatpush.bf16.msrb.mxu3 %v14109_v13  ;;  %v14090_v8 = vld [vmem:[#allocation7 + $0x17b0] sm:$0xf0]  ;;  %v13825_v13 = vor.u32 %v17385_v39, %v13824_v23 }
 0x3f2   :  { %v14093_v53 = vor.u32 %v17450_v52, %v14090_v8  ;;  %v14000_v52 = vld [vmem:[#allocation7 + $0x16e8] sm:$0xf]  ;;  %v14010_v8 = vld [vmem:[#allocation7 + $0x1710] sm:$0xf0] }
 0x3f5   :  { %5927 = vmatpush.bf16.msrb.mxu3 %v14093_v53  ;;  %v17429_v53 = vld [vmem:[#allocation7 + $0x16f4] sm:$0xf0] }
 0x3f6   :  { %v4931_v6 = vpop.f32.mrf.mxu2 }
 0x3f7   :  { %v13681_v6 = vor.u32 %v17349_v59, %v13680_v56  ;;  %v14013_v56 = vor.u32 %v17430_v51, %v14010_v8  ;;  %v17387_v51 = vld [vmem:[#allocation7 + $0x15ac] sm:$0xf]  ;;  %v13842_v8 = vld [vmem:[#allocation7 + $0x15b8] sm:$0xf0] }
 0x3f8   :  { %v18590_v3 = vpop.f32.mrf.mxu0 }
 0x3f9   :  { %5928 = vmatpush.bf16.msrb.mxu3 %v14077_v19  ;;  %v17425_v19 = vld [vmem:[#allocation7 + $0x16d4] sm:$0xf0] }
 0x3fe   :  { %v4890_v25 = vpop.f32.mrf.mxu3 }
 0x3ff   :  { %v4891_v12 = vadd.f32 %v4890_v25, %v4878_v16  ;;  %v14061_v16 = vor.u32 %v17442_v17, %v14058_v49  ;;  %v13648_v25 = vld [vmem:[#allocation7 + $0x1428] sm:$0xf]  ;;  %v17421_v49 = vld [vmem:[#allocation7 + $0x16b4] sm:$0xf0] }
 0x400   :  { %v5009_v27 = vpop.f32.mrf.mxu0 }
 0x401   :  { %v18595_v31 = vpack.c.bf16 %v4891_v12, %v4891_v12  ;;  %v18597_v36 = vpop.f32.mrf.mxu2  ;;  %v17341_v12 = vld [vmem:[#allocation7 + $0x1434] sm:$0xf0]  ;;  %5929 = vmatpush.bf16.msrb.mxu3 %v14061_v16  ;;  %v17438_v27 = vld [vmem:[#allocation7 + $0x1744] sm:$0xf]  ;;  %v17351_v16 = vld [vmem:[#allocation7 + $0x148c] sm:$0xf] }
 0x402   :  { %v13649_v26 = vor.u32 %v17341_v12, %v13648_v25  ;;  %v4982_v1 = vadd.f32 %v18597_v36, %v4969_v2  ;;  %v14001_v36 = vor.u32 %v17429_v53, %v14000_v52  ;;  %v13969_v25 = vor.u32 %v17421_v49, %v13968_v42  ;;  %v13650_v52 = vld [vmem:[#allocation7 + $0x1438] sm:$0xf0]  ;;  %v13904_v53 = vld [vmem:[#allocation7 + $0x1628] sm:$0xf]  ;;  %v17427_v42 = vld [vmem:[#allocation7 + $0x16ec] sm:$0xf] }
 0x403   :  { %5842 = vmatmul.bf16.vlgmr.msra.gmra.mxu0 %v18595_v31  ;;  %v13701_v12 = vor.u32 %v17351_v16, %v13698_v11  ;;  %v4197_v2 = vperm.slane %v18587_v5, 3 }
 0x404   :  { %5938 = vmatpush.bf16.msra.mxu0 %v13745_v28  ;;  %v14042_v28 = vld [vmem:[#allocation7 + $0x1750] sm:$0xf0] }
 0x405   :  { %v14045_v29 = vor.u32 %v17438_v27, %v14042_v28  ;;  %v13952_v27 = vld [vmem:[#allocation7 + $0x1688] sm:$0xf]  ;;  %v17417_v28 = vld [vmem:[#allocation7 + $0x1694] sm:$0xf0] }
 0x406   :  { %v4892_v47 = vpop.f32.mrf.mxu3 }
 0x407   :  { %5930 = vmatpush.bf16.msrb.mxu3 %v14045_v29  ;;  %v13633_v47 = vor.u32 %v17337_v35, %v13632_v62  ;;  %v13682_v29 = vld [vmem:[#allocation7 + $0x1478] sm:$0xf0]  ;;  %v13761_v62 = vor.u32 %v17369_v20, %v13760_v33  ;;  %v13953_v35 = vor.u32 %v17417_v28, %v13952_v27  ;;  %v17423_v20 = vld [vmem:[#allocation7 + $0x16cc] sm:$0xf] }
 0x408   :  { %5939 = vmatpush.bf16.msra.mxu0 %v13729_v41  ;;  %v18602_v46 = vpop.f32.mrf.mxu1  ;;  %v14026_v41 = vld [vmem:[#allocation7 + $0x1730] sm:$0xf0]  ;;  %v13794_v33 = vld [vmem:[#allocation7 + $0x1558] sm:$0xf0] }
 0x409   :  { %v4983_v40 = vpop.f32.mrf.mxu2  ;;  %v14029_v45 = vor.u32 %v17434_v43, %v14026_v41  ;;  %v17413_v43 = vld [vmem:[#allocation7 + $0x1674] sm:$0xf0]  ;;  %v17343_v41 = vld [vmem:[#allocation7 + $0x144c] sm:$0xf]  ;;  %v13986_v27 = vld [vmem:[#allocation7 + $0x16d8] sm:$0xf0] }
 0x40b   :  { %5931 = vmatpush.bf16.msrb.mxu3 %v14029_v45  ;;  %v13858_v45 = vld [vmem:[#allocation7 + $0x15d8] sm:$0xf0] }
 0x40c   :  { %5940 = vmatpush.bf16.msra.mxu0 %v13713_v22  ;;  %v13808_v22 = vld [vmem:[#allocation7 + $0x1568] sm:$0xf] }
 0x40d   :  { %v13809_v14 = vor.u32 %v17381_v18, %v13808_v22  ;;  %v13920_v22 = vld [vmem:[#allocation7 + $0x1648] sm:$0xf]  ;;  %v13861_v18 = vor.u32 %v17391_v32, %v13858_v45  ;;  %v17449_v45 = vld [vmem:[#allocation7 + $0x1794] sm:$0xf0] }
 0x40e   :  { %v4942_v57 = vpop.f32.mrf.mxu3  ;;  %v14080_v32 = vld [vmem:[#allocation7 + $0x1788] sm:$0xf] }
 0x40f   :  { %v4943_v55 = vadd.f32 %v4942_v57, %v4930_v34  ;;  %v13984_v57 = vld [vmem:[#allocation7 + $0x16c8] sm:$0xf]  ;;  %5932 = vmatpush.bf16.msrb.mxu3 %v14013_v56  ;;  %v17405_v56 = vld [vmem:[#allocation7 + $0x1634] sm:$0xf0] }
 0x410   :  { %5941 = vmatpush.bf16.msra.mxu0 %v13697_v54  ;;  %v5022_v10 = vpop.f32.mrf.mxu1  ;;  %v13730_v54 = vld [vmem:[#allocation7 + $0x14d8] sm:$0xf0]  ;;  %v13985_v60 = vor.u32 %v17425_v19, %v13984_v57  ;;  %v13888_v19 = vld [vmem:[#allocation7 + $0x1608] sm:$0xf] }
 0x411   :  { %v18606_v61 = vpack.c.bf16 %v4943_v55, %v4943_v55  ;;  %v13733_v37 = vor.u32 %v17359_v48, %v13730_v54  ;;  %v17355_v55 = vld [vmem:[#allocation7 + $0x14ac] sm:$0xf]  ;;  %v17373_v10 = vld [vmem:[#allocation7 + $0x1534] sm:$0xf0]  ;;  %v5008_v48 = vadd.f32 %v18590_v3, %v4197_v2  ;;  %v13845_v54 = vor.u32 %v17387_v51, %v13842_v8  ;;  %v14128_v3 = vld [vmem:[#allocation7 + $0x17e8] sm:$0xf] }
 0x412   :  { %v17367_v2 = vld [vmem:[#allocation7 + $0x150c] sm:$0xf]  ;;  %v17445_v51 = vld [vmem:[#allocation7 + $0x1774] sm:$0xf0] }
 0x413   :  { %5855 = vmatmul.bf16.vlgmr.msra.gmra.mxu1 %v18606_v61  ;;  %5894 = vmatmul.bf16.vlgmr.msrb.gmra.mxu0 %v18595_v31  ;;  %v17411_v8 = vld [vmem:[#allocation7 + $0x166c] sm:$0xf] }
 0x414   :  { %5942 = vmatpush.bf16.msra.mxu0 %v13681_v6  ;;  %5951 = vmatpush.bf16.msra.mxu1 %v13873_v7  ;;  %v13714_v6 = vld [vmem:[#allocation7 + $0x14b8] sm:$0xf0]  ;;  %v13793_v7 = vor.u32 %v17377_v63, %v13792_v4  ;;  %v5021_v4 = vadd.f32 %v18602_v46, %v5008_v48  ;;  %v13905_v63 = vor.u32 %v17405_v56, %v13904_v53  ;;  %v14048_v48 = vld [vmem:[#allocation7 + $0x1748] sm:$0xf]  ;;  %v17407_v56 = vld [vmem:[#allocation7 + $0x164c] sm:$0xf] }
 0x415   :  { %v13717_v9 = vor.u32 %v17355_v55, %v13714_v6  ;;  %v17401_v55 = vld [vmem:[#allocation7 + $0x1614] sm:$0xf0] }
 0x416   :  { %v4944_v15 = vpop.f32.mrf.mxu3  ;;  %v13889_v46 = vor.u32 %v17401_v55, %v13888_v19 }
 0x417   :  { %v17347_v15 = vld [vmem:[#allocation7 + $0x146c] sm:$0xf] }
 0x418   :  { %5943 = vmatpush.bf16.msra.mxu0 %v13665_v21  ;;  %5952 = vmatpush.bf16.msra.mxu1 %v13857_v50  ;;  %v13777_v50 = vor.u32 %v17373_v10, %v13776_v58  ;;  %v13685_v23 = vor.u32 %v17347_v15, %v13682_v29  ;;  %v13810_v10 = vld [vmem:[#allocation7 + $0x1578] sm:$0xf0]  ;;  %v13989_v29 = vor.u32 %v17423_v20, %v13986_v27  ;;  %v17443_v20 = vld [vmem:[#allocation7 + $0x176c] sm:$0xf] }
 0x419   :  { %v14066_v27 = vld [vmem:[#allocation7 + $0x1778] sm:$0xf0] }
 0x41c   :  { %5944 = vmatpush.bf16.msra.mxu0 %v13649_v26  ;;  %5953 = vmatpush.bf16.msra.mxu1 %v13841_v30  ;;  %v17395_v26 = vld [vmem:[#allocation7 + $0x15ec] sm:$0xf]  ;;  %v13874_v30 = vld [vmem:[#allocation7 + $0x15f8] sm:$0xf0] }
 0x41d   :  { %v13877_v39 = vor.u32 %v17395_v26, %v13874_v30  ;;  %v14096_v26 = vld [vmem:[#allocation7 + $0x17a8] sm:$0xf]  ;;  %v17453_v30 = vld [vmem:[#allocation7 + $0x17b4] sm:$0xf0] }
 0x41e   :  { %v4994_v40 = vpop.f32.mrf.mxu3 }
 0x41f   :  { %v4995_v59 = vadd.f32 %v4994_v40, %v4982_v1  ;;  %v18614_v24 = vpop.f32.mrf.mxu2  ;;  %v17409_v1 = vld [vmem:[#allocation7 + $0x1654] sm:$0xf0] }
 0x420   :  { %5945 = vmatpush.bf16.msra.mxu0 %v13633_v47  ;;  %5954 = vmatpush.bf16.msra.mxu1 %v13825_v13  ;;  %v13937_v47 = vor.u32 %v17413_v43, %v13936_v38  ;;  %v13669_v13 = vor.u32 %v17343_v41, %v13666_v44  ;;  %v13921_v40 = vor.u32 %v17409_v1, %v13920_v22  ;;  %v17419_v38 = vld [vmem:[#allocation7 + $0x16ac] sm:$0xf]  ;;  %v13954_v22 = vld [vmem:[#allocation7 + $0x1698] sm:$0xf0] }
 0x421   :  { %v18616_v34 = vpack.c.bf16 %v4995_v59, %v4995_v59  ;;  %v17335_v59 = vld [vmem:[#allocation7 + $0x140c] sm:$0xf]  ;;  %v5034_v6 = vadd.f32 %v18614_v24, %v5021_v4  ;;  %v14112_v24 = vld [vmem:[#allocation7 + $0x17c8] sm:$0xf]  ;;  %v14097_v43 = vor.u32 %v17453_v30, %v14096_v26  ;;  %v17437_v4 = vld [vmem:[#allocation7 + $0x1734] sm:$0xf0]  ;;  %v14069_v26 = vor.u32 %v17443_v20, %v14066_v27 }
 0x422   :  { %v17439_v30 = vld [vmem:[#allocation7 + $0x174c] sm:$0xf]  ;;  %v14234_v20 = vld [vmem:[#allocation7 + $0x18d0] sm:$0xf0] }
 0x423   :  { %5868 = vmatmul.bf16.vlgmr.msra.gmra.mxu2 %v18616_v34  ;;  %5907 = vmatmul.bf16.vlgmr.msrb.gmra.mxu1 %v18606_v61 }
 0x424   :  { %5990 = vmatpush.bf16.msrb.mxu0 %v13749_v0  ;;  %5955 = vmatpush.bf16.msra.mxu1 %v13809_v14  ;;  %v17339_v0 = vld [vmem:[#allocation7 + $0x142c] sm:$0xf]  ;;  %v13634_v14 = vld [vmem:[#allocation7 + $0x1418] sm:$0xf0] }
 0x425   :  { %5946 = vmatmul.bf16.vlgmr.msra.gmra.mxu0 %v18595_v31  ;;  %5964 = vmatpush.bf16.msra.mxu2 %v14001_v36  ;;  %v13653_v5 = vor.u32 %v17339_v0, %v13650_v52  ;;  %v17383_v36 = vld [vmem:[#allocation7 + $0x158c] sm:$0xf]  ;;  %v13637_v57 = vor.u32 %v17335_v59, %v13634_v14  ;;  %v14064_v52 = vld [vmem:[#allocation7 + $0x1768] sm:$0xf]  ;;  %v13922_v59 = vld [vmem:[#allocation7 + $0x1658] sm:$0xf0] }
 0x426   :  { %v4996_v17 = vpop.f32.mrf.mxu3 }
 0x427   :  { %v5035_v21 = vpop.f32.mrf.mxu2  ;;  %v14002_v17 = vld [vmem:[#allocation7 + $0x16f8] sm:$0xf0] }
 0x428   :  { %5991 = vmatpush.bf16.msrb.mxu0 %v13733_v37  ;;  %5956 = vmatpush.bf16.msra.mxu1 %v13793_v7  ;;  %v13826_v37 = vld [vmem:[#allocation7 + $0x1598] sm:$0xf0] }
 0x429   :  { %5965 = vmatpush.bf16.msra.mxu2 %v13985_v60  ;;  %v13829_v7 = vor.u32 %v17383_v36, %v13826_v37  ;;  %v17461_v60 = vld [vmem:[#allocation7 + $0x17f4] sm:$0xf0]  ;;  %v13925_v36 = vor.u32 %v17407_v56, %v13922_v59  ;;  %v14032_v37 = vld [vmem:[#allocation7 + $0x1728] sm:$0xf]  ;;  %v17472_v56 = vld [vmem:[#allocation7 + $0x184c] sm:$0xf0] }
 0x42a   :  { %v14129_v16 = vor.u32 %v17461_v60, %v14128_v3  ;;  %v14033_v19 = vor.u32 %v17437_v4, %v14032_v37  ;;  %v17399_v3 = vld [vmem:[#allocation7 + $0x160c] sm:$0xf]  ;;  %v13890_v60 = vld [vmem:[#allocation7 + $0x1618] sm:$0xf0]  ;;  %v14360_v59 = vld [vmem:[#allocation7 + $0x19c0] sm:$0xf] }
 0x42b   :  { %v14152_v4 = vld [vmem:[#allocation7 + $0x1820] sm:$0xf] }
 0x42c   :  { %5992 = vmatpush.bf16.msrb.mxu0 %v13717_v9  ;;  %5957 = vmatpush.bf16.msra.mxu1 %v13777_v50  ;;  %v17379_v9 = vld [vmem:[#allocation7 + $0x156c] sm:$0xf]  ;;  %v14005_v50 = vor.u32 %v17427_v42, %v14002_v17  ;;  %v13893_v42 = vor.u32 %v17399_v3, %v13890_v60  ;;  %v14136_v3 = vld [vmem:[#allocation7 + $0x1800] sm:$0xf]  ;;  %v17464_v60 = vld [vmem:[#allocation7 + $0x180c] sm:$0xf0] }
 0x42d   :  { %5966 = vmatpush.bf16.msra.mxu2 %v13969_v25  ;;  %v13813_v21 = vor.u32 %v17379_v9, %v13810_v10  ;;  %v17457_v25 = vld [vmem:[#allocation7 + $0x17d4] sm:$0xf0]  ;;  %v17459_v9 = vld [vmem:[#allocation7 + $0x17ec] sm:$0xf] }
 0x42e   :  { %v14113_v28 = vor.u32 %v17457_v25, %v14112_v24  ;;  %v17447_v25 = vld [vmem:[#allocation7 + $0x178c] sm:$0xf] }
 0x430   :  { %5993 = vmatpush.bf16.msrb.mxu0 %v13701_v12  ;;  %5958 = vmatpush.bf16.msra.mxu1 %v13761_v62  ;;  %v17375_v12 = vld [vmem:[#allocation7 + $0x154c] sm:$0xf] }
 0x431   :  { %5967 = vmatpush.bf16.msra.mxu2 %v13953_v35  ;;  %v13797_v15 = vor.u32 %v17375_v12, %v13794_v33  ;;  %v17371_v62 = vld [vmem:[#allocation7 + $0x152c] sm:$0xf]  ;;  %v14082_v12 = vld [vmem:[#allocation7 + $0x1798] sm:$0xf0] }
 0x432   :  { %v14085_v33 = vor.u32 %v17447_v25, %v14082_v12 }
 0x433   :  { %5920 = vmatmul.bf16.vlgmr.msrb.gmra.mxu2 %v18616_v34  ;;  %5959 = vmatmul.bf16.vlgmr.msra.gmra.mxu1 %v18606_v61 }
 0x434   :  { %5994 = vmatpush.bf16.msrb.mxu0 %v13685_v23  ;;  %6003 = vmatpush.bf16.msrb.mxu1 %v13877_v39  ;;  %v13778_v23 = vld [vmem:[#allocation7 + $0x1538] sm:$0xf0] }
 0x435   :  { %5968 = vmatpush.bf16.msra.mxu2 %v13937_v47  ;;  %v13970_v39 = vld [vmem:[#allocation7 + $0x16b8] sm:$0xf0]  ;;  %v13781_v41 = vor.u32 %v17371_v62, %v13778_v23  ;;  %v17435_v23 = vld [vmem:[#allocation7 + $0x172c] sm:$0xf] }
 0x436   :  { %v13973_v44 = vor.u32 %v17419_v38, %v13970_v39  ;;  %v13762_v47 = vld [vmem:[#allocation7 + $0x1518] sm:$0xf0]  ;;  %v14232_v39 = vld [vmem:[#allocation7 + $0x18c0] sm:$0xf] }
 0x437   :  { %v13765_v1 = vor.u32 %v17367_v2, %v13762_v47  ;;  %v14050_v62 = vld [vmem:[#allocation7 + $0x1758] sm:$0xf0]  ;;  %v17431_v2 = vld [vmem:[#allocation7 + $0x170c] sm:$0xf] }
 0x438   :  { %5995 = vmatpush.bf16.msrb.mxu0 %v13669_v13  ;;  %6004 = vmatpush.bf16.msrb.mxu1 %v13861_v18  ;;  %v17415_v13 = vld [vmem:[#allocation7 + $0x168c] sm:$0xf]  ;;  %v14081_v18 = vor.u32 %v17449_v45, %v14080_v32  ;;  %v14034_v38 = vld [vmem:[#allocation7 + $0x1738] sm:$0xf0]  ;;  %v17484_v32 = vld [vmem:[#allocation7 + $0x18ac] sm:$0xf0] }
 0x439   :  { %5969 = vmatpush.bf16.msra.mxu2 %v13921_v40  ;;  %v13957_v0 = vor.u32 %v17415_v13, %v13954_v22  ;;  %v13938_v40 = vld [vmem:[#allocation7 + $0x1678] sm:$0xf0]  ;;  %v14037_v45 = vor.u32 %v17435_v23, %v14034_v38  ;;  %v17482_v23 = vld [vmem:[#allocation7 + $0x18a4] sm:$0xf]  ;;  %v14218_v38 = vld [vmem:[#allocation7 + $0x18b0] sm:$0xf0] }
 0x43a   :  { %v13941_v53 = vor.u32 %v17411_v8, %v13938_v40  ;;  %v14018_v47 = vld [vmem:[#allocation7 + $0x1718] sm:$0xf0]  ;;  %v14376_v8 = vld [vmem:[#allocation7 + $0x19e0] sm:$0xf]  ;;  %v17524_v40 = vld [vmem:[#allocation7 + $0x19ec] sm:$0xf0] }
 0x43b   :  { %v14021_v22 = vor.u32 %v17431_v2, %v14018_v47 }
 0x43c   :  { %5996 = vmatpush.bf16.msrb.mxu0 %v13653_v5  ;;  %6005 = vmatpush.bf16.msrb.mxu1 %v13845_v54  ;;  %v14065_v5 = vor.u32 %v17445_v51, %v14064_v52  ;;  %v17441_v54 = vld [vmem:[#allocation7 + $0x1754] sm:$0xf0]  ;;  %v17476_v51 = vld [vmem:[#allocation7 + $0x186c] sm:$0xf0] }
 0x43d   :  { %5970 = vmatpush.bf16.msra.mxu2 %v13905_v63  ;;  %v14049_v14 = vor.u32 %v17441_v54, %v14048_v48  ;;  %v17403_v63 = vld [vmem:[#allocation7 + $0x162c] sm:$0xf]  ;;  %v14168_v54 = vld [vmem:[#allocation7 + $0x1840] sm:$0xf] }
 0x43e   :  { %v5046_v58 = vpop.f32.mrf.mxu3 }
 0x43f   :  { %v5047_v49 = vadd.f32 %v5046_v58, %v5034_v6  ;;  %v14016_v6 = vld [vmem:[#allocation7 + $0x1708] sm:$0xf]  ;;  %v14130_v58 = vld [vmem:[#allocation7 + $0x17f8] sm:$0xf0] }
 0x440   :  { %5997 = vmatpush.bf16.msrb.mxu0 %v13637_v57  ;;  %6006 = vmatpush.bf16.msrb.mxu1 %v13829_v7  ;;  %v13906_v57 = vld [vmem:[#allocation7 + $0x1638] sm:$0xf0]  ;;  %v17433_v7 = vld [vmem:[#allocation7 + $0x1714] sm:$0xf0]  ;;  %v14133_v17 = vor.u32 %v17459_v9, %v14130_v58  ;;  %v14328_v9 = vld [vmem:[#allocation7 + $0x1980] sm:$0xf]  ;;  %v14137_v58 = vor.u32 %v17464_v60, %v14136_v3 }
 0x441   :  { %v18627_v11 = vpack.c.bf16 %v5047_v49, %v5047_v49  ;;  %5971 = vmatpush.bf16.msra.mxu2 %v13889_v46  ;;  %v13909_v55 = vor.u32 %v17403_v63, %v13906_v57  ;;  %v14017_v10 = vor.u32 %v17433_v7, %v14016_v6  ;;  %v17455_v49 = vld [vmem:[#allocation7 + $0x17cc] sm:$0xf]  ;;  %v14114_v46 = vld [vmem:[#allocation7 + $0x17d8] sm:$0xf0]  ;;  %v17468_v63 = vld [vmem:[#allocation7 + $0x182c] sm:$0xf0] }
 0x442   :  { %v14344_v57 = vld [vmem:[#allocation7 + $0x19a0] sm:$0xf]  ;;  %v14362_v3 = vld [vmem:[#allocation7 + $0x19d0] sm:$0xf0] }
 0x443   :  { %5881 = vmatmul.bf16.vlgmr.msra.gmra.mxu3 %v18627_v11  ;;  %5998 = vmatmul.bf16.vlgmr.msrb.gmra.mxu0 %v18595_v31  ;;  %v14424_v60 = vld [vmem:[#allocation7 + $0x1a40] sm:$0xf] }
 0x444   :  { %5977 = vmatpush.bf16.msra.mxu3 %v14129_v16  ;;  %6007 = vmatpush.bf16.msrb.mxu1 %v13813_v21  ;;  %v14117_v16 = vor.u32 %v17455_v49, %v14114_v46  ;;  %v17451_v21 = vld [vmem:[#allocation7 + $0x17ac] sm:$0xf] }
 0x445   :  { %6016 = vmatpush.bf16.msrb.mxu2 %v14005_v50  ;;  %v14098_v50 = vld [vmem:[#allocation7 + $0x17b8] sm:$0xf0] }
 0x446   :  { %v5048_v35 = vpop.f32.mrf.mxu3  ;;  %5972 = vmatmul.bf16.vlgmr.msra.gmra.mxu2 %v18616_v34  ;;  %v14101_v24 = vor.u32 %v17451_v21, %v14098_v50  ;;  %v17508_v21 = vld [vmem:[#allocation7 + $0x196c] sm:$0xf0]  ;;  %v14504_v50 = vld [vmem:[#allocation7 + $0x1ae0] sm:$0xf] }
 0x447   :  { %v14053_v35 = vor.u32 %v17439_v30, %v14050_v62  ;;  %v14488_v30 = vld [vmem:[#allocation7 + $0x1ac0] sm:$0xf] }
 0x448   :  { %5978 = vmatpush.bf16.msra.mxu3 %v14113_v28  ;;  %6008 = vmatpush.bf16.msrb.mxu1 %v13797_v15  ;;  %v14248_v28 = vld [vmem:[#allocation7 + $0x18e0] sm:$0xf]  ;;  %v17492_v15 = vld [vmem:[#allocation7 + $0x18ec] sm:$0xf0] }
 0x449   :  { %6017 = vmatpush.bf16.msrb.mxu2 %v13989_v29  ;;  %v14249_v29 = vor.u32 %v17492_v15, %v14248_v28 }
 0x44b   :  { %6826 = vmatpush.bf16.msra.mxu0 %v14249_v29  ;;  %v14296_v29 = vld [vmem:[#allocation7 + $0x1940] sm:$0xf] }
 0x44c   :  { %5979 = vmatpush.bf16.msra.mxu3 %v14097_v43  ;;  %6009 = vmatpush.bf16.msrb.mxu1 %v13781_v41  ;;  %v17488_v43 = vld [vmem:[#allocation7 + $0x18cc] sm:$0xf0] }
 0x44d   :  { %6018 = vmatpush.bf16.msrb.mxu2 %v13973_v44  ;;  %v14233_v41 = vor.u32 %v17488_v43, %v14232_v39  ;;  %v14216_v44 = vld [vmem:[#allocation7 + $0x18a0] sm:$0xf]  ;;  %v14221_v43 = vor.u32 %v17482_v23, %v14218_v38 }
 0x44e   :  { %v14217_v13 = vor.u32 %v17484_v32, %v14216_v44  ;;  %v17500_v44 = vld [vmem:[#allocation7 + $0x192c] sm:$0xf0]  ;;  %v14472_v32 = vld [vmem:[#allocation7 + $0x1aa0] sm:$0xf] }
 0x44f   :  { %6827 = vmatpush.bf16.msra.mxu0 %v14233_v41  ;;  %v14280_v41 = vld [vmem:[#allocation7 + $0x1920] sm:$0xf] }
 0x450   :  { %5980 = vmatpush.bf16.msra.mxu3 %v14081_v18  ;;  %6010 = vmatpush.bf16.msrb.mxu1 %v13765_v1  ;;  %v14200_v18 = vld [vmem:[#allocation7 + $0x1880] sm:$0xf]  ;;  %v17480_v1 = vld [vmem:[#allocation7 + $0x188c] sm:$0xf0]  ;;  %v14281_v2 = vor.u32 %v17500_v44, %v14280_v41 }
 0x451   :  { %6019 = vmatpush.bf16.msrb.mxu2 %v13957_v0  ;;  %v14184_v0 = vld [vmem:[#allocation7 + $0x1860] sm:$0xf]  ;;  %v14201_v52 = vor.u32 %v17480_v1, %v14200_v18 }
 0x452   :  { %v14392_v38 = vld [vmem:[#allocation7 + $0x1a00] sm:$0xf] }
 0x453   :  { %5933 = vmatmul.bf16.vlgmr.msrb.gmra.mxu3 %v18627_v11  ;;  %6011 = vmatmul.bf16.vlgmr.msrb.gmra.mxu1 %v18606_v61 }
 0x454   :  { %5981 = vmatpush.bf16.msra.mxu3 %v14065_v5  ;;  %6828 = vmatpush.bf16.msra.mxu0 %v14217_v13  ;;  %v14377_v5 = vor.u32 %v17524_v40, %v14376_v8  ;;  %v17478_v13 = vld [vmem:[#allocation7 + $0x1884] sm:$0xf]  ;;  %v14456_v8 = vld [vmem:[#allocation7 + $0x1a80] sm:$0xf] }
 0x455   :  { %6020 = vmatpush.bf16.msrb.mxu2 %v13941_v53  ;;  %v14185_v53 = vor.u32 %v17476_v51, %v14184_v0  ;;  %v17496_v51 = vld [vmem:[#allocation7 + $0x190c] sm:$0xf0] }
 0x456   :  { %6839 = vmatpush.bf16.msra.mxu1 %v14377_v5  ;;  %v17544_v5 = vld [vmem:[#allocation7 + $0x1a8c] sm:$0xf0] }
 0x458   :  { %5982 = vmatpush.bf16.msra.mxu3 %v14049_v14  ;;  %6829 = vmatpush.bf16.msra.mxu0 %v14201_v52  ;;  %v14169_v14 = vor.u32 %v17472_v56, %v14168_v54  ;;  %v14264_v52 = vld [vmem:[#allocation7 + $0x1900] sm:$0xf]  ;;  %v14186_v54 = vld [vmem:[#allocation7 + $0x1870] sm:$0xf0]  ;;  %v14457_v56 = vor.u32 %v17544_v5, %v14456_v8  ;;  %v17502_v8 = vld [vmem:[#allocation7 + $0x1944] sm:$0xf] }
 0x459   :  { %6021 = vmatpush.bf16.msrb.mxu2 %v13925_v36  ;;  %v17520_v36 = vld [vmem:[#allocation7 + $0x19cc] sm:$0xf0]  ;;  %v14265_v40 = vor.u32 %v17496_v51, %v14264_v52  ;;  %v17550_v5 = vld [vmem:[#allocation7 + $0x1ac4] sm:$0xf] }
 0x45a   :  { %v14361_v37 = vor.u32 %v17520_v36, %v14360_v59  ;;  %v14378_v36 = vld [vmem:[#allocation7 + $0x19f0] sm:$0xf0]  ;;  %v17584_v52 = vld [vmem:[#allocation7 + $0x1bcc] sm:$0xf0] }
 0x45c   :  { %5983 = vmatpush.bf16.msra.mxu3 %v14033_v19  ;;  %6830 = vmatpush.bf16.msra.mxu0 %v14185_v53  ;;  %v14153_v19 = vor.u32 %v17468_v63, %v14152_v4  ;;  %v17474_v53 = vld [vmem:[#allocation7 + $0x1864] sm:$0xf]  ;;  %v14440_v4 = vld [vmem:[#allocation7 + $0x1a60] sm:$0xf]  ;;  %v17540_v63 = vld [vmem:[#allocation7 + $0x1a6c] sm:$0xf0] }
 0x45d   :  { %6022 = vmatpush.bf16.msrb.mxu2 %v13909_v55  ;;  %v17516_v55 = vld [vmem:[#allocation7 + $0x19ac] sm:$0xf0]  ;;  %6840 = vmatpush.bf16.msra.mxu1 %v14361_v37  ;;  %v14189_v59 = vor.u32 %v17474_v53, %v14186_v54 }
 0x45e   :  { %v14345_v6 = vor.u32 %v17516_v55, %v14344_v57  ;;  %v14441_v57 = vor.u32 %v17540_v63, %v14440_v4  ;;  %v14170_v55 = vld [vmem:[#allocation7 + $0x1850] sm:$0xf0]  ;;  %v17498_v63 = vld [vmem:[#allocation7 + $0x1924] sm:$0xf] }
 0x460   :  { %5984 = vmatpush.bf16.msra.mxu3 %v14017_v10  ;;  %6831 = vmatpush.bf16.msra.mxu0 %v14169_v14  ;;  %v17512_v10 = vld [vmem:[#allocation7 + $0x198c] sm:$0xf0]  ;;  %v17522_v14 = vld [vmem:[#allocation7 + $0x19e4] sm:$0xf] }
 0x461   :  { %6023 = vmatpush.bf16.msrb.mxu2 %v13893_v42  ;;  %6841 = vmatpush.bf16.msra.mxu1 %v14345_v6  ;;  %v17490_v42 = vld [vmem:[#allocation7 + $0x18e4] sm:$0xf]  ;;  %v14329_v49 = vor.u32 %v17512_v10, %v14328_v9  ;;  %v14381_v37 = vor.u32 %v17522_v14, %v14378_v36  ;;  %v17536_v9 = vld [vmem:[#allocation7 + $0x1a4c] sm:$0xf0]  ;;  %v14600_v36 = vld [vmem:[#allocation7 + $0x1ba0] sm:$0xf] }
 0x462   :  { %v17518_v6 = vld [vmem:[#allocation7 + $0x19c4] sm:$0xf] }
 0x463   :  { %5985 = vmatmul.bf16.vlgmr.msra.gmra.mxu3 %v18627_v11 }
 0x464   :  { %6029 = vmatpush.bf16.msrb.mxu3 %v14133_v17  ;;  %6024 = vmatmul.bf16.vlgmr.msrb.gmra.mxu2 %v18616_v34  ;;  %v14250_v17 = vld [vmem:[#allocation7 + $0x18f0] sm:$0xf0] }
 0x465   :  { %6832 = vmatpush.bf16.msra.mxu0 %v14153_v19  ;;  %v14253_v46 = vor.u32 %v17490_v42, %v14250_v17  ;;  %6842 = vmatpush.bf16.msra.mxu1 %v14329_v49  ;;  %v17470_v19 = vld [vmem:[#allocation7 + $0x1844] sm:$0xf]  ;;  %v14425_v42 = vor.u32 %v17536_v9, %v14424_v60  ;;  %v17576_v60 = vld [vmem:[#allocation7 + $0x1b8c] sm:$0xf0] }
 0x466   :  { %v17466_v49 = vld [vmem:[#allocation7 + $0x1824] sm:$0xf] }
 0x468   :  { %6030 = vmatpush.bf16.msrb.mxu3 %v14117_v16  ;;  %v14312_v16 = vld [vmem:[#allocation7 + $0x1960] sm:$0xf] }
 0x469   :  { %6833 = vmatpush.bf16.msra.mxu0 %v14137_v58  ;;  %v14313_v25 = vor.u32 %v17508_v21, %v14312_v16  ;;  %v14365_v58 = vor.u32 %v17518_v6, %v14362_v3  ;;  %v17514_v16 = vld [vmem:[#allocation7 + $0x19a4] sm:$0xf]  ;;  %v14474_v6 = vld [vmem:[#allocation7 + $0x1ab0] sm:$0xf0]  ;;  %v14584_v3 = vld [vmem:[#allocation7 + $0x1b80] sm:$0xf] }
 0x46a   :  { %v14585_v9 = vor.u32 %v17576_v60, %v14584_v3  ;;  %v14224_v60 = vld [vmem:[#allocation7 + $0x18a8] sm:$0xf] }
 0x46b   :  { %6843 = vmatpush.bf16.msra.mxu1 %v14313_v25  ;;  %v14408_v25 = vld [vmem:[#allocation7 + $0x1a20] sm:$0xf] }
 0x46c   :  { %6031 = vmatpush.bf16.msrb.mxu3 %v14101_v24  ;;  %v17556_v24 = vld [vmem:[#allocation7 + $0x1aec] sm:$0xf0] }
 0x46d   :  { %6878 = vmatpush.bf16.msrb.mxu0 %v14253_v46  ;;  %v14505_v12 = vor.u32 %v17556_v24, %v14504_v50  ;;  %v14154_v46 = vld [vmem:[#allocation7 + $0x1830] sm:$0xf0] }
 0x46e   :  { %v14157_v21 = vor.u32 %v17466_v49, %v14154_v46  ;;  %v14346_v50 = vld [vmem:[#allocation7 + $0x19b0] sm:$0xf0]  ;;  %v17542_v49 = vld [vmem:[#allocation7 + $0x1a84] sm:$0xf] }
 0x46f   :  { %6852 = vmatpush.bf16.msra.mxu2 %v14505_v12  ;;  %v14349_v24 = vor.u32 %v17514_v16, %v14346_v50  ;;  %v17532_v12 = vld [vmem:[#allocation7 + $0x1a2c] sm:$0xf0]  ;;  %v18653_v50 = vld [vmem:[#allocation8 + $0x14] sm:$0xf] }
 0x470   :  { %6032 = vmatpush.bf16.msrb.mxu3 %v14085_v33  ;;  %v17486_v33 = vld [vmem:[#allocation7 + $0x18c4] sm:$0xf] }
 0x471   :  { %v14237_v27 = vor.u32 %v17486_v33, %v14234_v20  ;;  %v14409_v33 = vor.u32 %v17532_v12, %v14408_v25  ;;  %v17462_v20 = vld [vmem:[#allocation7 + $0x1804] sm:$0xf]  ;;  %v14568_v12 = vld [vmem:[#allocation7 + $0x1b60] sm:$0xf] }
 0x473   :  { %6879 = vmatpush.bf16.msrb.mxu0 %v14237_v27  ;;  %v14138_v27 = vld [vmem:[#allocation7 + $0x1810] sm:$0xf0] }
 0x474   :  { %6033 = vmatpush.bf16.msrb.mxu3 %v14069_v26  ;;  %v17504_v26 = vld [vmem:[#allocation7 + $0x194c] sm:$0xf0] }
 0x475   :  { %v14297_v62 = vor.u32 %v17504_v26, %v14296_v29  ;;  %v17510_v29 = vld [vmem:[#allocation7 + $0x1984] sm:$0xf] }
 0x477   :  { %6844 = vmatpush.bf16.msra.mxu1 %v14297_v62  ;;  %6880 = vmatpush.bf16.msrb.mxu0 %v14221_v43  ;;  %v14330_v62 = vld [vmem:[#allocation7 + $0x1990] sm:$0xf0]  ;;  %v14632_v43 = vld [vmem:[#allocation7 + $0x1be0] sm:$0xf] }
 0x478   :  { %6034 = vmatpush.bf16.msrb.mxu3 %v14053_v35  ;;  %v17552_v35 = vld [vmem:[#allocation7 + $0x1acc] sm:$0xf0] }
 0x479   :  { %v14489_v39 = vor.u32 %v17552_v35, %v14488_v30  ;;  %v14141_v30 = vor.u32 %v17462_v20, %v14138_v27  ;;  %v14333_v35 = vor.u32 %v17510_v29, %v14330_v62  ;;  %v17538_v27 = vld [vmem:[#allocation7 + $0x1a64] sm:$0xf]  ;;  %v14442_v29 = vld [vmem:[#allocation7 + $0x1a70] sm:$0xf0] }
 0x47a   :  { %v14445_v62 = vor.u32 %v17538_v27, %v14442_v29  ;;  %v14602_v27 = vld [vmem:[#allocation7 + $0x1bb0] sm:$0xf0] }
 0x47b   :  { %6853 = vmatpush.bf16.msra.mxu2 %v14489_v39  ;;  %6845 = vmatpush.bf16.msra.mxu1 %v14281_v2  ;;  %v17528_v39 = vld [vmem:[#allocation7 + $0x1a0c] sm:$0xf0]  ;;  %v14314_v2 = vld [vmem:[#allocation7 + $0x1970] sm:$0xf0] }
 0x47c   :  { %6035 = vmatpush.bf16.msrb.mxu3 %v14037_v45  ;;  %v17548_v45 = vld [vmem:[#allocation7 + $0x1aac] sm:$0xf0]  ;;  %v14393_v44 = vor.u32 %v17528_v39, %v14392_v38 }
 0x47d   :  { %v14473_v47 = vor.u32 %v17548_v45, %v14472_v32  ;;  %v17588_v32 = vld [vmem:[#allocation7 + $0x1bec] sm:$0xf0]  ;;  %v17506_v45 = vld [vmem:[#allocation7 + $0x1964] sm:$0xf] }
 0x47f   :  { %6854 = vmatpush.bf16.msra.mxu2 %v14473_v47  ;;  %6846 = vmatpush.bf16.msra.mxu1 %v14265_v40  ;;  %v14633_v47 = vor.u32 %v17588_v32, %v14632_v43  ;;  %v14298_v40 = vld [vmem:[#allocation7 + $0x1950] sm:$0xf0]  ;;  %v17534_v43 = vld [vmem:[#allocation7 + $0x1a44] sm:$0xf] }
 0x480   :  { %6036 = vmatpush.bf16.msrb.mxu3 %v14021_v22  ;;  %v18637_v48 = vpop.f32.mrf.mxu0  ;;  %v14202_v22 = vld [vmem:[#allocation7 + $0x1890] sm:$0xf0]  ;;  %v14301_v54 = vor.u32 %v17502_v8, %v14298_v40 }
 0x481   :  { %v14205_v18 = vor.u32 %v17478_v13, %v14202_v22  ;;  %v14317_v13 = vor.u32 %v17506_v45, %v14314_v2  ;;  %v17554_v22 = vld [vmem:[#allocation7 + $0x1ae4] sm:$0xf] }
 0x483   :  { %6037 = vmatmul.bf16.vlgmr.msrb.gmra.mxu3 %v18627_v11  ;;  %6881 = vmatpush.bf16.msrb.mxu0 %v14205_v18  ;;  %v14506_v18 = vld [vmem:[#allocation7 + $0x1af0] sm:$0xf0] }
 0x484   :  { %6855 = vmatpush.bf16.msra.mxu2 %v14457_v56  ;;  %6891 = vmatpush.bf16.msrb.mxu1 %v14381_v37  ;;  %v14490_v56 = vld [vmem:[#allocation7 + $0x1ad0] sm:$0xf0]  ;;  %v17580_v37 = vld [vmem:[#allocation7 + $0x1bac] sm:$0xf0] }
 0x485   :  { %6865 = vmatpush.bf16.msra.mxu3 %v14633_v47  ;;  %v14601_v4 = vor.u32 %v17580_v37, %v14600_v36  ;;  %v14536_v47 = vld [vmem:[#allocation7 + $0x1b20] sm:$0xf]  ;;  %v14394_v36 = vld [vmem:[#allocation7 + $0x1a10] sm:$0xf0]  ;;  %v17586_v37 = vld [vmem:[#allocation7 + $0x1be4] sm:$0xf] }
 0x487   :  { %6882 = vmatpush.bf16.msrb.mxu0 %v14189_v59  ;;  %v14493_v59 = vor.u32 %v17550_v5, %v14490_v56 }
 0x488   :  { %v5845_v7 = vpop.f32.mrf.mxu0  ;;  %6856 = vmatpush.bf16.msra.mxu2 %v14441_v57  ;;  %6892 = vmatpush.bf16.msrb.mxu1 %v14365_v58  ;;  %v14282_v57 = vld [vmem:[#allocation7 + $0x1930] sm:$0xf0]  ;;  %v17494_v58 = vld [vmem:[#allocation7 + $0x1904] sm:$0xf] }
 0x489   :  { %v14173_v7 = vor.u32 %v17470_v19, %v14170_v55  ;;  %v17546_v19 = vld [vmem:[#allocation7 + $0x1aa4] sm:$0xf]  ;;  %v14285_v55 = vor.u32 %v17498_v63, %v14282_v57  ;;  %v14240_v63 = vld [vmem:[#allocation7 + $0x18c8] sm:$0xf]  ;;  %v17489_v57 = vld [vmem:[#allocation7 + $0x18d4] sm:$0xf0] }
 0x48a   :  { %v14241_v3 = vor.u32 %v17489_v57, %v14240_v63 }
 0x48b   :  { %6883 = vmatpush.bf16.msrb.mxu0 %v14173_v7  ;;  %v14477_v7 = vor.u32 %v17546_v19, %v14474_v6  ;;  %v14634_v19 = vld [vmem:[#allocation7 + $0x1bf0] sm:$0xf0] }
 0x48c   :  { %6857 = vmatpush.bf16.msra.mxu2 %v14425_v42  ;;  %6893 = vmatpush.bf16.msrb.mxu1 %v14349_v24  ;;  %v14266_v42 = vld [vmem:[#allocation7 + $0x1910] sm:$0xf0]  ;;  %v14637_v6 = vor.u32 %v17586_v37, %v14634_v19 }
 0x48d   :  { %v14269_v16 = vor.u32 %v17494_v58, %v14266_v42  ;;  %v17582_v58 = vld [vmem:[#allocation7 + $0x1bc4] sm:$0xf]  ;;  %v14618_v42 = vld [vmem:[#allocation7 + $0x1bd0] sm:$0xf0] }
 0x48e   :  { %v14554_v37 = vld [vmem:[#allocation7 + $0x1b50] sm:$0xf0] }
 0x48f   :  { %6884 = vmatpush.bf16.msrb.mxu0 %v14157_v21  ;;  %v14458_v21 = vld [vmem:[#allocation7 + $0x1a90] sm:$0xf0] }
 0x490   :  { %v18639_v28 = vpop.f32.mrf.mxu1  ;;  %v18641_v15 = vpop.f32.mrf.mxu0  ;;  %6858 = vmatpush.bf16.msra.mxu2 %v14409_v33  ;;  %6894 = vmatpush.bf16.msrb.mxu1 %v14333_v35  ;;  %v14461_v24 = vor.u32 %v17542_v49, %v14458_v21  ;;  %v17572_v33 = vld [vmem:[#allocation7 + $0x1b6c] sm:$0xf0]  ;;  %v14552_v35 = vld [vmem:[#allocation7 + $0x1b40] sm:$0xf] }
 0x491   :  { %v14569_v20 = vor.u32 %v17572_v33, %v14568_v12  ;;  %v17481_v33 = vld [vmem:[#allocation7 + $0x1894] sm:$0xf0] }
 0x493   :  { %6885 = vmatpush.bf16.msrb.mxu0 %v14141_v30  ;;  %v5186_v30 = vperm.slane %v18653_v50, 0 }
 0x494   :  { %6859 = vmatpush.bf16.msra.mxu2 %v14393_v44  ;;  %6895 = vmatpush.bf16.msrb.mxu1 %v14317_v13  ;;  %v17564_v13 = vld [vmem:[#allocation7 + $0x1b2c] sm:$0xf0] }
 0x495   :  { %v5844_v44 = vadd.f32 %v18637_v48, %v5186_v30  ;;  %v14520_v48 = vld [vmem:[#allocation7 + $0x1b00] sm:$0xf] }
 0x497   :  { %v5857_v2 = vadd.f32 %v18639_v28, %v5844_v44  ;;  %v17525_v44 = vld [vmem:[#allocation7 + $0x19f4] sm:$0xf0] }
 0x498   :  { %v5858_v1 = vpop.f32.mrf.mxu1  ;;  %v5897_v0 = vpop.f32.mrf.mxu0  ;;  %6896 = vmatpush.bf16.msrb.mxu1 %v14301_v54 }
 0x499   :  { %v14509_v1 = vor.u32 %v17554_v22, %v14506_v18  ;;  %v14616_v0 = vld [vmem:[#allocation7 + $0x1bc0] sm:$0xf]  ;;  %v14537_v22 = vor.u32 %v17564_v13, %v14536_v47  ;;  %v17530_v18 = vld [vmem:[#allocation7 + $0x1a24] sm:$0xf] }
 0x49a   :  { %v14617_v51 = vor.u32 %v17584_v52, %v14616_v0  ;;  %v14256_v52 = vld [vmem:[#allocation7 + $0x18e8] sm:$0xf] }
 0x49b   :  { %6904 = vmatpush.bf16.msrb.mxu2 %v14509_v1  ;;  %v14410_v1 = vld [vmem:[#allocation7 + $0x1a30] sm:$0xf0] }
 0x49c   :  { %6866 = vmatpush.bf16.msra.mxu3 %v14617_v51  ;;  %6897 = vmatpush.bf16.msrb.mxu1 %v14285_v55  ;;  %v17493_v51 = vld [vmem:[#allocation7 + $0x18f4] sm:$0xf0]  ;;  %v14413_v8 = vor.u32 %v17530_v18, %v14410_v1  ;;  %v14176_v18 = vld [vmem:[#allocation7 + $0x1848] sm:$0xf] }
 0x49d   :  { %v14257_v56 = vor.u32 %v17493_v51, %v14256_v52  ;;  %v17473_v1 = vld [vmem:[#allocation7 + $0x1854] sm:$0xf0] }
 0x49e   :  { %v17521_v51 = vld [vmem:[#allocation7 + $0x19d4] sm:$0xf0] }
 0x49f   :  { %6905 = vmatpush.bf16.msrb.mxu2 %v14493_v59  ;;  %v17526_v59 = vld [vmem:[#allocation7 + $0x1a04] sm:$0xf] }
 0x4a0   :  { %v18643_v10 = vpop.f32.mrf.mxu1  ;;  %6867 = vmatpush.bf16.msra.mxu3 %v14601_v4  ;;  %6898 = vmatpush.bf16.msrb.mxu1 %v14269_v16  ;;  %v14621_v16 = vor.u32 %v17582_v58, %v14618_v42  ;;  %v17562_v58 = vld [vmem:[#allocation7 + $0x1b24] sm:$0xf]  ;;  %v14538_v42 = vld [vmem:[#allocation7 + $0x1b30] sm:$0xf0] }
 0x4a2   :  { %v18645_v17 = vpop.f32.mrf.mxu0 }
 0x4a3   :  { %6906 = vmatpush.bf16.msrb.mxu2 %v14477_v7  ;;  %v5187_v7 = vperm.slane %v18653_v50, 1 }
 0x4a4   :  { %6868 = vmatpush.bf16.msra.mxu3 %v14585_v9  ;;  %v17485_v9 = vld [vmem:[#allocation7 + $0x18b4] sm:$0xf0] }
 0x4a5   :  { %v14225_v21 = vor.u32 %v17485_v9, %v14224_v60  ;;  %v17513_v9 = vld [vmem:[#allocation7 + $0x1994] sm:$0xf0] }
 0x4a6   :  { %v18647_v26 = vpop.f32.mrf.mxu2 }
 0x4a7   :  { %6907 = vmatpush.bf16.msrb.mxu2 %v14461_v24  ;;  %v5870_v0 = vadd.f32 %v18647_v26, %v5857_v2  ;;  %v14397_v26 = vor.u32 %v17526_v59, %v14394_v36  ;;  %v14208_v24 = vld [vmem:[#allocation7 + $0x1888] sm:$0xf]  ;;  %v17517_v59 = vld [vmem:[#allocation7 + $0x19b4] sm:$0xf0]  ;;  %v17566_v36 = vld [vmem:[#allocation7 + $0x1b44] sm:$0xf] }
 0x4a8   :  { %v5910_v23 = vpop.f32.mrf.mxu1  ;;  %6869 = vmatpush.bf16.msra.mxu3 %v14569_v20  ;;  %v17578_v20 = vld [vmem:[#allocation7 + $0x1ba4] sm:$0xf]  ;;  %v14557_v57 = vor.u32 %v17566_v36, %v14554_v37 }
 0x4a9   :  { %v17568_v23 = vld [vmem:[#allocation7 + $0x1b4c] sm:$0xf0]  ;;  %v14605_v30 = vor.u32 %v17578_v20, %v14602_v27  ;;  %v14320_v20 = vld [vmem:[#allocation7 + $0x1968] sm:$0xf]  ;;  %v17509_v27 = vld [vmem:[#allocation7 + $0x1974] sm:$0xf0] }
 0x4aa   :  { %v5949_v41 = vpop.f32.mrf.mxu0  ;;  %v14553_v39 = vor.u32 %v17568_v23, %v14552_v35  ;;  %v14209_v35 = vor.u32 %v17481_v33, %v14208_v24  ;;  %v14192_v23 = vld [vmem:[#allocation7 + $0x1868] sm:$0xf] }
 0x4ab   :  { %6908 = vmatpush.bf16.msrb.mxu2 %v14445_v62  ;;  %v14426_v41 = vld [vmem:[#allocation7 + $0x1a50] sm:$0xf0] }
 0x4ac   :  { %v14429_v45 = vor.u32 %v17534_v43, %v14426_v41  ;;  %6870 = vmatpush.bf16.msra.mxu3 %v14553_v39  ;;  %v17477_v39 = vld [vmem:[#allocation7 + $0x1874] sm:$0xf0]  ;;  %v14384_v43 = vld [vmem:[#allocation7 + $0x19e8] sm:$0xf] }
 0x4ad   :  { %v14193_v13 = vor.u32 %v17477_v39, %v14192_v23  ;;  %v17557_v39 = vld [vmem:[#allocation7 + $0x1af4] sm:$0xf0] }
 0x4ae   :  { %v5871_v53 = vpop.f32.mrf.mxu2 }
 0x4af   :  { %6909 = vmatpush.bf16.msrb.mxu2 %v14429_v45  ;;  %v17560_v53 = vld [vmem:[#allocation7 + $0x1b0c] sm:$0xf0] }
 0x4b0   :  { %v18649_v14 = vpop.f32.mrf.mxu1  ;;  %6871 = vmatpush.bf16.msra.mxu3 %v14537_v22  ;;  %v14521_v28 = vor.u32 %v17560_v53, %v14520_v48  ;;  %v14385_v22 = vor.u32 %v17525_v44, %v14384_v43  ;;  %v14177_v48 = vor.u32 %v17473_v1, %v14176_v18  ;;  %v17487_v43 = vld [vmem:[#allocation7 + $0x18cc] sm:$0xf]  ;;  %v17553_v18 = vld [vmem:[#allocation7 + $0x1ad4] sm:$0xf0] }
 0x4b1   :  { %v17483_v1 = vld [vmem:[#allocation7 + $0x18ac] sm:$0xf] }
 0x4b3   :  { %6910 = vmatpush.bf16.msrb.mxu2 %v14413_v8  ;;  %v17570_v8 = vld [vmem:[#allocation7 + $0x1b64] sm:$0xf] }
 0x4b4   :  { %6872 = vmatpush.bf16.msra.mxu3 %v14521_v28  ;;  %v14352_v28 = vld [vmem:[#allocation7 + $0x19a8] sm:$0xf] }
 0x4b5   :  { %v14353_v19 = vor.u32 %v17517_v59, %v14352_v28 }
 0x4b6   :  { %v18651_v46 = vpop.f32.mrf.mxu2 }
 0x4b7   :  { %6911 = vmatpush.bf16.msrb.mxu2 %v14397_v26 }
 0x4b8   :  { %v5962_v25 = vpop.f32.mrf.mxu1  ;;  %6917 = vmatpush.bf16.msrb.mxu3 %v14637_v6  ;;  %v14144_v6 = vld [vmem:[#allocation7 + $0x1808] sm:$0xf] }
 0x4b9   :  { %v5896_v25 = vadd.f32 %v18641_v15, %v5187_v7  ;;  %v17574_v15 = vld [vmem:[#allocation7 + $0x1b84] sm:$0xf]  ;;  %v17465_v7 = vld [vmem:[#allocation7 + $0x1814] sm:$0xf0] }
 0x4bb   :  { %v5909_v62 = vadd.f32 %v18643_v10, %v5896_v25  ;;  %v14368_v10 = vld [vmem:[#allocation7 + $0x19c8] sm:$0xf]  ;;  %v14145_v25 = vor.u32 %v17465_v7, %v14144_v6  ;;  %v17475_v6 = vld [vmem:[#allocation7 + $0x186c] sm:$0xf]  ;;  %v14194_v7 = vld [vmem:[#allocation7 + $0x1878] sm:$0xf0] }
 0x4bc   :  { %6918 = vmatpush.bf16.msrb.mxu3 %v14621_v16  ;;  %v14369_v53 = vor.u32 %v17521_v51, %v14368_v10  ;;  %v14258_v16 = vld [vmem:[#allocation7 + $0x18f8] sm:$0xf0] }
 0x4bd   :  { %v5922_v41 = vadd.f32 %v18651_v46, %v5909_v62  ;;  %v14570_v46 = vld [vmem:[#allocation7 + $0x1b70] sm:$0xf0]  ;;  %v14512_v62 = vld [vmem:[#allocation7 + $0x1ae8] sm:$0xf]  ;;  %v14226_v10 = vld [vmem:[#allocation7 + $0x18b8] sm:$0xf0] }
 0x4be   :  { %v5923_v32 = vpop.f32.mrf.mxu2 }
 0x4bf   :  { %v14586_v32 = vld [vmem:[#allocation7 + $0x1b90] sm:$0xf0] }
 0x4c0   :  { %v18656_v38 = vpop.f32.mrf.mxu0  ;;  %6919 = vmatpush.bf16.msrb.mxu3 %v14605_v30  ;;  %v14589_v2 = vor.u32 %v17574_v15, %v14586_v32  ;;  %v14321_v32 = vor.u32 %v17509_v27, %v14320_v20  ;;  %v14370_v20 = vld [vmem:[#allocation7 + $0x19d8] sm:$0xf0]  ;;  %v5189_v27 = vperm.slane %v18653_v50, 3 }
 0x4c4   :  { %6920 = vmatpush.bf16.msrb.mxu3 %v14589_v2 }
 0x4c6   :  { %v5882_v40 = vpop.f32.mrf.mxu3 }
 0x4c7   :  { %v5883_v5 = vadd.f32 %v5882_v40, %v5870_v0  ;;  %v14573_v40 = vor.u32 %v17570_v8, %v14570_v46  ;;  %v14229_v8 = vor.u32 %v17483_v1, %v14226_v10  ;;  %v14288_v46 = vld [vmem:[#allocation7 + $0x1928] sm:$0xf] }
 0x4c8   :  { %v6001_v54 = vpop.f32.mrf.mxu0 }
 0x4c9   :  { %v18661_v4 = vpack.c.bf16 %v5883_v5, %v5883_v5  ;;  %v18663_v55 = vpop.f32.mrf.mxu2  ;;  %v5188_v5 = vperm.slane %v18653_v50, 2  ;;  %v14160_v54 = vld [vmem:[#allocation7 + $0x1828] sm:$0xf]  ;;  %6921 = vmatpush.bf16.msrb.mxu3 %v14573_v40  ;;  %v17501_v40 = vld [vmem:[#allocation7 + $0x1934] sm:$0xf0] }
 0x4ca   :  { %v14289_v59 = vor.u32 %v17501_v40, %v14288_v46 }
 0x4cb   :  { %6834 = vmatmul.bf16.vlgmr.msra.gmra.mxu0 %v18661_v4  ;;  %v5948_v60 = vadd.f32 %v18645_v17, %v5188_v5  ;;  %v17558_v17 = vld [vmem:[#allocation7 + $0x1b04] sm:$0xf]  ;;  %v14480_v5 = vld [vmem:[#allocation7 + $0x1aa8] sm:$0xf] }
 0x4cc   :  { %6930 = vmatpush.bf16.msra.mxu0 %v14257_v56  ;;  %v17469_v56 = vld [vmem:[#allocation7 + $0x1834] sm:$0xf0] }
 0x4cd   :  { %v14161_v26 = vor.u32 %v17469_v56, %v14160_v54  ;;  %6922 = vmatpush.bf16.msrb.mxu3 %v14557_v57  ;;  %v5961_v24 = vadd.f32 %v18649_v14, %v5948_v60  ;;  %v17479_v54 = vld [vmem:[#allocation7 + $0x188c] sm:$0xf]  ;;  %v14210_v56 = vld [vmem:[#allocation7 + $0x1898] sm:$0xf0]  ;;  %v17497_v57 = vld [vmem:[#allocation7 + $0x1914] sm:$0xf0] }
 0x4ce   :  { %v5884_v49 = vpop.f32.mrf.mxu3  ;;  %v14213_v37 = vor.u32 %v17479_v54, %v14210_v56  ;;  %v14386_v60 = vld [vmem:[#allocation7 + $0x19f8] sm:$0xf0]  ;;  %v17555_v56 = vld [vmem:[#allocation7 + $0x1aec] sm:$0xf] }
 0x4cf   :  { %v17491_v49 = vld [vmem:[#allocation7 + $0x18ec] sm:$0xf]  ;;  %v14322_v54 = vld [vmem:[#allocation7 + $0x1978] sm:$0xf0] }
 0x4d0   :  { %6931 = vmatpush.bf16.msra.mxu0 %v14241_v3  ;;  %v18668_v12 = vpop.f32.mrf.mxu1  ;;  %v14336_v3 = vld [vmem:[#allocation7 + $0x1988] sm:$0xf]  ;;  %v14261_v30 = vor.u32 %v17491_v49, %v14258_v16 }
 0x4d1   :  { %v5975_v29 = vpop.f32.mrf.mxu2  ;;  %v14337_v33 = vor.u32 %v17513_v9, %v14336_v3  ;;  %v17523_v3 = vld [vmem:[#allocation7 + $0x19ec] sm:$0xf]  ;;  %v14448_v49 = vld [vmem:[#allocation7 + $0x1a68] sm:$0xf] }
 0x4d2   :  { %v5974_v29 = vadd.f32 %v18663_v55, %v5961_v24  ;;  %v14513_v55 = vor.u32 %v17557_v39, %v14512_v62  ;;  %v14389_v16 = vor.u32 %v17523_v3, %v14386_v60  ;;  %v17471_v24 = vld [vmem:[#allocation7 + $0x184c] sm:$0xf]  ;;  %v14432_v62 = vld [vmem:[#allocation7 + $0x1a48] sm:$0xf]  ;;  %v14162_v39 = vld [vmem:[#allocation7 + $0x1838] sm:$0xf0] }
 0x4d3   :  { %v14498_v3 = vld [vmem:[#allocation7 + $0x1ad8] sm:$0xf0] }
 0x4d4   :  { %6932 = vmatpush.bf16.msra.mxu0 %v14225_v21  ;;  %v14541_v21 = vor.u32 %v17562_v58, %v14538_v42  ;;  %v14197_v42 = vor.u32 %v17475_v6, %v14194_v7  ;;  %v14306_v6 = vld [vmem:[#allocation7 + $0x1958] sm:$0xf0]  ;;  %v17551_v7 = vld [vmem:[#allocation7 + $0x1acc] sm:$0xf] }
 0x4d6   :  { %v5934_v45 = vpop.f32.mrf.mxu3  ;;  %6923 = vmatpush.bf16.msrb.mxu3 %v14541_v21  ;;  %v17541_v21 = vld [vmem:[#allocation7 + $0x1a74] sm:$0xf0] }
 0x4d7   :  { %v5935_v47 = vadd.f32 %v5934_v45, %v5922_v41  ;;  %v14242_v41 = vld [vmem:[#allocation7 + $0x18d8] sm:$0xf0] }
 0x4d8   :  { %6933 = vmatpush.bf16.msra.mxu0 %v14209_v35  ;;  %v6014_v52 = vpop.f32.mrf.mxu1  ;;  %v14522_v35 = vld [vmem:[#allocation7 + $0x1b10] sm:$0xf0]  ;;  %v14245_v2 = vor.u32 %v17487_v43, %v14242_v41  ;;  %v17515_v43 = vld [vmem:[#allocation7 + $0x19ac] sm:$0xf]  ;;  %v14354_v41 = vld [vmem:[#allocation7 + $0x19b8] sm:$0xf0] }
 0x4d9   :  { %v18672_v0 = vpack.c.bf16 %v5935_v47, %v5935_v47  ;;  %v14525_v44 = vor.u32 %v17558_v17, %v14522_v35  ;;  %v14304_v47 = vld [vmem:[#allocation7 + $0x1948] sm:$0xf]  ;;  %v17537_v35 = vld [vmem:[#allocation7 + $0x1a54] sm:$0xf0] }
 0x4db   :  { %6847 = vmatmul.bf16.vlgmr.msra.gmra.mxu1 %v18672_v0  ;;  %6886 = vmatmul.bf16.vlgmr.msrb.gmra.mxu0 %v18661_v4 }
 0x4dc   :  { %6934 = vmatpush.bf16.msra.mxu0 %v14193_v13  ;;  %6943 = vmatpush.bf16.msra.mxu1 %v14385_v22  ;;  %v17505_v13 = vld [vmem:[#allocation7 + $0x1954] sm:$0xf0]  ;;  %v14496_v22 = vld [vmem:[#allocation7 + $0x1ac8] sm:$0xf] }
 0x4dd   :  { %6924 = vmatpush.bf16.msrb.mxu3 %v14525_v44  ;;  %v14305_v52 = vor.u32 %v17505_v13, %v14304_v47  ;;  %v14497_v51 = vor.u32 %v17553_v18, %v14496_v22  ;;  %v14433_v44 = vor.u32 %v17537_v35, %v14432_v62  ;;  %v17463_v47 = vld [vmem:[#allocation7 + $0x180c] sm:$0xf]  ;;  %v14146_v13 = vld [vmem:[#allocation7 + $0x1818] sm:$0xf0] }
 0x4de   :  { %v5936_v63 = vpop.f32.mrf.mxu3  ;;  %v17511_v22 = vld [vmem:[#allocation7 + $0x198c] sm:$0xf]  ;;  %v14338_v18 = vld [vmem:[#allocation7 + $0x1998] sm:$0xf0] }
 0x4df   :  { %v14272_v63 = vld [vmem:[#allocation7 + $0x1908] sm:$0xf]  ;;  %v14341_v40 = vor.u32 %v17511_v22, %v14338_v18  ;;  %v17495_v62 = vld [vmem:[#allocation7 + $0x190c] sm:$0xf]  ;;  %v14434_v18 = vld [vmem:[#allocation7 + $0x1a58] sm:$0xf0] }
 0x4e0   :  { %6935 = vmatpush.bf16.msra.mxu0 %v14177_v48  ;;  %6944 = vmatpush.bf16.msra.mxu1 %v14369_v53  ;;  %v17549_v53 = vld [vmem:[#allocation7 + $0x1ab4] sm:$0xf0]  ;;  %v14273_v9 = vor.u32 %v17497_v57, %v14272_v63  ;;  %v17543_v35 = vld [vmem:[#allocation7 + $0x1a8c] sm:$0xf] }
 0x4e1   :  { %v14481_v36 = vor.u32 %v17549_v53, %v14480_v5  ;;  %v17589_v5 = vld [vmem:[#allocation7 + $0x1bf4] sm:$0xf0]  ;;  %v17535_v22 = vld [vmem:[#allocation7 + $0x1a4c] sm:$0xf] }
 0x4e4   :  { %6936 = vmatpush.bf16.msra.mxu0 %v14161_v26  ;;  %6945 = vmatpush.bf16.msra.mxu1 %v14353_v19  ;;  %v14464_v26 = vld [vmem:[#allocation7 + $0x1a88] sm:$0xf]  ;;  %v17545_v19 = vld [vmem:[#allocation7 + $0x1a94] sm:$0xf0] }
 0x4e5   :  { %v14465_v58 = vor.u32 %v17545_v19, %v14464_v26  ;;  %v17585_v26 = vld [vmem:[#allocation7 + $0x1bd4] sm:$0xf0]  ;;  %v17503_v19 = vld [vmem:[#allocation7 + $0x194c] sm:$0xf] }
 0x4e6   :  { %v5986_v23 = vpop.f32.mrf.mxu3 }
 0x4e7   :  { %v5987_v15 = vadd.f32 %v5986_v23, %v5974_v29  ;;  %v18680_v14 = vpop.f32.mrf.mxu2  ;;  %v14449_v29 = vor.u32 %v17541_v21, %v14448_v49  ;;  %v17467_v23 = vld [vmem:[#allocation7 + $0x182c] sm:$0xf]  ;;  %v17581_v49 = vld [vmem:[#allocation7 + $0x1bb4] sm:$0xf0] }
 0x4e8   :  { %6937 = vmatpush.bf16.msra.mxu0 %v14145_v25  ;;  %6946 = vmatpush.bf16.msra.mxu1 %v14337_v33  ;;  %v14178_v25 = vld [vmem:[#allocation7 + $0x1858] sm:$0xf0]  ;;  %v17519_v33 = vld [vmem:[#allocation7 + $0x19cc] sm:$0xf]  ;;  %v14165_v50 = vor.u32 %v17467_v23, %v14162_v39 }
 0x4e9   :  { %v18682_v45 = vpack.c.bf16 %v5987_v15, %v5987_v15  ;;  %v14373_v17 = vor.u32 %v17519_v33, %v14370_v20  ;;  %v14416_v15 = vld [vmem:[#allocation7 + $0x1a28] sm:$0xf]  ;;  %v14482_v33 = vld [vmem:[#allocation7 + $0x1ab8] sm:$0xf0] }
 0x4ea   :  { %v14466_v23 = vld [vmem:[#allocation7 + $0x1a98] sm:$0xf0] }
 0x4eb   :  { %6860 = vmatmul.bf16.vlgmr.msra.gmra.mxu2 %v18682_v45  ;;  %6899 = vmatmul.bf16.vlgmr.msrb.gmra.mxu1 %v18672_v0 }
 0x4ec   :  { %6982 = vmatpush.bf16.msrb.mxu0 %v14261_v30  ;;  %6947 = vmatpush.bf16.msra.mxu1 %v14321_v32  ;;  %v14181_v30 = vor.u32 %v17471_v24, %v14178_v25  ;;  %v6000_v32 = vadd.f32 %v18656_v38, %v5189_v27  ;;  %v14640_v38 = vld [vmem:[#allocation7 + $0x1be8] sm:$0xf]  ;;  %v14290_v24 = vld [vmem:[#allocation7 + $0x1938] sm:$0xf0]  ;;  %v17547_v25 = vld [vmem:[#allocation7 + $0x1aac] sm:$0xf] }
 0x4ed   :  { %6938 = vmatmul.bf16.vlgmr.msra.gmra.mxu0 %v18661_v4  ;;  %6956 = vmatpush.bf16.msra.mxu2 %v14513_v55  ;;  %v14357_v55 = vor.u32 %v17515_v43, %v14354_v41  ;;  %v14485_v27 = vor.u32 %v17547_v25, %v14482_v33  ;;  %v14469_v41 = vor.u32 %v17543_v35, %v14466_v23  ;;  %v17563_v33 = vld [vmem:[#allocation7 + $0x1b2c] sm:$0xf]  ;;  %v14530_v35 = vld [vmem:[#allocation7 + $0x1b18] sm:$0xf0] }
 0x4ee   :  { %v5988_v48 = vpop.f32.mrf.mxu3  ;;  %v6013_v1 = vadd.f32 %v18668_v12, %v6000_v32  ;;  %v14450_v32 = vld [vmem:[#allocation7 + $0x1a78] sm:$0xf0] }
 0x4ef   :  { %v6027_v28 = vpop.f32.mrf.mxu2  ;;  %v17507_v48 = vld [vmem:[#allocation7 + $0x196c] sm:$0xf] }
 0x4f0   :  { %6983 = vmatpush.bf16.msrb.mxu0 %v14245_v2  ;;  %6948 = vmatpush.bf16.msra.mxu1 %v14305_v52  ;;  %v17533_v2 = vld [vmem:[#allocation7 + $0x1a34] sm:$0xf0]  ;;  %v14149_v52 = vor.u32 %v17463_v47, %v14146_v13  ;;  %v6026_v46 = vadd.f32 %v18680_v14, %v6013_v1  ;;  %v14514_v28 = vld [vmem:[#allocation7 + $0x1af8] sm:$0xf0]  ;;  %v14325_v63 = vor.u32 %v17507_v48, %v14322_v54  ;;  %v14624_v14 = vld [vmem:[#allocation7 + $0x1bc8] sm:$0xf] }
 0x4f1   :  { %6957 = vmatpush.bf16.msra.mxu2 %v14497_v51  ;;  %v14417_v10 = vor.u32 %v17533_v2, %v14416_v15  ;;  %v14400_v51 = vld [vmem:[#allocation7 + $0x1a08] sm:$0xf]  ;;  %v14517_v57 = vor.u32 %v17555_v56, %v14514_v28  ;;  %v14625_v60 = vor.u32 %v17585_v26, %v14624_v14  ;;  %v17539_v15 = vld [vmem:[#allocation7 + $0x1a6c] sm:$0xf]  ;;  %v17569_v13 = vld [vmem:[#allocation7 + $0x1b54] sm:$0xf0] }
 0x4f2   :  { %v14453_v2 = vor.u32 %v17539_v15, %v14450_v32  ;;  %v14560_v47 = vld [vmem:[#allocation7 + $0x1b48] sm:$0xf]  ;;  %v17561_v48 = vld [vmem:[#allocation7 + $0x1b14] sm:$0xf0]  ;;  %v14402_v54 = vld [vmem:[#allocation7 + $0x1a18] sm:$0xf0] }
 0x4f3   :  { %v14561_v1 = vor.u32 %v17569_v13, %v14560_v47  ;;  %v17587_v56 = vld [vmem:[#allocation7 + $0x1bec] sm:$0xf]  ;;  %v14642_v28 = vld [vmem:[#allocation7 + $0x1bf8] sm:$0xf0]  ;;  %v17604_v15 = vld [vmem:[#allocation7 + $0x1c6c] sm:$0xf0] }
 0x4f4   :  { %6984 = vmatpush.bf16.msrb.mxu0 %v14229_v8  ;;  %6949 = vmatpush.bf16.msra.mxu1 %v14289_v59  ;;  %v17529_v8 = vld [vmem:[#allocation7 + $0x1a14] sm:$0xf0]  ;;  %v17579_v14 = vld [vmem:[#allocation7 + $0x1bac] sm:$0xf]  ;;  %v14610_v26 = vld [vmem:[#allocation7 + $0x1bb8] sm:$0xf0] }
 0x4f5   :  { %6958 = vmatpush.bf16.msra.mxu2 %v14481_v36  ;;  %v14401_v12 = vor.u32 %v17529_v8, %v14400_v51  ;;  %v14641_v36 = vor.u32 %v17589_v5, %v14640_v38  ;;  %v17565_v51 = vld [vmem:[#allocation7 + $0x1b34] sm:$0xf0]  ;;  %v17531_v8 = vld [vmem:[#allocation7 + $0x1a2c] sm:$0xf]  ;;  %v14528_v5 = vld [vmem:[#allocation7 + $0x1b08] sm:$0xf] }
 0x4f6   :  { %v14888_v32 = vld [vmem:[#allocation7 + $0x1de0] sm:$0xf] }
 0x4f8   :  { %6985 = vmatpush.bf16.msrb.mxu0 %v14213_v37  ;;  %6950 = vmatpush.bf16.msra.mxu1 %v14273_v9  ;;  %v14309_v9 = vor.u32 %v17503_v19, %v14306_v6  ;;  %v14613_v19 = vor.u32 %v17579_v14, %v14610_v26  ;;  %v17575_v6 = vld [vmem:[#allocation7 + $0x1b8c] sm:$0xf]  ;;  %v17636_v14 = vld [vmem:[#allocation7 + $0x1d6c] sm:$0xf0]  ;;  %v15016_v26 = vld [vmem:[#allocation7 + $0x1ee0] sm:$0xf] }
 0x4f9   :  { %6959 = vmatpush.bf16.msra.mxu2 %v14465_v58  ;;  %v14501_v58 = vor.u32 %v17551_v7, %v14498_v3  ;;  %v14594_v7 = vld [vmem:[#allocation7 + $0x1b98] sm:$0xf0] }
 0x4fa   :  { %v14597_v3 = vor.u32 %v17575_v6, %v14594_v7 }
 0x4fb   :  { %6912 = vmatmul.bf16.vlgmr.msrb.gmra.mxu2 %v18682_v45  ;;  %6951 = vmatmul.bf16.vlgmr.msra.gmra.mxu1 %v18672_v0 }
 0x4fc   :  { %6986 = vmatpush.bf16.msrb.mxu0 %v14197_v42  ;;  %6995 = vmatpush.bf16.msrb.mxu1 %v14389_v16  ;;  %v14608_v42 = vld [vmem:[#allocation7 + $0x1ba8] sm:$0xf]  ;;  %v17499_v16 = vld [vmem:[#allocation7 + $0x192c] sm:$0xf] }
 0x4fd   :  { %6960 = vmatpush.bf16.msra.mxu2 %v14449_v29  ;;  %v14609_v20 = vor.u32 %v17581_v49, %v14608_v42  ;;  %v14592_v29 = vld [vmem:[#allocation7 + $0x1b88] sm:$0xf]  ;;  %v17620_v42 = vld [vmem:[#allocation7 + $0x1cec] sm:$0xf0] }
 0x500   :  { %6987 = vmatpush.bf16.msrb.mxu0 %v14181_v30  ;;  %6996 = vmatpush.bf16.msrb.mxu1 %v14373_v17  ;;  %v17577_v30 = vld [vmem:[#allocation7 + $0x1b94] sm:$0xf0]  ;;  %v14274_v17 = vld [vmem:[#allocation7 + $0x1918] sm:$0xf0] }
 0x501   :  { %6961 = vmatpush.bf16.msra.mxu2 %v14433_v44  ;;  %v14593_v39 = vor.u32 %v17577_v30, %v14592_v29  ;;  %v14277_v43 = vor.u32 %v17495_v62, %v14274_v17  ;;  %v14576_v44 = vld [vmem:[#allocation7 + $0x1b68] sm:$0xf]  ;;  %v14728_v29 = vld [vmem:[#allocation7 + $0x1ca0] sm:$0xf]  ;;  %v17612_v30 = vld [vmem:[#allocation7 + $0x1cac] sm:$0xf0] }
 0x502   :  { %v17559_v17 = vld [vmem:[#allocation7 + $0x1b0c] sm:$0xf]  ;;  %v14729_v23 = vor.u32 %v17612_v30, %v14728_v29  ;;  %v17628_v29 = vld [vmem:[#allocation7 + $0x1d2c] sm:$0xf0]  ;;  %v14984_v30 = vld [vmem:[#allocation7 + $0x1ea0] sm:$0xf] }
 0x504   :  { %6988 = vmatpush.bf16.msrb.mxu0 %v14165_v50  ;;  %6997 = vmatpush.bf16.msrb.mxu1 %v14357_v55  ;;  %v17573_v50 = vld [vmem:[#allocation7 + $0x1b74] sm:$0xf0] }
 0x505   :  { %6962 = vmatpush.bf16.msra.mxu2 %v14417_v10  ;;  %v14577_v55 = vor.u32 %v17573_v50, %v14576_v44  ;;  %v14437_v10 = vor.u32 %v17535_v22, %v14434_v18  ;;  %v14696_v44 = vld [vmem:[#allocation7 + $0x1c60] sm:$0xf]  ;;  %v17600_v18 = vld [vmem:[#allocation7 + $0x1c4c] sm:$0xf0] }
 0x506   :  { %v6038_v53 = vpop.f32.mrf.mxu3  ;;  %v14697_v47 = vor.u32 %v17604_v15, %v14696_v44  ;;  %v14680_v22 = vld [vmem:[#allocation7 + $0x1c40] sm:$0xf]  ;;  %v17624_v15 = vld [vmem:[#allocation7 + $0x1d0c] sm:$0xf0] }
 0x507   :  { %v6039_v59 = vadd.f32 %v6038_v53, %v6026_v46  ;;  %v14418_v46 = vld [vmem:[#allocation7 + $0x1a38] sm:$0xf0]  ;;  %v17527_v53 = vld [vmem:[#allocation7 + $0x1a0c] sm:$0xf] }
 0x508   :  { %6989 = vmatpush.bf16.msrb.mxu0 %v14149_v52  ;;  %6998 = vmatpush.bf16.msrb.mxu1 %v14341_v40  ;;  %v14544_v52 = vld [vmem:[#allocation7 + $0x1b28] sm:$0xf]  ;;  %v14421_v38 = vor.u32 %v17531_v8, %v14418_v46  ;;  %v14664_v8 = vld [vmem:[#allocation7 + $0x1c20] sm:$0xf]  ;;  %v17596_v46 = vld [vmem:[#allocation7 + $0x1c2c] sm:$0xf0] }
 0x509   :  { %v18693_v37 = vpack.c.bf16 %v6039_v59, %v6039_v59  ;;  %6963 = vmatpush.bf16.msra.mxu2 %v14401_v12  ;;  %v14545_v40 = vor.u32 %v17565_v51, %v14544_v52  ;;  %v14529_v59 = vor.u32 %v17561_v48, %v14528_v5  ;;  %v14645_v12 = vor.u32 %v17587_v56, %v14642_v28  ;;  %v17648_v52 = vld [vmem:[#allocation7 + $0x1dcc] sm:$0xf0]  ;;  %v14840_v56 = vld [vmem:[#allocation7 + $0x1d80] sm:$0xf] }
 0x50a   :  { %v17644_v5 = vld [vmem:[#allocation7 + $0x1dac] sm:$0xf0] }
 0x50b   :  { %6873 = vmatmul.bf16.vlgmr.msra.gmra.mxu3 %v18693_v37  ;;  %6990 = vmatmul.bf16.vlgmr.msrb.gmra.mxu0 %v18661_v4  ;;  %v14293_v4 = vor.u32 %v17499_v16, %v14290_v24  ;;  %v14562_v24 = vld [vmem:[#allocation7 + $0x1b58] sm:$0xf0] }
 0x50c   :  { %6969 = vmatpush.bf16.msra.mxu3 %v14641_v36  ;;  %6999 = vmatpush.bf16.msrb.mxu1 %v14325_v63  ;;  %v17583_v36 = vld [vmem:[#allocation7 + $0x1bcc] sm:$0xf]  ;;  %v14626_v63 = vld [vmem:[#allocation7 + $0x1bd8] sm:$0xf0] }
 0x50d   :  { %7008 = vmatpush.bf16.msrb.mxu2 %v14517_v57  ;;  %v14629_v57 = vor.u32 %v17583_v36, %v14626_v63 }
 0x50e   :  { %v6040_v21 = vpop.f32.mrf.mxu3  ;;  %6964 = vmatmul.bf16.vlgmr.msra.gmra.mxu2 %v18682_v45 }
 0x50f   :  { %v17567_v21 = vld [vmem:[#allocation7 + $0x1b4c] sm:$0xf] }
 0x510   :  { %6970 = vmatpush.bf16.msra.mxu3 %v14625_v60  ;;  %7000 = vmatpush.bf16.msrb.mxu1 %v14309_v9  ;;  %v17571_v60 = vld [vmem:[#allocation7 + $0x1b6c] sm:$0xf]  ;;  %v14578_v9 = vld [vmem:[#allocation7 + $0x1b78] sm:$0xf0]  ;;  %v14565_v25 = vor.u32 %v17567_v21, %v14562_v24  ;;  %v15000_v21 = vld [vmem:[#allocation7 + $0x1ec0] sm:$0xf] }
 0x511   :  { %7009 = vmatpush.bf16.msrb.mxu2 %v14501_v58  ;;  %v14760_v58 = vld [vmem:[#allocation7 + $0x1ce0] sm:$0xf]  ;;  %v14581_v16 = vor.u32 %v17571_v60, %v14578_v9  ;;  %v14746_v60 = vld [vmem:[#allocation7 + $0x1cd0] sm:$0xf0] }
 0x512   :  { %v14761_v49 = vor.u32 %v17620_v42, %v14760_v58 }
 0x514   :  { %6971 = vmatpush.bf16.msra.mxu3 %v14609_v20  ;;  %7001 = vmatpush.bf16.msrb.mxu1 %v14293_v4  ;;  %v14744_v20 = vld [vmem:[#allocation7 + $0x1cc0] sm:$0xf]  ;;  %v17616_v4 = vld [vmem:[#allocation7 + $0x1ccc] sm:$0xf0] }
 0x515   :  { %7010 = vmatpush.bf16.msrb.mxu2 %v14485_v27  ;;  %7818 = vmatpush.bf16.msra.mxu0 %v14761_v49  ;;  %v14745_v27 = vor.u32 %v17616_v4, %v14744_v20  ;;  %v14808_v49 = vld [vmem:[#allocation7 + $0x1d40] sm:$0xf] }
 0x518   :  { %6972 = vmatpush.bf16.msra.mxu3 %v14593_v39  ;;  %7002 = vmatpush.bf16.msrb.mxu1 %v14277_v43  ;;  %v14533_v39 = vor.u32 %v17559_v17, %v14530_v35  ;;  %v14712_v43 = vld [vmem:[#allocation7 + $0x1c80] sm:$0xf] }
 0x519   :  { %7011 = vmatpush.bf16.msrb.mxu2 %v14469_v41  ;;  %7819 = vmatpush.bf16.msra.mxu0 %v14745_v27  ;;  %v17608_v41 = vld [vmem:[#allocation7 + $0x1c8c] sm:$0xf0]  ;;  %v14792_v27 = vld [vmem:[#allocation7 + $0x1d20] sm:$0xf] }
 0x51a   :  { %v14713_v50 = vor.u32 %v17608_v41, %v14712_v43  ;;  %v14793_v17 = vor.u32 %v17628_v29, %v14792_v27 }
 0x51b   :  { %6925 = vmatmul.bf16.vlgmr.msrb.gmra.mxu3 %v18693_v37  ;;  %7003 = vmatmul.bf16.vlgmr.msrb.gmra.mxu1 %v18672_v0  ;;  %v14405_v0 = vor.u32 %v17527_v53, %v14402_v54  ;;  %v17592_v54 = vld [vmem:[#allocation7 + $0x1c0c] sm:$0xf0] }
 0x51c   :  { %6973 = vmatpush.bf16.msra.mxu3 %v14577_v55  ;;  %v17652_v55 = vld [vmem:[#allocation7 + $0x1dec] sm:$0xf0] }
 0x51d   :  { %7012 = vmatpush.bf16.msrb.mxu2 %v14453_v2  ;;  %7820 = vmatpush.bf16.msra.mxu0 %v14729_v23  ;;  %v14889_v2 = vor.u32 %v17652_v55, %v14888_v32  ;;  %v17606_v23 = vld [vmem:[#allocation7 + $0x1c84] sm:$0xf]  ;;  %v14968_v32 = vld [vmem:[#allocation7 + $0x1e80] sm:$0xf] }
 0x51f   :  { %7831 = vmatpush.bf16.msra.mxu1 %v14889_v2  ;;  %v17672_v2 = vld [vmem:[#allocation7 + $0x1e8c] sm:$0xf0] }
 0x520   :  { %6974 = vmatpush.bf16.msra.mxu3 %v14561_v1  ;;  %v14872_v1 = vld [vmem:[#allocation7 + $0x1dc0] sm:$0xf] }
 0x521   :  { %7013 = vmatpush.bf16.msrb.mxu2 %v14437_v10  ;;  %7821 = vmatpush.bf16.msra.mxu0 %v14713_v50  ;;  %v14681_v10 = vor.u32 %v17600_v18, %v14680_v22  ;;  %v14873_v51 = vor.u32 %v17648_v52, %v14872_v1  ;;  %v14776_v50 = vld [vmem:[#allocation7 + $0x1d00] sm:$0xf]  ;;  %v14698_v22 = vld [vmem:[#allocation7 + $0x1c70] sm:$0xf0]  ;;  %v14969_v18 = vor.u32 %v17672_v2, %v14968_v32  ;;  %v17630_v32 = vld [vmem:[#allocation7 + $0x1d44] sm:$0xf] }
 0x522   :  { %v14777_v55 = vor.u32 %v17624_v15, %v14776_v50  ;;  %v14890_v52 = vld [vmem:[#allocation7 + $0x1df0] sm:$0xf0]  ;;  %v17712_v50 = vld [vmem:[#allocation7 + $0x1fcc] sm:$0xf0]  ;;  %v17678_v2 = vld [vmem:[#allocation7 + $0x1ec4] sm:$0xf] }
 0x523   :  { %7832 = vmatpush.bf16.msra.mxu1 %v14873_v51 }
 0x524   :  { %6975 = vmatpush.bf16.msra.mxu3 %v14545_v40  ;;  %v14856_v40 = vld [vmem:[#allocation7 + $0x1da0] sm:$0xf] }
 0x525   :  { %7014 = vmatpush.bf16.msrb.mxu2 %v14421_v38  ;;  %7822 = vmatpush.bf16.msra.mxu0 %v14697_v47  ;;  %v14665_v38 = vor.u32 %v17596_v46, %v14664_v8  ;;  %v14857_v48 = vor.u32 %v17644_v5, %v14856_v40  ;;  %v17602_v47 = vld [vmem:[#allocation7 + $0x1c64] sm:$0xf]  ;;  %v14952_v8 = vld [vmem:[#allocation7 + $0x1e60] sm:$0xf]  ;;  %v17668_v46 = vld [vmem:[#allocation7 + $0x1e6c] sm:$0xf0] }
 0x526   :  { %v14701_v1 = vor.u32 %v17602_v47, %v14698_v22  ;;  %v14953_v40 = vor.u32 %v17668_v46, %v14952_v8  ;;  %v14682_v5 = vld [vmem:[#allocation7 + $0x1c50] sm:$0xf0]  ;;  %v17626_v46 = vld [vmem:[#allocation7 + $0x1d24] sm:$0xf] }
 0x527   :  { %7833 = vmatpush.bf16.msra.mxu1 %v14857_v48  ;;  %v17646_v48 = vld [vmem:[#allocation7 + $0x1dc4] sm:$0xf] }
 0x528   :  { %6976 = vmatpush.bf16.msra.mxu3 %v14529_v59  ;;  %v17640_v59 = vld [vmem:[#allocation7 + $0x1d8c] sm:$0xf0] }
 0x529   :  { %7015 = vmatpush.bf16.msrb.mxu2 %v14405_v0  ;;  %7823 = vmatpush.bf16.msra.mxu0 %v14681_v10  ;;  %v17618_v0 = vld [vmem:[#allocation7 + $0x1ce4] sm:$0xf]  ;;  %v14841_v36 = vor.u32 %v17640_v59, %v14840_v56  ;;  %v17664_v56 = vld [vmem:[#allocation7 + $0x1e4c] sm:$0xf0] }
 0x52a   :  { %v17650_v10 = vld [vmem:[#allocation7 + $0x1de4] sm:$0xf] }
 0x52b   :  { %6977 = vmatmul.bf16.vlgmr.msra.gmra.mxu3 %v18693_v37  ;;  %7834 = vmatpush.bf16.msra.mxu1 %v14841_v36  ;;  %v14893_v51 = vor.u32 %v17650_v10, %v14890_v52  ;;  %v17594_v36 = vld [vmem:[#allocation7 + $0x1c24] sm:$0xf]  ;;  %v15112_v52 = vld [vmem:[#allocation7 + $0x1fa0] sm:$0xf] }
 0x52c   :  { %7021 = vmatpush.bf16.msrb.mxu3 %v14645_v12  ;;  %7016 = vmatmul.bf16.vlgmr.msrb.gmra.mxu2 %v18682_v45  ;;  %v14546_v45 = vld [vmem:[#allocation7 + $0x1b38] sm:$0xf0]  ;;  %v14762_v12 = vld [vmem:[#allocation7 + $0x1cf0] sm:$0xf0] }
 0x52d   :  { %v14549_v62 = vor.u32 %v17563_v33, %v14546_v45  ;;  %7824 = vmatpush.bf16.msra.mxu0 %v14665_v38  ;;  %v14765_v63 = vor.u32 %v17618_v0, %v14762_v12  ;;  %v17610_v33 = vld [vmem:[#allocation7 + $0x1ca4] sm:$0xf]  ;;  %v14730_v45 = vld [vmem:[#allocation7 + $0x1cb0] sm:$0xf0] }
 0x52e   :  { %v14733_v4 = vor.u32 %v17610_v33, %v14730_v45  ;;  %v17598_v38 = vld [vmem:[#allocation7 + $0x1c44] sm:$0xf]  ;;  %v14904_v45 = vld [vmem:[#allocation7 + $0x1e00] sm:$0xf] }
 0x530   :  { %7022 = vmatpush.bf16.msrb.mxu3 %v14629_v57  ;;  %v14824_v57 = vld [vmem:[#allocation7 + $0x1d60] sm:$0xf] }
 0x531   :  { %v14825_v6 = vor.u32 %v17636_v14, %v14824_v57  ;;  %v17642_v57 = vld [vmem:[#allocation7 + $0x1da4] sm:$0xf] }
 0x533   :  { %7835 = vmatpush.bf16.msra.mxu1 %v14825_v6  ;;  %v14920_v6 = vld [vmem:[#allocation7 + $0x1e20] sm:$0xf] }
 0x534   :  { %7023 = vmatpush.bf16.msrb.mxu3 %v14613_v19  ;;  %v17684_v19 = vld [vmem:[#allocation7 + $0x1eec] sm:$0xf0] }
 0x535   :  { %v15017_v7 = vor.u32 %v17684_v19, %v15016_v26  ;;  %v14858_v26 = vld [vmem:[#allocation7 + $0x1db0] sm:$0xf0] }
 0x536   :  { %v14861_v19 = vor.u32 %v17642_v57, %v14858_v26  ;;  %v18719_v26 = vld [vmem:[#allocation8 + $0x18] sm:$0xf] }
 0x537   :  { %7844 = vmatpush.bf16.msra.mxu2 %v15017_v7  ;;  %v17660_v7 = vld [vmem:[#allocation7 + $0x1e2c] sm:$0xf0] }
 0x538   :  { %7024 = vmatpush.bf16.msrb.mxu3 %v14597_v3  ;;  %v17614_v3 = vld [vmem:[#allocation7 + $0x1cc4] sm:$0xf] }
 0x539   :  { %v14749_v9 = vor.u32 %v17614_v3, %v14746_v60  ;;  %v14921_v3 = vor.u32 %v17660_v7, %v14920_v6  ;;  %v17590_v60 = vld [vmem:[#allocation7 + $0x1c04] sm:$0xf]  ;;  %v15080_v7 = vld [vmem:[#allocation7 + $0x1f60] sm:$0xf] }
 0x53c   :  { %7025 = vmatpush.bf16.msrb.mxu3 %v14581_v16  ;;  %v17632_v16 = vld [vmem:[#allocation7 + $0x1d4c] sm:$0xf0] }
 0x53d   :  { %v14809_v24 = vor.u32 %v17632_v16, %v14808_v49  ;;  %v17638_v49 = vld [vmem:[#allocation7 + $0x1d84] sm:$0xf] }
 0x53f   :  { %7836 = vmatpush.bf16.msra.mxu1 %v14809_v24  ;;  %v14842_v24 = vld [vmem:[#allocation7 + $0x1d90] sm:$0xf0] }
 0x540   :  { %7026 = vmatpush.bf16.msrb.mxu3 %v14565_v25  ;;  %v17680_v25 = vld [vmem:[#allocation7 + $0x1ecc] sm:$0xf0] }
 0x541   :  { %v15001_v20 = vor.u32 %v17680_v25, %v15000_v21  ;;  %v14845_v25 = vor.u32 %v17638_v49, %v14842_v24  ;;  %v14954_v49 = vld [vmem:[#allocation7 + $0x1e70] sm:$0xf0] }
 0x543   :  { %7845 = vmatpush.bf16.msra.mxu2 %v15001_v20  ;;  %7837 = vmatpush.bf16.msra.mxu1 %v14793_v17  ;;  %v17656_v20 = vld [vmem:[#allocation7 + $0x1e0c] sm:$0xf0]  ;;  %v14826_v17 = vld [vmem:[#allocation7 + $0x1d70] sm:$0xf0] }
 0x544   :  { %7027 = vmatpush.bf16.msrb.mxu3 %v14549_v62  ;;  %v17676_v62 = vld [vmem:[#allocation7 + $0x1eac] sm:$0xf0]  ;;  %v14905_v29 = vor.u32 %v17656_v20, %v14904_v45 }
 0x545   :  { %v14985_v35 = vor.u32 %v17676_v62, %v14984_v30  ;;  %v17716_v30 = vld [vmem:[#allocation7 + $0x1fec] sm:$0xf0]  ;;  %v17634_v62 = vld [vmem:[#allocation7 + $0x1d64] sm:$0xf] }
 0x547   :  { %7846 = vmatpush.bf16.msra.mxu2 %v14985_v35  ;;  %7838 = vmatpush.bf16.msra.mxu1 %v14777_v55  ;;  %v14810_v55 = vld [vmem:[#allocation7 + $0x1d50] sm:$0xf0] }
 0x548   :  { %7028 = vmatpush.bf16.msrb.mxu3 %v14533_v39  ;;  %v18703_v13 = vpop.f32.mrf.mxu0  ;;  %v14714_v39 = vld [vmem:[#allocation7 + $0x1c90] sm:$0xf0]  ;;  %v14813_v22 = vor.u32 %v17630_v32, %v14810_v55 }
 0x549   :  { %v14717_v43 = vor.u32 %v17606_v23, %v14714_v39  ;;  %v14829_v23 = vor.u32 %v17634_v62, %v14826_v17  ;;  %v17682_v39 = vld [vmem:[#allocation7 + $0x1ee4] sm:$0xf] }
 0x54b   :  { %7029 = vmatmul.bf16.vlgmr.msrb.gmra.mxu3 %v18693_v37  ;;  %v14648_v37 = vld [vmem:[#allocation7 + $0x1c00] sm:$0xf]  ;;  %7847 = vmatpush.bf16.msra.mxu2 %v14969_v18  ;;  %v15002_v18 = vld [vmem:[#allocation7 + $0x1ed0] sm:$0xf0] }
 0x54c   :  { %v14649_v28 = vor.u32 %v17592_v54, %v14648_v37  ;;  %7883 = vmatpush.bf16.msrb.mxu1 %v14893_v51  ;;  %v14874_v37 = vld [vmem:[#allocation7 + $0x1dd0] sm:$0xf0]  ;;  %v14936_v54 = vld [vmem:[#allocation7 + $0x1e40] sm:$0xf]  ;;  %v17708_v51 = vld [vmem:[#allocation7 + $0x1fac] sm:$0xf0] }
 0x54d   :  { %v14937_v0 = vor.u32 %v17664_v56, %v14936_v54  ;;  %v15113_v8 = vor.u32 %v17708_v51, %v15112_v52  ;;  %v17704_v54 = vld [vmem:[#allocation7 + $0x1f8c] sm:$0xf0]  ;;  %v14906_v52 = vld [vmem:[#allocation7 + $0x1e10] sm:$0xf0]  ;;  %v17714_v51 = vld [vmem:[#allocation7 + $0x1fe4] sm:$0xf] }
 0x54e   :  { %7825 = vmatpush.bf16.msra.mxu0 %v14649_v28  ;;  %v14877_v28 = vor.u32 %v17646_v48, %v14874_v37  ;;  %v14986_v48 = vld [vmem:[#allocation7 + $0x1eb0] sm:$0xf0]  ;;  %v15096_v37 = vld [vmem:[#allocation7 + $0x1f80] sm:$0xf] }
 0x54f   :  { %7848 = vmatpush.bf16.msra.mxu2 %v14953_v40  ;;  %v14794_v40 = vld [vmem:[#allocation7 + $0x1d30] sm:$0xf0]  ;;  %v15097_v56 = vor.u32 %v17704_v54, %v15096_v37  ;;  %v14736_v54 = vld [vmem:[#allocation7 + $0x1ca8] sm:$0xf] }
 0x550   :  { %v6837_v53 = vpop.f32.mrf.mxu0  ;;  %7884 = vmatpush.bf16.msrb.mxu1 %v14877_v28  ;;  %v17622_v28 = vld [vmem:[#allocation7 + $0x1d04] sm:$0xf] }
 0x551   :  { %v14685_v53 = vor.u32 %v17598_v38, %v14682_v5  ;;  %v17674_v38 = vld [vmem:[#allocation7 + $0x1ea4] sm:$0xf]  ;;  %v14797_v5 = vor.u32 %v17626_v46, %v14794_v40  ;;  %v14752_v46 = vld [vmem:[#allocation7 + $0x1cc8] sm:$0xf]  ;;  %v17617_v40 = vld [vmem:[#allocation7 + $0x1cd4] sm:$0xf0] }
 0x552   :  { %7870 = vmatpush.bf16.msrb.mxu0 %v14765_v63  ;;  %v14666_v63 = vld [vmem:[#allocation7 + $0x1c30] sm:$0xf0]  ;;  %v14753_v37 = vor.u32 %v17617_v40, %v14752_v46 }
 0x553   :  { %v14669_v14 = vor.u32 %v17594_v36, %v14666_v63  ;;  %7849 = vmatpush.bf16.msra.mxu2 %v14937_v0  ;;  %v14778_v0 = vld [vmem:[#allocation7 + $0x1d10] sm:$0xf0]  ;;  %v17670_v36 = vld [vmem:[#allocation7 + $0x1e84] sm:$0xf] }
 0x554   :  { %7885 = vmatpush.bf16.msrb.mxu1 %v14861_v19  ;;  %v14781_v57 = vor.u32 %v17622_v28, %v14778_v0  ;;  %v17710_v28 = vld [vmem:[#allocation7 + $0x1fc4] sm:$0xf]  ;;  %v15130_v0 = vld [vmem:[#allocation7 + $0x1fd0] sm:$0xf0] }
 0x556   :  { %7871 = vmatpush.bf16.msrb.mxu0 %v14749_v9  ;;  %v14650_v9 = vld [vmem:[#allocation7 + $0x1c10] sm:$0xf0] }
 0x557   :  { %v14653_v21 = vor.u32 %v17590_v60, %v14650_v9  ;;  %7850 = vmatpush.bf16.msra.mxu2 %v14921_v3  ;;  %v17700_v3 = vld [vmem:[#allocation7 + $0x1f6c] sm:$0xf0]  ;;  %v17666_v9 = vld [vmem:[#allocation7 + $0x1e64] sm:$0xf] }
 0x558   :  { %v18705_v58 = vpop.f32.mrf.mxu1  ;;  %v18707_v42 = vpop.f32.mrf.mxu0  ;;  %7886 = vmatpush.bf16.msrb.mxu1 %v14845_v25  ;;  %v15081_v60 = vor.u32 %v17700_v3, %v15080_v7  ;;  %v14957_v24 = vor.u32 %v17666_v9, %v14954_v49  ;;  %v15064_v25 = vld [vmem:[#allocation7 + $0x1f40] sm:$0xf]  ;;  %v17609_v3 = vld [vmem:[#allocation7 + $0x1c94] sm:$0xf0]  ;;  %v15114_v9 = vld [vmem:[#allocation7 + $0x1fb0] sm:$0xf0] }
 0x55a   :  { %7872 = vmatpush.bf16.msrb.mxu0 %v14733_v4  ;;  %v15144_v4 = vld [vmem:[#allocation7 + $0x1fe0] sm:$0xf] }
 0x55b   :  { %v15145_v35 = vor.u32 %v17716_v30, %v15144_v4  ;;  %7851 = vmatpush.bf16.msra.mxu2 %v14905_v29  ;;  %v17662_v4 = vld [vmem:[#allocation7 + $0x1e44] sm:$0xf] }
 0x55c   :  { %7887 = vmatpush.bf16.msrb.mxu1 %v14829_v23  ;;  %v17692_v23 = vld [vmem:[#allocation7 + $0x1f2c] sm:$0xf0] }
 0x55d   :  { %7857 = vmatpush.bf16.msra.mxu3 %v15145_v35  ;;  %v15048_v35 = vld [vmem:[#allocation7 + $0x1f20] sm:$0xf] }
 0x55e   :  { %7873 = vmatpush.bf16.msrb.mxu0 %v14717_v43  ;;  %v15018_v43 = vld [vmem:[#allocation7 + $0x1ef0] sm:$0xf0] }
 0x560   :  { %v6850_v41 = vpop.f32.mrf.mxu1  ;;  %v6889_v44 = vpop.f32.mrf.mxu0  ;;  %7888 = vmatpush.bf16.msrb.mxu1 %v14813_v22 }
 0x561   :  { %v15021_v41 = vor.u32 %v17682_v39, %v15018_v43  ;;  %v15128_v44 = vld [vmem:[#allocation7 + $0x1fc0] sm:$0xf]  ;;  %v15049_v39 = vor.u32 %v17692_v23, %v15048_v35  ;;  %v17658_v43 = vld [vmem:[#allocation7 + $0x1e24] sm:$0xf] }
 0x562   :  { %7874 = vmatpush.bf16.msrb.mxu0 %v14701_v1  ;;  %v15129_v15 = vor.u32 %v17712_v50, %v15128_v44  ;;  %v15005_v1 = vor.u32 %v17678_v2, %v15002_v18  ;;  %v14768_v50 = vld [vmem:[#allocation7 + $0x1ce8] sm:$0xf] }
 0x563   :  { %7896 = vmatpush.bf16.msrb.mxu2 %v15021_v41  ;;  %v14922_v41 = vld [vmem:[#allocation7 + $0x1e30] sm:$0xf0] }
 0x564   :  { %7858 = vmatpush.bf16.msra.mxu3 %v15129_v15  ;;  %7889 = vmatpush.bf16.msrb.mxu1 %v14797_v5  ;;  %v17621_v15 = vld [vmem:[#allocation7 + $0x1cf4] sm:$0xf0]  ;;  %v14925_v32 = vor.u32 %v17658_v43, %v14922_v41  ;;  %v14688_v43 = vld [vmem:[#allocation7 + $0x1c48] sm:$0xf] }
 0x565   :  { %v14769_v18 = vor.u32 %v17621_v15, %v14768_v50  ;;  %v17601_v41 = vld [vmem:[#allocation7 + $0x1c54] sm:$0xf0] }
 0x566   :  { %7875 = vmatpush.bf16.msrb.mxu0 %v14685_v53  ;;  %v14989_v53 = vor.u32 %v17674_v38, %v14986_v48  ;;  %v15146_v38 = vld [vmem:[#allocation7 + $0x1ff0] sm:$0xf0]  ;;  %v17649_v15 = vld [vmem:[#allocation7 + $0x1dd4] sm:$0xf0] }
 0x567   :  { %7897 = vmatpush.bf16.msrb.mxu2 %v15005_v1  ;;  %v17654_v1 = vld [vmem:[#allocation7 + $0x1e04] sm:$0xf]  ;;  %v15149_v48 = vor.u32 %v17714_v51, %v15146_v38  ;;  %v15066_v51 = vld [vmem:[#allocation7 + $0x1f50] sm:$0xf0] }
 0x568   :  { %v18709_v59 = vpop.f32.mrf.mxu1  ;;  %7859 = vmatpush.bf16.msra.mxu3 %v15113_v8  ;;  %7890 = vmatpush.bf16.msrb.mxu1 %v14781_v57  ;;  %v15133_v57 = vor.u32 %v17710_v28, %v15130_v0  ;;  %v17690_v28 = vld [vmem:[#allocation7 + $0x1f24] sm:$0xf]  ;;  %v15050_v0 = vld [vmem:[#allocation7 + $0x1f30] sm:$0xf0] }
 0x56a   :  { %v18711_v12 = vpop.f32.mrf.mxu0  ;;  %7876 = vmatpush.bf16.msrb.mxu0 %v14669_v14  ;;  %v14970_v14 = vld [vmem:[#allocation7 + $0x1e90] sm:$0xf0] }
 0x56b   :  { %7898 = vmatpush.bf16.msrb.mxu2 %v14989_v53  ;;  %v14973_v19 = vor.u32 %v17670_v36, %v14970_v14  ;;  %v6179_v53 = vperm.slane %v18719_v26, 1 }
 0x56c   :  { %7860 = vmatpush.bf16.msra.mxu3 %v15097_v56  ;;  %v17613_v56 = vld [vmem:[#allocation7 + $0x1cb4] sm:$0xf0] }
 0x56d   :  { %v14737_v14 = vor.u32 %v17613_v56, %v14736_v54  ;;  %v17641_v56 = vld [vmem:[#allocation7 + $0x1d94] sm:$0xf0] }
 0x56e   :  { %v18713_v16 = vpop.f32.mrf.mxu2  ;;  %7877 = vmatpush.bf16.msrb.mxu0 %v14653_v21  ;;  %v6178_v21 = vperm.slane %v18719_v26, 0 }
 0x56f   :  { %7899 = vmatpush.bf16.msrb.mxu2 %v14973_v19  ;;  %v14720_v19 = vld [vmem:[#allocation7 + $0x1c88] sm:$0xf] }
 0x570   :  { %v6902_v33 = vpop.f32.mrf.mxu1  ;;  %7861 = vmatpush.bf16.msra.mxu3 %v15081_v60  ;;  %v6836_v29 = vadd.f32 %v18703_v13, %v6178_v21  ;;  %v15032_v13 = vld [vmem:[#allocation7 + $0x1f00] sm:$0xf]  ;;  %v17706_v60 = vld [vmem:[#allocation7 + $0x1fa4] sm:$0xf] }
 0x571   :  { %v17696_v33 = vld [vmem:[#allocation7 + $0x1f4c] sm:$0xf0]  ;;  %v15117_v21 = vor.u32 %v17706_v60, %v15114_v9  ;;  %v14832_v60 = vld [vmem:[#allocation7 + $0x1d68] sm:$0xf]  ;;  %v17637_v9 = vld [vmem:[#allocation7 + $0x1d74] sm:$0xf0] }
 0x572   :  { %v6941_v27 = vpop.f32.mrf.mxu0  ;;  %v15065_v20 = vor.u32 %v17696_v33, %v15064_v25  ;;  %v6849_v17 = vadd.f32 %v18705_v58, %v6836_v29  ;;  %v14721_v25 = vor.u32 %v17609_v3, %v14720_v19  ;;  %v14704_v33 = vld [vmem:[#allocation7 + $0x1c68] sm:$0xf]  ;;  %v17653_v29 = vld [vmem:[#allocation7 + $0x1df4] sm:$0xf0] }
 0x573   :  { %7900 = vmatpush.bf16.msrb.mxu2 %v14957_v24  ;;  %v14938_v27 = vld [vmem:[#allocation7 + $0x1e50] sm:$0xf0] }
 0x574   :  { %v14941_v62 = vor.u32 %v17662_v4, %v14938_v27  ;;  %7862 = vmatpush.bf16.msra.mxu3 %v15065_v20  ;;  %v6862_v44 = vadd.f32 %v18713_v16, %v6849_v17  ;;  %v14909_v16 = vor.u32 %v17654_v1, %v14906_v52  ;;  %v17605_v20 = vld [vmem:[#allocation7 + $0x1c74] sm:$0xf0]  ;;  %v14896_v4 = vld [vmem:[#allocation7 + $0x1de8] sm:$0xf]  ;;  %v17694_v52 = vld [vmem:[#allocation7 + $0x1f44] sm:$0xf] }
 0x575   :  { %v14705_v23 = vor.u32 %v17605_v20, %v14704_v33  ;;  %v17645_v1 = vld [vmem:[#allocation7 + $0x1db4] sm:$0xf0]  ;;  %v15069_v40 = vor.u32 %v17694_v52, %v15066_v51 }
 0x576   :  { %v6863_v47 = vpop.f32.mrf.mxu2  ;;  %v17685_v20 = vld [vmem:[#allocation7 + $0x1ef4] sm:$0xf0] }
 0x577   :  { %7901 = vmatpush.bf16.msrb.mxu2 %v14941_v62  ;;  %v17688_v47 = vld [vmem:[#allocation7 + $0x1f0c] sm:$0xf0] }
 0x578   :  { %v18715_v10 = vpop.f32.mrf.mxu1  ;;  %7863 = vmatpush.bf16.msra.mxu3 %v15049_v39  ;;  %v15033_v58 = vor.u32 %v17688_v47, %v15032_v13  ;;  %v14897_v39 = vor.u32 %v17653_v29, %v14896_v4  ;;  %v14689_v13 = vor.u32 %v17601_v41, %v14688_v43  ;;  %v17615_v4 = vld [vmem:[#allocation7 + $0x1ccc] sm:$0xf]  ;;  %v17681_v43 = vld [vmem:[#allocation7 + $0x1ed4] sm:$0xf0] }
 0x579   :  { %v17611_v41 = vld [vmem:[#allocation7 + $0x1cac] sm:$0xf] }
 0x57b   :  { %7902 = vmatpush.bf16.msrb.mxu2 %v14925_v32  ;;  %v17698_v32 = vld [vmem:[#allocation7 + $0x1f64] sm:$0xf] }
 0x57c   :  { %7864 = vmatpush.bf16.msra.mxu3 %v15033_v58  ;;  %v14864_v58 = vld [vmem:[#allocation7 + $0x1da8] sm:$0xf] }
 0x57d   :  { %v14865_v38 = vor.u32 %v17645_v1, %v14864_v58 }
 0x57e   :  { %v18717_v63 = vpop.f32.mrf.mxu2 }
 0x57f   :  { %7903 = vmatpush.bf16.msrb.mxu2 %v14909_v16 }
 0x580   :  { %v6954_v6 = vpop.f32.mrf.mxu1  ;;  %7909 = vmatpush.bf16.msrb.mxu3 %v15149_v48  ;;  %v14656_v48 = vld [vmem:[#allocation7 + $0x1c08] sm:$0xf] }
 0x581   :  { %v6888_v6 = vadd.f32 %v18707_v42, %v6179_v53  ;;  %v17702_v42 = vld [vmem:[#allocation7 + $0x1f84] sm:$0xf]  ;;  %v17593_v53 = vld [vmem:[#allocation7 + $0x1c14] sm:$0xf0] }
 0x583   :  { %v6901_v24 = vadd.f32 %v18709_v59, %v6888_v6  ;;  %v14880_v59 = vld [vmem:[#allocation7 + $0x1dc8] sm:$0xf]  ;;  %v14657_v6 = vor.u32 %v17593_v53, %v14656_v48  ;;  %v17603_v48 = vld [vmem:[#allocation7 + $0x1c6c] sm:$0xf]  ;;  %v14706_v53 = vld [vmem:[#allocation7 + $0x1c78] sm:$0xf0] }
 0x584   :  { %7910 = vmatpush.bf16.msrb.mxu3 %v15133_v57  ;;  %v14881_v47 = vor.u32 %v17649_v15, %v14880_v59  ;;  %v14770_v57 = vld [vmem:[#allocation7 + $0x1cf8] sm:$0xf0] }
 0x585   :  { %v6914_v27 = vadd.f32 %v18717_v63, %v6901_v24  ;;  %v15082_v63 = vld [vmem:[#allocation7 + $0x1f70] sm:$0xf0]  ;;  %v15024_v24 = vld [vmem:[#allocation7 + $0x1ee8] sm:$0xf]  ;;  %v14738_v59 = vld [vmem:[#allocation7 + $0x1cb8] sm:$0xf0] }
 0x586   :  { %v6915_v30 = vpop.f32.mrf.mxu2 }
 0x587   :  { %v15098_v30 = vld [vmem:[#allocation7 + $0x1f90] sm:$0xf0] }
 0x588   :  { %v18722_v45 = vpop.f32.mrf.mxu0  ;;  %7911 = vmatpush.bf16.msrb.mxu3 %v15117_v21  ;;  %v15101_v17 = vor.u32 %v17702_v42, %v15098_v30  ;;  %v14833_v30 = vor.u32 %v17637_v9, %v14832_v60  ;;  %v14882_v60 = vld [vmem:[#allocation7 + $0x1dd8] sm:$0xf0]  ;;  %v6181_v9 = vperm.slane %v18719_v26, 3 }
 0x58c   :  { %7912 = vmatpush.bf16.msrb.mxu3 %v15101_v17 }
 0x58e   :  { %v6874_v55 = vpop.f32.mrf.mxu3 }
 0x58f   :  { %v6875_v2 = vadd.f32 %v6874_v55, %v6862_v44  ;;  %v15085_v55 = vor.u32 %v17698_v32, %v15082_v63  ;;  %v14741_v32 = vor.u32 %v17611_v41, %v14738_v59  ;;  %v14800_v63 = vld [vmem:[#allocation7 + $0x1d28] sm:$0xf]  ;;  %v15272_v41 = vld [vmem:[#allocation7 + $0x20e0] sm:$0xf]  ;;  %v17748_v59 = vld [vmem:[#allocation7 + $0x20ec] sm:$0xf0] }
 0x590   :  { %v6993_v22 = vpop.f32.mrf.mxu0 }
 0x591   :  { %v18727_v8 = vpack.c.bf16 %v6875_v2, %v6875_v2  ;;  %v18729_v5 = vpop.f32.mrf.mxu2  ;;  %v6180_v2 = vperm.slane %v18719_v26, 2  ;;  %v14672_v22 = vld [vmem:[#allocation7 + $0x1c28] sm:$0xf]  ;;  %7913 = vmatpush.bf16.msrb.mxu3 %v15085_v55  ;;  %v17629_v55 = vld [vmem:[#allocation7 + $0x1d34] sm:$0xf0] }
 0x592   :  { %v14801_v1 = vor.u32 %v17629_v55, %v14800_v63  ;;  %v14912_v63 = vld [vmem:[#allocation7 + $0x1e08] sm:$0xf]  ;;  %v17657_v55 = vld [vmem:[#allocation7 + $0x1e14] sm:$0xf0] }
 0x593   :  { %7826 = vmatmul.bf16.vlgmr.msra.gmra.mxu0 %v18727_v8  ;;  %v6940_v54 = vadd.f32 %v18711_v12, %v6180_v2  ;;  %v17686_v12 = vld [vmem:[#allocation7 + $0x1f04] sm:$0xf]  ;;  %v14992_v2 = vld [vmem:[#allocation7 + $0x1ea8] sm:$0xf] }
 0x594   :  { %7922 = vmatpush.bf16.msra.mxu0 %v14769_v18  ;;  %v17597_v18 = vld [vmem:[#allocation7 + $0x1c34] sm:$0xf0] }
 0x595   :  { %v14673_v16 = vor.u32 %v17597_v18, %v14672_v22  ;;  %7914 = vmatpush.bf16.msrb.mxu3 %v15069_v40  ;;  %v6953_v19 = vadd.f32 %v18715_v10, %v6940_v54  ;;  %v17607_v22 = vld [vmem:[#allocation7 + $0x1c8c] sm:$0xf]  ;;  %v14722_v18 = vld [vmem:[#allocation7 + $0x1c98] sm:$0xf0]  ;;  %v17625_v40 = vld [vmem:[#allocation7 + $0x1d14] sm:$0xf0] }
 0x596   :  { %v6876_v36 = vpop.f32.mrf.mxu3  ;;  %v14725_v51 = vor.u32 %v17607_v22, %v14722_v18  ;;  %v14898_v54 = vld [vmem:[#allocation7 + $0x1df8] sm:$0xf0]  ;;  %v17717_v22 = vld [vmem:[#allocation7 + $0x1ff4] sm:$0xf0]  ;;  %v17635_v18 = vld [vmem:[#allocation7 + $0x1d6c] sm:$0xf] }
 0x597   :  { %v17619_v36 = vld [vmem:[#allocation7 + $0x1cec] sm:$0xf] }
 0x598   :  { %7923 = vmatpush.bf16.msra.mxu0 %v14753_v37  ;;  %v18734_v7 = vpop.f32.mrf.mxu1  ;;  %v14848_v37 = vld [vmem:[#allocation7 + $0x1d88] sm:$0xf]  ;;  %v14773_v21 = vor.u32 %v17619_v36, %v14770_v57 }
 0x599   :  { %v6967_v49 = vpop.f32.mrf.mxu2  ;;  %v14849_v3 = vor.u32 %v17641_v56, %v14848_v37  ;;  %v17651_v37 = vld [vmem:[#allocation7 + $0x1dec] sm:$0xf]  ;;  %v14960_v36 = vld [vmem:[#allocation7 + $0x1e68] sm:$0xf] }
 0x59a   :  { %v6966_v49 = vadd.f32 %v18729_v5, %v6953_v19  ;;  %v15025_v5 = vor.u32 %v17685_v20, %v15024_v24  ;;  %v14901_v57 = vor.u32 %v17651_v37, %v14898_v54  ;;  %v17599_v19 = vld [vmem:[#allocation7 + $0x1c4c] sm:$0xf]  ;;  %v14944_v24 = vld [vmem:[#allocation7 + $0x1e48] sm:$0xf]  ;;  %v14674_v20 = vld [vmem:[#allocation7 + $0x1c38] sm:$0xf0] }
 0x59b   :  { %v15136_v37 = vld [vmem:[#allocation7 + $0x1fc8] sm:$0xf]  ;;  %v17713_v54 = vld [vmem:[#allocation7 + $0x1fd4] sm:$0xf0] }
 0x59c   :  { %7924 = vmatpush.bf16.msra.mxu0 %v14737_v14  ;;  %v15053_v14 = vor.u32 %v17690_v28, %v15050_v0  ;;  %v14709_v0 = vor.u32 %v17603_v48, %v14706_v53 }
 0x59e   :  { %v6926_v62 = vpop.f32.mrf.mxu3  ;;  %7915 = vmatpush.bf16.msrb.mxu3 %v15053_v14  ;;  %v17669_v14 = vld [vmem:[#allocation7 + $0x1e74] sm:$0xf0] }
 0x59f   :  { %v6927_v35 = vadd.f32 %v6926_v62, %v6914_v27  ;;  %v14754_v27 = vld [vmem:[#allocation7 + $0x1cd8] sm:$0xf0] }
 0x5a0   :  { %7925 = vmatpush.bf16.msra.mxu0 %v14721_v25  ;;  %v7006_v50 = vpop.f32.mrf.mxu1  ;;  %v15034_v25 = vld [vmem:[#allocation7 + $0x1f10] sm:$0xf0]  ;;  %v14757_v17 = vor.u32 %v17615_v4, %v14754_v27  ;;  %v17643_v4 = vld [vmem:[#allocation7 + $0x1dac] sm:$0xf]  ;;  %v14866_v27 = vld [vmem:[#allocation7 + $0x1db8] sm:$0xf0] }
 0x5a1   :  { %v18738_v44 = vpack.c.bf16 %v6927_v35, %v6927_v35  ;;  %v15037_v29 = vor.u32 %v17686_v12, %v15034_v25  ;;  %v14816_v35 = vld [vmem:[#allocation7 + $0x1d48] sm:$0xf]  ;;  %v17665_v25 = vld [vmem:[#allocation7 + $0x1e54] sm:$0xf0] }
 0x5a3   :  { %7839 = vmatmul.bf16.vlgmr.msra.gmra.mxu1 %v18738_v44  ;;  %7878 = vmatmul.bf16.vlgmr.msrb.gmra.mxu0 %v18727_v8 }
 0x5a4   :  { %7926 = vmatpush.bf16.msra.mxu0 %v14705_v23  ;;  %7935 = vmatpush.bf16.msra.mxu1 %v14897_v39  ;;  %v17633_v23 = vld [vmem:[#allocation7 + $0x1d54] sm:$0xf0]  ;;  %v15008_v39 = vld [vmem:[#allocation7 + $0x1ec8] sm:$0xf] }
 0x5a5   :  { %7916 = vmatpush.bf16.msrb.mxu3 %v15037_v29  ;;  %v14817_v50 = vor.u32 %v17633_v23, %v14816_v35  ;;  %v15009_v15 = vor.u32 %v17681_v43, %v15008_v39  ;;  %v14945_v29 = vor.u32 %v17665_v25, %v14944_v24  ;;  %v17591_v35 = vld [vmem:[#allocation7 + $0x1c0c] sm:$0xf]  ;;  %v14658_v23 = vld [vmem:[#allocation7 + $0x1c18] sm:$0xf0] }
 0x5a6   :  { %v6928_v46 = vpop.f32.mrf.mxu3  ;;  %v17639_v39 = vld [vmem:[#allocation7 + $0x1d8c] sm:$0xf]  ;;  %v14850_v43 = vld [vmem:[#allocation7 + $0x1d98] sm:$0xf0] }
 0x5a7   :  { %v14784_v46 = vld [vmem:[#allocation7 + $0x1d08] sm:$0xf]  ;;  %v14802_v25 = vld [vmem:[#allocation7 + $0x1d38] sm:$0xf0] }
 0x5a8   :  { %7927 = vmatpush.bf16.msra.mxu0 %v14689_v13  ;;  %7936 = vmatpush.bf16.msra.mxu1 %v14881_v47  ;;  %v17677_v47 = vld [vmem:[#allocation7 + $0x1eb4] sm:$0xf0]  ;;  %v14785_v56 = vor.u32 %v17625_v40, %v14784_v46  ;;  %v17744_v40 = vld [vmem:[#allocation7 + $0x20cc] sm:$0xf0] }
 0x5a9   :  { %v14993_v52 = vor.u32 %v17677_v47, %v14992_v2  ;;  %v15152_v47 = vld [vmem:[#allocation7 + $0x1fe8] sm:$0xf] }
 0x5ac   :  { %7928 = vmatpush.bf16.msra.mxu0 %v14673_v16  ;;  %7937 = vmatpush.bf16.msra.mxu1 %v14865_v38  ;;  %v14976_v16 = vld [vmem:[#allocation7 + $0x1e88] sm:$0xf]  ;;  %v17673_v38 = vld [vmem:[#allocation7 + $0x1e94] sm:$0xf0] }
 0x5ad   :  { %v14977_v28 = vor.u32 %v17673_v38, %v14976_v16  ;;  %v14913_v16 = vor.u32 %v17657_v55, %v14912_v63  ;;  %v15153_v38 = vor.u32 %v17717_v22, %v15152_v47  ;;  %v15088_v55 = vld [vmem:[#allocation7 + $0x1f68] sm:$0xf]  ;;  %v17667_v47 = vld [vmem:[#allocation7 + $0x1e6c] sm:$0xf]  ;;  %v14962_v22 = vld [vmem:[#allocation7 + $0x1e78] sm:$0xf0] }
 0x5ae   :  { %v6978_v33 = vpop.f32.mrf.mxu3 }
 0x5af   :  { %v6979_v42 = vadd.f32 %v6978_v33, %v6966_v49  ;;  %v18746_v10 = vpop.f32.mrf.mxu2  ;;  %v14961_v49 = vor.u32 %v17669_v14, %v14960_v36  ;;  %v17595_v33 = vld [vmem:[#allocation7 + $0x1c2c] sm:$0xf]  ;;  %v15240_v14 = vld [vmem:[#allocation7 + $0x20a0] sm:$0xf] }
 0x5b0   :  { %7929 = vmatpush.bf16.msra.mxu0 %v14657_v6  ;;  %7938 = vmatpush.bf16.msra.mxu1 %v14849_v3  ;;  %v14690_v6 = vld [vmem:[#allocation7 + $0x1c58] sm:$0xf0]  ;;  %v17647_v3 = vld [vmem:[#allocation7 + $0x1dcc] sm:$0xf]  ;;  %v14677_v26 = vor.u32 %v17595_v33, %v14674_v20 }
 0x5b1   :  { %v18748_v62 = vpack.c.bf16 %v6979_v42, %v6979_v42  ;;  %v14885_v12 = vor.u32 %v17647_v3, %v14882_v60  ;;  %v14928_v42 = vld [vmem:[#allocation7 + $0x1e28] sm:$0xf]  ;;  %v17679_v36 = vld [vmem:[#allocation7 + $0x1ecc] sm:$0xf]  ;;  %v14994_v20 = vld [vmem:[#allocation7 + $0x1eb8] sm:$0xf0] }
 0x5b2   :  { %v17675_v33 = vld [vmem:[#allocation7 + $0x1eac] sm:$0xf] }
 0x5b3   :  { %7852 = vmatmul.bf16.vlgmr.msra.gmra.mxu2 %v18748_v62  ;;  %7891 = vmatmul.bf16.vlgmr.msrb.gmra.mxu1 %v18738_v44 }
 0x5b4   :  { %7974 = vmatpush.bf16.msrb.mxu0 %v14773_v21  ;;  %7939 = vmatpush.bf16.msra.mxu1 %v14833_v30  ;;  %v14693_v21 = vor.u32 %v17599_v19, %v14690_v6  ;;  %v17661_v30 = vld [vmem:[#allocation7 + $0x1e34] sm:$0xf0]  ;;  %v17740_v19 = vld [vmem:[#allocation7 + $0x20ac] sm:$0xf0]  ;;  %v15137_v6 = vor.u32 %v17713_v54, %v15136_v37  ;;  %v15176_v37 = vld [vmem:[#allocation7 + $0x2020] sm:$0xf] }
 0x5b5   :  { %7930 = vmatmul.bf16.vlgmr.msra.gmra.mxu0 %v18727_v8  ;;  %7948 = vmatpush.bf16.msra.mxu2 %v15025_v5  ;;  %v6992_v5 = vadd.f32 %v18722_v45, %v6181_v9  ;;  %v14853_v45 = vor.u32 %v17639_v39, %v14850_v43  ;;  %v15120_v9 = vld [vmem:[#allocation7 + $0x1fa8] sm:$0xf]  ;;  %v14978_v39 = vld [vmem:[#allocation7 + $0x1e98] sm:$0xf0]  ;;  %v15208_v43 = vld [vmem:[#allocation7 + $0x2060] sm:$0xf] }
 0x5b6   :  { %v6980_v13 = vpop.f32.mrf.mxu3  ;;  %v17724_v54 = vld [vmem:[#allocation7 + $0x202c] sm:$0xf0] }
 0x5b7   :  { %v7019_v58 = vpop.f32.mrf.mxu2  ;;  %v15273_v13 = vor.u32 %v17748_v59, %v15272_v41  ;;  %v17732_v41 = vld [vmem:[#allocation7 + $0x206c] sm:$0xf0]  ;;  %v15400_v59 = vld [vmem:[#allocation7 + $0x21e0] sm:$0xf] }
 0x5b8   :  { %7975 = vmatpush.bf16.msrb.mxu0 %v14757_v17  ;;  %7940 = vmatpush.bf16.msra.mxu1 %v14817_v50  ;;  %v14869_v17 = vor.u32 %v17643_v4, %v14866_v27  ;;  %v7005_v50 = vadd.f32 %v18734_v7, %v6992_v5  ;;  %v15256_v7 = vld [vmem:[#allocation7 + $0x20c0] sm:$0xf]  ;;  %v17736_v4 = vld [vmem:[#allocation7 + $0x208c] sm:$0xf0]  ;;  %v17623_v5 = vld [vmem:[#allocation7 + $0x1d0c] sm:$0xf] }
 0x5b9   :  { %7949 = vmatpush.bf16.msra.mxu2 %v15009_v15  ;;  %v14929_v15 = vor.u32 %v17661_v30, %v14928_v42  ;;  %v14997_v42 = vor.u32 %v17675_v33, %v14994_v20  ;;  %v17705_v30 = vld [vmem:[#allocation7 + $0x1f94] sm:$0xf0]  ;;  %v15274_v33 = vld [vmem:[#allocation7 + $0x20f0] sm:$0xf0]  ;;  %v15040_v20 = vld [vmem:[#allocation7 + $0x1f08] sm:$0xf] }
 0x5ba   :  { %v7018_v2 = vadd.f32 %v18746_v10, %v7005_v50  ;;  %v17780_v50 = vld [vmem:[#allocation7 + $0x21ec] sm:$0xf0] }
 0x5bc   :  { %7976 = vmatpush.bf16.msrb.mxu0 %v14741_v32  ;;  %7941 = vmatpush.bf16.msra.mxu1 %v14801_v1  ;;  %v14661_v32 = vor.u32 %v17591_v35, %v14658_v23  ;;  %v14834_v1 = vld [vmem:[#allocation7 + $0x1d78] sm:$0xf0]  ;;  %v17671_v23 = vld [vmem:[#allocation7 + $0x1e8c] sm:$0xf] }
 0x5bd   :  { %7950 = vmatpush.bf16.msra.mxu2 %v14993_v52  ;;  %v17683_v52 = vld [vmem:[#allocation7 + $0x1eec] sm:$0xf]  ;;  %v14837_v10 = vor.u32 %v17635_v18, %v14834_v1  ;;  %v14981_v63 = vor.u32 %v17671_v23, %v14978_v39  ;;  %v15192_v18 = vld [vmem:[#allocation7 + $0x2040] sm:$0xf] }
 0x5be   :  { %v15384_v1 = vld [vmem:[#allocation7 + $0x21c0] sm:$0xf] }
 0x5bf   :  { %v15528_v23 = vld [vmem:[#allocation7 + $0x22e0] sm:$0xf] }
 0x5c0   :  { %7977 = vmatpush.bf16.msrb.mxu0 %v14725_v51  ;;  %7942 = vmatpush.bf16.msra.mxu1 %v14785_v56  ;;  %v15026_v51 = vld [vmem:[#allocation7 + $0x1ef8] sm:$0xf0]  ;;  %v17631_v56 = vld [vmem:[#allocation7 + $0x1d4c] sm:$0xf] }
 0x5c1   :  { %7951 = vmatpush.bf16.msra.mxu2 %v14977_v28  ;;  %v15029_v53 = vor.u32 %v17683_v52, %v15026_v51  ;;  %v15257_v28 = vor.u32 %v17744_v40, %v15256_v7  ;;  %v17776_v52 = vld [vmem:[#allocation7 + $0x21cc] sm:$0xf0]  ;;  %v15072_v7 = vld [vmem:[#allocation7 + $0x1f48] sm:$0xf]  ;;  %v17697_v40 = vld [vmem:[#allocation7 + $0x1f54] sm:$0xf0] }
 0x5c3   :  { %7904 = vmatmul.bf16.vlgmr.msrb.gmra.mxu2 %v18748_v62  ;;  %7943 = vmatmul.bf16.vlgmr.msra.gmra.mxu1 %v18738_v44 }
 0x5c4   :  { %7978 = vmatpush.bf16.msrb.mxu0 %v14709_v0  ;;  %7987 = vmatpush.bf16.msrb.mxu1 %v14901_v57  ;;  %v14818_v0 = vld [vmem:[#allocation7 + $0x1d58] sm:$0xf0] }
 0x5c5   :  { %7952 = vmatpush.bf16.msra.mxu2 %v14961_v49  ;;  %v15010_v57 = vld [vmem:[#allocation7 + $0x1ed8] sm:$0xf0]  ;;  %v14821_v3 = vor.u32 %v17631_v56, %v14818_v0  ;;  %v17709_v49 = vld [vmem:[#allocation7 + $0x1fb4] sm:$0xf0]  ;;  %v15368_v56 = vld [vmem:[#allocation7 + $0x21a0] sm:$0xf]  ;;  %v15073_v0 = vor.u32 %v17697_v40, %v15072_v7 }
 0x5c6   :  { %v15013_v60 = vor.u32 %v17679_v36, %v15010_v57  ;;  %v15121_v27 = vor.u32 %v17709_v49, %v15120_v9  ;;  %v15056_v57 = vld [vmem:[#allocation7 + $0x1f28] sm:$0xf]  ;;  %v15160_v9 = vld [vmem:[#allocation7 + $0x2000] sm:$0xf]  ;;  %v17720_v49 = vld [vmem:[#allocation7 + $0x200c] sm:$0xf0] }
 0x5c7   :  { %v15122_v7 = vld [vmem:[#allocation7 + $0x1fb8] sm:$0xf0] }
 0x5c8   :  { %7979 = vmatpush.bf16.msrb.mxu0 %v14693_v21  ;;  %7988 = vmatpush.bf16.msrb.mxu1 %v14885_v12  ;;  %v17627_v21 = vld [vmem:[#allocation7 + $0x1d2c] sm:$0xf]  ;;  %v15241_v12 = vor.u32 %v17740_v19, %v15240_v14  ;;  %v17693_v14 = vld [vmem:[#allocation7 + $0x1f34] sm:$0xf0]  ;;  %v15177_v19 = vor.u32 %v17724_v54, %v15176_v37  ;;  %v17804_v37 = vld [vmem:[#allocation7 + $0x22ac] sm:$0xf0] }
 0x5c9   :  { %7953 = vmatpush.bf16.msra.mxu2 %v14945_v29  ;;  %v15104_v29 = vld [vmem:[#allocation7 + $0x1f88] sm:$0xf]  ;;  %v17734_v54 = vld [vmem:[#allocation7 + $0x2084] sm:$0xf] }
 0x5cc   :  { %7980 = vmatpush.bf16.msrb.mxu0 %v14677_v26  ;;  %7989 = vmatpush.bf16.msrb.mxu1 %v14869_v17  ;;  %v14805_v26 = vor.u32 %v17627_v21, %v14802_v25  ;;  %v14786_v17 = vld [vmem:[#allocation7 + $0x1d18] sm:$0xf0]  ;;  %v15352_v21 = vld [vmem:[#allocation7 + $0x2180] sm:$0xf]  ;;  %v17746_v25 = vld [vmem:[#allocation7 + $0x20e4] sm:$0xf] }
 0x5cd   :  { %7954 = vmatpush.bf16.msra.mxu2 %v14929_v15  ;;  %v15105_v15 = vor.u32 %v17705_v30, %v15104_v29  ;;  %v15154_v30 = vld [vmem:[#allocation7 + $0x1ff8] sm:$0xf0] }
 0x5ce   :  { %v7030_v58 = vpop.f32.mrf.mxu3 }
 0x5cf   :  { %v7031_v46 = vadd.f32 %v7030_v58, %v7018_v2  ;;  %v17701_v2 = vld [vmem:[#allocation7 + $0x1f74] sm:$0xf0]  ;;  %v17728_v58 = vld [vmem:[#allocation7 + $0x204c] sm:$0xf0] }
 0x5d0   :  { %7981 = vmatpush.bf16.msrb.mxu0 %v14661_v32  ;;  %7990 = vmatpush.bf16.msrb.mxu1 %v14853_v45  ;;  %v14789_v32 = vor.u32 %v17623_v5, %v14786_v17  ;;  %v15209_v45 = vor.u32 %v17732_v41, %v15208_v43  ;;  %v15089_v51 = vor.u32 %v17701_v2, %v15088_v55  ;;  %v15336_v17 = vld [vmem:[#allocation7 + $0x2160] sm:$0xf]  ;;  %v17812_v43 = vld [vmem:[#allocation7 + $0x22ec] sm:$0xf0]  ;;  %v17742_v41 = vld [vmem:[#allocation7 + $0x20c4] sm:$0xf] }
 0x5d1   :  { %v18759_v48 = vpack.c.bf16 %v7031_v46, %v7031_v46  ;;  %7955 = vmatpush.bf16.msra.mxu2 %v14913_v16  ;;  %v14965_v46 = vor.u32 %v17667_v47, %v14962_v22  ;;  %v15193_v16 = vor.u32 %v17728_v58, %v15192_v18  ;;  %v15277_v5 = vor.u32 %v17746_v25, %v15274_v33  ;;  %v15138_v55 = vld [vmem:[#allocation7 + $0x1fd8] sm:$0xf0]  ;;  %v17760_v47 = vld [vmem:[#allocation7 + $0x214c] sm:$0xf0]  ;;  %v15512_v22 = vld [vmem:[#allocation7 + $0x22c0] sm:$0xf] }
 0x5d2   :  { %v15529_v2 = vor.u32 %v17812_v43, %v15528_v23  ;;  %v17808_v18 = vld [vmem:[#allocation7 + $0x22cc] sm:$0xf0]  ;;  %v17738_v58 = vld [vmem:[#allocation7 + $0x20a4] sm:$0xf]  ;;  %v17699_v33 = vld [vmem:[#allocation7 + $0x1f6c] sm:$0xf] }
 0x5d3   :  { %7865 = vmatmul.bf16.vlgmr.msra.gmra.mxu3 %v18759_v48  ;;  %7982 = vmatmul.bf16.vlgmr.msrb.gmra.mxu0 %v18727_v8  ;;  %v15224_v8 = vld [vmem:[#allocation7 + $0x2080] sm:$0xf]  ;;  %v15513_v40 = vor.u32 %v17808_v18, %v15512_v22  ;;  %v15074_v23 = vld [vmem:[#allocation7 + $0x1f58] sm:$0xf0] }
 0x5d4   :  { %8822 = vmatpush.bf16.msra.mxu0 %v15273_v13  ;;  %7961 = vmatpush.bf16.msra.mxu3 %v15153_v38  ;;  %v15225_v35 = vor.u32 %v17736_v4, %v15224_v8  ;;  %v15401_v13 = vor.u32 %v17780_v50, %v15400_v59  ;;  %v15385_v38 = vor.u32 %v17776_v52, %v15384_v1  ;;  %v17689_v8 = vld [vmem:[#allocation7 + $0x1f14] sm:$0xf0]  ;;  %v17655_v4 = vld [vmem:[#allocation7 + $0x1e0c] sm:$0xf]  ;;  %v15258_v59 = vld [vmem:[#allocation7 + $0x20d0] sm:$0xf0] }
 0x5d5   :  { %7991 = vmatpush.bf16.msrb.mxu1 %v14837_v10  ;;  %8000 = vmatpush.bf16.msrb.mxu2 %v15029_v53  ;;  %v17663_v10 = vld [vmem:[#allocation7 + $0x1e4c] sm:$0xf]  ;;  %v14946_v53 = vld [vmem:[#allocation7 + $0x1e58] sm:$0xf0]  ;;  %v15041_v39 = vor.u32 %v17689_v8, %v15040_v20  ;;  %v15242_v1 = vld [vmem:[#allocation7 + $0x20b0] sm:$0xf0] }
 0x5d6   :  { %v7032_v24 = vpop.f32.mrf.mxu3  ;;  %7956 = vmatmul.bf16.vlgmr.msra.gmra.mxu2 %v18748_v62  ;;  %v14949_v36 = vor.u32 %v17663_v10, %v14946_v53  ;;  %v17756_v10 = vld [vmem:[#allocation7 + $0x212c] sm:$0xf0]  ;;  %v15496_v53 = vld [vmem:[#allocation7 + $0x22a0] sm:$0xf] }
 0x5d7   :  { %v17768_v24 = vld [vmem:[#allocation7 + $0x218c] sm:$0xf0]  ;;  %v15432_v18 = vld [vmem:[#allocation7 + $0x2220] sm:$0xf] }
 0x5d8   :  { %8823 = vmatpush.bf16.msra.mxu0 %v15257_v28  ;;  %7962 = vmatpush.bf16.msra.mxu3 %v15137_v6  ;;  %v17772_v28 = vld [vmem:[#allocation7 + $0x21ac] sm:$0xf0]  ;;  %v15353_v29 = vor.u32 %v17768_v24, %v15352_v21  ;;  %v15210_v21 = vld [vmem:[#allocation7 + $0x2070] sm:$0xf0]  ;;  %v17778_v24 = vld [vmem:[#allocation7 + $0x21e4] sm:$0xf] }
 0x5d9   :  { %7992 = vmatpush.bf16.msrb.mxu1 %v14821_v3  ;;  %8001 = vmatpush.bf16.msrb.mxu2 %v15013_v60  ;;  %v15369_v6 = vor.u32 %v17772_v28, %v15368_v56  ;;  %v17659_v3 = vld [vmem:[#allocation7 + $0x1e2c] sm:$0xf]  ;;  %v14930_v60 = vld [vmem:[#allocation7 + $0x1e38] sm:$0xf0]  ;;  %v15226_v56 = vld [vmem:[#allocation7 + $0x2090] sm:$0xf0] }
 0x5dc   :  { %8824 = vmatpush.bf16.msra.mxu0 %v15241_v12  ;;  %7963 = vmatpush.bf16.msra.mxu3 %v15121_v27  ;;  %v15057_v12 = vor.u32 %v17693_v14, %v15056_v57  ;;  %v15161_v27 = vor.u32 %v17720_v49, %v15160_v9  ;;  %v15106_v57 = vld [vmem:[#allocation7 + $0x1f98] sm:$0xf0]  ;;  %v15497_v14 = vor.u32 %v17804_v37, %v15496_v53  ;;  %v17800_v9 = vld [vmem:[#allocation7 + $0x228c] sm:$0xf0]  ;;  %v17730_v49 = vld [vmem:[#allocation7 + $0x2064] sm:$0xf] }
 0x5dd   :  { %7993 = vmatpush.bf16.msrb.mxu1 %v14805_v26  ;;  %8002 = vmatpush.bf16.msrb.mxu2 %v14997_v42  ;;  %v14914_v26 = vld [vmem:[#allocation7 + $0x1e18] sm:$0xf0]  ;;  %v17715_v42 = vld [vmem:[#allocation7 + $0x1fec] sm:$0xf]  ;;  %v15213_v8 = vor.u32 %v17730_v49, %v15210_v21  ;;  %v15264_v21 = vld [vmem:[#allocation7 + $0x20c8] sm:$0xf] }
 0x5de   :  { %v14917_v50 = vor.u32 %v17655_v4, %v14914_v26  ;;  %v15464_v4 = vld [vmem:[#allocation7 + $0x2260] sm:$0xf]  ;;  %v17726_v26 = vld [vmem:[#allocation7 + $0x2044] sm:$0xf]  ;;  %v15042_v53 = vld [vmem:[#allocation7 + $0x1f18] sm:$0xf0] }
 0x5e0   :  { %8825 = vmatpush.bf16.msra.mxu0 %v15225_v35  ;;  %7964 = vmatpush.bf16.msra.mxu3 %v15105_v15  ;;  %v17764_v35 = vld [vmem:[#allocation7 + $0x216c] sm:$0xf0]  ;;  %v15157_v15 = vor.u32 %v17715_v42, %v15154_v30  ;;  %v15194_v42 = vld [vmem:[#allocation7 + $0x2050] sm:$0xf0] }
 0x5e1   :  { %7994 = vmatpush.bf16.msrb.mxu1 %v14789_v32  ;;  %8003 = vmatpush.bf16.msrb.mxu2 %v14981_v63  ;;  %v15337_v32 = vor.u32 %v17764_v35, %v15336_v17  ;;  %v17711_v63 = vld [vmem:[#allocation7 + $0x1fcc] sm:$0xf]  ;;  %v15386_v17 = vld [vmem:[#allocation7 + $0x21d0] sm:$0xf0]  ;;  %v15197_v43 = vor.u32 %v17726_v26, %v15194_v42  ;;  %v15248_v42 = vld [vmem:[#allocation7 + $0x20a8] sm:$0xf] }
 0x5e2   :  { %v15141_v52 = vor.u32 %v17711_v63, %v15138_v55  ;;  %v17695_v35 = vld [vmem:[#allocation7 + $0x1f4c] sm:$0xf]  ;;  %v17770_v55 = vld [vmem:[#allocation7 + $0x21a4] sm:$0xf] }
 0x5e3   :  { %7917 = vmatmul.bf16.vlgmr.msrb.gmra.mxu3 %v18759_v48  ;;  %v15077_v63 = vor.u32 %v17695_v35, %v15074_v23 }
 0x5e4   :  { %8826 = vmatpush.bf16.msra.mxu0 %v15209_v45  ;;  %7965 = vmatpush.bf16.msra.mxu3 %v15089_v51  ;;  %v15261_v45 = vor.u32 %v17742_v41, %v15258_v59  ;;  %v15448_v41 = vld [vmem:[#allocation7 + $0x2240] sm:$0xf] }
 0x5e5   :  { %8835 = vmatpush.bf16.msra.mxu1 %v15401_v13  ;;  %8004 = vmatpush.bf16.msrb.mxu2 %v14965_v46  ;;  %v15320_v13 = vld [vmem:[#allocation7 + $0x2140] sm:$0xf]  ;;  %v17707_v46 = vld [vmem:[#allocation7 + $0x1fac] sm:$0xf] }
 0x5e6   :  { %7995 = vmatmul.bf16.vlgmr.msrb.gmra.mxu1 %v18738_v44  ;;  %v14933_v44 = vor.u32 %v17659_v3, %v14930_v60  ;;  %v15321_v51 = vor.u32 %v17760_v47, %v15320_v13  ;;  %v15125_v28 = vor.u32 %v17707_v46, %v15122_v7  ;;  %v17752_v3 = vld [vmem:[#allocation7 + $0x210c] sm:$0xf0]  ;;  %v15480_v60 = vld [vmem:[#allocation7 + $0x2280] sm:$0xf]  ;;  %v15058_v13 = vld [vmem:[#allocation7 + $0x1f38] sm:$0xf0] }
 0x5e7   :  { %v15481_v20 = vor.u32 %v17800_v9, %v15480_v60  ;;  %v17766_v46 = vld [vmem:[#allocation7 + $0x2184] sm:$0xf]  ;;  %v15530_v9 = vld [vmem:[#allocation7 + $0x22f0] sm:$0xf0] }
 0x5e8   :  { %8827 = vmatpush.bf16.msra.mxu0 %v15193_v16  ;;  %7966 = vmatpush.bf16.msra.mxu3 %v15073_v0  ;;  %v15245_v16 = vor.u32 %v17738_v58, %v15242_v1  ;;  %v17788_v58 = vld [vmem:[#allocation7 + $0x222c] sm:$0xf0]  ;;  %v17810_v60 = vld [vmem:[#allocation7 + $0x22e4] sm:$0xf] }
 0x5e9   :  { %8836 = vmatpush.bf16.msra.mxu1 %v15385_v38  ;;  %8005 = vmatpush.bf16.msrb.mxu2 %v14949_v36  ;;  %v15304_v38 = vld [vmem:[#allocation7 + $0x2120] sm:$0xf]  ;;  %v17703_v36 = vld [vmem:[#allocation7 + $0x1f8c] sm:$0xf]  ;;  %v15433_v37 = vor.u32 %v17788_v58, %v15432_v18  ;;  %v17798_v58 = vld [vmem:[#allocation7 + $0x2284] sm:$0xf] }
 0x5ea   :  { %v15305_v0 = vor.u32 %v17756_v10, %v15304_v38  ;;  %v17749_v38 = vld [vmem:[#allocation7 + $0x20f4] sm:$0xf0]  ;;  %v17687_v10 = vld [vmem:[#allocation7 + $0x1f0c] sm:$0xf] }
 0x5ec   :  { %8828 = vmatpush.bf16.msra.mxu0 %v15177_v19  ;;  %7967 = vmatpush.bf16.msra.mxu3 %v15057_v12  ;;  %v15229_v19 = vor.u32 %v17734_v54, %v15226_v56  ;;  %v15402_v12 = vld [vmem:[#allocation7 + $0x21f0] sm:$0xf0]  ;;  %v15656_v56 = vld [vmem:[#allocation7 + $0x23e0] sm:$0xf] }
 0x5ed   :  { %8837 = vmatpush.bf16.msra.mxu1 %v15369_v6  ;;  %8006 = vmatpush.bf16.msrb.mxu2 %v14933_v44  ;;  %v15288_v6 = vld [vmem:[#allocation7 + $0x2100] sm:$0xf]  ;;  %v15090_v44 = vld [vmem:[#allocation7 + $0x1f78] sm:$0xf0] }
 0x5ee   :  { %v15289_v25 = vor.u32 %v17752_v3, %v15288_v6  ;;  %v15093_v30 = vor.u32 %v17699_v33, %v15090_v44  ;;  %v15045_v6 = vor.u32 %v17687_v10, %v15042_v53  ;;  %v15338_v3 = vld [vmem:[#allocation7 + $0x2170] sm:$0xf0]  ;;  %v15533_v44 = vor.u32 %v17810_v60, %v15530_v9  ;;  %v18775_v10 = vld [vmem:[#allocation8 + $0x1c] sm:$0xf]  ;;  %v15576_v60 = vld [vmem:[#allocation7 + $0x2340] sm:$0xf] }
 0x5ef   :  { %v17824_v9 = vld [vmem:[#allocation7 + $0x234c] sm:$0xf0] }
 0x5f0   :  { %8829 = vmatpush.bf16.msra.mxu0 %v15161_v27  ;;  %7968 = vmatpush.bf16.msra.mxu3 %v15041_v39  ;;  %v15405_v27 = vor.u32 %v17778_v24, %v15402_v12  ;;  %v15640_v12 = vld [vmem:[#allocation7 + $0x23c0] sm:$0xf] }
 0x5f1   :  { %8838 = vmatpush.bf16.msra.mxu1 %v15353_v29  ;;  %8007 = vmatpush.bf16.msrb.mxu2 %v14917_v50  ;;  %v17796_v29 = vld [vmem:[#allocation7 + $0x226c] sm:$0xf0] }
 0x5f2   :  { %v15465_v39 = vor.u32 %v17796_v29, %v15464_v4  ;;  %v17792_v50 = vld [vmem:[#allocation7 + $0x224c] sm:$0xf0]  ;;  %v15322_v4 = vld [vmem:[#allocation7 + $0x2150] sm:$0xf0] }
 0x5f3   :  { %8830 = vmatmul.bf16.vlgmr.msra.gmra.mxu0 %v18595_v31  ;;  %7969 = vmatmul.bf16.vlgmr.msra.gmra.mxu3 %v18759_v48  ;;  %v15449_v47 = vor.u32 %v17792_v50, %v15448_v41  ;;  %v15514_v29 = vld [vmem:[#allocation7 + $0x22d0] sm:$0xf0] }
 0x5f4   :  { %8874 = vmatpush.bf16.msrb.mxu0 %v15277_v5  ;;  %8013 = vmatpush.bf16.msrb.mxu3 %v15157_v15  ;;  %v17774_v5 = vld [vmem:[#allocation7 + $0x21c4] sm:$0xf]  ;;  %v15306_v41 = vld [vmem:[#allocation7 + $0x2130] sm:$0xf0] }
 0x5f5   :  { %8839 = vmatpush.bf16.msra.mxu1 %v15337_v32  ;;  %8848 = vmatpush.bf16.msra.mxu2 %v15529_v2  ;;  %v15389_v59 = vor.u32 %v17774_v5, %v15386_v17  ;;  %v17722_v15 = vld [vmem:[#allocation7 + $0x2024] sm:$0xf]  ;;  %v15178_v32 = vld [vmem:[#allocation7 + $0x2030] sm:$0xf0]  ;;  %v15624_v5 = vld [vmem:[#allocation7 + $0x23a0] sm:$0xf] }
 0x5f6   :  { %8008 = vmatmul.bf16.vlgmr.msrb.gmra.mxu2 %v18748_v62  ;;  %v15109_v62 = vor.u32 %v17703_v36, %v15106_v57  ;;  %v15370_v2 = vld [vmem:[#allocation7 + $0x21b0] sm:$0xf0]  ;;  %v15181_v22 = vor.u32 %v17722_v15, %v15178_v32  ;;  %v15416_v57 = vld [vmem:[#allocation7 + $0x2200] sm:$0xf]  ;;  %v17836_v17 = vld [vmem:[#allocation7 + $0x23ac] sm:$0xf0] }
 0x5f7   :  { %v15373_v1 = vor.u32 %v17770_v55, %v15370_v2  ;;  %v15498_v50 = vld [vmem:[#allocation7 + $0x22b0] sm:$0xf0]  ;;  %v15625_v15 = vor.u32 %v17836_v17, %v15624_v5  ;;  %v15232_v32 = vld [vmem:[#allocation7 + $0x2088] sm:$0xf]  ;;  %v15608_v2 = vld [vmem:[#allocation7 + $0x2380] sm:$0xf] }
 0x5f8   :  { %8875 = vmatpush.bf16.msrb.mxu0 %v15261_v45  ;;  %8014 = vmatpush.bf16.msrb.mxu3 %v15141_v52  ;;  %v17691_v45 = vld [vmem:[#allocation7 + $0x1f2c] sm:$0xf]  ;;  %v17718_v52 = vld [vmem:[#allocation7 + $0x2004] sm:$0xf]  ;;  %v15434_v17 = vld [vmem:[#allocation7 + $0x2230] sm:$0xf0] }
 0x5f9   :  { %8840 = vmatpush.bf16.msra.mxu1 %v15321_v51  ;;  %8849 = vmatpush.bf16.msra.mxu2 %v15513_v40  ;;  %v15162_v51 = vld [vmem:[#allocation7 + $0x2010] sm:$0xf0]  ;;  %v15061_v7 = vor.u32 %v17691_v45, %v15058_v13  ;;  %v17832_v45 = vld [vmem:[#allocation7 + $0x238c] sm:$0xf0] }
 0x5fa   :  { %v15354_v40 = vld [vmem:[#allocation7 + $0x2190] sm:$0xf0]  ;;  %v15165_v54 = vor.u32 %v17718_v52, %v15162_v51  ;;  %v15216_v52 = vld [vmem:[#allocation7 + $0x2068] sm:$0xf]  ;;  %v15609_v51 = vor.u32 %v17832_v45, %v15608_v2  ;;  %v15544_v2 = vld [vmem:[#allocation7 + $0x2300] sm:$0xf] }
 0x5fb   :  { %v17816_v45 = vld [vmem:[#allocation7 + $0x230c] sm:$0xf0] }
 0x5fc   :  { %8876 = vmatpush.bf16.msrb.mxu0 %v15245_v16  ;;  %8015 = vmatpush.bf16.msrb.mxu3 %v15125_v28  ;;  %v15280_v16 = vld [vmem:[#allocation7 + $0x20e8] sm:$0xf]  ;;  %v17844_v28 = vld [vmem:[#allocation7 + $0x23ec] sm:$0xf0] }
 0x5fd   :  { %8841 = vmatpush.bf16.msra.mxu1 %v15305_v0  ;;  %8850 = vmatpush.bf16.msra.mxu2 %v15497_v14  ;;  %v15357_v0 = vor.u32 %v17766_v46, %v15354_v40  ;;  %v15281_v36 = vor.u32 %v17749_v38, %v15280_v16  ;;  %v17784_v14 = vld [vmem:[#allocation7 + $0x220c] sm:$0xf0]  ;;  %v15657_v49 = vor.u32 %v17844_v28, %v15656_v56  ;;  %v17733_v46 = vld [vmem:[#allocation7 + $0x2074] sm:$0xf0]  ;;  %v15592_v16 = vld [vmem:[#allocation7 + $0x2360] sm:$0xf] }
 0x5fe   :  { %v15417_v24 = vor.u32 %v17784_v14, %v15416_v57  ;;  %v17781_v40 = vld [vmem:[#allocation7 + $0x21f4] sm:$0xf0]  ;;  %v17828_v38 = vld [vmem:[#allocation7 + $0x236c] sm:$0xf0]  ;;  %v17794_v28 = vld [vmem:[#allocation7 + $0x2264] sm:$0xf] }
 0x5ff   :  { %v15593_v57 = vor.u32 %v17828_v38, %v15592_v16  ;;  %v17729_v14 = vld [vmem:[#allocation7 + $0x2054] sm:$0xf0] }
 0x600   :  { %8877 = vmatpush.bf16.msrb.mxu0 %v15229_v19  ;;  %8016 = vmatpush.bf16.msrb.mxu3 %v15109_v62  ;;  %v17762_v19 = vld [vmem:[#allocation7 + $0x2164] sm:$0xf]  ;;  %v17745_v62 = vld [vmem:[#allocation7 + $0x20d4] sm:$0xf0] }
 0x601   :  { %8842 = vmatpush.bf16.msra.mxu1 %v15289_v25  ;;  %8851 = vmatpush.bf16.msra.mxu2 %v15481_v20  ;;  %v17840_v25 = vld [vmem:[#allocation7 + $0x23cc] sm:$0xf0]  ;;  %v15341_v33 = vor.u32 %v17762_v19, %v15338_v3  ;;  %v17758_v20 = vld [vmem:[#allocation7 + $0x2144] sm:$0xf]  ;;  %v15392_v19 = vld [vmem:[#allocation7 + $0x21c8] sm:$0xf] }
 0x602   :  { %v15641_v26 = vor.u32 %v17840_v25, %v15640_v12  ;;  %v15325_v35 = vor.u32 %v17758_v20, %v15322_v4  ;;  %v17790_v12 = vld [vmem:[#allocation7 + $0x2244] sm:$0xf]  ;;  %v15450_v25 = vld [vmem:[#allocation7 + $0x2250] sm:$0xf0]  ;;  %v17725_v20 = vld [vmem:[#allocation7 + $0x2034] sm:$0xf0] }
 0x603   :  { %v17773_v4 = vld [vmem:[#allocation7 + $0x21b4] sm:$0xf0] }
 0x604   :  { %8878 = vmatpush.bf16.msrb.mxu0 %v15213_v8  ;;  %8017 = vmatpush.bf16.msrb.mxu3 %v15093_v30  ;;  %v15265_v8 = vor.u32 %v17745_v62, %v15264_v21  ;;  %v17741_v30 = vld [vmem:[#allocation7 + $0x20b4] sm:$0xf0] }
 0x605   :  { %8887 = vmatpush.bf16.msrb.mxu1 %v15405_v27  ;;  %8852 = vmatpush.bf16.msra.mxu2 %v15465_v39  ;;  %v17806_v27 = vld [vmem:[#allocation7 + $0x22c4] sm:$0xf]  ;;  %v17813_v16 = vld [vmem:[#allocation7 + $0x22f4] sm:$0xf0] }
 0x606   :  { %8843 = vmatmul.bf16.vlgmr.msra.gmra.mxu1 %v18606_v61  ;;  %v15517_v23 = vor.u32 %v17806_v27, %v15514_v29  ;;  %v17754_v39 = vld [vmem:[#allocation7 + $0x2124] sm:$0xf]  ;;  %v15560_v27 = vld [vmem:[#allocation7 + $0x2320] sm:$0xf]  ;;  %v17820_v29 = vld [vmem:[#allocation7 + $0x232c] sm:$0xf0] }
 0x607   :  { %v15309_v13 = vor.u32 %v17754_v39, %v15306_v41  ;;  %v15360_v41 = vld [vmem:[#allocation7 + $0x2188] sm:$0xf] }
 0x608   :  { %8879 = vmatpush.bf16.msrb.mxu0 %v15197_v43  ;;  %8018 = vmatpush.bf16.msrb.mxu3 %v15077_v63  ;;  %v15249_v43 = vor.u32 %v17741_v30, %v15248_v42  ;;  %v17737_v63 = vld [vmem:[#allocation7 + $0x2094] sm:$0xf0]  ;;  %v17786_v42 = vld [vmem:[#allocation7 + $0x2224] sm:$0xf] }
 0x609   :  { %8888 = vmatpush.bf16.msrb.mxu1 %v15389_v59  ;;  %8853 = vmatpush.bf16.msra.mxu2 %v15449_v47  ;;  %v17802_v59 = vld [vmem:[#allocation7 + $0x22a4] sm:$0xf]  ;;  %v15233_v18 = vor.u32 %v17737_v63, %v15232_v32  ;;  %v15282_v63 = vld [vmem:[#allocation7 + $0x20f8] sm:$0xf0] }
 0x60a   :  { %v15501_v47 = vor.u32 %v17802_v59, %v15498_v50  ;;  %v17769_v59 = vld [vmem:[#allocation7 + $0x2194] sm:$0xf0]  ;;  %v17747_v50 = vld [vmem:[#allocation7 + $0x20ec] sm:$0xf] }
 0x60c   :  { %8880 = vmatpush.bf16.msrb.mxu0 %v15181_v22  ;;  %8019 = vmatpush.bf16.msrb.mxu3 %v15061_v7  ;;  %v15290_v22 = vld [vmem:[#allocation7 + $0x2110] sm:$0xf0]  ;;  %v15408_v7 = vld [vmem:[#allocation7 + $0x21e8] sm:$0xf] }
 0x60d   :  { %8889 = vmatpush.bf16.msrb.mxu1 %v15373_v1  ;;  %8854 = vmatpush.bf16.msra.mxu2 %v15433_v37  ;;  %v15482_v1 = vld [vmem:[#allocation7 + $0x2290] sm:$0xf0]  ;;  %v15409_v56 = vor.u32 %v17781_v40, %v15408_v7  ;;  %v17765_v7 = vld [vmem:[#allocation7 + $0x2174] sm:$0xf0]  ;;  %v15536_v40 = vld [vmem:[#allocation7 + $0x22e8] sm:$0xf] }
 0x60e   :  { %v15485_v37 = vor.u32 %v17798_v58, %v15482_v1  ;;  %v17782_v58 = vld [vmem:[#allocation7 + $0x2204] sm:$0xf]  ;;  %v15418_v1 = vld [vmem:[#allocation7 + $0x2210] sm:$0xf0] }
 0x610   :  { %8881 = vmatpush.bf16.msrb.mxu0 %v15165_v54  ;;  %8020 = vmatpush.bf16.msrb.mxu3 %v15045_v6  ;;  %v18773_v55 = vpop.f32.mrf.mxu0  ;;  %v15217_v54 = vor.u32 %v17733_v46, %v15216_v52  ;;  %v17777_v6 = vld [vmem:[#allocation7 + $0x21d4] sm:$0xf0]  ;;  %v15344_v52 = vld [vmem:[#allocation7 + $0x2168] sm:$0xf]  ;;  %v15545_v46 = vor.u32 %v17816_v45, %v15544_v2 }
 0x611   :  { %8890 = vmatpush.bf16.msrb.mxu1 %v15357_v0  ;;  %8855 = vmatpush.bf16.msra.mxu2 %v15417_v24  ;;  %v15466_v0 = vld [vmem:[#allocation7 + $0x2270] sm:$0xf0]  ;;  %v15393_v24 = vor.u32 %v17777_v6, %v15392_v19  ;;  %v17761_v19 = vld [vmem:[#allocation7 + $0x2154] sm:$0xf0]  ;;  %v15520_v6 = vld [vmem:[#allocation7 + $0x22c8] sm:$0xf] }
 0x612   :  { %v15469_v21 = vor.u32 %v17794_v28, %v15466_v0  ;;  %v15642_v28 = vld [vmem:[#allocation7 + $0x23d0] sm:$0xf0]  ;;  %v15345_v0 = vor.u32 %v17765_v7, %v15344_v52  ;;  %v15472_v7 = vld [vmem:[#allocation7 + $0x2268] sm:$0xf] }
 0x613   :  { %8882 = vmatmul.bf16.vlgmr.msrb.gmra.mxu0 %v18595_v31  ;;  %8021 = vmatmul.bf16.vlgmr.msrb.gmra.mxu3 %v18759_v48  ;;  %v17750_v48 = vld [vmem:[#allocation7 + $0x2104] sm:$0xf] }
 0x614   :  { %8926 = vmatpush.bf16.msra.mxu0 %v15281_v36  ;;  %8861 = vmatpush.bf16.msra.mxu3 %v15657_v49  ;;  %v15293_v53 = vor.u32 %v17750_v48, %v15290_v22  ;;  %v15200_v36 = vld [vmem:[#allocation7 + $0x2048] sm:$0xf]  ;;  %v7170_v49 = vperm.slane %v18775_v10, 0  ;;  %v17842_v48 = vld [vmem:[#allocation7 + $0x23e4] sm:$0xf] }
 0x615   :  { %8891 = vmatpush.bf16.msrb.mxu1 %v15341_v33  ;;  %8900 = vmatpush.bf16.msrb.mxu2 %v15533_v44  ;;  %v15201_v62 = vor.u32 %v17729_v14, %v15200_v36  ;;  %v15184_v33 = vld [vmem:[#allocation7 + $0x2028] sm:$0xf]  ;;  %v15577_v44 = vor.u32 %v17824_v9, %v15576_v60  ;;  %v15658_v22 = vld [vmem:[#allocation7 + $0x23f0] sm:$0xf0]  ;;  %v15537_v36 = vor.u32 %v17813_v16, %v15536_v40  ;;  %v17797_v40 = vld [vmem:[#allocation7 + $0x2274] sm:$0xf0] }
 0x616   :  { %8856 = vmatmul.bf16.vlgmr.msra.gmra.mxu2 %v18616_v34  ;;  %v15185_v30 = vor.u32 %v17725_v20, %v15184_v33  ;;  %v7828_v39 = vadd.f32 %v18773_v55, %v7170_v49  ;;  %v15661_v38 = vor.u32 %v17842_v48, %v15658_v22  ;;  %v15312_v20 = vld [vmem:[#allocation7 + $0x2128] sm:$0xf]  ;;  %v17779_v48 = vld [vmem:[#allocation7 + $0x21ec] sm:$0xf]  ;;  %v15410_v22 = vld [vmem:[#allocation7 + $0x21f8] sm:$0xf0] }
 0x617   :  { %v17727_v16 = vld [vmem:[#allocation7 + $0x204c] sm:$0xf] }
 0x618   :  { %8927 = vmatpush.bf16.msra.mxu0 %v15265_v8  ;;  %8862 = vmatpush.bf16.msra.mxu3 %v15641_v26  ;;  %v7829_v3 = vpop.f32.mrf.mxu0  ;;  %v15376_v8 = vld [vmem:[#allocation7 + $0x21a8] sm:$0xf]  ;;  %v15453_v26 = vor.u32 %v17790_v12, %v15450_v25  ;;  %v15626_v12 = vld [vmem:[#allocation7 + $0x23b0] sm:$0xf0]  ;;  %v7171_v25 = vperm.slane %v18775_v10, 1 }
 0x619   :  { %8892 = vmatpush.bf16.msrb.mxu1 %v15325_v35  ;;  %8901 = vmatpush.bf16.msrb.mxu2 %v15517_v23  ;;  %v15377_v5 = vor.u32 %v17773_v4, %v15376_v8  ;;  %v15168_v35 = vld [vmem:[#allocation7 + $0x2008] sm:$0xf]  ;;  %v17721_v23 = vld [vmem:[#allocation7 + $0x2014] sm:$0xf0] }
 0x61a   :  { %v15169_v55 = vor.u32 %v17721_v23, %v15168_v35  ;;  %v17809_v3 = vld [vmem:[#allocation7 + $0x22d4] sm:$0xf0] }
 0x61b   :  { %v17757_v4 = vld [vmem:[#allocation7 + $0x2134] sm:$0xf0] }
 0x61c   :  { %8928 = vmatpush.bf16.msra.mxu0 %v15249_v43  ;;  %8863 = vmatpush.bf16.msra.mxu3 %v15625_v15  ;;  %v15561_v43 = vor.u32 %v17820_v29, %v15560_v27  ;;  %v15504_v27 = vld [vmem:[#allocation7 + $0x22a8] sm:$0xf]  ;;  %v17805_v29 = vld [vmem:[#allocation7 + $0x22b4] sm:$0xf0]  ;;  %v15313_v35 = vor.u32 %v17757_v4, %v15312_v20 }
 0x61d   :  { %8893 = vmatpush.bf16.msrb.mxu1 %v15309_v13  ;;  %8902 = vmatpush.bf16.msrb.mxu2 %v15501_v47  ;;  %v15437_v47 = vor.u32 %v17786_v42, %v15434_v17  ;;  %v17735_v42 = vld [vmem:[#allocation7 + $0x208c] sm:$0xf]  ;;  %v15610_v17 = vld [vmem:[#allocation7 + $0x2390] sm:$0xf0]  ;;  %v15505_v23 = vor.u32 %v17805_v29, %v15504_v27  ;;  %v15440_v4 = vld [vmem:[#allocation7 + $0x2228] sm:$0xf] }
 0x61e   :  { %v17789_v27 = vld [vmem:[#allocation7 + $0x2234] sm:$0xf0]  ;;  %v17719_v29 = vld [vmem:[#allocation7 + $0x200c] sm:$0xf] }
 0x620   :  { %8929 = vmatpush.bf16.msra.mxu0 %v15233_v18  ;;  %8864 = vmatpush.bf16.msra.mxu3 %v15609_v51  ;;  %v7840_v15 = vpop.f32.mrf.mxu1  ;;  %v18780_v32 = vpop.f32.mrf.mxu0  ;;  %v15361_v18 = vor.u32 %v17769_v59, %v15360_v41  ;;  %v15285_v51 = vor.u32 %v17747_v50, %v15282_v63  ;;  %v15488_v50 = vld [vmem:[#allocation7 + $0x2288] sm:$0xf]  ;;  %v17731_v63 = vld [vmem:[#allocation7 + $0x206c] sm:$0xf] }
 0x621   :  { %8894 = vmatpush.bf16.msrb.mxu1 %v15293_v53  ;;  %8903 = vmatpush.bf16.msrb.mxu2 %v15485_v37  ;;  %v18782_v13 = vadd.f32 %v7840_v15, %v7828_v39  ;;  %v17743_v53 = vld [vmem:[#allocation7 + $0x20cc] sm:$0xf]  ;;  %v15266_v37 = vld [vmem:[#allocation7 + $0x20d8] sm:$0xf0]  ;;  %v15296_v39 = vld [vmem:[#allocation7 + $0x2108] sm:$0xf]  ;;  %v7880_v41 = vadd.f32 %v18780_v32, %v7171_v25 }
 0x622   :  { %v15269_v14 = vor.u32 %v17743_v53, %v15266_v37  ;;  %v17801_v15 = vld [vmem:[#allocation7 + $0x2294] sm:$0xf0]  ;;  %v15202_v53 = vld [vmem:[#allocation7 + $0x2058] sm:$0xf0]  ;;  %v17775_v37 = vld [vmem:[#allocation7 + $0x21cc] sm:$0xf] }
 0x623   :  { %v15489_v52 = vor.u32 %v17801_v15, %v15488_v50  ;;  %v17818_v25 = vld [vmem:[#allocation7 + $0x2324] sm:$0xf] }
 0x624   :  { %8930 = vmatpush.bf16.msra.mxu0 %v15217_v54  ;;  %8865 = vmatpush.bf16.msra.mxu3 %v15593_v57  ;;  %v15421_v54 = vor.u32 %v17782_v58, %v15418_v1  ;;  %v15328_v57 = vld [vmem:[#allocation7 + $0x2148] sm:$0xf]  ;;  %v17826_v58 = vld [vmem:[#allocation7 + $0x2364] sm:$0xf]  ;;  %v15594_v1 = vld [vmem:[#allocation7 + $0x2370] sm:$0xf0] }
 0x625   :  { %8939 = vmatpush.bf16.msra.mxu1 %v15409_v56  ;;  %8904 = vmatpush.bf16.msrb.mxu2 %v15469_v21  ;;  %v17838_v56 = vld [vmem:[#allocation7 + $0x23c4] sm:$0xf]  ;;  %v17739_v21 = vld [vmem:[#allocation7 + $0x20ac] sm:$0xf]  ;;  %v15329_v33 = vor.u32 %v17761_v19, %v15328_v57 }
 0x626   :  { %8895 = vmatmul.bf16.vlgmr.msrb.gmra.mxu1 %v18606_v61  ;;  %v15645_v49 = vor.u32 %v17838_v56, %v15642_v28  ;;  %v17822_v56 = vld [vmem:[#allocation7 + $0x2344] sm:$0xf]  ;;  %v15578_v28 = vld [vmem:[#allocation7 + $0x2350] sm:$0xf0] }
 0x628   :  { %8931 = vmatpush.bf16.msra.mxu0 %v15201_v62  ;;  %8866 = vmatpush.bf16.msra.mxu3 %v15577_v44  ;;  %v7842_v60 = vpop.f32.mrf.mxu1  ;;  %v7881_v9 = vpop.f32.mrf.mxu0  ;;  %v15250_v62 = vld [vmem:[#allocation7 + $0x20b8] sm:$0xf0]  ;;  %v15521_v44 = vor.u32 %v17809_v3, %v15520_v6  ;;  %v15456_v6 = vld [vmem:[#allocation7 + $0x2248] sm:$0xf]  ;;  %v17793_v3 = vld [vmem:[#allocation7 + $0x2254] sm:$0xf0] }
 0x629   :  { %8940 = vmatpush.bf16.msra.mxu1 %v15393_v24  ;;  %8905 = vmatpush.bf16.msrb.mxu2 %v15453_v26  ;;  %v17834_v24 = vld [vmem:[#allocation7 + $0x23a4] sm:$0xf]  ;;  %v15253_v8 = vor.u32 %v17739_v21, %v15250_v62  ;;  %v17723_v60 = vld [vmem:[#allocation7 + $0x202c] sm:$0xf]  ;;  %v15186_v21 = vld [vmem:[#allocation7 + $0x2038] sm:$0xf0] }
 0x62a   :  { %v15629_v26 = vor.u32 %v17834_v24, %v15626_v12  ;;  %v17771_v62 = vld [vmem:[#allocation7 + $0x21ac] sm:$0xf]  ;;  %v15378_v24 = vld [vmem:[#allocation7 + $0x21b8] sm:$0xf0]  ;;  %v15189_v20 = vor.u32 %v17723_v60, %v15186_v21  ;;  %v15616_v21 = vld [vmem:[#allocation7 + $0x2388] sm:$0xf] }
 0x62b   :  { %v15314_v60 = vld [vmem:[#allocation7 + $0x2138] sm:$0xf0] }
 0x62c   :  { %8932 = vmatpush.bf16.msra.mxu0 %v15185_v30  ;;  %8867 = vmatpush.bf16.msra.mxu3 %v15561_v43  ;;  %v15234_v30 = vld [vmem:[#allocation7 + $0x2098] sm:$0xf0]  ;;  %v17753_v43 = vld [vmem:[#allocation7 + $0x2114] sm:$0xf0] }
 0x62d   :  { %8941 = vmatpush.bf16.msra.mxu1 %v15377_v5  ;;  %8906 = vmatpush.bf16.msrb.mxu2 %v15437_v47  ;;  %v17830_v5 = vld [vmem:[#allocation7 + $0x2384] sm:$0xf]  ;;  %v15237_v59 = vor.u32 %v17735_v42, %v15234_v30  ;;  %v15218_v47 = vld [vmem:[#allocation7 + $0x2078] sm:$0xf0]  ;;  %v15297_v32 = vor.u32 %v17753_v43, %v15296_v39  ;;  %v17767_v30 = vld [vmem:[#allocation7 + $0x218c] sm:$0xf]  ;;  %v15441_v39 = vor.u32 %v17789_v27, %v15440_v4 }
 0x62e   :  { %v15613_v45 = vor.u32 %v17830_v5, %v15610_v17  ;;  %v15170_v42 = vld [vmem:[#allocation7 + $0x2018] sm:$0xf0]  ;;  %v17814_v17 = vld [vmem:[#allocation7 + $0x2304] sm:$0xf]  ;;  %v15664_v43 = vld [vmem:[#allocation7 + $0x23e8] sm:$0xf] }
 0x62f   :  { %v15362_v5 = vld [vmem:[#allocation7 + $0x2198] sm:$0xf0]  ;;  %v15173_v50 = vor.u32 %v17719_v29, %v15170_v42  ;;  %v15600_v4 = vld [vmem:[#allocation7 + $0x2368] sm:$0xf]  ;;  %v17829_v27 = vld [vmem:[#allocation7 + $0x2374] sm:$0xf0] }
 0x630   :  { %8933 = vmatpush.bf16.msra.mxu0 %v15169_v55  ;;  %8868 = vmatpush.bf16.msra.mxu3 %v15545_v46  ;;  %v7892_v2 = vpop.f32.mrf.mxu1  ;;  %v15413_v46 = vor.u32 %v17779_v48, %v15410_v22  ;;  %v15365_v15 = vor.u32 %v17767_v30, %v15362_v5  ;;  %v15346_v22 = vld [vmem:[#allocation7 + $0x2178] sm:$0xf0]  ;;  %v17795_v42 = vld [vmem:[#allocation7 + $0x226c] sm:$0xf]  ;;  %v15601_v5 = vor.u32 %v17829_v27, %v15600_v4  ;;  %v15720_v4 = vld [vmem:[#allocation7 + $0x2460] sm:$0xf] }
 0x631   :  { %8942 = vmatpush.bf16.msra.mxu1 %v15361_v18  ;;  %8907 = vmatpush.bf16.msrb.mxu2 %v15421_v54  ;;  %v18789_v55 = vadd.f32 %v7892_v2, %v7880_v41  ;;  %v15394_v54 = vld [vmem:[#allocation7 + $0x21d8] sm:$0xf0]  ;;  %v17845_v41 = vld [vmem:[#allocation7 + $0x23f4] sm:$0xf0]  ;;  %v17860_v27 = vld [vmem:[#allocation7 + $0x246c] sm:$0xf0] }
 0x632   :  { %v18791_v18 = vpop.f32.mrf.mxu0  ;;  %v15397_v19 = vor.u32 %v17775_v37, %v15394_v54  ;;  %v17785_v2 = vld [vmem:[#allocation7 + $0x2214] sm:$0xf0]  ;;  %v15522_v37 = vld [vmem:[#allocation7 + $0x22d8] sm:$0xf0] }
 0x633   :  { %8934 = vmatmul.bf16.vlgmr.msra.gmra.mxu0 %v18595_v31  ;;  %8869 = vmatmul.bf16.vlgmr.msra.gmra.mxu3 %v18627_v11  ;;  %v15474_v30 = vld [vmem:[#allocation7 + $0x2278] sm:$0xf0] }
 0x634   :  { %8978 = vmatpush.bf16.msrb.mxu0 %v15285_v51  ;;  %8913 = vmatpush.bf16.msrb.mxu3 %v15661_v38  ;;  %v15221_v51 = vor.u32 %v17731_v63, %v15218_v47  ;;  %v15597_v38 = vor.u32 %v17826_v58, %v15594_v1  ;;  %v15424_v63 = vld [vmem:[#allocation7 + $0x2208] sm:$0xf]  ;;  %v17811_v58 = vld [vmem:[#allocation7 + $0x22ec] sm:$0xf]  ;;  %v15538_v1 = vld [vmem:[#allocation7 + $0x22f8] sm:$0xf0] }
 0x635   :  { %8943 = vmatpush.bf16.msra.mxu1 %v15345_v0  ;;  %8952 = vmatpush.bf16.msra.mxu2 %v15537_v36  ;;  %v15473_v36 = vor.u32 %v17797_v40, %v15472_v7  ;;  %v15541_v40 = vor.u32 %v17811_v58, %v15538_v1  ;;  %v17787_v1 = vld [vmem:[#allocation7 + $0x222c] sm:$0xf] }
 0x636   :  { %8908 = vmatmul.bf16.vlgmr.msrb.gmra.mxu2 %v18616_v34  ;;  %v7853_v0 = vpop.f32.mrf.mxu2 }
 0x637   :  { %v18794_v57 = vadd.f32 %v7853_v0, %v18782_v13  ;;  %v15457_v13 = vor.u32 %v17793_v3, %v15456_v6  ;;  %v17837_v0 = vld [vmem:[#allocation7 + $0x23b4] sm:$0xf0]  ;;  %v17755_v6 = vld [vmem:[#allocation7 + $0x212c] sm:$0xf] }
 0x638   :  { %8979 = vmatpush.bf16.msrb.mxu0 %v15269_v14  ;;  %8914 = vmatpush.bf16.msrb.mxu3 %v15645_v49  ;;  %v15205_v14 = vor.u32 %v17727_v16, %v15202_v53  ;;  %v7894_v9 = vpop.f32.mrf.mxu1  ;;  %v15581_v49 = vor.u32 %v17822_v56, %v15578_v28  ;;  %v17759_v16 = vld [vmem:[#allocation7 + $0x214c] sm:$0xf]  ;;  %v15632_v28 = vld [vmem:[#allocation7 + $0x23a8] sm:$0xf] }
 0x639   :  { %8944 = vmatpush.bf16.msra.mxu1 %v15329_v33  ;;  %8953 = vmatpush.bf16.msra.mxu2 %v15521_v44  ;;  %v15562_v33 = vld [vmem:[#allocation7 + $0x2330] sm:$0xf0]  ;;  %v7172_v44 = vperm.slane %v18775_v10, 2  ;;  %v17807_v53 = vld [vmem:[#allocation7 + $0x22cc] sm:$0xf] }
 0x63a   :  { %v7933_v12 = vpop.f32.mrf.mxu0  ;;  %v17803_v9 = vld [vmem:[#allocation7 + $0x22ac] sm:$0xf] }
 0x63b   :  { %v17751_v12 = vld [vmem:[#allocation7 + $0x210c] sm:$0xf] }
 0x63c   :  { %8980 = vmatpush.bf16.msrb.mxu0 %v15253_v8  ;;  %8915 = vmatpush.bf16.msrb.mxu3 %v15629_v26  ;;  %v15381_v8 = vor.u32 %v17771_v62, %v15378_v24  ;;  %v15565_v26 = vor.u32 %v17818_v25, %v15562_v33  ;;  %v17833_v62 = vld [vmem:[#allocation7 + $0x2394] sm:$0xf0]  ;;  %v15317_v24 = vor.u32 %v17755_v6, %v15314_v60  ;;  %v15298_v25 = vld [vmem:[#allocation7 + $0x2118] sm:$0xf0]  ;;  %v17799_v33 = vld [vmem:[#allocation7 + $0x228c] sm:$0xf] }
 0x63d   :  { %8945 = vmatpush.bf16.msra.mxu1 %v15313_v35  ;;  %8954 = vmatpush.bf16.msra.mxu2 %v15505_v23  ;;  %v15546_v35 = vld [vmem:[#allocation7 + $0x2310] sm:$0xf0]  ;;  %v15301_v29 = vor.u32 %v17751_v12, %v15298_v25  ;;  %v17839_v60 = vld [vmem:[#allocation7 + $0x23cc] sm:$0xf]  ;;  %v15634_v12 = vld [vmem:[#allocation7 + $0x23b8] sm:$0xf0] }
 0x63e   :  { %v7855_v23 = vpop.f32.mrf.mxu2  ;;  %v15549_v48 = vor.u32 %v17814_v17, %v15546_v35  ;;  %v15584_v17 = vld [vmem:[#allocation7 + $0x2348] sm:$0xf]  ;;  %v17825_v35 = vld [vmem:[#allocation7 + $0x2354] sm:$0xf0] }
 0x640   :  { %8981 = vmatpush.bf16.msrb.mxu0 %v15237_v59  ;;  %8916 = vmatpush.bf16.msrb.mxu3 %v15613_v45  ;;  %v7932_v59 = vadd.f32 %v18791_v18, %v7172_v44  ;;  %v17763_v45 = vld [vmem:[#allocation7 + $0x216c] sm:$0xf]  ;;  %v7944_v47 = vpop.f32.mrf.mxu1  ;;  %v17841_v18 = vld [vmem:[#allocation7 + $0x23d4] sm:$0xf0]  ;;  %v15490_v44 = vld [vmem:[#allocation7 + $0x2298] sm:$0xf0] }
 0x641   :  { %8946 = vmatpush.bf16.msra.mxu1 %v15297_v32  ;;  %8955 = vmatpush.bf16.msra.mxu2 %v15489_v52  ;;  %v15665_v52 = vor.u32 %v17845_v41, %v15664_v43  ;;  %v15349_v7 = vor.u32 %v17763_v45, %v15346_v22  ;;  %v17791_v41 = vld [vmem:[#allocation7 + $0x224c] sm:$0xf]  ;;  %v15784_v45 = vld [vmem:[#allocation7 + $0x24e0] sm:$0xf] }
 0x642   :  { %v18799_v32 = vadd.f32 %v7944_v47, %v7932_v59  ;;  %v15458_v59 = vld [vmem:[#allocation7 + $0x2258] sm:$0xf0]  ;;  %v17876_v47 = vld [vmem:[#allocation7 + $0x24ec] sm:$0xf0] }
 0x643   :  { %v15461_v22 = vor.u32 %v17791_v41, %v15458_v59  ;;  %v15785_v58 = vor.u32 %v17876_v47, %v15784_v45  ;;  %v17819_v45 = vld [vmem:[#allocation7 + $0x232c] sm:$0xf] }
 0x644   :  { %8982 = vmatpush.bf16.msrb.mxu0 %v15221_v51  ;;  %8917 = vmatpush.bf16.msrb.mxu3 %v15597_v38  ;;  %v15425_v51 = vor.u32 %v17785_v2, %v15424_v63  ;;  %v15330_v38 = vld [vmem:[#allocation7 + $0x2158] sm:$0xf0]  ;;  %v15568_v63 = vld [vmem:[#allocation7 + $0x2328] sm:$0xf]  ;;  %v17821_v2 = vld [vmem:[#allocation7 + $0x2334] sm:$0xf0] }
 0x645   :  { %8991 = vmatpush.bf16.msrb.mxu1 %v15413_v46  ;;  %8956 = vmatpush.bf16.msra.mxu2 %v15473_v36  ;;  %v15648_v46 = vld [vmem:[#allocation7 + $0x23c8] sm:$0xf] }
 0x646   :  { %8947 = vmatmul.bf16.vlgmr.msra.gmra.mxu1 %v18606_v61  ;;  %v15649_v54 = vor.u32 %v17841_v18, %v15648_v46  ;;  %v7905_v56 = vpop.f32.mrf.mxu2  ;;  %v17817_v46 = vld [vmem:[#allocation7 + $0x2314] sm:$0xf0]  ;;  %v15768_v18 = vld [vmem:[#allocation7 + $0x24c0] sm:$0xf] }
 0x647   :  { %v18803_v36 = vadd.f32 %v7905_v56, %v18789_v55 }
 0x648   :  { %8983 = vmatpush.bf16.msrb.mxu0 %v15205_v14  ;;  %8918 = vmatpush.bf16.msrb.mxu3 %v15581_v49  ;;  %v15333_v14 = vor.u32 %v17759_v16, %v15330_v38  ;;  %v7946_v3 = vpop.f32.mrf.mxu1  ;;  %v15506_v49 = vld [vmem:[#allocation7 + $0x22b8] sm:$0xf0]  ;;  %v17843_v16 = vld [vmem:[#allocation7 + $0x23ec] sm:$0xf] }
 0x649   :  { %8992 = vmatpush.bf16.msrb.mxu1 %v15397_v19  ;;  %8957 = vmatpush.bf16.msra.mxu2 %v15457_v13  ;;  %v15525_v19 = vor.u32 %v17807_v53, %v15522_v37  ;;  %v15509_v55 = vor.u32 %v17803_v9, %v15506_v49  ;;  %v15666_v38 = vld [vmem:[#allocation7 + $0x23f8] sm:$0xf0]  ;;  %v17783_v37 = vld [vmem:[#allocation7 + $0x220c] sm:$0xf] }
 0x64a   :  { %v15650_v9 = vld [vmem:[#allocation7 + $0x23d8] sm:$0xf0] }
 0x64c   :  { %8984 = vmatpush.bf16.msrb.mxu0 %v15189_v20  ;;  %8919 = vmatpush.bf16.msrb.mxu3 %v15565_v26  ;;  %v15617_v20 = vor.u32 %v17833_v62, %v15616_v21  ;;  %v15493_v26 = vor.u32 %v17799_v33, %v15490_v44  ;;  %v15736_v21 = vld [vmem:[#allocation7 + $0x2480] sm:$0xf]  ;;  %v17864_v62 = vld [vmem:[#allocation7 + $0x248c] sm:$0xf0] }
 0x64d   :  { %8993 = vmatpush.bf16.msrb.mxu1 %v15381_v8  ;;  %8958 = vmatpush.bf16.msra.mxu2 %v15441_v39  ;;  %v15477_v39 = vor.u32 %v17795_v42, %v15474_v30  ;;  %v15737_v25 = vor.u32 %v17864_v62, %v15736_v21  ;;  %v15721_v42 = vor.u32 %v17860_v27, %v15720_v4  ;;  %v15738_v4 = vld [vmem:[#allocation7 + $0x2490] sm:$0xf0] }
 0x64e   :  { %v7907_v8 = vpop.f32.mrf.mxu2 }
 0x650   :  { %8985 = vmatpush.bf16.msrb.mxu0 %v15173_v50  ;;  %8920 = vmatpush.bf16.msrb.mxu3 %v15549_v48  ;;  %v18807_v13 = vpop.f32.mrf.mxu0 }
 0x651   :  { %8994 = vmatpush.bf16.msrb.mxu1 %v15365_v15  ;;  %8959 = vmatpush.bf16.msra.mxu2 %v15425_v51  ;;  %v15585_v15 = vor.u32 %v17825_v35, %v15584_v17  ;;  %v15552_v51 = vld [vmem:[#allocation7 + $0x2308] sm:$0xf] }
 0x652   :  { %v15553_v56 = vor.u32 %v17817_v46, %v15552_v51  ;;  %v17908_v51 = vld [vmem:[#allocation7 + $0x25ec] sm:$0xf0]  ;;  %v17874_v46 = vld [vmem:[#allocation7 + $0x24e4] sm:$0xf] }
 0x653   :  { %8986 = vmatmul.bf16.vlgmr.msrb.gmra.mxu0 %v18595_v31  ;;  %8921 = vmatmul.bf16.vlgmr.msrb.gmra.mxu3 %v18627_v11  ;;  %v15633_v31 = vor.u32 %v17837_v0, %v15632_v28  ;;  %v15669_v0 = vor.u32 %v17843_v16, %v15666_v38 }
 0x654   :  { %8965 = vmatpush.bf16.msra.mxu3 %v15665_v52  ;;  %8960 = vmatmul.bf16.vlgmr.msra.gmra.mxu2 %v18616_v34  ;;  %v15442_v52 = vld [vmem:[#allocation7 + $0x2238] sm:$0xf0] }
 0x655   :  { %8995 = vmatpush.bf16.msrb.mxu1 %v15349_v7  ;;  %9004 = vmatpush.bf16.msrb.mxu2 %v15541_v40  ;;  %v17872_v7 = vld [vmem:[#allocation7 + $0x24cc] sm:$0xf0] }
 0x656   :  { %v7866_v23 = vpop.f32.mrf.mxu3  ;;  %9814 = vmatpush.bf16.msra.mxu0 %v15785_v58  ;;  %v15769_v53 = vor.u32 %v17872_v7, %v15768_v18  ;;  %v15672_v58 = vld [vmem:[#allocation7 + $0x2400] sm:$0xf] }
 0x657   :  { %v18810_v43 = vadd.f32 %v7866_v23, %v18794_v57  ;;  %v15569_v57 = vor.u32 %v17821_v2, %v15568_v63  ;;  %v17823_v63 = vld [vmem:[#allocation7 + $0x234c] sm:$0xf]  ;;  %v15586_v2 = vld [vmem:[#allocation7 + $0x2358] sm:$0xf0] }
 0x658   :  { %8966 = vmatpush.bf16.msra.mxu3 %v15649_v54  ;;  %v7985_v50 = vpop.f32.mrf.mxu0  ;;  %v15426_v54 = vld [vmem:[#allocation7 + $0x2218] sm:$0xf0]  ;;  %v15589_v47 = vor.u32 %v17823_v63, %v15586_v2  ;;  %v15816_v2 = vld [vmem:[#allocation7 + $0x2520] sm:$0xf] }
 0x659   :  { %8996 = vmatpush.bf16.msrb.mxu1 %v15333_v14  ;;  %9005 = vmatpush.bf16.msrb.mxu2 %v15525_v19  ;;  %v18813_v48 = vpop.f32.mrf.mxu2  ;;  %v15752_v14 = vld [vmem:[#allocation7 + $0x24a0] sm:$0xf]  ;;  %v17868_v19 = vld [vmem:[#allocation7 + $0x24ac] sm:$0xf0]  ;;  %v15429_v3 = vor.u32 %v17783_v37, %v15426_v54  ;;  %v17815_v37 = vld [vmem:[#allocation7 + $0x230c] sm:$0xf] }
 0x65a   :  { %9815 = vmatpush.bf16.msra.mxu0 %v15769_v53  ;;  %v15753_v49 = vor.u32 %v17868_v19, %v15752_v14  ;;  %v15688_v50 = vld [vmem:[#allocation7 + $0x2420] sm:$0xf]  ;;  %v15554_v54 = vld [vmem:[#allocation7 + $0x2318] sm:$0xf0]  ;;  %v17870_v19 = vld [vmem:[#allocation7 + $0x24c4] sm:$0xf] }
 0x65c   :  { %8967 = vmatpush.bf16.msra.mxu3 %v15633_v31  ;;  %v15653_v31 = vor.u32 %v17839_v60, %v15650_v9  ;;  %v15557_v60 = vor.u32 %v17815_v37, %v15554_v54  ;;  %v15880_v9 = vld [vmem:[#allocation7 + $0x25a0] sm:$0xf]  ;;  %v17940_v37 = vld [vmem:[#allocation7 + $0x26ec] sm:$0xf0] }
 0x65d   :  { %8997 = vmatpush.bf16.msrb.mxu1 %v15317_v24  ;;  %9006 = vmatpush.bf16.msrb.mxu2 %v15509_v55  ;;  %v17835_v55 = vld [vmem:[#allocation7 + $0x23ac] sm:$0xf] }
 0x65e   :  { %v7868_v40 = vpop.f32.mrf.mxu3  ;;  %9816 = vmatpush.bf16.msra.mxu0 %v15753_v49  ;;  %v15637_v8 = vor.u32 %v17835_v55, %v15634_v12  ;;  %v17900_v49 = vld [vmem:[#allocation7 + $0x25ac] sm:$0xf0] }
 0x65f   :  { %v15881_v62 = vor.u32 %v17900_v49, %v15880_v9  ;;  %v17902_v9 = vld [vmem:[#allocation7 + $0x25c4] sm:$0xf] }
 0x660   :  { %8968 = vmatpush.bf16.msra.mxu3 %v15617_v20 }
 0x661   :  { %8998 = vmatpush.bf16.msrb.mxu1 %v15301_v29  ;;  %9007 = vmatpush.bf16.msrb.mxu2 %v15493_v26  ;;  %v7959_v6 = vpop.f32.mrf.mxu2  ;;  %v17831_v29 = vld [vmem:[#allocation7 + $0x238c] sm:$0xf]  ;;  %v15618_v26 = vld [vmem:[#allocation7 + $0x2398] sm:$0xf0] }
 0x662   :  { %9817 = vmatpush.bf16.msra.mxu0 %v15737_v25  ;;  %v15621_v17 = vor.u32 %v17831_v29, %v15618_v26  ;;  %v15770_v6 = vld [vmem:[#allocation7 + $0x24d0] sm:$0xf0]  ;;  %v15848_v26 = vld [vmem:[#allocation7 + $0x2560] sm:$0xf] }
 0x663   :  { %v18815_v28 = vpop.f32.mrf.mxu1 }
 0x664   :  { %8969 = vmatpush.bf16.msra.mxu3 %v15601_v5  ;;  %8999 = vmatmul.bf16.vlgmr.msrb.gmra.mxu1 %v18606_v61  ;;  %v15445_v61 = vor.u32 %v17787_v1, %v15442_v52  ;;  %v17856_v5 = vld [vmem:[#allocation7 + $0x244c] sm:$0xf0] }
 0x665   :  { %9008 = vmatpush.bf16.msrb.mxu2 %v15477_v39  ;;  %v15602_v39 = vld [vmem:[#allocation7 + $0x2378] sm:$0xf0]  ;;  %v17848_v1 = vld [vmem:[#allocation7 + $0x240c] sm:$0xf0] }
 0x666   :  { %v7918_v24 = vpop.f32.mrf.mxu3  ;;  %9818 = vmatpush.bf16.msra.mxu0 %v15721_v42  ;;  %v15673_v52 = vor.u32 %v17848_v1, %v15672_v58  ;;  %v17892_v42 = vld [vmem:[#allocation7 + $0x256c] sm:$0xf0]  ;;  %v15690_v58 = vld [vmem:[#allocation7 + $0x2430] sm:$0xf0] }
 0x667   :  { %v7919_v33 = vadd.f32 %v7918_v24, %v18803_v36  ;;  %v15704_v36 = vld [vmem:[#allocation7 + $0x2440] sm:$0xf]  ;;  %v15754_v24 = vld [vmem:[#allocation7 + $0x24b0] sm:$0xf0] }
 0x668   :  { %8970 = vmatpush.bf16.msra.mxu3 %v15585_v15  ;;  %v15705_v35 = vor.u32 %v17856_v5, %v15704_v36  ;;  %v17852_v15 = vld [vmem:[#allocation7 + $0x242c] sm:$0xf0]  ;;  %v17858_v36 = vld [vmem:[#allocation7 + $0x2464] sm:$0xf]  ;;  %v15849_v5 = vor.u32 %v17892_v42, %v15848_v26  ;;  %v15992_v42 = vld [vmem:[#allocation7 + $0x2680] sm:$0xf] }
 0x669   :  { %9009 = vmatpush.bf16.msrb.mxu2 %v15461_v22  ;;  %v8030_v44 = vrot.slane %v7919_v33, 6  ;;  %v15570_v22 = vld [vmem:[#allocation7 + $0x2338] sm:$0xf0]  ;;  %v15864_v33 = vld [vmem:[#allocation7 + $0x2580] sm:$0xf] }
 0x66a   :  { %9819 = vmatpush.bf16.msra.mxu0 %v15705_v35  ;;  %v15573_v53 = vor.u32 %v17819_v45, %v15570_v22  ;;  %v17850_v45 = vld [vmem:[#allocation7 + $0x2424] sm:$0xf] }
 0x66b   :  { %v7998_v20 = vpop.f32.mrf.mxu1  ;;  %v18822_v30 = vsel %vm8033_vm0, %v18810_v43, %v8030_v44  ;;  %v15689_v43 = vor.u32 %v17852_v15, %v15688_v50  ;;  %v17896_v44 = vld [vmem:[#allocation7 + $0x258c] sm:$0xf0]  ;;  %v15706_v15 = vld [vmem:[#allocation7 + $0x2450] sm:$0xf0]  ;;  %v15693_v1 = vor.u32 %v17850_v45, %v15690_v58 }
 0x66c   :  { %8971 = vmatpush.bf16.msra.mxu3 %v15569_v57  ;;  %v15912_v57 = vld [vmem:[#allocation7 + $0x25e0] sm:$0xf]  ;;  %v17862_v20 = vld [vmem:[#allocation7 + $0x2484] sm:$0xf]  ;;  %v17920_v45 = vld [vmem:[#allocation7 + $0x264c] sm:$0xf0] }
 0x66d   :  { %9010 = vmatpush.bf16.msrb.mxu2 %v15445_v61  ;;  %v15913_v40 = vor.u32 %v17908_v51, %v15912_v57  ;;  %v15786_v61 = vld [vmem:[#allocation7 + $0x24f0] sm:$0xf0]  ;;  %v15741_v27 = vor.u32 %v17862_v20, %v15738_v4  ;;  %v15800_v57 = vld [vmem:[#allocation7 + $0x2500] sm:$0xf]  ;;  %v17880_v51 = vld [vmem:[#allocation7 + $0x250c] sm:$0xf0] }
 0x66e   :  { %v7920_v23 = vpop.f32.mrf.mxu3  ;;  %9820 = vmatpush.bf16.msra.mxu0 %v15689_v43  ;;  %v15789_v38 = vor.u32 %v17874_v46, %v15786_v61  ;;  %v17884_v43 = vld [vmem:[#allocation7 + $0x252c] sm:$0xf0]  ;;  %v17846_v46 = vld [vmem:[#allocation7 + $0x2404] sm:$0xf] }
 0x66f   :  { %9827 = vmatpush.bf16.msra.mxu1 %v15913_v40  ;;  %v15832_v23 = vld [vmem:[#allocation7 + $0x2540] sm:$0xf]  ;;  %v15817_v22 = vor.u32 %v17884_v43, %v15816_v2 }
 0x670   :  { %8972 = vmatpush.bf16.msra.mxu3 %v15553_v56  ;;  %v18824_v41 = vpop.f32.mrf.mxu0  ;;  %v15896_v56 = vld [vmem:[#allocation7 + $0x25c0] sm:$0xf] }
 0x671   :  { %9011 = vmatpush.bf16.msrb.mxu2 %v15429_v3  ;;  %v15773_v3 = vor.u32 %v17870_v19, %v15770_v6  ;;  %v80_v6 = vld [vmem:[#allocation2] sm:$0xff]  ;;  %v15960_v43 = vld [vmem:[#allocation7 + $0x2640] sm:$0xf] }
 0x672   :  { %9821 = vmatpush.bf16.msra.mxu0 %v15673_v52  ;;  %v7958_v52 = vadd.f32 %v18813_v48, %v18799_v32  ;;  %v17906_v32 = vld [vmem:[#allocation7 + $0x25e4] sm:$0xf]  ;;  %v15914_v48 = vld [vmem:[#allocation7 + $0x25f0] sm:$0xf0]  ;;  %v15961_v58 = vor.u32 %v17920_v45, %v15960_v43  ;;  %v17960_v43 = vld [vmem:[#allocation7 + $0x278c] sm:$0xf0] }
 0x673   :  { %8973 = vmatmul.bf16.vlgmr.msra.gmra.mxu3 %v18627_v11  ;;  %v15917_v19 = vor.u32 %v17906_v32, %v15914_v48  ;;  %v17878_v32 = vld [vmem:[#allocation7 + $0x2504] sm:$0xf] }
 0x674   :  { %9017 = vmatpush.bf16.msrb.mxu3 %v15669_v0  ;;  %9012 = vmatmul.bf16.vlgmr.msrb.gmra.mxu2 %v18616_v34  ;;  %v17827_v34 = vld [vmem:[#allocation7 + $0x236c] sm:$0xf]  ;;  %v17904_v0 = vld [vmem:[#allocation7 + $0x25cc] sm:$0xf0]  ;;  %v17926_v45 = vld [vmem:[#allocation7 + $0x2684] sm:$0xf] }
 0x675   :  { %v15605_v59 = vor.u32 %v17827_v34, %v15602_v39  ;;  %v15897_v14 = vor.u32 %v17904_v0, %v15896_v56  ;;  %v17888_v34 = vld [vmem:[#allocation7 + $0x254c] sm:$0xf0]  ;;  %v17854_v39 = vld [vmem:[#allocation7 + $0x2444] sm:$0xf] }
 0x676   :  { %v18826_v7 = vpop.f32.mrf.mxu3  ;;  %9866 = vmatpush.bf16.msrb.mxu0 %v15789_v38  ;;  %v15709_v63 = vor.u32 %v17854_v39, %v15706_v15  ;;  %v15801_v38 = vor.u32 %v17880_v51, %v15800_v57  ;;  %v17924_v39 = vld [vmem:[#allocation7 + $0x266c] sm:$0xf0]  ;;  %v15944_v51 = vld [vmem:[#allocation7 + $0x2620] sm:$0xf] }
 0x677   :  { %9828 = vmatpush.bf16.msra.mxu1 %v15897_v14 }
 0x678   :  { %9018 = vmatpush.bf16.msrb.mxu3 %v15653_v31  ;;  %v8833_v18 = vpop.f32.mrf.mxu0  ;;  %v17866_v31 = vld [vmem:[#allocation7 + $0x24a4] sm:$0xf] }
 0x679   :  { %v18828_v16 = vpop.f32.mrf.mxu2  ;;  %v15757_v12 = vor.u32 %v17866_v31, %v15754_v24  ;;  %v7971_v18 = vadd.f32 %v18826_v7, %v7958_v52 }
 0x67a   :  { %9867 = vmatpush.bf16.msrb.mxu0 %v15773_v3  ;;  %v16024_v3 = vld [vmem:[#allocation7 + $0x26c0] sm:$0xf] }
 0x67b   :  { %9829 = vmatpush.bf16.msra.mxu1 %v15881_v62  ;;  %v8031_v7 = vrot.slane %v7971_v18, 4  ;;  %v15898_v62 = vld [vmem:[#allocation7 + $0x25d0] sm:$0xf0]  ;;  %v17882_v18 = vld [vmem:[#allocation7 + $0x2524] sm:$0xf] }
 0x67c   :  { %9019 = vmatpush.bf16.msrb.mxu3 %v15637_v8  ;;  %v15865_v8 = vor.u32 %v17896_v44, %v15864_v33  ;;  %v15901_v24 = vor.u32 %v17902_v9, %v15898_v62  ;;  %v17898_v33 = vld [vmem:[#allocation7 + $0x25a4] sm:$0xf]  ;;  %v15776_v62 = vld [vmem:[#allocation7 + $0x24c8] sm:$0xf] }
 0x67e   :  { %v7972_v55 = vpop.f32.mrf.mxu3  ;;  %9868 = vmatpush.bf16.msrb.mxu0 %v15757_v12  ;;  %v16008_v12 = vld [vmem:[#allocation7 + $0x26a0] sm:$0xf] }
 0x67f   :  { %9830 = vmatpush.bf16.msra.mxu1 %v15865_v8 }
 0x680   :  { %9020 = vmatpush.bf16.msrb.mxu3 %v15621_v17  ;;  %v15722_v17 = vld [vmem:[#allocation7 + $0x2470] sm:$0xf0] }
 0x681   :  { %v8011_v25 = vpop.f32.mrf.mxu2  ;;  %v15725_v35 = vor.u32 %v17858_v36, %v15722_v17  ;;  %v17928_v36 = vld [vmem:[#allocation7 + $0x268c] sm:$0xf0]  ;;  %v15866_v17 = vld [vmem:[#allocation7 + $0x2590] sm:$0xf0] }
 0x682   :  { %9869 = vmatpush.bf16.msrb.mxu0 %v15741_v27  ;;  %v17932_v25 = vld [vmem:[#allocation7 + $0x26ac] sm:$0xf0]  ;;  %v15882_v27 = vld [vmem:[#allocation7 + $0x25b0] sm:$0xf0] }
 0x683   :  { %v18830_v21 = vpop.f32.mrf.mxu1  ;;  %9831 = vmatpush.bf16.msra.mxu1 %v15849_v5  ;;  %v16009_v4 = vor.u32 %v17932_v25, %v16008_v12  ;;  %v15885_v26 = vor.u32 %v17898_v33, %v15882_v27  ;;  %v17894_v5 = vld [vmem:[#allocation7 + $0x2584] sm:$0xf]  ;;  %v16152_v12 = vld [vmem:[#allocation7 + $0x27c0] sm:$0xf]  ;;  %v17968_v25 = vld [vmem:[#allocation7 + $0x27cc] sm:$0xf0] }
 0x684   :  { %9021 = vmatpush.bf16.msrb.mxu3 %v15605_v59  ;;  %v7173_v59 = vperm.slane %v18775_v10, 3  ;;  %v17934_v33 = vld [vmem:[#allocation7 + $0x26c4] sm:$0xf]  ;;  %v15760_v27 = vld [vmem:[#allocation7 + $0x24a8] sm:$0xf] }
 0x686   :  { %9870 = vmatpush.bf16.msrb.mxu0 %v15725_v35  ;;  %v15869_v35 = vor.u32 %v17894_v5, %v15866_v17  ;;  %v17930_v5 = vld [vmem:[#allocation7 + $0x26a4] sm:$0xf] }
 0x688   :  { %9022 = vmatpush.bf16.msrb.mxu3 %v15589_v47  ;;  %v7984_v47 = vadd.f32 %v18807_v13, %v7173_v59  ;;  %v15674_v13 = vld [vmem:[#allocation7 + $0x2410] sm:$0xf0]  ;;  %v17890_v59 = vld [vmem:[#allocation7 + $0x2564] sm:$0xf] }
 0x689   :  { %v15677_v56 = vor.u32 %v17846_v46, %v15674_v13  ;;  %v17916_v46 = vld [vmem:[#allocation7 + $0x262c] sm:$0xf0] }
 0x68a   :  { %9871 = vmatpush.bf16.msrb.mxu0 %v15709_v63  ;;  %v7997_v10 = vadd.f32 %v18815_v28, %v7984_v47  ;;  %v15850_v63 = vld [vmem:[#allocation7 + $0x2570] sm:$0xf0]  ;;  %v17886_v47 = vld [vmem:[#allocation7 + $0x2544] sm:$0xf] }
 0x68b   :  { %v8846_v29 = vpop.f32.mrf.mxu1  ;;  %v15853_v2 = vor.u32 %v17890_v59, %v15850_v63  ;;  %v17865_v63 = vld [vmem:[#allocation7 + $0x2494] sm:$0xf0] }
 0x68c   :  { %9023 = vmatpush.bf16.msrb.mxu3 %v15573_v53  ;;  %v8010_v40 = vadd.f32 %v18828_v16, %v7997_v10  ;;  %v16040_v53 = vld [vmem:[#allocation7 + $0x26e0] sm:$0xf] }
 0x68d   :  { %v16041_v0 = vor.u32 %v17940_v37, %v16040_v53  ;;  %v15792_v53 = vld [vmem:[#allocation7 + $0x24e8] sm:$0xf]  ;;  %v17877_v37 = vld [vmem:[#allocation7 + $0x24f4] sm:$0xf0] }
 0x68e   :  { %9872 = vmatpush.bf16.msrb.mxu0 %v15693_v1  ;;  %v15834_v1 = vld [vmem:[#allocation7 + $0x2550] sm:$0xf0]  ;;  %v15793_v9 = vor.u32 %v17877_v37, %v15792_v53  ;;  %v15712_v37 = vld [vmem:[#allocation7 + $0x2448] sm:$0xf] }
 0x68f   :  { %9840 = vmatpush.bf16.msra.mxu2 %v16041_v0  ;;  %v15837_v10 = vor.u32 %v17886_v47, %v15834_v1  ;;  %v17912_v0 = vld [vmem:[#allocation7 + $0x260c] sm:$0xf0]  ;;  %v15728_v1 = vld [vmem:[#allocation7 + $0x2468] sm:$0xf] }
 0x690   :  { %9024 = vmatpush.bf16.msrb.mxu3 %v15557_v60  ;;  %v18834_v50 = vpop.f32.mrf.mxu0  ;;  %v17936_v60 = vld [vmem:[#allocation7 + $0x26cc] sm:$0xf0] }
 0x691   :  { %v16025_v31 = vor.u32 %v17936_v60, %v16024_v3  ;;  %v16168_v3 = vld [vmem:[#allocation7 + $0x27e0] sm:$0xf]  ;;  %v17938_v60 = vld [vmem:[#allocation7 + $0x26e4] sm:$0xf] }
 0x692   :  { %9873 = vmatpush.bf16.msrb.mxu0 %v15677_v56  ;;  %v15928_v56 = vld [vmem:[#allocation7 + $0x2600] sm:$0xf] }
 0x693   :  { %9025 = vmatmul.bf16.vlgmr.msrb.gmra.mxu3 %v18627_v11  ;;  %v15833_v11 = vor.u32 %v17888_v34, %v15832_v23  ;;  %9841 = vmatpush.bf16.msra.mxu2 %v16025_v31  ;;  %v15976_v34 = vld [vmem:[#allocation7 + $0x2660] sm:$0xf]  ;;  %v16042_v31 = vld [vmem:[#allocation7 + $0x26f0] sm:$0xf0] }
 0x694   :  { %v15977_v15 = vor.u32 %v17924_v39, %v15976_v34 }
 0x695   :  { %9832 = vmatpush.bf16.msra.mxu1 %v15833_v11  ;;  %v18849_v11 = vld [vmem:[#allocation8 + $0x20] sm:$0xf] }
 0x696   :  { %v8022_v54 = vpop.f32.mrf.mxu3 }
 0x697   :  { %v8023_v28 = vadd.f32 %v8022_v54, %v8010_v40  ;;  %9842 = vmatpush.bf16.msra.mxu2 %v16009_v4  ;;  %v15945_v40 = vor.u32 %v17916_v46, %v15944_v51  ;;  %v16104_v51 = vld [vmem:[#allocation7 + $0x2760] sm:$0xf]  ;;  %v17956_v46 = vld [vmem:[#allocation7 + $0x276c] sm:$0xf0] }
 0x698   :  { %v8885_v61 = vpop.f32.mrf.mxu0 }
 0x699   :  { %9833 = vmatpush.bf16.msra.mxu1 %v15817_v22  ;;  %v18842_v14 = vpop.f32.mrf.mxu2  ;;  %v8032_v16 = vrot.slane %v8023_v28, 2  ;;  %v8174_v22 = vperm.slane %v18849_v11, 0  ;;  %v15818_v61 = vld [vmem:[#allocation7 + $0x2530] sm:$0xf0]  ;;  %v15929_v28 = vor.u32 %v17912_v0, %v15928_v56  ;;  %v16088_v56 = vld [vmem:[#allocation7 + $0x2740] sm:$0xf] }
 0x69a   :  { %v15821_v13 = vor.u32 %v17882_v18, %v15818_v61  ;;  %v17922_v61 = vld [vmem:[#allocation7 + $0x2664] sm:$0xf]  ;;  %v17952_v0 = vld [vmem:[#allocation7 + $0x274c] sm:$0xf0] }
 0x69b   :  { %v8036_v49 = vsel %vm8035_vm1, %v8031_v7, %v8032_v16  ;;  %v8832_v57 = vadd.f32 %v18824_v41, %v8174_v22  ;;  %v15994_v22 = vld [vmem:[#allocation7 + $0x2690] sm:$0xf0] }
 0x69c   :  { %v8038_v55 = vsel %vm8037_vm2, %v18822_v30, %v8036_v49  ;;  %v15993_v30 = vor.u32 %v17928_v36, %v15992_v42  ;;  %v16136_v42 = vld [vmem:[#allocation7 + $0x27a0] sm:$0xf]  ;;  %v17964_v36 = vld [vmem:[#allocation7 + $0x27ac] sm:$0xf0] }
 0x69d   :  { %9834 = vmatpush.bf16.msra.mxu1 %v15801_v38  ;;  %v8040_v44 = vadd.f32 %v8038_v55, %v80_v6  ;;  %v8845_v38 = vadd.f32 %v18830_v21, %v8832_v57  ;;  %v17972_v21 = vld [vmem:[#allocation7 + $0x27ec] sm:$0xf0]  ;;  %v16045_v55 = vor.u32 %v17938_v60, %v16042_v31  ;;  %v17861_v57 = vld [vmem:[#allocation7 + $0x2474] sm:$0xf0]  ;;  %v17914_v31 = vld [vmem:[#allocation7 + $0x2624] sm:$0xf] }
 0x69e   :  { %v8024_v20 = vpop.f32.mrf.mxu3  ;;  %9843 = vmatpush.bf16.msra.mxu2 %v15993_v30  ;;  %v16169_v49 = vor.u32 %v17972_v21, %v16168_v3  ;;  %v15729_v53 = vor.u32 %v17861_v57, %v15728_v1  ;;  %v15696_v3 = vld [vmem:[#allocation7 + $0x2428] sm:$0xf]  ;;  %v17853_v21 = vld [vmem:[#allocation7 + $0x2434] sm:$0xf0]  ;;  %v16154_v57 = vld [vmem:[#allocation7 + $0x27d0] sm:$0xf0] }
 0x69f   :  { %8041 = vst [vmem:[#allocation10] sm:$0xff] %v8040_v44  ;;  %v8858_v54 = vadd.f32 %v18842_v14, %v8845_v38  ;;  %v16153_v44 = vor.u32 %v17968_v25, %v16152_v12  ;;  %v16026_v20 = vld [vmem:[#allocation7 + $0x26d0] sm:$0xf0]  ;;  %v15697_v12 = vor.u32 %v17853_v21, %v15696_v3  ;;  %v15680_v25 = vld [vmem:[#allocation7 + $0x2408] sm:$0xf] }
 0x6a0   :  { %9853 = vmatpush.bf16.msra.mxu3 %v16169_v49  ;;  %v15978_v38 = vld [vmem:[#allocation7 + $0x2670] sm:$0xf0]  ;;  %v17948_v49 = vld [vmem:[#allocation7 + $0x272c] sm:$0xf0]  ;;  %v17958_v21 = vld [vmem:[#allocation7 + $0x2784] sm:$0xf] }
 0x6a1   :  { %9879 = vmatpush.bf16.msrb.mxu1 %v15917_v19  ;;  %v8859_v29 = vpop.f32.mrf.mxu2  ;;  %v15802_v19 = vld [vmem:[#allocation7 + $0x2510] sm:$0xf0]  ;;  %11037 = dma.vmem_to_hbm [thread:$0]  %s11033_s3, 128, %s11035_s17, [#allocation4]  }
 0x6a2   :  { %9844 = vmatpush.bf16.msra.mxu2 %v15977_v15  ;;  %v15805_v6 = vor.u32 %v17878_v32, %v15802_v19  ;;  %v17869_v29 = vld [vmem:[#allocation7 + $0x24b4] sm:$0xf0]  ;;  %v15744_v15 = vld [vmem:[#allocation7 + $0x2488] sm:$0xf]  ;;  %v17918_v32 = vld [vmem:[#allocation7 + $0x2644] sm:$0xf] }
 0x6a3   :  { %v18847_v8 = vpop.f32.mrf.mxu1  ;;  %v15761_v59 = vor.u32 %v17869_v29, %v15760_v27  ;;  %v17875_v27 = vld [vmem:[#allocation7 + $0x24ec] sm:$0xf]  ;;  %v15794_v29 = vld [vmem:[#allocation7 + $0x24f8] sm:$0xf0] }
 0x6a4   :  { %9854 = vmatpush.bf16.msra.mxu3 %v16153_v44  ;;  %v15920_v44 = vld [vmem:[#allocation7 + $0x25e8] sm:$0xf] }
 0x6a5   :  { %9880 = vmatpush.bf16.msrb.mxu1 %v15901_v24  ;;  %v17873_v24 = vld [vmem:[#allocation7 + $0x24d4] sm:$0xf0] }
 0x6a6   :  { %9845 = vmatpush.bf16.msra.mxu2 %v15961_v58  ;;  %v15777_v4 = vor.u32 %v17873_v24, %v15776_v62  ;;  %v15745_v58 = vor.u32 %v17865_v63, %v15744_v15  ;;  %v15946_v24 = vld [vmem:[#allocation7 + $0x2630] sm:$0xf0]  ;;  %v17970_v15 = vld [vmem:[#allocation7 + $0x27e4] sm:$0xf] }
 0x6a9   :  { %9881 = vmatpush.bf16.msrb.mxu1 %v15885_v26  ;;  %v16029_v26 = vor.u32 %v17934_v33, %v16026_v20  ;;  %v17849_v33 = vld [vmem:[#allocation7 + $0x2414] sm:$0xf0]  ;;  %v15949_v20 = vor.u32 %v17914_v31, %v15946_v24  ;;  %v15856_v31 = vld [vmem:[#allocation7 + $0x2568] sm:$0xf]  ;;  %v17859_v24 = vld [vmem:[#allocation7 + $0x246c] sm:$0xf] }
 0x6aa   :  { %9846 = vmatpush.bf16.msra.mxu2 %v15945_v40  ;;  %v16105_v40 = vor.u32 %v17956_v46, %v16104_v51 }
 0x6ab   :  { %v8898_v23 = vpop.f32.mrf.mxu1 }
 0x6ac   :  { %v16010_v23 = vld [vmem:[#allocation7 + $0x26b0] sm:$0xf0] }
 0x6ad   :  { %9882 = vmatpush.bf16.msrb.mxu1 %v15869_v35  ;;  %v16137_v35 = vor.u32 %v17964_v36, %v16136_v42  ;;  %v16013_v39 = vor.u32 %v17930_v5, %v16010_v23  ;;  %v17944_v42 = vld [vmem:[#allocation7 + $0x270c] sm:$0xf0]  ;;  %v17910_v36 = vld [vmem:[#allocation7 + $0x2604] sm:$0xf] }
 0x6ae   :  { %9847 = vmatpush.bf16.msra.mxu2 %v15929_v28  ;;  %v15962_v28 = vld [vmem:[#allocation7 + $0x2650] sm:$0xf0] }
 0x6af   :  { %9855 = vmatpush.bf16.msra.mxu3 %v16137_v35 }
 0x6b0   :  { %v18852_v52 = vpop.f32.mrf.mxu0 }
 0x6b1   :  { %9883 = vmatpush.bf16.msrb.mxu1 %v15853_v2  ;;  %v16120_v2 = vld [vmem:[#allocation7 + $0x2780] sm:$0xf] }
 0x6b2   :  { %9892 = vmatpush.bf16.msrb.mxu2 %v16045_v55  ;;  %v16121_v47 = vor.u32 %v17960_v43, %v16120_v2  ;;  %v15797_v2 = vor.u32 %v17875_v27, %v15794_v29  ;;  %v15904_v43 = vld [vmem:[#allocation7 + $0x25c8] sm:$0xf] }
 0x6b3   :  { %v15840_v29 = vld [vmem:[#allocation7 + $0x2548] sm:$0xf] }
 0x6b4   :  { %9856 = vmatpush.bf16.msra.mxu3 %v16121_v47  ;;  %v17905_v47 = vld [vmem:[#allocation7 + $0x25d4] sm:$0xf0] }
 0x6b5   :  { %9884 = vmatpush.bf16.msrb.mxu1 %v15837_v10  ;;  %v15997_v10 = vor.u32 %v17926_v45, %v15994_v22  ;;  %v17871_v22 = vld [vmem:[#allocation7 + $0x24cc] sm:$0xf]  ;;  %v15905_v51 = vor.u32 %v17905_v47, %v15904_v43  ;;  %v17946_v43 = vld [vmem:[#allocation7 + $0x2724] sm:$0xf] }
 0x6b6   :  { %v8870_v48 = vpop.f32.mrf.mxu3  ;;  %9893 = vmatpush.bf16.msrb.mxu2 %v16029_v26  ;;  %v16056_v26 = vld [vmem:[#allocation7 + $0x2700] sm:$0xf] }
 0x6b7   :  { %v8871_v7 = vadd.f32 %v8870_v48, %v8858_v54  ;;  %v17857_v54 = vld [vmem:[#allocation7 + $0x2454] sm:$0xf0]  ;;  %v8175_v48 = vperm.slane %v18849_v11, 1  ;;  %v16057_v35 = vor.u32 %v17944_v42, %v16056_v26  ;;  %v17855_v26 = vld [vmem:[#allocation7 + $0x244c] sm:$0xf] }
 0x6b8   :  { %v8937_v41 = vpop.f32.mrf.mxu0  ;;  %9857 = vmatpush.bf16.msra.mxu3 %v16105_v40  ;;  %v17901_v40 = vld [vmem:[#allocation7 + $0x25b4] sm:$0xf0]  ;;  %v15714_v42 = vld [vmem:[#allocation7 + $0x2458] sm:$0xf0] }
 0x6b9   :  { %9885 = vmatpush.bf16.msrb.mxu1 %v15821_v13  ;;  %v18857_v16 = vpop.f32.mrf.mxu2  ;;  %v18859_v14 = vpack.c.bf16 %v8871_v7, %v8871_v7  ;;  %v15981_v13 = vor.u32 %v17922_v61, %v15978_v38  ;;  %v16089_v41 = vor.u32 %v17952_v0, %v16088_v56  ;;  %v15965_v7 = vor.u32 %v17918_v32, %v15962_v28  ;;  %v17867_v61 = vld [vmem:[#allocation7 + $0x24ac] sm:$0xf]  ;;  %v15762_v38 = vld [vmem:[#allocation7 + $0x24b8] sm:$0xf0]  ;;  %v16138_v56 = vld [vmem:[#allocation7 + $0x27b0] sm:$0xf0] }
 0x6ba   :  { %9894 = vmatpush.bf16.msrb.mxu2 %v16013_v39  ;;  %v8884_v60 = vadd.f32 %v18834_v50, %v8175_v48  ;;  %v15681_v39 = vor.u32 %v17849_v33, %v15680_v25  ;;  %v15765_v48 = vor.u32 %v17867_v61, %v15762_v38  ;;  %v17897_v28 = vld [vmem:[#allocation7 + $0x2594] sm:$0xf0]  ;;  %v17954_v33 = vld [vmem:[#allocation7 + $0x2764] sm:$0xf]  ;;  %v17907_v38 = vld [vmem:[#allocation7 + $0x25ec] sm:$0xf] }
 0x6bb   :  { %9822 = vmatmul.bf16.vlgmr.msra.gmra.mxu0 %v18859_v14  ;;  %v17941_v61 = vld [vmem:[#allocation7 + $0x26f4] sm:$0xf0] }
 0x6bc   :  { %9918 = vmatpush.bf16.msra.mxu0 %v15793_v9  ;;  %9858 = vmatpush.bf16.msra.mxu3 %v16089_v41  ;;  %v16072_v9 = vld [vmem:[#allocation7 + $0x2720] sm:$0xf]  ;;  %v8897_v55 = vadd.f32 %v18847_v8, %v8884_v60  ;;  %v15930_v8 = vld [vmem:[#allocation7 + $0x2610] sm:$0xf0]  ;;  %v15872_v41 = vld [vmem:[#allocation7 + $0x2588] sm:$0xf] }
 0x6bd   :  { %9886 = vmatpush.bf16.msrb.mxu1 %v15805_v6  ;;  %v15713_v6 = vor.u32 %v17857_v54, %v15712_v37  ;;  %v16073_v62 = vor.u32 %v17948_v49, %v16072_v9  ;;  %v17962_v54 = vld [vmem:[#allocation7 + $0x27a4] sm:$0xf]  ;;  %v16122_v60 = vld [vmem:[#allocation7 + $0x2790] sm:$0xf0]  ;;  %v15873_v9 = vor.u32 %v17897_v28, %v15872_v41  ;;  %v16032_v28 = vld [vmem:[#allocation7 + $0x26c8] sm:$0xf] }
 0x6be   :  { %v8872_v30 = vpop.f32.mrf.mxu3  ;;  %9895 = vmatpush.bf16.msrb.mxu2 %v15997_v10  ;;  %v8910_v50 = vadd.f32 %v18857_v16, %v8897_v55  ;;  %v16170_v16 = vld [vmem:[#allocation7 + $0x27f0] sm:$0xf0]  ;;  %v17966_v10 = vld [vmem:[#allocation7 + $0x27c4] sm:$0xf]  ;;  %v16141_v3 = vor.u32 %v17962_v54, %v16138_v56  ;;  %v15730_v55 = vld [vmem:[#allocation7 + $0x2478] sm:$0xf0] }
 0x6bf   :  { %v16173_v1 = vor.u32 %v17970_v15, %v16170_v16  ;;  %v15733_v27 = vor.u32 %v17859_v24, %v15730_v55  ;;  %v17851_v15 = vld [vmem:[#allocation7 + $0x242c] sm:$0xf]  ;;  %v16074_v16 = vld [vmem:[#allocation7 + $0x2730] sm:$0xf0]  ;;  %v17942_v54 = vld [vmem:[#allocation7 + $0x2704] sm:$0xf] }
 0x6c0   :  { %9919 = vmatpush.bf16.msra.mxu0 %v15777_v4  ;;  %v17909_v4 = vld [vmem:[#allocation7 + $0x25f4] sm:$0xf0]  ;;  %9859 = vmatpush.bf16.msra.mxu3 %v16073_v62  ;;  %v17899_v24 = vld [vmem:[#allocation7 + $0x25ac] sm:$0xf]  ;;  %v15890_v55 = vld [vmem:[#allocation7 + $0x25b8] sm:$0xf0] }
 0x6c1   :  { %v8911_v34 = vpop.f32.mrf.mxu2  ;;  %v15921_v63 = vor.u32 %v17909_v4, %v15920_v44  ;;  %v17893_v62 = vld [vmem:[#allocation7 + $0x2574] sm:$0xf0]  ;;  %v16106_v44 = vld [vmem:[#allocation7 + $0x2770] sm:$0xf0] }
 0x6c2   :  { %9896 = vmatpush.bf16.msrb.mxu2 %v15981_v13  ;;  %v16157_v13 = vor.u32 %v17966_v10, %v16154_v57  ;;  %v15857_v4 = vor.u32 %v17893_v62, %v15856_v31  ;;  %v17881_v10 = vld [vmem:[#allocation7 + $0x2514] sm:$0xf0] }
 0x6c3   :  { %v18862_v17 = vpop.f32.mrf.mxu1  ;;  %v17933_v62 = vld [vmem:[#allocation7 + $0x26b4] sm:$0xf0] }
 0x6c4   :  { %9920 = vmatpush.bf16.msra.mxu0 %v15761_v59  ;;  %v15933_v59 = vor.u32 %v17910_v36, %v15930_v8  ;;  %9860 = vmatpush.bf16.msra.mxu3 %v16057_v35  ;;  %v16109_v36 = vor.u32 %v17954_v33, %v16106_v44  ;;  %v15717_v8 = vor.u32 %v17855_v26, %v15714_v42  ;;  %v16000_v44 = vld [vmem:[#allocation7 + $0x2688] sm:$0xf]  ;;  %v17925_v42 = vld [vmem:[#allocation7 + $0x2674] sm:$0xf0] }
 0x6c5   :  { %v15893_v33 = vor.u32 %v17899_v24, %v15890_v55  ;;  %v15984_v26 = vld [vmem:[#allocation7 + $0x2668] sm:$0xf]  ;;  %v17961_v24 = vld [vmem:[#allocation7 + $0x2794] sm:$0xf0]  ;;  %v17927_v55 = vld [vmem:[#allocation7 + $0x268c] sm:$0xf] }
 0x6c6   :  { %9897 = vmatpush.bf16.msrb.mxu2 %v15965_v7  ;;  %v17863_v7 = vld [vmem:[#allocation7 + $0x248c] sm:$0xf] }
 0x6c8   :  { %9921 = vmatpush.bf16.msra.mxu0 %v15745_v58  ;;  %v15778_v58 = vld [vmem:[#allocation7 + $0x24d8] sm:$0xf0]  ;;  %9905 = vmatpush.bf16.msrb.mxu3 %v16173_v1  ;;  %v15808_v1 = vld [vmem:[#allocation7 + $0x2508] sm:$0xf] }
 0x6c9   :  { %v15781_v46 = vor.u32 %v17871_v22, %v15778_v58 }
 0x6ca   :  { %9898 = vmatpush.bf16.msrb.mxu2 %v15949_v20  ;;  %v8176_v20 = vperm.slane %v18849_v11, 2 }
 0x6cb   :  { %v8950_v18 = vpop.f32.mrf.mxu1  ;;  %9874 = vmatmul.bf16.vlgmr.msrb.gmra.mxu0 %v18859_v14 }
 0x6cc   :  { %9922 = vmatpush.bf16.msra.mxu0 %v15729_v53  ;;  %v15888_v18 = vld [vmem:[#allocation7 + $0x25a8] sm:$0xf]  ;;  %9906 = vmatpush.bf16.msrb.mxu3 %v16157_v13  ;;  %v15922_v13 = vld [vmem:[#allocation7 + $0x25f8] sm:$0xf0] }
 0x6cd   :  { %v15889_v32 = vor.u32 %v17901_v40, %v15888_v18  ;;  %v16077_v18 = vor.u32 %v17946_v43, %v16074_v16  ;;  %v15925_v41 = vor.u32 %v17907_v38, %v15922_v13  ;;  %v17917_v16 = vld [vmem:[#allocation7 + $0x2634] sm:$0xf0]  ;;  %v17939_v38 = vld [vmem:[#allocation7 + $0x26ec] sm:$0xf] }
 0x6ce   :  { %9899 = vmatpush.bf16.msrb.mxu2 %v15933_v59  ;;  %v17885_v59 = vld [vmem:[#allocation7 + $0x2534] sm:$0xf0] }
 0x6d0   :  { %v18865_v19 = vpop.f32.mrf.mxu0  ;;  %9923 = vmatpush.bf16.msra.mxu0 %v15713_v6  ;;  %v15746_v6 = vld [vmem:[#allocation7 + $0x2498] sm:$0xf0]  ;;  %9907 = vmatpush.bf16.msrb.mxu3 %v16141_v3 }
 0x6d1   :  { %v15749_v49 = vor.u32 %v17863_v7, %v15746_v6  ;;  %v17937_v7 = vld [vmem:[#allocation7 + $0x26d4] sm:$0xf0]  ;;  %v17903_v6 = vld [vmem:[#allocation7 + $0x25cc] sm:$0xf]  ;;  %v15906_v3 = vld [vmem:[#allocation7 + $0x25d8] sm:$0xf0] }
 0x6d4   :  { %9924 = vmatpush.bf16.msra.mxu0 %v15697_v12  ;;  %v16125_v12 = vor.u32 %v17958_v21, %v16122_v60  ;;  %v16033_v60 = vor.u32 %v17937_v7, %v16032_v28 }
 0x6d6   :  { %v8922_v5 = vpop.f32.mrf.mxu3  ;;  %9908 = vmatpush.bf16.msrb.mxu3 %v16125_v12 }
 0x6d7   :  { %v8923_v23 = vadd.f32 %v8922_v5, %v8910_v50  ;;  %v18871_v34 = vpop.f32.mrf.mxu2  ;;  %v17889_v50 = vld [vmem:[#allocation7 + $0x2554] sm:$0xf0]  ;;  %v17950_v5 = vld [vmem:[#allocation7 + $0x2744] sm:$0xf] }
 0x6d8   :  { %v8989_v30 = vpop.f32.mrf.mxu0  ;;  %9925 = vmatpush.bf16.msra.mxu0 %v15681_v39  ;;  %v15841_v35 = vor.u32 %v17889_v50, %v15840_v29  ;;  %v8936_v39 = vadd.f32 %v18852_v52, %v8176_v20  ;;  %v16048_v52 = vld [vmem:[#allocation7 + $0x26e8] sm:$0xf]  ;;  %v17929_v20 = vld [vmem:[#allocation7 + $0x2694] sm:$0xf0] }
 0x6d9   :  { %v18873_v45 = vpack.c.bf16 %v8923_v23, %v8923_v23  ;;  %v16090_v30 = vld [vmem:[#allocation7 + $0x2750] sm:$0xf0]  ;;  %v15824_v23 = vld [vmem:[#allocation7 + $0x2528] sm:$0xf]  ;;  %v16001_v29 = vor.u32 %v17929_v20, %v16000_v44  ;;  %v17957_v20 = vld [vmem:[#allocation7 + $0x2774] sm:$0xf0] }
 0x6da   :  { %9909 = vmatpush.bf16.msrb.mxu3 %v16109_v36  ;;  %v8949_v47 = vadd.f32 %v18862_v17, %v8936_v39  ;;  %v15825_v22 = vor.u32 %v17885_v59, %v15824_v23  ;;  %v16058_v17 = vld [vmem:[#allocation7 + $0x2710] sm:$0xf0]  ;;  %v17891_v36 = vld [vmem:[#allocation7 + $0x256c] sm:$0xf]  ;;  %v17921_v23 = vld [vmem:[#allocation7 + $0x2654] sm:$0xf0] }
 0x6db   :  { %9835 = vmatmul.bf16.vlgmr.msra.gmra.mxu1 %v18873_v45  ;;  %9926 = vmatmul.bf16.vlgmr.msra.gmra.mxu0 %v18859_v14  ;;  %v16061_v21 = vor.u32 %v17942_v54, %v16058_v17  ;;  %v17887_v39 = vld [vmem:[#allocation7 + $0x254c] sm:$0xf]  ;;  %v15842_v59 = vld [vmem:[#allocation7 + $0x2558] sm:$0xf0]  ;;  %v16112_v44 = vld [vmem:[#allocation7 + $0x2768] sm:$0xf] }
 0x6dc   :  { %9931 = vmatpush.bf16.msra.mxu1 %v15921_v63  ;;  %9970 = vmatpush.bf16.msrb.mxu0 %v15797_v2  ;;  %v15698_v63 = vld [vmem:[#allocation7 + $0x2438] sm:$0xf0]  ;;  %v16093_v2 = vor.u32 %v17950_v5, %v16090_v30  ;;  %v8962_v57 = vadd.f32 %v18871_v34, %v8949_v47  ;;  %v16049_v34 = vor.u32 %v17941_v61, %v16048_v52  ;;  %v17883_v47 = vld [vmem:[#allocation7 + $0x252c] sm:$0xf]  ;;  %v17973_v61 = vld [vmem:[#allocation7 + $0x27f4] sm:$0xf0] }
 0x6dd   :  { %v15701_v58 = vor.u32 %v17851_v15, %v15698_v63  ;;  %v15858_v5 = vld [vmem:[#allocation7 + $0x2578] sm:$0xf0]  ;;  %v15985_v30 = vor.u32 %v17925_v42, %v15984_v26  ;;  %v15845_v63 = vor.u32 %v17887_v39, %v15842_v59  ;;  %v17953_v26 = vld [vmem:[#allocation7 + $0x2754] sm:$0xf0]  ;;  %v17919_v42 = vld [vmem:[#allocation7 + $0x264c] sm:$0xf] }
 0x6de   :  { %v8924_v53 = vpop.f32.mrf.mxu3  ;;  %9910 = vmatpush.bf16.msrb.mxu3 %v16093_v2  ;;  %v15952_v2 = vld [vmem:[#allocation7 + $0x2628] sm:$0xf]  ;;  %v15810_v52 = vld [vmem:[#allocation7 + $0x2518] sm:$0xf0] }
 0x6df   :  { %v8963_v0 = vpop.f32.mrf.mxu2 }
 0x6e0   :  { %9932 = vmatpush.bf16.msra.mxu1 %v15905_v51  ;;  %9971 = vmatpush.bf16.msrb.mxu0 %v15781_v46  ;;  %v17847_v51 = vld [vmem:[#allocation7 + $0x240c] sm:$0xf]  ;;  %v15682_v46 = vld [vmem:[#allocation7 + $0x2418] sm:$0xf0]  ;;  %v15809_v0 = vor.u32 %v17881_v10, %v15808_v1  ;;  %v15936_v10 = vld [vmem:[#allocation7 + $0x2608] sm:$0xf] }
 0x6e1   :  { %v18876_v37 = vpop.f32.mrf.mxu1 }
 0x6e2   :  { %9911 = vmatpush.bf16.msrb.mxu3 %v16077_v18  ;;  %v16176_v18 = vld [vmem:[#allocation7 + $0x27e8] sm:$0xf] }
 0x6e3   :  { %v16177_v17 = vor.u32 %v17973_v61, %v16176_v18  ;;  %v17959_v18 = vld [vmem:[#allocation7 + $0x278c] sm:$0xf] }
 0x6e4   :  { %9933 = vmatpush.bf16.msra.mxu1 %v15889_v32  ;;  %9972 = vmatpush.bf16.msrb.mxu0 %v15765_v48  ;;  %v15685_v32 = vor.u32 %v17847_v51, %v15682_v46  ;;  %v17879_v46 = vld [vmem:[#allocation7 + $0x250c] sm:$0xf] }
 0x6e6   :  { %9912 = vmatpush.bf16.msrb.mxu3 %v16061_v21  ;;  %v17965_v21 = vld [vmem:[#allocation7 + $0x27b4] sm:$0xf0] }
 0x6e8   :  { %9934 = vmatpush.bf16.msra.mxu1 %v15873_v9  ;;  %9973 = vmatpush.bf16.msrb.mxu0 %v15749_v49  ;;  %v15909_v9 = vor.u32 %v17903_v6, %v15906_v3  ;;  %v16016_v49 = vld [vmem:[#allocation7 + $0x26a8] sm:$0xf] }
 0x6e9   :  { %v9002_v25 = vpop.f32.mrf.mxu1  ;;  %v16144_v6 = vld [vmem:[#allocation7 + $0x27a8] sm:$0xf] }
 0x6ea   :  { %v16017_v25 = vor.u32 %v17933_v62, %v16016_v49  ;;  %v16145_v49 = vor.u32 %v17965_v21, %v16144_v6  ;;  %v16128_v62 = vld [vmem:[#allocation7 + $0x2788] sm:$0xf]  ;;  %v16082_v6 = vld [vmem:[#allocation7 + $0x2738] sm:$0xf0] }
 0x6eb   :  { %9887 = vmatmul.bf16.vlgmr.msrb.gmra.mxu1 %v18873_v45 }
 0x6ec   :  { %9935 = vmatpush.bf16.msra.mxu1 %v15857_v4  ;;  %9974 = vmatpush.bf16.msrb.mxu0 %v15733_v27  ;;  %v17895_v4 = vld [vmem:[#allocation7 + $0x258c] sm:$0xf]  ;;  %v15874_v27 = vld [vmem:[#allocation7 + $0x2598] sm:$0xf0] }
 0x6ed   :  { %v15877_v50 = vor.u32 %v17895_v4, %v15874_v27  ;;  %v17923_v4 = vld [vmem:[#allocation7 + $0x266c] sm:$0xf]  ;;  %v15986_v27 = vld [vmem:[#allocation7 + $0x2678] sm:$0xf0] }
 0x6f0   :  { %9936 = vmatpush.bf16.msra.mxu1 %v15841_v35  ;;  %9975 = vmatpush.bf16.msrb.mxu0 %v15717_v8  ;;  %v15861_v35 = vor.u32 %v17891_v36, %v15858_v5  ;;  %v15968_v8 = vld [vmem:[#allocation7 + $0x2648] sm:$0xf]  ;;  %v15970_v36 = vld [vmem:[#allocation7 + $0x2658] sm:$0xf0] }
 0x6f1   :  { %v15969_v15 = vor.u32 %v17921_v23, %v15968_v8  ;;  %v17915_v8 = vld [vmem:[#allocation7 + $0x262c] sm:$0xf]  ;;  %v15954_v23 = vld [vmem:[#allocation7 + $0x2638] sm:$0xf0] }
 0x6f2   :  { %v15957_v59 = vor.u32 %v17915_v8, %v15954_v23  ;;  %v16200_v8 = vld [vmem:[#allocation7 + $0x2820] sm:$0xf]  ;;  %v17980_v23 = vld [vmem:[#allocation7 + $0x282c] sm:$0xf0] }
 0x6f4   :  { %9937 = vmatpush.bf16.msra.mxu1 %v15825_v22  ;;  %9976 = vmatpush.bf16.msrb.mxu0 %v15701_v58  ;;  %v15953_v58 = vor.u32 %v17917_v16, %v15952_v2  ;;  %v17911_v2 = vld [vmem:[#allocation7 + $0x260c] sm:$0xf] }
 0x6f5   :  { %v17971_v16 = vld [vmem:[#allocation7 + $0x27ec] sm:$0xf] }
 0x6f6   :  { %v8974_v40 = vpop.f32.mrf.mxu3 }
 0x6f7   :  { %v8975_v53 = vadd.f32 %v8974_v40, %v8962_v57  ;;  %v18884_v56 = vpop.f32.mrf.mxu2  ;;  %v17913_v57 = vld [vmem:[#allocation7 + $0x2614] sm:$0xf0] }
 0x6f8   :  { %9938 = vmatpush.bf16.msra.mxu1 %v15809_v0  ;;  %9977 = vmatpush.bf16.msrb.mxu0 %v15685_v32  ;;  %v16160_v32 = vld [vmem:[#allocation7 + $0x27c8] sm:$0xf] }
 0x6f9   :  { %v18886_v48 = vpack.c.bf16 %v8975_v53, %v8975_v53  ;;  %v15937_v53 = vor.u32 %v17913_v57, %v15936_v10  ;;  %v16162_v10 = vld [vmem:[#allocation7 + $0x27d8] sm:$0xf0] }
 0x6fb   :  { %9848 = vmatmul.bf16.vlgmr.msra.gmra.mxu2 %v18886_v48  ;;  %9978 = vmatmul.bf16.vlgmr.msrb.gmra.mxu0 %v18859_v14  ;;  %v8177_v14 = vperm.slane %v18849_v11, 3  ;;  %v15826_v11 = vld [vmem:[#allocation7 + $0x2538] sm:$0xf0] }
 0x6fc   :  { %9944 = vmatpush.bf16.msra.mxu2 %v16049_v34  ;;  %9983 = vmatpush.bf16.msrb.mxu1 %v15925_v41  ;;  %v15829_v1 = vor.u32 %v17883_v47, %v15826_v11  ;;  %v17969_v34 = vld [vmem:[#allocation7 + $0x27d4] sm:$0xf0]  ;;  %v17935_v41 = vld [vmem:[#allocation7 + $0x26cc] sm:$0xf]  ;;  %v16178_v47 = vld [vmem:[#allocation7 + $0x27f8] sm:$0xf0] }
 0x6fd   :  { %9939 = vmatmul.bf16.vlgmr.msra.gmra.mxu1 %v18873_v45  ;;  %v8988_v43 = vadd.f32 %v18865_v19, %v8177_v14  ;;  %v16050_v19 = vld [vmem:[#allocation7 + $0x26f8] sm:$0xf0]  ;;  %v16161_v28 = vor.u32 %v17969_v34, %v16160_v32  ;;  %v15973_v14 = vor.u32 %v17919_v42, %v15970_v36  ;;  %v18004_v32 = vld [vmem:[#allocation7 + $0x28ec] sm:$0xf0]  ;;  %v16408_v36 = vld [vmem:[#allocation7 + $0x29c0] sm:$0xf] }
 0x6fe   :  { %v8976_v31 = vpop.f32.mrf.mxu3  ;;  %v16053_v0 = vor.u32 %v17939_v38, %v16050_v19  ;;  %v17955_v19 = vld [vmem:[#allocation7 + $0x276c] sm:$0xf]  ;;  %v17984_v42 = vld [vmem:[#allocation7 + $0x284c] sm:$0xf0] }
 0x6ff   :  { %v9015_v12 = vpop.f32.mrf.mxu2  ;;  %v9001_v22 = vadd.f32 %v18876_v37, %v8988_v43  ;;  %v15813_v37 = vor.u32 %v17879_v46, %v15810_v52  ;;  %v15938_v43 = vld [vmem:[#allocation7 + $0x2618] sm:$0xf0] }
 0x700   :  { %9945 = vmatpush.bf16.msra.mxu2 %v16033_v60  ;;  %9984 = vmatpush.bf16.msrb.mxu1 %v15909_v9  ;;  %v17931_v60 = vld [vmem:[#allocation7 + $0x26ac] sm:$0xf]  ;;  %v16018_v9 = vld [vmem:[#allocation7 + $0x26b8] sm:$0xf0] }
 0x701   :  { %v9014_v51 = vadd.f32 %v18884_v56, %v9001_v22  ;;  %v16034_v56 = vld [vmem:[#allocation7 + $0x26d8] sm:$0xf0]  ;;  %v16021_v31 = vor.u32 %v17931_v60, %v16018_v9  ;;  %v15941_v22 = vor.u32 %v17911_v2, %v15938_v43  ;;  %v17943_v60 = vld [vmem:[#allocation7 + $0x270c] sm:$0xf]  ;;  %v16184_v2 = vld [vmem:[#allocation7 + $0x2800] sm:$0xf] }
 0x702   :  { %v16037_v7 = vor.u32 %v17935_v41, %v16034_v56  ;;  %v16002_v12 = vld [vmem:[#allocation7 + $0x2698] sm:$0xf0]  ;;  %v16280_v56 = vld [vmem:[#allocation7 + $0x28c0] sm:$0xf]  ;;  %v17976_v43 = vld [vmem:[#allocation7 + $0x280c] sm:$0xf0] }
 0x703   :  { %v16146_v46 = vld [vmem:[#allocation7 + $0x27b8] sm:$0xf0] }
 0x704   :  { %9946 = vmatpush.bf16.msra.mxu2 %v16017_v25  ;;  %9985 = vmatpush.bf16.msrb.mxu1 %v15893_v33  ;;  %v16129_v25 = vor.u32 %v17961_v24, %v16128_v62  ;;  %v16005_v33 = vor.u32 %v17927_v55, %v16002_v12  ;;  %v16066_v9 = vld [vmem:[#allocation7 + $0x2718] sm:$0xf0]  ;;  %v16248_v62 = vld [vmem:[#allocation7 + $0x2880] sm:$0xf]  ;;  %v17992_v55 = vld [vmem:[#allocation7 + $0x288c] sm:$0xf0] }
 0x708   :  { %9947 = vmatpush.bf16.msra.mxu2 %v16001_v29  ;;  %9986 = vmatpush.bf16.msrb.mxu1 %v15877_v50  ;;  %v15989_v29 = vor.u32 %v17923_v4, %v15986_v27  ;;  %v16096_v50 = vld [vmem:[#allocation7 + $0x2748] sm:$0xf]  ;;  %v16424_v4 = vld [vmem:[#allocation7 + $0x29e0] sm:$0xf] }
 0x709   :  { %v16097_v5 = vor.u32 %v17953_v26, %v16096_v50  ;;  %v16216_v26 = vld [vmem:[#allocation7 + $0x2840] sm:$0xf] }
 0x70b   :  { %9900 = vmatmul.bf16.vlgmr.msrb.gmra.mxu2 %v18886_v48 }
 0x70c   :  { %9948 = vmatpush.bf16.msra.mxu2 %v15985_v30  ;;  %9987 = vmatpush.bf16.msrb.mxu1 %v15861_v35  ;;  %v16080_v30 = vld [vmem:[#allocation7 + $0x2728] sm:$0xf]  ;;  %v17949_v35 = vld [vmem:[#allocation7 + $0x2734] sm:$0xf0] }
 0x70d   :  { %v16081_v39 = vor.u32 %v17949_v35, %v16080_v30 }
 0x710   :  { %9949 = vmatpush.bf16.msra.mxu2 %v15969_v15  ;;  %9988 = vmatpush.bf16.msrb.mxu1 %v15845_v63  ;;  %v16064_v15 = vld [vmem:[#allocation7 + $0x2708] sm:$0xf]  ;;  %v17945_v63 = vld [vmem:[#allocation7 + $0x2714] sm:$0xf0] }
 0x711   :  { %v16065_v11 = vor.u32 %v17945_v63, %v16064_v15  ;;  %v18028_v15 = vld [vmem:[#allocation7 + $0x29ac] sm:$0xf0] }
 0x714   :  { %9950 = vmatpush.bf16.msra.mxu2 %v15953_v58  ;;  %9989 = vmatpush.bf16.msrb.mxu1 %v15829_v1  ;;  %v16181_v58 = vor.u32 %v17971_v16, %v16178_v47  ;;  %v17967_v1 = vld [vmem:[#allocation7 + $0x27cc] sm:$0xf]  ;;  %v16376_v16 = vld [vmem:[#allocation7 + $0x2980] sm:$0xf]  ;;  %v16185_v47 = vor.u32 %v17976_v43, %v16184_v2 }
 0x715   :  { %v16165_v57 = vor.u32 %v17967_v1, %v16162_v10  ;;  %v16472_v43 = vld [vmem:[#allocation7 + $0x2a40] sm:$0xf] }
 0x716   :  { %v9026_v40 = vpop.f32.mrf.mxu3 }
 0x717   :  { %v9027_v13 = vadd.f32 %v9026_v40, %v9014_v51  ;;  %v17963_v51 = vld [vmem:[#allocation7 + $0x27ac] sm:$0xf]  ;;  %v16130_v40 = vld [vmem:[#allocation7 + $0x2798] sm:$0xf0] }
 0x718   :  { %9951 = vmatpush.bf16.msra.mxu2 %v15937_v53  ;;  %9990 = vmatpush.bf16.msrb.mxu1 %v15813_v37  ;;  %v16149_v52 = vor.u32 %v17963_v51, %v16146_v46  ;;  %v16133_v38 = vor.u32 %v17959_v18, %v16130_v40  ;;  %v17951_v37 = vld [vmem:[#allocation7 + $0x274c] sm:$0xf]  ;;  %v16360_v51 = vld [vmem:[#allocation7 + $0x2960] sm:$0xf]  ;;  %v18020_v46 = vld [vmem:[#allocation7 + $0x296c] sm:$0xf0] }
 0x719   :  { %v18896_v54 = vpack.c.bf16 %v9027_v13, %v9027_v13  ;;  %v16114_v13 = vld [vmem:[#allocation7 + $0x2778] sm:$0xf0]  ;;  %v16361_v18 = vor.u32 %v18020_v46, %v16360_v51  ;;  %v18068_v40 = vld [vmem:[#allocation7 + $0x2aec] sm:$0xf0] }
 0x71a   :  { %v16117_v53 = vor.u32 %v17955_v19, %v16114_v13  ;;  %v16282_v19 = vld [vmem:[#allocation7 + $0x28d0] sm:$0xf0] }
 0x71b   :  { %9861 = vmatmul.bf16.vlgmr.msra.gmra.mxu3 %v18896_v54  ;;  %9991 = vmatmul.bf16.vlgmr.msrb.gmra.mxu1 %v18873_v45  ;;  %v16113_v45 = vor.u32 %v17957_v20, %v16112_v44  ;;  %v16232_v44 = vld [vmem:[#allocation7 + $0x2860] sm:$0xf]  ;;  %v17988_v20 = vld [vmem:[#allocation7 + $0x286c] sm:$0xf0] }
 0x71c   :  { %9957 = vmatpush.bf16.msra.mxu3 %v16177_v17  ;;  %9996 = vmatpush.bf16.msrb.mxu2 %v16053_v0  ;;  %v16098_v17 = vld [vmem:[#allocation7 + $0x2758] sm:$0xf0]  ;;  %v16296_v0 = vld [vmem:[#allocation7 + $0x28e0] sm:$0xf]  ;;  %v16233_v27 = vor.u32 %v17988_v20, %v16232_v44  ;;  %v18056_v20 = vld [vmem:[#allocation7 + $0x2a8c] sm:$0xf0] }
 0x71d   :  { %9952 = vmatmul.bf16.vlgmr.msra.gmra.mxu2 %v18886_v48  ;;  %v16297_v34 = vor.u32 %v18004_v32, %v16296_v0  ;;  %v16101_v41 = vor.u32 %v17951_v37, %v16098_v17  ;;  %v16344_v17 = vld [vmem:[#allocation7 + $0x2940] sm:$0xf]  ;;  %v18016_v0 = vld [vmem:[#allocation7 + $0x294c] sm:$0xf0] }
 0x71e   :  { %v9028_v3 = vpop.f32.mrf.mxu3  ;;  %v16536_v32 = vld [vmem:[#allocation7 + $0x2ac0] sm:$0xf] }
 0x71f   :  { %10806 = vmatpush.bf16.msra.mxu0 %v16297_v34  ;;  %v18064_v34 = vld [vmem:[#allocation7 + $0x2acc] sm:$0xf0]  ;;  %v16504_v44 = vld [vmem:[#allocation7 + $0x2a80] sm:$0xf] }
 0x720   :  { %9958 = vmatpush.bf16.msra.mxu3 %v16161_v28  ;;  %9997 = vmatpush.bf16.msrb.mxu2 %v16037_v7  ;;  %v18000_v28 = vld [vmem:[#allocation7 + $0x28cc] sm:$0xf0]  ;;  %v17947_v7 = vld [vmem:[#allocation7 + $0x272c] sm:$0xf] }
 0x721   :  { %v16281_v3 = vor.u32 %v18000_v28, %v16280_v56  ;;  %v16085_v21 = vor.u32 %v17947_v7, %v16082_v6  ;;  %v16345_v56 = vor.u32 %v18016_v0, %v16344_v17  ;;  %v16537_v28 = vor.u32 %v18064_v34, %v16536_v32  ;;  %v16378_v17 = vld [vmem:[#allocation7 + $0x2990] sm:$0xf0]  ;;  %v16440_v32 = vld [vmem:[#allocation7 + $0x2a00] sm:$0xf]  ;;  %v18040_v34 = vld [vmem:[#allocation7 + $0x2a0c] sm:$0xf0] }
 0x723   :  { %10807 = vmatpush.bf16.msra.mxu0 %v16281_v3  ;;  %v16328_v3 = vld [vmem:[#allocation7 + $0x2920] sm:$0xf] }
 0x724   :  { %9959 = vmatpush.bf16.msra.mxu3 %v16145_v49  ;;  %9998 = vmatpush.bf16.msrb.mxu2 %v16021_v31  ;;  %v16264_v49 = vld [vmem:[#allocation7 + $0x28a0] sm:$0xf]  ;;  %v17996_v31 = vld [vmem:[#allocation7 + $0x28ac] sm:$0xf0] }
 0x725   :  { %v16265_v24 = vor.u32 %v17996_v31, %v16264_v49  ;;  %v18060_v49 = vld [vmem:[#allocation7 + $0x2aac] sm:$0xf0]  ;;  %v17990_v31 = vld [vmem:[#allocation7 + $0x2884] sm:$0xf] }
 0x727   :  { %10808 = vmatpush.bf16.msra.mxu0 %v16265_v24 }
 0x728   :  { %9960 = vmatpush.bf16.msra.mxu3 %v16129_v25  ;;  %9999 = vmatpush.bf16.msrb.mxu2 %v16005_v33  ;;  %v16069_v25 = vor.u32 %v17943_v60, %v16066_v9  ;;  %v16249_v33 = vor.u32 %v17992_v55, %v16248_v62  ;;  %v16520_v60 = vld [vmem:[#allocation7 + $0x2aa0] sm:$0xf]  ;;  %v16250_v62 = vld [vmem:[#allocation7 + $0x2890] sm:$0xf0] }
 0x729   :  { %v16521_v24 = vor.u32 %v18060_v49, %v16520_v60  ;;  %v16253_v55 = vor.u32 %v17990_v31, %v16250_v62  ;;  %v18066_v60 = vld [vmem:[#allocation7 + $0x2ae4] sm:$0xf] }
 0x72b   :  { %9913 = vmatmul.bf16.vlgmr.msrb.gmra.mxu3 %v18896_v54  ;;  %10809 = vmatpush.bf16.msra.mxu0 %v16249_v33  ;;  %v18008_v33 = vld [vmem:[#allocation7 + $0x290c] sm:$0xf0] }
 0x72c   :  { %9961 = vmatpush.bf16.msra.mxu3 %v16113_v45  ;;  %10000 = vmatpush.bf16.msrb.mxu2 %v15989_v29  ;;  %v18036_v45 = vld [vmem:[#allocation7 + $0x29ec] sm:$0xf0] }
 0x72d   :  { %v16425_v29 = vor.u32 %v18036_v45, %v16424_v4  ;;  %v17986_v4 = vld [vmem:[#allocation7 + $0x2864] sm:$0xf] }
 0x72f   :  { %10810 = vmatpush.bf16.msra.mxu0 %v16233_v27  ;;  %10819 = vmatpush.bf16.msra.mxu1 %v16425_v29  ;;  %v16234_v27 = vld [vmem:[#allocation7 + $0x2870] sm:$0xf0]  ;;  %v16505_v29 = vor.u32 %v18056_v20, %v16504_v44  ;;  %v18014_v44 = vld [vmem:[#allocation7 + $0x2944] sm:$0xf] }
 0x730   :  { %9962 = vmatpush.bf16.msra.mxu3 %v16097_v5  ;;  %10001 = vmatpush.bf16.msrb.mxu2 %v15973_v14  ;;  %v16217_v5 = vor.u32 %v17984_v42, %v16216_v26  ;;  %v18032_v14 = vld [vmem:[#allocation7 + $0x29cc] sm:$0xf0]  ;;  %v16426_v26 = vld [vmem:[#allocation7 + $0x29f0] sm:$0xf0]  ;;  %v16237_v42 = vor.u32 %v17986_v4, %v16234_v27  ;;  %v18062_v4 = vld [vmem:[#allocation7 + $0x2ac4] sm:$0xf] }
 0x731   :  { %v16409_v30 = vor.u32 %v18032_v14, %v16408_v36  ;;  %v16488_v14 = vld [vmem:[#allocation7 + $0x2a60] sm:$0xf]  ;;  %v16346_v20 = vld [vmem:[#allocation7 + $0x2950] sm:$0xf0] }
 0x732   :  { %v16349_v27 = vor.u32 %v18014_v44, %v16346_v20  ;;  %v18072_v44 = vld [vmem:[#allocation7 + $0x2b0c] sm:$0xf0] }
 0x733   :  { %10811 = vmatpush.bf16.msra.mxu0 %v16217_v5  ;;  %10820 = vmatpush.bf16.msra.mxu1 %v16409_v30  ;;  %v18052_v30 = vld [vmem:[#allocation7 + $0x2a6c] sm:$0xf0] }
 0x734   :  { %9963 = vmatpush.bf16.msra.mxu3 %v16081_v39  ;;  %10002 = vmatpush.bf16.msrb.mxu2 %v15957_v59  ;;  %v16392_v39 = vld [vmem:[#allocation7 + $0x29a0] sm:$0xf]  ;;  %v16201_v59 = vor.u32 %v17980_v23, %v16200_v8  ;;  %v16489_v8 = vor.u32 %v18052_v30, %v16488_v14  ;;  %v17982_v23 = vld [vmem:[#allocation7 + $0x2844] sm:$0xf] }
 0x735   :  { %v16393_v63 = vor.u32 %v18028_v15, %v16392_v39  ;;  %v16218_v39 = vld [vmem:[#allocation7 + $0x2850] sm:$0xf0]  ;;  %v18058_v14 = vld [vmem:[#allocation7 + $0x2aa4] sm:$0xf] }
 0x736   :  { %v16221_v15 = vor.u32 %v17982_v23, %v16218_v39  ;;  %v16632_v39 = vld [vmem:[#allocation7 + $0x2b80] sm:$0xf] }
 0x737   :  { %10812 = vmatpush.bf16.msra.mxu0 %v16201_v59  ;;  %10821 = vmatpush.bf16.msra.mxu1 %v16393_v63  ;;  %v18030_v59 = vld [vmem:[#allocation7 + $0x29c4] sm:$0xf]  ;;  %v16410_v63 = vld [vmem:[#allocation7 + $0x29d0] sm:$0xf0] }
 0x738   :  { %9964 = vmatpush.bf16.msra.mxu3 %v16065_v11  ;;  %10003 = vmatpush.bf16.msrb.mxu2 %v15941_v22  ;;  %v18904_v61 = vpop.f32.mrf.mxu0  ;;  %v18024_v11 = vld [vmem:[#allocation7 + $0x298c] sm:$0xf0]  ;;  %v18002_v22 = vld [vmem:[#allocation7 + $0x28e4] sm:$0xf]  ;;  %v16413_v2 = vor.u32 %v18030_v59, %v16410_v63 }
 0x739   :  { %v16377_v1 = vor.u32 %v18024_v11, %v16376_v16  ;;  %v18048_v16 = vld [vmem:[#allocation7 + $0x2a4c] sm:$0xf0]  ;;  %v17978_v11 = vld [vmem:[#allocation7 + $0x2824] sm:$0xf] }
 0x73a   :  { %v18088_v59 = vld [vmem:[#allocation7 + $0x2b8c] sm:$0xf0] }
 0x73b   :  { %10004 = vmatmul.bf16.vlgmr.msrb.gmra.mxu2 %v18886_v48  ;;  %9965 = vmatmul.bf16.vlgmr.msra.gmra.mxu3 %v18896_v54  ;;  %v16633_v63 = vor.u32 %v18088_v59, %v16632_v39  ;;  %v16666_v39 = vld [vmem:[#allocation7 + $0x2bd0] sm:$0xf0] }
 0x73c   :  { %10009 = vmatpush.bf16.msrb.mxu3 %v16181_v58  ;;  %v16298_v58 = vld [vmem:[#allocation7 + $0x28f0] sm:$0xf0]  ;;  %10813 = vmatpush.bf16.msra.mxu0 %v16185_v47  ;;  %v16473_v47 = vor.u32 %v18048_v16, %v16472_v43  ;;  %v18054_v16 = vld [vmem:[#allocation7 + $0x2a84] sm:$0xf] }
 0x73d   :  { %v16301_v10 = vor.u32 %v18002_v22, %v16298_v58  ;;  %10822 = vmatpush.bf16.msra.mxu1 %v16377_v1  ;;  %v16202_v22 = vld [vmem:[#allocation7 + $0x2830] sm:$0xf0]  ;;  %v18026_v58 = vld [vmem:[#allocation7 + $0x29a4] sm:$0xf] }
 0x73e   :  { %v16205_v1 = vor.u32 %v17978_v11, %v16202_v22  ;;  %v16314_v43 = vld [vmem:[#allocation7 + $0x2910] sm:$0xf0] }
 0x73f   :  { %v16506_v22 = vld [vmem:[#allocation7 + $0x2a90] sm:$0xf0] }
 0x740   :  { %10010 = vmatpush.bf16.msrb.mxu3 %v16165_v57  ;;  %v9825_v48 = vpop.f32.mrf.mxu0  ;;  %10858 = vmatpush.bf16.msrb.mxu0 %v16301_v10  ;;  %v16394_v10 = vld [vmem:[#allocation7 + $0x29b0] sm:$0xf0] }
 0x741   :  { %v17994_v48 = vld [vmem:[#allocation7 + $0x28a4] sm:$0xf]  ;;  %10823 = vmatpush.bf16.msra.mxu1 %v16361_v18  ;;  %v16397_v46 = vor.u32 %v18026_v58, %v16394_v10  ;;  %v18044_v18 = vld [vmem:[#allocation7 + $0x2a2c] sm:$0xf0]  ;;  %v16509_v58 = vor.u32 %v18054_v16, %v16506_v22 }
 0x742   :  { %v18084_v10 = vld [vmem:[#allocation7 + $0x2b6c] sm:$0xf0]  ;;  %v18090_v22 = vld [vmem:[#allocation7 + $0x2ba4] sm:$0xf] }
 0x744   :  { %10011 = vmatpush.bf16.msrb.mxu3 %v16149_v52  ;;  %v16552_v52 = vld [vmem:[#allocation7 + $0x2ae0] sm:$0xf] }
 0x745   :  { %10824 = vmatpush.bf16.msra.mxu1 %v16345_v56  ;;  %v18100_v56 = vld [vmem:[#allocation7 + $0x2bec] sm:$0xf0] }
 0x748   :  { %10012 = vmatpush.bf16.msrb.mxu3 %v16133_v38  ;;  %v18906_v12 = vpop.f32.mrf.mxu0  ;;  %v17998_v38 = vld [vmem:[#allocation7 + $0x28c4] sm:$0xf] }
 0x749   :  { %v16285_v37 = vor.u32 %v17998_v38, %v16282_v19  ;;  %v17974_v19 = vld [vmem:[#allocation7 + $0x2804] sm:$0xf] }
 0x74b   :  { %10859 = vmatpush.bf16.msrb.mxu0 %v16285_v37 }
 0x74c   :  { %10013 = vmatpush.bf16.msrb.mxu3 %v16117_v53  ;;  %v16553_v53 = vor.u32 %v18068_v40, %v16552_v52  ;;  %v16456_v52 = vld [vmem:[#allocation7 + $0x2a20] sm:$0xf] }
 0x74d   :  { %v16457_v38 = vor.u32 %v18044_v18, %v16456_v52  ;;  %v18050_v18 = vld [vmem:[#allocation7 + $0x2a64] sm:$0xf] }
 0x74e   :  { %10832 = vmatpush.bf16.msra.mxu2 %v16553_v53  ;;  %v18022_v53 = vld [vmem:[#allocation7 + $0x2984] sm:$0xf] }
 0x74f   :  { %v16381_v0 = vor.u32 %v18022_v53, %v16378_v17  ;;  %v18080_v53 = vld [vmem:[#allocation7 + $0x2b4c] sm:$0xf0] }
 0x750   :  { %10014 = vmatpush.bf16.msrb.mxu3 %v16101_v41  ;;  %v9877_v50 = vpop.f32.mrf.mxu0  ;;  %v16266_v41 = vld [vmem:[#allocation7 + $0x28b0] sm:$0xf0] }
 0x751   :  { %v16269_v7 = vor.u32 %v17994_v48, %v16266_v41  ;;  %v18034_v50 = vld [vmem:[#allocation7 + $0x29e4] sm:$0xf]  ;;  %v16680_v48 = vld [vmem:[#allocation7 + $0x2be0] sm:$0xf]  ;;  %v16441_v41 = vor.u32 %v18040_v34, %v16440_v32  ;;  %v16474_v34 = vld [vmem:[#allocation7 + $0x2a50] sm:$0xf0] }
 0x752   :  { %10833 = vmatpush.bf16.msra.mxu2 %v16537_v28  ;;  %v16429_v36 = vor.u32 %v18034_v50, %v16426_v26  ;;  %v18018_v28 = vld [vmem:[#allocation7 + $0x2964] sm:$0xf]  ;;  %v16648_v50 = vld [vmem:[#allocation7 + $0x2ba0] sm:$0xf]  ;;  %v18092_v26 = vld [vmem:[#allocation7 + $0x2bac] sm:$0xf0] }
 0x753   :  { %10860 = vmatpush.bf16.msrb.mxu0 %v16269_v7  ;;  %v16362_v7 = vld [vmem:[#allocation7 + $0x2970] sm:$0xf0] }
 0x754   :  { %10015 = vmatpush.bf16.msrb.mxu3 %v16085_v21  ;;  %v18012_v21 = vld [vmem:[#allocation7 + $0x292c] sm:$0xf0] }
 0x755   :  { %v16329_v9 = vor.u32 %v18012_v21, %v16328_v3  ;;  %v16681_v3 = vor.u32 %v18100_v56, %v16680_v48  ;;  %v16365_v21 = vor.u32 %v18018_v28, %v16362_v7  ;;  %v16304_v28 = vld [vmem:[#allocation7 + $0x28e8] sm:$0xf]  ;;  %v16584_v7 = vld [vmem:[#allocation7 + $0x2b20] sm:$0xf] }
 0x756   :  { %10834 = vmatpush.bf16.msra.mxu2 %v16521_v24  ;;  %v16664_v24 = vld [vmem:[#allocation7 + $0x2bc0] sm:$0xf] }
 0x757   :  { %10825 = vmatpush.bf16.msra.mxu1 %v16329_v9  ;;  %10861 = vmatpush.bf16.msrb.mxu0 %v16253_v55  ;;  %v16554_v9 = vld [vmem:[#allocation7 + $0x2af0] sm:$0xf0]  ;;  %v18096_v55 = vld [vmem:[#allocation7 + $0x2bcc] sm:$0xf0] }
 0x758   :  { %10016 = vmatpush.bf16.msrb.mxu3 %v16069_v25  ;;  %v18909_v35 = vpop.f32.mrf.mxu1  ;;  %v16312_v25 = vld [vmem:[#allocation7 + $0x2900] sm:$0xf]  ;;  %v16557_v62 = vor.u32 %v18066_v60, %v16554_v9  ;;  %v18005_v60 = vld [vmem:[#allocation7 + $0x28f4] sm:$0xf0] }
 0x759   :  { %v16313_v45 = vor.u32 %v18008_v33, %v16312_v25  ;;  %v16665_v33 = vor.u32 %v18096_v55, %v16664_v24  ;;  %v16288_v55 = vld [vmem:[#allocation7 + $0x28c8] sm:$0xf] }
 0x75a   :  { %10835 = vmatpush.bf16.msra.mxu2 %v16505_v29 }
 0x75b   :  { %10017 = vmatmul.bf16.vlgmr.msrb.gmra.mxu3 %v18896_v54  ;;  %v18911_v54 = vpop.f32.mrf.mxu0  ;;  %10826 = vmatpush.bf16.msra.mxu1 %v16313_v45  ;;  %v16538_v45 = vld [vmem:[#allocation7 + $0x2ad0] sm:$0xf0] }
 0x75c   :  { %10862 = vmatpush.bf16.msrb.mxu0 %v16237_v42  ;;  %10845 = vmatpush.bf16.msra.mxu3 %v16681_v3  ;;  %v16541_v29 = vor.u32 %v18062_v4, %v16538_v45  ;;  %v16649_v42 = vor.u32 %v18092_v26, %v16648_v50  ;;  %v18076_v3 = vld [vmem:[#allocation7 + $0x2b2c] sm:$0xf0]  ;;  %v18098_v45 = vld [vmem:[#allocation7 + $0x2be4] sm:$0xf]  ;;  %v16682_v26 = vld [vmem:[#allocation7 + $0x2bf0] sm:$0xf0] }
 0x75d   :  { %v16585_v9 = vor.u32 %v18076_v3, %v16584_v7  ;;  %v18033_v3 = vld [vmem:[#allocation7 + $0x29d4] sm:$0xf0] }
 0x75e   :  { %10836 = vmatpush.bf16.msra.mxu2 %v16489_v8  ;;  %v16522_v8 = vld [vmem:[#allocation7 + $0x2ab0] sm:$0xf0] }
 0x75f   :  { %10871 = vmatpush.bf16.msrb.mxu1 %v16429_v36  ;;  %v18010_v36 = vld [vmem:[#allocation7 + $0x2924] sm:$0xf]  ;;  %v16525_v23 = vor.u32 %v18058_v14, %v16522_v8  ;;  %v17997_v8 = vld [vmem:[#allocation7 + $0x28b4] sm:$0xf0] }
 0x760   :  { %v9838_v57 = vpop.f32.mrf.mxu1  ;;  %10863 = vmatpush.bf16.msrb.mxu0 %v16221_v15  ;;  %10846 = vmatpush.bf16.msra.mxu3 %v16665_v33  ;;  %v18001_v33 = vld [vmem:[#allocation7 + $0x28d4] sm:$0xf0] }
 0x761   :  { %v16289_v14 = vor.u32 %v18001_v33, %v16288_v55  ;;  %v18078_v55 = vld [vmem:[#allocation7 + $0x2b44] sm:$0xf] }
 0x762   :  { %10837 = vmatpush.bf16.msra.mxu2 %v16473_v47  ;;  %v18923_v47 = vld [vmem:[#allocation8 + $0x24] sm:$0xf] }
 0x763   :  { %v9929_v13 = vpop.f32.mrf.mxu0  ;;  %10872 = vmatpush.bf16.msrb.mxu1 %v16413_v2  ;;  %v18006_v2 = vld [vmem:[#allocation7 + $0x2904] sm:$0xf]  ;;  %v9168_v33 = vperm.slane %v18923_v47, 2 }
 0x764   :  { %10864 = vmatpush.bf16.msrb.mxu0 %v16205_v1  ;;  %v16186_v13 = vld [vmem:[#allocation7 + $0x2810] sm:$0xf0]  ;;  %10847 = vmatpush.bf16.msra.mxu3 %v16649_v42  ;;  %v16317_v11 = vor.u32 %v18006_v2, %v16314_v43  ;;  %v16616_v1 = vld [vmem:[#allocation7 + $0x2b60] sm:$0xf]  ;;  %v16685_v42 = vor.u32 %v18098_v45, %v16682_v26  ;;  %v16256_v43 = vld [vmem:[#allocation7 + $0x2888] sm:$0xf] }
 0x765   :  { %v16189_v37 = vor.u32 %v17974_v19, %v16186_v13  ;;  %v16617_v52 = vor.u32 %v18084_v10, %v16616_v1  ;;  %v16600_v13 = vld [vmem:[#allocation7 + $0x2b40] sm:$0xf]  ;;  %v17977_v45 = vld [vmem:[#allocation7 + $0x2814] sm:$0xf0] }
 0x766   :  { %10838 = vmatpush.bf16.msra.mxu2 %v16457_v38  ;;  %v16490_v38 = vld [vmem:[#allocation7 + $0x2a70] sm:$0xf0]  ;;  %v16601_v32 = vor.u32 %v18080_v53, %v16600_v13  ;;  %v18037_v53 = vld [vmem:[#allocation7 + $0x29f4] sm:$0xf0] }
 0x767   :  { %10873 = vmatpush.bf16.msrb.mxu1 %v16397_v46  ;;  %v9166_v46 = vperm.slane %v18923_v47, 0  ;;  %v16493_v19 = vor.u32 %v18050_v18, %v16490_v38  ;;  %v16240_v18 = vld [vmem:[#allocation7 + $0x2868] sm:$0xf]  ;;  %v17989_v38 = vld [vmem:[#allocation7 + $0x2874] sm:$0xf0] }
 0x768   :  { %v18913_v6 = vpop.f32.mrf.mxu1  ;;  %10865 = vmatpush.bf16.msrb.mxu0 %v16189_v37  ;;  %10848 = vmatpush.bf16.msra.mxu3 %v16633_v63  ;;  %v18046_v37 = vld [vmem:[#allocation7 + $0x2a44] sm:$0xf]  ;;  %v18025_v26 = vld [vmem:[#allocation7 + $0x2994] sm:$0xf0] }
 0x769   :  { %v9824_v17 = vadd.f32 %v18904_v61, %v9166_v46  ;;  %v16477_v48 = vor.u32 %v18046_v37, %v16474_v34  ;;  %v16458_v61 = vld [vmem:[#allocation7 + $0x2a30] sm:$0xf0]  ;;  %v18086_v37 = vld [vmem:[#allocation7 + $0x2b84] sm:$0xf]  ;;  %v16241_v34 = vor.u32 %v17989_v38, %v16240_v18 }
 0x76a   :  { %10839 = vmatpush.bf16.msra.mxu2 %v16441_v41 }
 0x76b   :  { %10874 = vmatpush.bf16.msrb.mxu1 %v16381_v0  ;;  %v9837_v41 = vadd.f32 %v18909_v35, %v9824_v17  ;;  %v16568_v35 = vld [vmem:[#allocation7 + $0x2b00] sm:$0xf]  ;;  %v16634_v17 = vld [vmem:[#allocation7 + $0x2b90] sm:$0xf0] }
 0x76c   :  { %10849 = vmatpush.bf16.msra.mxu3 %v16617_v52  ;;  %v16569_v4 = vor.u32 %v18072_v44, %v16568_v35 }
 0x76e   :  { %10884 = vmatpush.bf16.msrb.mxu2 %v16557_v62 }
 0x76f   :  { %10875 = vmatpush.bf16.msrb.mxu1 %v16365_v21 }
 0x770   :  { %v9890_v5 = vpop.f32.mrf.mxu1  ;;  %10850 = vmatpush.bf16.msra.mxu3 %v16601_v32 }
 0x771   :  { %v16330_v5 = vld [vmem:[#allocation7 + $0x2930] sm:$0xf0] }
 0x772   :  { %10885 = vmatpush.bf16.msrb.mxu2 %v16541_v29  ;;  %v16333_v30 = vor.u32 %v18010_v36, %v16330_v5  ;;  %v9167_v36 = vperm.slane %v18923_v47, 1 }
 0x773   :  { %10876 = vmatpush.bf16.msrb.mxu1 %v16349_v27  ;;  %v18038_v27 = vld [vmem:[#allocation7 + $0x2a04] sm:$0xf] }
 0x774   :  { %10851 = vmatpush.bf16.msra.mxu3 %v16585_v9  ;;  %v9876_v16 = vadd.f32 %v18906_v12, %v9167_v36  ;;  %v16586_v36 = vld [vmem:[#allocation7 + $0x2b30] sm:$0xf0] }
 0x776   :  { %10886 = vmatpush.bf16.msrb.mxu2 %v16525_v23  ;;  %v18094_v23 = vld [vmem:[#allocation7 + $0x2bc4] sm:$0xf]  ;;  %v9889_v46 = vadd.f32 %v18913_v6, %v9876_v16  ;;  %v16416_v6 = vld [vmem:[#allocation7 + $0x29c8] sm:$0xf] }
 0x777   :  { %10877 = vmatpush.bf16.msrb.mxu1 %v16333_v30  ;;  %v16272_v30 = vld [vmem:[#allocation7 + $0x28a8] sm:$0xf]  ;;  %v16669_v63 = vor.u32 %v18094_v23, %v16666_v39 }
 0x778   :  { %v18915_v57 = vpop.f32.mrf.mxu0  ;;  %10852 = vmatpush.bf16.msra.mxu3 %v16569_v4  ;;  %v16273_v2 = vor.u32 %v17997_v8, %v16272_v30  ;;  %v16306_v30 = vld [vmem:[#allocation7 + $0x28f8] sm:$0xf0]  ;;  %v16560_v16 = vld [vmem:[#allocation7 + $0x2ae8] sm:$0xf] }
 0x77a   :  { %v18917_v51 = vpop.f32.mrf.mxu1  ;;  %10887 = vmatpush.bf16.msrb.mxu2 %v16509_v58  ;;  %v16650_v58 = vld [vmem:[#allocation7 + $0x2bb0] sm:$0xf0] }
 0x77b   :  { %10878 = vmatpush.bf16.msrb.mxu1 %v16317_v11  ;;  %v17993_v11 = vld [vmem:[#allocation7 + $0x2894] sm:$0xf0]  ;;  %v16653_v10 = vor.u32 %v18090_v22, %v16650_v58  ;;  %v16570_v22 = vld [vmem:[#allocation7 + $0x2b10] sm:$0xf0] }
 0x77c   :  { %10897 = vmatpush.bf16.msrb.mxu3 %v16685_v42  ;;  %v16257_v52 = vor.u32 %v17993_v11, %v16256_v43  ;;  %v18074_v42 = vld [vmem:[#allocation7 + $0x2b24] sm:$0xf] }
 0x77d   :  { %v16589_v8 = vor.u32 %v18074_v42, %v16586_v36  ;;  %v18070_v11 = vld [vmem:[#allocation7 + $0x2b04] sm:$0xf]  ;;  %v18053_v36 = vld [vmem:[#allocation7 + $0x2a74] sm:$0xf0] }
 0x77e   :  { %v18919_v40 = vpop.f32.mrf.mxu2  ;;  %10888 = vmatpush.bf16.msrb.mxu2 %v16493_v19  ;;  %v16432_v19 = vld [vmem:[#allocation7 + $0x29e8] sm:$0xf] }
 0x77f   :  { %v9850_v21 = vadd.f32 %v18919_v40, %v9837_v41  ;;  %v16442_v40 = vld [vmem:[#allocation7 + $0x2a10] sm:$0xf0]  ;;  %v16224_v41 = vld [vmem:[#allocation7 + $0x2848] sm:$0xf] }
 0x780   :  { %v9981_v49 = vpop.f32.mrf.mxu0  ;;  %v16445_v50 = vor.u32 %v18038_v27, %v16442_v40  ;;  %10898 = vmatpush.bf16.msrb.mxu3 %v16669_v63  ;;  %v16192_v40 = vld [vmem:[#allocation7 + $0x2808] sm:$0xf] }
 0x781   :  { %v18042_v49 = vld [vmem:[#allocation7 + $0x2a24] sm:$0xf]  ;;  %v16193_v39 = vor.u32 %v17977_v45, %v16192_v40  ;;  %v16368_v63 = vld [vmem:[#allocation7 + $0x2968] sm:$0xf] }
 0x782   :  { %v9942_v31 = vpop.f32.mrf.mxu1  ;;  %10889 = vmatpush.bf16.msrb.mxu2 %v16477_v48  ;;  %v16461_v62 = vor.u32 %v18042_v49, %v16458_v61  ;;  %v16433_v48 = vor.u32 %v18037_v53, %v16432_v19  ;;  %v16417_v49 = vor.u32 %v18033_v3, %v16416_v6  ;;  %v16208_v61 = vld [vmem:[#allocation7 + $0x2828] sm:$0xf]  ;;  %v18013_v6 = vld [vmem:[#allocation7 + $0x2934] sm:$0xf0] }
 0x783   :  { %v16352_v53 = vld [vmem:[#allocation7 + $0x2948] sm:$0xf] }
 0x784   :  { %10899 = vmatpush.bf16.msrb.mxu3 %v16653_v10  ;;  %v16290_v10 = vld [vmem:[#allocation7 + $0x28d8] sm:$0xf0]  ;;  %v16528_v3 = vld [vmem:[#allocation7 + $0x2aa8] sm:$0xf] }
 0x786   :  { %v9851_v25 = vpop.f32.mrf.mxu2  ;;  %10890 = vmatpush.bf16.msrb.mxu2 %v16461_v62  ;;  %v16400_v62 = vld [vmem:[#allocation7 + $0x29a8] sm:$0xf] }
 0x787   :  { %v16305_v25 = vor.u32 %v18005_v60, %v16304_v28  ;;  %v17985_v28 = vld [vmem:[#allocation7 + $0x2854] sm:$0xf0]  ;;  %v16618_v60 = vld [vmem:[#allocation7 + $0x2b70] sm:$0xf0] }
 0x788   :  { %v16225_v9 = vor.u32 %v17985_v28, %v16224_v41  ;;  %v16336_v28 = vld [vmem:[#allocation7 + $0x2928] sm:$0xf] }
 0x78a   :  { %10891 = vmatpush.bf16.msrb.mxu2 %v16445_v50  ;;  %v16384_v50 = vld [vmem:[#allocation7 + $0x2988] sm:$0xf] }
 0x78e   :  { %v18921_v15 = vpop.f32.mrf.mxu2 }
 0x78f   :  { %v9902_v13 = vadd.f32 %v18921_v15, %v9889_v46  ;;  %v16573_v46 = vor.u32 %v18070_v11, %v16570_v22  ;;  %v9169_v11 = vperm.slane %v18923_v47, 3  ;;  %v18027_v22 = vld [vmem:[#allocation7 + $0x29ac] sm:$0xf]  ;;  %v16386_v47 = vld [vmem:[#allocation7 + $0x2998] sm:$0xf0] }
 0x796   :  { %v9903_v0 = vpop.f32.mrf.mxu2 }
 0x797   :  { %v16637_v0 = vor.u32 %v18086_v37, %v16634_v17  ;;  %v18017_v37 = vld [vmem:[#allocation7 + $0x2954] sm:$0xf0]  ;;  %v16544_v17 = vld [vmem:[#allocation7 + $0x2ac8] sm:$0xf] }
 0x798   :  { %v18928_v56 = vpop.f32.mrf.mxu1 }
 0x799   :  { %10900 = vmatpush.bf16.msrb.mxu3 %v16637_v0  ;;  %v17995_v0 = vld [vmem:[#allocation7 + $0x28ac] sm:$0xf] }
 0x79e   :  { %v9862_v31 = vpop.f32.mrf.mxu3 }
 0x79f   :  { %v9863_v24 = vadd.f32 %v9862_v31, %v9850_v21  ;;  %v18082_v21 = vld [vmem:[#allocation7 + $0x2b64] sm:$0xf]  ;;  %v17981_v31 = vld [vmem:[#allocation7 + $0x2834] sm:$0xf0] }
 0x7a0   :  { %v18933_v29 = vpop.f32.mrf.mxu2  ;;  %v9994_v5 = vpop.f32.mrf.mxu1  ;;  %v16621_v15 = vor.u32 %v18082_v21, %v16618_v60  ;;  %v16209_v4 = vor.u32 %v17981_v31, %v16208_v61  ;;  %v18061_v21 = vld [vmem:[#allocation7 + $0x2ab4] sm:$0xf0]  ;;  %v17991_v60 = vld [vmem:[#allocation7 + $0x288c] sm:$0xf]  ;;  %v16337_v61 = vor.u32 %v18013_v6, %v16336_v28  ;;  %v16370_v6 = vld [vmem:[#allocation7 + $0x2978] sm:$0xf0] }
 0x7a1   :  { %v18931_v20 = vpack.c.bf16 %v9863_v24, %v9863_v24  ;;  %v18029_v24 = vld [vmem:[#allocation7 + $0x29b4] sm:$0xf0]  ;;  %v9928_v5 = vadd.f32 %v18911_v54, %v9168_v33  ;;  %v17999_v54 = vld [vmem:[#allocation7 + $0x28cc] sm:$0xf]  ;;  %v16529_v31 = vor.u32 %v18061_v21, %v16528_v3  ;;  %v16562_v21 = vld [vmem:[#allocation7 + $0x2af8] sm:$0xf0] }
 0x7a2   :  { %10901 = vmatpush.bf16.msrb.mxu3 %v16621_v15  ;;  %v16401_v27 = vor.u32 %v18029_v24, %v16400_v62  ;;  %v16258_v15 = vld [vmem:[#allocation7 + $0x2898] sm:$0xf0]  ;;  %v16320_v24 = vld [vmem:[#allocation7 + $0x2908] sm:$0xf]  ;;  %v18057_v33 = vld [vmem:[#allocation7 + $0x2a94] sm:$0xf0] }
 0x7a3   :  { %10814 = vmatmul.bf16.vlgmr.msra.gmra.mxu0 %v18931_v20  ;;  %v9941_v23 = vadd.f32 %v18917_v51, %v9928_v5  ;;  %v16261_v62 = vor.u32 %v17991_v60, %v16258_v15  ;;  %v17983_v5 = vld [vmem:[#allocation7 + $0x284c] sm:$0xf] }
 0x7a4   :  { %10910 = vmatpush.bf16.msra.mxu0 %v16305_v25  ;;  %v16602_v25 = vld [vmem:[#allocation7 + $0x2b50] sm:$0xf0]  ;;  %v18019_v28 = vld [vmem:[#allocation7 + $0x296c] sm:$0xf] }
 0x7a5   :  { %v16605_v44 = vor.u32 %v18078_v55, %v16602_v25  ;;  %v9954_v58 = vadd.f32 %v18933_v29, %v9941_v23  ;;  %v18065_v29 = vld [vmem:[#allocation7 + $0x2ad4] sm:$0xf0]  ;;  %v16512_v25 = vld [vmem:[#allocation7 + $0x2a88] sm:$0xf] }
 0x7a6   :  { %v9864_v59 = vpop.f32.mrf.mxu3  ;;  %v18009_v55 = vld [vmem:[#allocation7 + $0x2914] sm:$0xf0]  ;;  %v16513_v45 = vor.u32 %v18057_v33, %v16512_v25  ;;  %v16546_v25 = vld [vmem:[#allocation7 + $0x2ad8] sm:$0xf0] }
 0x7a7   :  { %10902 = vmatpush.bf16.msrb.mxu3 %v16605_v44  ;;  %v16385_v59 = vor.u32 %v18025_v26, %v16384_v50  ;;  %v16242_v44 = vld [vmem:[#allocation7 + $0x2878] sm:$0xf0]  ;;  %v16321_v40 = vor.u32 %v18009_v55, %v16320_v24  ;;  %v16496_v26 = vld [vmem:[#allocation7 + $0x2a68] sm:$0xf]  ;;  %v18015_v24 = vld [vmem:[#allocation7 + $0x294c] sm:$0xf] }
 0x7a8   :  { %10911 = vmatpush.bf16.msra.mxu0 %v16289_v14  ;;  %v9955_v1 = vpop.f32.mrf.mxu2  ;;  %v18003_v14 = vld [vmem:[#allocation7 + $0x28ec] sm:$0xf]  ;;  %v16497_v23 = vor.u32 %v18053_v36, %v16496_v26 }
 0x7a9   :  { %v16309_v43 = vor.u32 %v18003_v14, %v16306_v30  ;;  %v18069_v1 = vld [vmem:[#allocation7 + $0x2af4] sm:$0xf0]  ;;  %v16226_v14 = vld [vmem:[#allocation7 + $0x2858] sm:$0xf0]  ;;  %v18031_v30 = vld [vmem:[#allocation7 + $0x29cc] sm:$0xf] }
 0x7aa   :  { %v16561_v19 = vor.u32 %v18069_v1, %v16560_v16  ;;  %v16210_v16 = vld [vmem:[#allocation7 + $0x2838] sm:$0xf0]  ;;  %v18063_v55 = vld [vmem:[#allocation7 + $0x2acc] sm:$0xf] }
 0x7ab   :  { %10903 = vmatpush.bf16.msrb.mxu3 %v16589_v8  ;;  %v16418_v8 = vld [vmem:[#allocation7 + $0x29d8] sm:$0xf0]  ;;  %v18059_v26 = vld [vmem:[#allocation7 + $0x2aac] sm:$0xf] }
 0x7ac   :  { %10912 = vmatpush.bf16.msra.mxu0 %v16273_v2  ;;  %v18021_v2 = vld [vmem:[#allocation7 + $0x2974] sm:$0xf0] }
 0x7ad   :  { %v16369_v38 = vor.u32 %v18021_v2, %v16368_v63  ;;  %v16421_v63 = vor.u32 %v18031_v30, %v16418_v8  ;;  %v18049_v2 = vld [vmem:[#allocation7 + $0x2a54] sm:$0xf0]  ;;  %v18007_v8 = vld [vmem:[#allocation7 + $0x290c] sm:$0xf] }
 0x7ae   :  { %v9914_v12 = vpop.f32.mrf.mxu3  ;;  %v18089_v30 = vld [vmem:[#allocation7 + $0x2b94] sm:$0xf0] }
 0x7af   :  { %v9915_v32 = vadd.f32 %v9914_v12, %v9902_v13  ;;  %v16293_v13 = vor.u32 %v17999_v54, %v16290_v10  ;;  %10904 = vmatpush.bf16.msrb.mxu3 %v16573_v46  ;;  %v16464_v10 = vld [vmem:[#allocation7 + $0x2a28] sm:$0xf] }
 0x7b0   :  { %10913 = vmatpush.bf16.msra.mxu0 %v16257_v52 }
 0x7b1   :  { %v18940_v7 = vpack.c.bf16 %v9915_v32, %v9915_v32  ;;  %v16274_v32 = vld [vmem:[#allocation7 + $0x28b8] sm:$0xf0] }
 0x7b2   :  { %v16277_v41 = vor.u32 %v17995_v0, %v16274_v32  ;;  %v16448_v0 = vld [vmem:[#allocation7 + $0x2a08] sm:$0xf]  ;;  %v18041_v32 = vld [vmem:[#allocation7 + $0x2a14] sm:$0xf0] }
 0x7b3   :  { %10827 = vmatmul.bf16.vlgmr.msra.gmra.mxu1 %v18940_v7  ;;  %10866 = vmatmul.bf16.vlgmr.msrb.gmra.mxu0 %v18931_v20 }
 0x7b4   :  { %10914 = vmatpush.bf16.msra.mxu0 %v16241_v34  ;;  %10923 = vmatpush.bf16.msra.mxu1 %v16433_v48  ;;  %v16353_v34 = vor.u32 %v18017_v37, %v16352_v53  ;;  %v16545_v48 = vor.u32 %v18065_v29, %v16544_v17 }
 0x7b6   :  { %v9916_v35 = vpop.f32.mrf.mxu3 }
 0x7b7   :  { %v17987_v35 = vld [vmem:[#allocation7 + $0x286c] sm:$0xf] }
 0x7b8   :  { %10915 = vmatpush.bf16.msra.mxu0 %v16225_v9  ;;  %10924 = vmatpush.bf16.msra.mxu1 %v16417_v49  ;;  %v16245_v50 = vor.u32 %v17987_v35, %v16242_v44  ;;  %v16656_v44 = vld [vmem:[#allocation7 + $0x2ba8] sm:$0xf] }
 0x7bc   :  { %10916 = vmatpush.bf16.msra.mxu0 %v16209_v4  ;;  %10925 = vmatpush.bf16.msra.mxu1 %v16401_v27  ;;  %v18035_v4 = vld [vmem:[#allocation7 + $0x29ec] sm:$0xf]  ;;  %v16434_v27 = vld [vmem:[#allocation7 + $0x29f8] sm:$0xf0] }
 0x7bd   :  { %v16437_v42 = vor.u32 %v18035_v4, %v16434_v27  ;;  %v16549_v4 = vor.u32 %v18063_v55, %v16546_v25  ;;  %v18093_v27 = vld [vmem:[#allocation7 + $0x2bb4] sm:$0xf0]  ;;  %v18079_v25 = vld [vmem:[#allocation7 + $0x2b4c] sm:$0xf] }
 0x7be   :  { %v18948_v52 = vpop.f32.mrf.mxu2  ;;  %v9966_v51 = vpop.f32.mrf.mxu3 }
 0x7bf   :  { %v9967_v18 = vadd.f32 %v9966_v51, %v9954_v58  ;;  %v16402_v58 = vld [vmem:[#allocation7 + $0x29b8] sm:$0xf0]  ;;  %v18045_v51 = vld [vmem:[#allocation7 + $0x2a34] sm:$0xf0] }
 0x7c0   :  { %10917 = vmatpush.bf16.msra.mxu0 %v16193_v39  ;;  %10926 = vmatpush.bf16.msra.mxu1 %v16385_v59  ;;  %v16229_v39 = vor.u32 %v17983_v5, %v16226_v14  ;;  %v16480_v59 = vld [vmem:[#allocation7 + $0x2a48] sm:$0xf]  ;;  %v16405_v46 = vor.u32 %v18027_v22, %v16402_v58  ;;  %v16465_v37 = vor.u32 %v18045_v51, %v16464_v10  ;;  %v18051_v22 = vld [vmem:[#allocation7 + $0x2a6c] sm:$0xf]  ;;  %v16498_v58 = vld [vmem:[#allocation7 + $0x2a78] sm:$0xf0] }
 0x7c1   :  { %v18950_v12 = vpack.c.bf16 %v9967_v18, %v9967_v18  ;;  %v16481_v1 = vor.u32 %v18049_v2, %v16480_v59  ;;  %v17975_v18 = vld [vmem:[#allocation7 + $0x280c] sm:$0xf]  ;;  %v16640_v5 = vld [vmem:[#allocation7 + $0x2b88] sm:$0xf]  ;;  %v16514_v59 = vld [vmem:[#allocation7 + $0x2a98] sm:$0xf0] }
 0x7c2   :  { %v16608_v10 = vld [vmem:[#allocation7 + $0x2b48] sm:$0xf]  ;;  %v18047_v51 = vld [vmem:[#allocation7 + $0x2a4c] sm:$0xf] }
 0x7c3   :  { %10879 = vmatmul.bf16.vlgmr.msrb.gmra.mxu1 %v18940_v7  ;;  %10918 = vmatmul.bf16.vlgmr.msra.gmra.mxu0 %v18931_v20 }
 0x7c4   :  { %10962 = vmatpush.bf16.msrb.mxu0 %v16309_v43  ;;  %10840 = vmatmul.bf16.vlgmr.msra.gmra.mxu2 %v18950_v12  ;;  %v17979_v43 = vld [vmem:[#allocation7 + $0x282c] sm:$0xf] }
 0x7c5   :  { %10927 = vmatpush.bf16.msra.mxu1 %v16369_v38  ;;  %10936 = vmatpush.bf16.msra.mxu2 %v16561_v19  ;;  %v16213_v54 = vor.u32 %v17979_v43, %v16210_v16  ;;  %v16194_v38 = vld [vmem:[#allocation7 + $0x2818] sm:$0xf0]  ;;  %v9980_v19 = vadd.f32 %v18915_v57, %v9169_v11  ;;  %v18067_v57 = vld [vmem:[#allocation7 + $0x2aec] sm:$0xf]  ;;  %v16624_v16 = vld [vmem:[#allocation7 + $0x2b68] sm:$0xf] }
 0x7c6   :  { %v10007_v9 = vpop.f32.mrf.mxu2  ;;  %v9968_v49 = vpop.f32.mrf.mxu3  ;;  %v16197_v17 = vor.u32 %v17975_v18, %v16194_v38  ;;  %v18085_v11 = vld [vmem:[#allocation7 + $0x2b74] sm:$0xf0]  ;;  %v16482_v18 = vld [vmem:[#allocation7 + $0x2a58] sm:$0xf0] }
 0x7c7   :  { %v9993_v53 = vadd.f32 %v18928_v56, %v9980_v19  ;;  %v16449_v56 = vor.u32 %v18041_v32, %v16448_v0  ;;  %v16373_v9 = vor.u32 %v18019_v28, %v16370_v6  ;;  %v16672_v49 = vld [vmem:[#allocation7 + $0x2bc8] sm:$0xf]  ;;  %v16485_v19 = vor.u32 %v18047_v51, %v16482_v18  ;;  %v18073_v32 = vld [vmem:[#allocation7 + $0x2b14] sm:$0xf0]  ;;  %v16690_v28 = vld [vmem:[#allocation7 + $0x2bf8] sm:$0xf0] }
 0x7c8   :  { %10963 = vmatpush.bf16.msrb.mxu0 %v16293_v13  ;;  %v18023_v13 = vld [vmem:[#allocation7 + $0x298c] sm:$0xf]  ;;  %v16576_v0 = vld [vmem:[#allocation7 + $0x2b08] sm:$0xf] }
 0x7c9   :  { %10928 = vmatpush.bf16.msra.mxu1 %v16353_v34  ;;  %10937 = vmatpush.bf16.msra.mxu2 %v16545_v48  ;;  %v16389_v29 = vor.u32 %v18023_v13, %v16386_v47  ;;  %v16688_v34 = vld [vmem:[#allocation7 + $0x2be8] sm:$0xf]  ;;  %v10006_v48 = vadd.f32 %v18948_v52, %v9993_v53  ;;  %v16354_v52 = vld [vmem:[#allocation7 + $0x2958] sm:$0xf0]  ;;  %v18077_v47 = vld [vmem:[#allocation7 + $0x2b34] sm:$0xf0] }
 0x7ca   :  { %v16357_v35 = vor.u32 %v18015_v24, %v16354_v52  ;;  %v16592_v13 = vld [vmem:[#allocation7 + $0x2b28] sm:$0xf]  ;;  %v18043_v53 = vld [vmem:[#allocation7 + $0x2a2c] sm:$0xf]  ;;  %v16626_v52 = vld [vmem:[#allocation7 + $0x2b78] sm:$0xf0] }
 0x7cb   :  { %v18083_v24 = vld [vmem:[#allocation7 + $0x2b6c] sm:$0xf] }
 0x7cc   :  { %10964 = vmatpush.bf16.msrb.mxu0 %v16277_v41  ;;  %v18101_v41 = vld [vmem:[#allocation7 + $0x2bf4] sm:$0xf0]  ;;  %v16629_v55 = vor.u32 %v18083_v24, %v16626_v52 }
 0x7cd   :  { %10929 = vmatpush.bf16.msra.mxu1 %v16337_v61  ;;  %10938 = vmatpush.bf16.msra.mxu2 %v16529_v31  ;;  %v16689_v15 = vor.u32 %v18101_v41, %v16688_v34  ;;  %v16565_v31 = vor.u32 %v18067_v57, %v16562_v21  ;;  %v18039_v34 = vld [vmem:[#allocation7 + $0x2a0c] sm:$0xf]  ;;  %v16674_v21 = vld [vmem:[#allocation7 + $0x2bd8] sm:$0xf0] }
 0x7ce   :  { %v18099_v41 = vld [vmem:[#allocation7 + $0x2bec] sm:$0xf] }
 0x7cf   :  { %v18095_v57 = vld [vmem:[#allocation7 + $0x2bcc] sm:$0xf] }
 0x7d0   :  { %10965 = vmatpush.bf16.msrb.mxu0 %v16261_v62  ;;  %v18097_v62 = vld [vmem:[#allocation7 + $0x2bd4] sm:$0xf0] }
 0x7d1   :  { %10930 = vmatpush.bf16.msra.mxu1 %v16321_v40  ;;  %10939 = vmatpush.bf16.msra.mxu2 %v16513_v45  ;;  %v16673_v33 = vor.u32 %v18097_v62, %v16672_v49  ;;  %v18011_v40 = vld [vmem:[#allocation7 + $0x292c] sm:$0xf]  ;;  %v16338_v45 = vld [vmem:[#allocation7 + $0x2938] sm:$0xf0] }
 0x7d2   :  { %v16341_v36 = vor.u32 %v18011_v40, %v16338_v45  ;;  %v18087_v49 = vld [vmem:[#allocation7 + $0x2b8c] sm:$0xf] }
 0x7d3   :  { %v18071_v40 = vld [vmem:[#allocation7 + $0x2b0c] sm:$0xf] }
 0x7d4   :  { %10966 = vmatpush.bf16.msrb.mxu0 %v16245_v50  ;;  %10931 = vmatmul.bf16.vlgmr.msra.gmra.mxu1 %v18940_v7 }
 0x7d5   :  { %10975 = vmatpush.bf16.msrb.mxu1 %v16437_v42  ;;  %10892 = vmatmul.bf16.vlgmr.msrb.gmra.mxu2 %v18950_v12  ;;  %v16657_v42 = vor.u32 %v18093_v27, %v16656_v44  ;;  %v18075_v44 = vld [vmem:[#allocation7 + $0x2b2c] sm:$0xf] }
 0x7d6   :  { %10940 = vmatpush.bf16.msra.mxu2 %v16497_v23  ;;  %v16322_v23 = vld [vmem:[#allocation7 + $0x2918] sm:$0xf0] }
 0x7d7   :  { %v16325_v2 = vor.u32 %v18007_v8, %v16322_v23 }
 0x7d8   :  { %10967 = vmatpush.bf16.msrb.mxu0 %v16229_v39  ;;  %v18055_v39 = vld [vmem:[#allocation7 + $0x2a8c] sm:$0xf] }
 0x7d9   :  { %10976 = vmatpush.bf16.msrb.mxu1 %v16421_v63  ;;  %v16641_v63 = vor.u32 %v18089_v30, %v16640_v5  ;;  %v16517_v43 = vor.u32 %v18055_v39, %v16514_v59 }
 0x7da   :  { %10941 = vmatpush.bf16.msra.mxu2 %v16481_v1  ;;  %v16625_v1 = vor.u32 %v18085_v11, %v16624_v16 }
 0x7dc   :  { %10968 = vmatpush.bf16.msrb.mxu0 %v16213_v54  ;;  %v16501_v54 = vor.u32 %v18051_v22, %v16498_v58 }
 0x7dd   :  { %10977 = vmatpush.bf16.msrb.mxu1 %v16405_v46  ;;  %v18081_v46 = vld [vmem:[#allocation7 + $0x2b54] sm:$0xf0] }
 0x7de   :  { %v10018_v3 = vpop.f32.mrf.mxu3  ;;  %10942 = vmatpush.bf16.msra.mxu2 %v16465_v37  ;;  %v16609_v38 = vor.u32 %v18081_v46, %v16608_v10  ;;  %v16466_v37 = vld [vmem:[#allocation7 + $0x2a38] sm:$0xf0] }
 0x7df   :  { %v10019_v60 = vadd.f32 %v10018_v3, %v10006_v48  ;;  %v16450_v48 = vld [vmem:[#allocation7 + $0x2a18] sm:$0xf0]  ;;  %v16693_v3 = vor.u32 %v18099_v41, %v16690_v28 }
 0x7e0   :  { %10969 = vmatpush.bf16.msrb.mxu0 %v16197_v17  ;;  %v16593_v17 = vor.u32 %v18077_v47, %v16592_v13  ;;  %v16453_v6 = vor.u32 %v18039_v34, %v16450_v48 }
 0x7e1   :  { %10978 = vmatpush.bf16.msrb.mxu1 %v16389_v29  ;;  %v18961_v61 = vpack.c.bf16 %v10019_v60, %v10019_v60  ;;  %v16469_v29 = vor.u32 %v18043_v53, %v16466_v37  ;;  %v16677_v60 = vor.u32 %v18095_v57, %v16674_v21 }
 0x7e2   :  { %10943 = vmatpush.bf16.msra.mxu2 %v16449_v56  ;;  %v18091_v56 = vld [vmem:[#allocation7 + $0x2bac] sm:$0xf] }
 0x7e3   :  { %10970 = vmatmul.bf16.vlgmr.msrb.gmra.mxu0 %v18931_v20  ;;  %10853 = vmatmul.bf16.vlgmr.msra.gmra.mxu3 %v18961_v61  ;;  %v16530_v20 = vld [vmem:[#allocation7 + $0x2ab8] sm:$0xf0] }
 0x7e4   :  { %10949 = vmatpush.bf16.msra.mxu3 %v16689_v15  ;;  %v16533_v14 = vor.u32 %v18059_v26, %v16530_v20  ;;  %v16658_v15 = vld [vmem:[#allocation7 + $0x2bb8] sm:$0xf0]  ;;  %v10156_v26 = vld [vmem:[#allocation8 + $0x28] sm:$0xf] }
 0x7e5   :  { %10979 = vmatpush.bf16.msrb.mxu1 %v16373_v9  ;;  %10944 = vmatmul.bf16.vlgmr.msra.gmra.mxu2 %v18950_v12  ;;  %v16661_v9 = vor.u32 %v18091_v56, %v16658_v15  ;;  %v10160_v58 = vperm.slane %v10156_v26, 2  ;;  %v10161_v56 = vperm.slane %v10156_v26, 3 }
 0x7e6   :  { %10988 = vmatpush.bf16.msrb.mxu2 %v16565_v31  ;;  %v10020_v50 = vpop.f32.mrf.mxu3  ;;  %v16642_v31 = vld [vmem:[#allocation7 + $0x2b98] sm:$0xf0] }
 0x7e7   :  { %v16645_v62 = vor.u32 %v18087_v49, %v16642_v31 }
 0x7e8   :  { %10950 = vmatpush.bf16.msra.mxu3 %v16673_v33  ;;  %v16610_v33 = vld [vmem:[#allocation7 + $0x2b58] sm:$0xf0] }
 0x7e9   :  { %10980 = vmatpush.bf16.msrb.mxu1 %v16357_v35  ;;  %v16613_v35 = vor.u32 %v18079_v25, %v16610_v33 }
 0x7ea   :  { %10989 = vmatpush.bf16.msrb.mxu2 %v16549_v4  ;;  %v16594_v4 = vld [vmem:[#allocation7 + $0x2b38] sm:$0xf0] }
 0x7eb   :  { %v16597_v27 = vor.u32 %v18075_v44, %v16594_v4  ;;  %v18112_v44 = vld [vmem:[#allocation2] sm:$0xff] }
 0x7ec   :  { %10951 = vmatpush.bf16.msra.mxu3 %v16657_v42  ;;  %v10158_v42 = vperm.slane %v10156_v26, 0 }
 0x7ed   :  { %10981 = vmatpush.bf16.msrb.mxu1 %v16341_v36 }
 0x7ee   :  { %10990 = vmatpush.bf16.msrb.mxu2 %v16533_v14 }
 0x7f0   :  { %10952 = vmatpush.bf16.msra.mxu3 %v16641_v63 }
 0x7f1   :  { %10982 = vmatpush.bf16.msrb.mxu1 %v16325_v2 }
 0x7f2   :  { %10991 = vmatpush.bf16.msrb.mxu2 %v16517_v43 }
 0x7f3   :  { %10905 = vmatmul.bf16.vlgmr.msrb.gmra.mxu3 %v18961_v61 }
 0x7f4   :  { %10983 = vmatmul.bf16.vlgmr.msrb.gmra.mxu1 %v18940_v7  ;;  %10953 = vmatpush.bf16.msra.mxu3 %v16625_v1  ;;  %v16577_v7 = vor.u32 %v18073_v32, %v16576_v0 }
 0x7f6   :  { %10992 = vmatpush.bf16.msrb.mxu2 %v16501_v54 }
 0x7f8   :  { %10954 = vmatpush.bf16.msra.mxu3 %v16609_v38 }
 0x7fa   :  { %10993 = vmatpush.bf16.msrb.mxu2 %v16485_v19 }
 0x7fc   :  { %10955 = vmatpush.bf16.msra.mxu3 %v16593_v17 }
 0x7fe   :  { %10994 = vmatpush.bf16.msrb.mxu2 %v16469_v29 }
 0x800   :  { %10956 = vmatpush.bf16.msra.mxu3 %v16577_v7 }
 0x802   :  { %10995 = vmatpush.bf16.msrb.mxu2 %v16453_v6 }
 0x803   :  { %10957 = vmatmul.bf16.vlgmr.msra.gmra.mxu3 %v18961_v61 }
 0x804   :  { %11001 = vmatpush.bf16.msrb.mxu3 %v16693_v3 }
 0x805   :  { %10996 = vmatmul.bf16.vlgmr.msrb.gmra.mxu2 %v18950_v12  ;;  %v16578_v12 = vld [vmem:[#allocation7 + $0x2b18] sm:$0xf0] }
 0x806   :  { %v16581_v45 = vor.u32 %v18071_v40, %v16578_v12 }
 0x808   :  { %11002 = vmatpush.bf16.msrb.mxu3 %v16677_v60 }
 0x80c   :  { %11003 = vmatpush.bf16.msrb.mxu3 %v16661_v9 }
 0x810   :  { %11004 = vmatpush.bf16.msrb.mxu3 %v16645_v62 }
 0x814   :  { %11005 = vmatpush.bf16.msrb.mxu3 %v16629_v55 }
 0x818   :  { %11006 = vmatpush.bf16.msrb.mxu3 %v16613_v35 }
 0x81c   :  { %11007 = vmatpush.bf16.msrb.mxu3 %v16597_v27 }
 0x820   :  { %11008 = vmatpush.bf16.msrb.mxu3 %v16581_v45  ;;  %v10815_v50 = vpop.f32.mrf.mxu0 }
 0x821   :  { %v10816_v36 = vadd.f32 %v10815_v50, %v10158_v42 }
 0x823   :  { %11009 = vmatmul.bf16.vlgmr.msrb.gmra.mxu3 %v18961_v61  ;;  %v10159_v61 = vperm.slane %v10156_v26, 1 }
 0x828   :  { %v10817_v20 = vpop.f32.mrf.mxu0 }
 0x830   :  { %v10828_v5 = vpop.f32.mrf.mxu1  ;;  %v10867_v14 = vpop.f32.mrf.mxu0 }
 0x831   :  { %v10829_v30 = vadd.f32 %v10828_v5, %v10816_v36  ;;  %v10868_v39 = vadd.f32 %v10867_v14, %v10159_v61 }
 0x838   :  { %v10830_v8 = vpop.f32.mrf.mxu1  ;;  %v10869_v23 = vpop.f32.mrf.mxu0 }
 0x840   :  { %v10880_v59 = vpop.f32.mrf.mxu1  ;;  %v10919_v63 = vpop.f32.mrf.mxu0 }
 0x841   :  { %v10881_v2 = vadd.f32 %v10880_v59, %v10868_v39  ;;  %v10920_v1 = vadd.f32 %v10919_v63, %v10160_v58 }
 0x847   :  { %v10841_v43 = vpop.f32.mrf.mxu2 }
 0x848   :  { %v10842_v16 = vadd.f32 %v10841_v43, %v10829_v30  ;;  %v10882_v11 = vpop.f32.mrf.mxu1  ;;  %v10921_v22 = vpop.f32.mrf.mxu0 }
 0x84f   :  { %v10843_v54 = vpop.f32.mrf.mxu2 }
 0x851   :  { %v10932_v10 = vpop.f32.mrf.mxu1 }
 0x852   :  { %v10933_v46 = vadd.f32 %v10932_v10, %v10920_v1 }
 0x858   :  { %v10893_v51 = vpop.f32.mrf.mxu2 }
 0x859   :  { %v10894_v18 = vadd.f32 %v10893_v51, %v10881_v2  ;;  %v10934_v38 = vpop.f32.mrf.mxu1 }
 0x860   :  { %v10971_v19 = vpop.f32.mrf.mxu0  ;;  %v10895_v13 = vpop.f32.mrf.mxu2 }
 0x861   :  { %v10972_v15 = vadd.f32 %v10971_v19, %v10161_v56 }
 0x866   :  { %v10854_v47 = vpop.f32.mrf.mxu3 }
 0x867   :  { %v10855_v41 = vadd.f32 %v10854_v47, %v10842_v16 }
 0x868   :  { %v10973_v53 = vpop.f32.mrf.mxu0  ;;  %v10945_v37 = vpop.f32.mrf.mxu2 }
 0x869   :  { %v10946_v9 = vadd.f32 %v10945_v37, %v10933_v46 }
 0x86e   :  { %v10856_v17 = vpop.f32.mrf.mxu3 }
 0x870   :  { %v10947_v0 = vpop.f32.mrf.mxu2 }
 0x871   :  { %v10984_v29 = vpop.f32.mrf.mxu1 }
 0x872   :  { %v10985_v49 = vadd.f32 %v10984_v29, %v10972_v15 }
 0x876   :  { %v10906_v32 = vpop.f32.mrf.mxu3 }
 0x877   :  { %v10907_v34 = vadd.f32 %v10906_v32, %v10894_v18 }
 0x879   :  { %v10986_v48 = vpop.f32.mrf.mxu1  ;;  %v11018_v28 = vrot.slane %v10907_v34, 6 }
 0x87b   :  { %v11021_v7 = vsel %vm8033_vm0, %v10855_v41, %v11018_v28 }
 0x87e   :  { %v10908_v6 = vpop.f32.mrf.mxu3 }
 0x886   :  { %v10958_v3 = vpop.f32.mrf.mxu3 }
 0x887   :  { %v10959_v31 = vadd.f32 %v10958_v3, %v10946_v9 }
 0x888   :  { %v10997_v57 = vpop.f32.mrf.mxu2 }
 0x889   :  { %v10998_v62 = vadd.f32 %v10997_v57, %v10985_v49  ;;  %v11019_v55 = vrot.slane %v10959_v31, 4 }
 0x88e   :  { %v10960_v21 = vpop.f32.mrf.mxu3 }
 0x890   :  { %v10999_v60 = vpop.f32.mrf.mxu2 }
 0x8a6   :  { %v11010_v24 = vpop.f32.mrf.mxu3 }
 0x8a7   :  { %v11011_v52 = vadd.f32 %v11010_v24, %v10998_v62 }
 0x8a9   :  { %v11020_v25 = vrot.slane %v11011_v52, 2 }
 0x8ab   :  { %v11022_v33 = vsel %vm8035_vm1, %v11019_v55, %v11020_v25 }
 0x8ac   :  { %v11023_v35 = vsel %vm8037_vm2, %v11021_v7, %v11022_v33 }
 0x8ad   :  { %v11025_v4 = vadd.f32 %v18112_v44, %v11023_v35 }
 0x8ae   :  { %v11012_v27 = vpop.f32.mrf.mxu3 }
 0x8af   :  { %11026 = vst [vmem:[#allocation11] sm:$0xff] %v11025_v4 }
 0x8b0   :  { %11048 = dma.vmem_to_hbm [thread:$0]  %s11044_s18, 128, %s11046_s21, [#allocation12]  }
 0x8b1   :  { %18263 = dma.done.wait [#allocation4], 128  }
 0x8b2   :  { %18264 = vsyncadd [#allocation4], 4294967168 }
 0x8b3   :  { %18265 = dma.done.wait [#allocation12], 128  }
 0x8b4   :  { %18266 = vsyncadd [#allocation12], 4294967168 }
 0x8b5   :  { %11057 = vsyncpa [#allocation3], 1 }
 0x8b6   :  { %11058 = vsyncpa [#allocation6], 1 }
 0x8b7   :  { %11059 = vsyncpa [#allocation9], 1 }
 0x8b8   :  { %11060 = vsyncpa [#allocation4], 1 }
 0x8b9   :  { %11061 = vsyncpa [#allocation12], 1 }

</bundles_post_ra>
